<compile_context>
chip_gen: v6e
topology: v6e:2x2x1
jax: 0.10.0
libtpu: 0.0.40
codegen_flags: <defaults>
</compile_context>

<pallas_src>
import jax
import jax.numpy as jnp
from jax.experimental import pallas as pl
from jax.experimental.pallas import tpu as pltpu

GRID_SIDE = 46                       # decoder meshgrid: linspace(-0.3, 0.3, 46)
M_POINTS = GRID_SIDE * GRID_SIDE     # m = 2116 folded points (as in the module)
M_TILE = 1088                        # decoder m-tile (multiple of 8 sublanes)
M_PAD = 2 * M_TILE                   # 2176 = m padded to a multiple of M_TILE
BN_EPS = 1e-5
VMEM_LIMIT = 48 * 1024 * 1024        # <= v7x physical VMEM (64 MiB)


def _const_spec(shape):
    """Full-array block with a constant index map (weights: DMA'd once)."""
    nd = len(shape)
    return pl.BlockSpec(shape, lambda *_: (0,) * nd)


# ---------------------------------------------------------------------------
# Encoder kernel: TB packed batch elements per grid step.
#   x (TB*N, 3) -> conv1/bn1/relu (VPU, K=3) -> local (TB*N, 64)
#              -> conv2/bn2/relu -> (TB*N, 128) -> conv3/bn3/relu -> (TB*N, 1024)
#              -> per-batch max over N -> global (TB, 1024)
#   fc1 on concat([local, global]) is a split matmul:
#     local @ Wfc1[:64] + global @ Wfc1[64:] (global row broadcast over N points)
#   fc2 -> relu -> per-batch max over N -> codeword (TB, 1, 512)
# MXU weights are bf16, accumulation f32.
# ---------------------------------------------------------------------------
def _encoder_kernel(x_ref, w1, b1, w2, b2, w3, b3,
                    wfa, wfb, bf1, wf2, bf2, cw_ref):
    TB = cw_ref.shape[0]
    P = x_ref.shape[0]
    N = P // TB
    x = x_ref[...]                                                  # (P, 3) f32

    # conv1/bn1/relu: K=3 -> unrolled VPU broadcast mul-add (no tiny-K MXU pass)
    w1f = w1[...]                                                   # (3, 64) f32
    h1 = jax.nn.relu(x[:, 0:1] * w1f[0:1, :]
                     + x[:, 1:2] * w1f[1:2, :]
                     + x[:, 2:3] * w1f[2:3, :] + b1[...])           # (P, 64)
    h1b = h1.astype(jnp.bfloat16)

    # conv2/bn2/relu and conv3/bn3/relu (bf16 weights, f32 accumulation)
    h2 = jax.nn.relu(jnp.dot(h1b, w2[...],
                             preferred_element_type=jnp.float32) + b2[...])     # (P, 128)
    h3 = jax.nn.relu(jnp.dot(h2.astype(jnp.bfloat16), w3[...],
                             preferred_element_type=jnp.float32) + b3[...])     # (P, 1024)

    # Per-batch global feature: max over the N points of each packed element.
    g_rows = [jnp.max(h3[t * N:(t + 1) * N], axis=0, keepdims=True)
              for t in range(TB)]                                   # TB x (1, 1024)
    g = g_rows[0] if TB == 1 else jnp.concatenate(g_rows, axis=0)   # (TB, 1024)

    # fc1 on concat([local, global]) as a split matmul.
    f_loc = jnp.dot(h1b, wfa[...], preferred_element_type=jnp.float32)          # (P, 1024)
    f_glb = jnp.dot(g.astype(jnp.bfloat16), wfb[...],
                    preferred_element_type=jnp.float32)                         # (TB, 1024)
    f1_parts = [jax.nn.relu(f_loc[t * N:(t + 1) * N] + f_glb[t:t + 1, :] + bf1[...])
                for t in range(TB)]                                 # TB x (N, 1024)
    f1 = f1_parts[0] if TB == 1 else jnp.concatenate(f1_parts, axis=0)          # (P, 1024)

    f2 = jax.nn.relu(jnp.dot(f1.astype(jnp.bfloat16), wf2[...],
                             preferred_element_type=jnp.float32) + bf2[...])    # (P, 512)

    cw_parts = [jnp.max(f2[t * N:(t + 1) * N], axis=0, keepdims=True)
                for t in range(TB)]                                 # TB x (1, 512)
    cw = cw_parts[0] if TB == 1 else jnp.concatenate(cw_parts, axis=0)
    cw_ref[...] = cw.reshape(TB, 1, 512)


# ---------------------------------------------------------------------------
# Decoder kernel: one (batch, m-tile) pair per grid step.
#   concat([codeword, grid]) -> mlp1 -> (TM, 3); concat([codeword, fold1]) -> mlp2.
# Concats are split matmuls: the codeword contribution is a single (1, C) row
# broadcast over the tile; the K=2 / K=3 grid / folded-point contributions are
# unrolled VPU broadcast multiply-adds.
# ---------------------------------------------------------------------------
def _decoder_kernel(cw_ref, grid_ref,
                    v1c, v1g, vb1, v2, vb2, v3, vb3,
                    u1c, u1p, ub1, u2, ub2, u3, ub3, out_ref):
    cw = cw_ref[0]                                                  # (1, 512) f32
    cwb = cw.astype(jnp.bfloat16)
    g = grid_ref[...]                                               # (TM, 2) f32

    # folding 1: mlp1(concat([codeword, grid]))
    base1 = jnp.dot(cwb, v1c[...], preferred_element_type=jnp.float32) + vb1[...]   # (1, 256)
    v1gf = v1g[...]                                                 # (2, 256) f32
    gpart = g[:, 0:1] * v1gf[0:1, :] + g[:, 1:2] * v1gf[1:2, :]     # (TM, 256) on VPU
    d1 = jax.nn.relu(gpart + base1)
    d2 = jax.nn.relu(jnp.dot(d1.astype(jnp.bfloat16), v2[...],
                             preferred_element_type=jnp.float32) + vb2[...])        # (TM, 64)
    d3 = jnp.dot(d2.astype(jnp.bfloat16), v3[...],
                 preferred_element_type=jnp.float32) + vb3[...]                     # (TM, 3)

    # folding 2: mlp2(concat([codeword, folded1]))
    base2 = jnp.dot(cwb, u1c[...], preferred_element_type=jnp.float32) + ub1[...]   # (1, 256)
    u1pf = u1p[...]                                                 # (3, 256) f32
    ppart = (d3[:, 0:1] * u1pf[0:1, :]
             + d3[:, 1:2] * u1pf[1:2, :]
             + d3[:, 2:3] * u1pf[2:3, :])                           # (TM, 256) on VPU
    e1 = jax.nn.relu(ppart + base2)
    e2 = jax.nn.relu(jnp.dot(e1.astype(jnp.bfloat16), u2[...],
                             preferred_element_type=jnp.float32) + ub2[...])        # (TM, 64)
    e3 = jnp.dot(e2.astype(jnp.bfloat16), u3[...],
                 preferred_element_type=jnp.float32) + ub3[...]                     # (TM, 3)
    out_ref[0] = e3


def _pick_batch_tile(B, N, target_rows=256):
    """Largest divisor of B keeping TB*N <= target_rows (fills MXU rows)."""
    for tb in range(min(B, max(1, target_rows // N)), 0, -1):
        if B % tb == 0:
            return tb
    return 1


def encoder_forward(x, enc_params):
    B, N, _ = x.shape
    TB = _pick_batch_tile(B, N)
    x2 = x.reshape(B * N, 3)                      # batch-major rows, no in-kernel reshape
    in_specs = [pl.BlockSpec((TB * N, 3), lambda b: (b, 0))]
    in_specs += [_const_spec(p.shape) for p in enc_params]
    return pl.pallas_call(
        _encoder_kernel,
        out_shape=jax.ShapeDtypeStruct((B, 1, 512), jnp.float32),
        grid=(B // TB,),
        in_specs=in_specs,
        out_specs=pl.BlockSpec((TB, 1, 512), lambda b: (b, 0, 0)),
        compiler_params=pltpu.CompilerParams(
            dimension_semantics=("parallel",),
            vmem_limit_bytes=VMEM_LIMIT),
    )(x2, *enc_params)


def decoder_forward(codeword, grid_pad, dec_params):
    B = codeword.shape[0]
    m_pad = grid_pad.shape[0]
    n_mt = m_pad // M_TILE
    in_specs = [pl.BlockSpec((1, 1, 512), lambda b, j: (b, 0, 0)),
                pl.BlockSpec((M_TILE, 2), lambda b, j: (j, 0))]
    in_specs += [_const_spec(p.shape) for p in dec_params]
    out = pl.pallas_call(
        _decoder_kernel,
        out_shape=jax.ShapeDtypeStruct((B, m_pad, 3), jnp.float32),
        grid=(B, n_mt),
        in_specs=in_specs,
        out_specs=pl.BlockSpec((1, M_TILE, 3), lambda b, j: (b, j, 0)),
        compiler_params=pltpu.CompilerParams(
            dimension_semantics=("parallel", "parallel"),
            vmem_limit_bytes=VMEM_LIMIT),
    )(codeword, grid_pad, *dec_params)
    return out[:, :M_POINTS, :]                   # drop the m padding


def build_grid(m_pad=M_PAD):
    # np.linspace(-0.3, 0.3, 46) x itertools.product ordering (second axis fastest),
    # zero-padded to m_pad rows (padded rows are sliced away after the decoder).
    xs = jnp.linspace(-0.3, 0.3, GRID_SIDE, dtype=jnp.float32)
    gx, gy = jnp.meshgrid(xs, xs, indexing="ij")
    grid = jnp.stack([gx.ravel(), gy.ravel()], axis=-1)             # (2116, 2)
    if m_pad > grid.shape[0]:
        grid = jnp.pad(grid, ((0, m_pad - grid.shape[0]), (0, 0)))
    return grid                                                     # (m_pad, 2)


def init_foldingnet_params(key):
    """Deterministic synthetic parameters, shapes match the PyTorch module.

    Weights are stored transposed (C_in, C_out) for the channels-last layout.
    MXU-bound weights are stored in bfloat16 (f32 accumulation in-kernel);
    tiny-K weights that run on the VPU and all biases stay float32.
    """
    keys = jax.random.split(key, 32)
    it = iter(keys)

    def w(shape, scale=0.05):
        return jax.random.normal(next(it), shape, jnp.float32) * scale

    def b(c, scale=0.01):
        return jax.random.normal(next(it), (1, c), jnp.float32) * scale

    def lo(a):                                   # bf16 storage for MXU weights
        return a.astype(jnp.bfloat16)

    bn_scale = jnp.float32(1.0 / jnp.sqrt(1.0 + BN_EPS))  # eval BN folded (mean=0,var=1,g=1,b=0)

    # ---- encoder ----
    w1, b1 = w((3, 64)) * bn_scale, b(64) * bn_scale                 # conv1 + bn1 (VPU, f32)
    w2, b2 = lo(w((64, 128)) * bn_scale), b(128) * bn_scale          # conv2 + bn2
    w3, b3 = lo(w((128, 1024)) * bn_scale), b(1024) * bn_scale       # conv3 + bn3
    wfc1 = w((1024 + 64, 1024))                                      # fc1: Linear(1088, 1024)
    wfa, wfb = lo(wfc1[:64]), lo(wfc1[64:])                          # local part / global part
    bf1 = b(1024)
    wf2, bf2 = lo(w((1024, 512))), b(512)                            # fc2
    enc_params = (w1, b1, w2, b2, w3, b3, wfa, wfb, bf1, wf2, bf2)

    # ---- decoder ----
    v1 = w((514, 256))                                               # mlp1 layer 0 (codeword||grid)
    v1c, v1g, vb1 = lo(v1[:512]), v1[512:], b(256)                   # grid part stays f32 (VPU)
    v2, vb2 = lo(w((256, 64))), b(64)
    v3, vb3 = lo(w((64, 3))), b(3)
    u1 = w((515, 256))                                               # mlp2 layer 0 (codeword||fold1)
    u1c, u1p, ub1 = lo(u1[:512]), u1[512:], b(256)                   # fold part stays f32 (VPU)
    u2, ub2 = lo(w((256, 64))), b(64)
    u3, ub3 = lo(w((64, 3))), b(3)
    dec_params = (v1c, v1g, vb1, v2, vb2, v3, vb3,
                  u1c, u1p, ub1, u2, ub2, u3, ub3)

    return enc_params, dec_params


def foldingnet_forward(x, enc_params, dec_params, grid_pad):
    codeword = encoder_forward(x, enc_params)            # (B, 1, 512)
    return decoder_forward(codeword, grid_pad, dec_params)  # (B, m, 3)


if __name__ == "__main__":
    key = jax.random.PRNGKey(0)
    kx, kp = jax.random.split(key)

    B, N = 2, 64                                    # small point cloud: (B, N, 3)
    x = jax.random.normal(kx, (B, N, 3), jnp.float32)
    enc_params, dec_params = init_foldingnet_params(kp)
    grid_pad = build_grid()

    out = foldingnet_forward(x, enc_params, dec_params, grid_pad)
    out = jax.block_until_ready(out)

    assert out.shape == (B, M_POINTS, 3), out.shape
    assert out.dtype == jnp.float32
    assert bool(jnp.all(jnp.isfinite(out)))
    print("KERNEL_OK")
</pallas_src>

<mosaic_0001>
module attributes {stable_mosaic.version = 11 : i64} {
  func.func @_encoder_kernel(%arg0: i32, %arg1: memref<128x3xf32, #tpu.memory_space<vmem>>, %arg2: memref<3x64xf32, #tpu.memory_space<vmem>>, %arg3: memref<1x64xf32, #tpu.memory_space<vmem>>, %arg4: memref<64x128xbf16, #tpu.memory_space<vmem>>, %arg5: memref<1x128xf32, #tpu.memory_space<vmem>>, %arg6: memref<128x1024xbf16, #tpu.memory_space<vmem>>, %arg7: memref<1x1024xf32, #tpu.memory_space<vmem>>, %arg8: memref<64x1024xbf16, #tpu.memory_space<vmem>>, %arg9: memref<1024x1024xbf16, #tpu.memory_space<vmem>>, %arg10: memref<1x1024xf32, #tpu.memory_space<vmem>>, %arg11: memref<1024x512xbf16, #tpu.memory_space<vmem>>, %arg12: memref<1x512xf32, #tpu.memory_space<vmem>>, %arg13: memref<2x1x512xf32, #tpu.memory_space<vmem>>) attributes {dimension_semantics = [#tpu.dimension_semantics<parallel>], iteration_bounds = array<i64: 1>, scalar_prefetch = 0 : i64, scratch_operands = 0 : i64, tpu.core_type = #tpu.core_type<tc>, window_params = [{transform_indices = @transform_0, window_bounds = array<i64: 128, 3>}, {pipeline_mode = #tpu.pipeline_mode<synchronous>, transform_indices = @transform_1, window_bounds = array<i64: 3, 64>}, {pipeline_mode = #tpu.pipeline_mode<synchronous>, transform_indices = @transform_2, window_bounds = array<i64: 1, 64>}, {pipeline_mode = #tpu.pipeline_mode<synchronous>, transform_indices = @transform_3, window_bounds = array<i64: 64, 128>}, {pipeline_mode = #tpu.pipeline_mode<synchronous>, transform_indices = @transform_4, window_bounds = array<i64: 1, 128>}, {pipeline_mode = #tpu.pipeline_mode<synchronous>, transform_indices = @transform_5, window_bounds = array<i64: 128, 1024>}, {pipeline_mode = #tpu.pipeline_mode<synchronous>, transform_indices = @transform_6, window_bounds = array<i64: 1, 1024>}, {pipeline_mode = #tpu.pipeline_mode<synchronous>, transform_indices = @transform_7, window_bounds = array<i64: 64, 1024>}, {pipeline_mode = #tpu.pipeline_mode<synchronous>, transform_indices = @transform_8, window_bounds = array<i64: 1024, 1024>}, {pipeline_mode = #tpu.pipeline_mode<synchronous>, transform_indices = @transform_9, window_bounds = array<i64: 1, 1024>}, {pipeline_mode = #tpu.pipeline_mode<synchronous>, transform_indices = @transform_10, window_bounds = array<i64: 1024, 512>}, {pipeline_mode = #tpu.pipeline_mode<synchronous>, transform_indices = @transform_11, window_bounds = array<i64: 1, 512>}, {transform_indices = @transform_12, window_bounds = array<i64: 2, 1, 512>}]} {
    %c0 = arith.constant 0 : index
    %c0_0 = arith.constant 0 : index
    %0 = vector.load %arg1[%c0, %c0_0] : memref<128x3xf32, #tpu.memory_space<vmem>>, vector<128x3xf32>
    %c0_1 = arith.constant 0 : index
    %c0_2 = arith.constant 0 : index
    %1 = vector.load %arg2[%c0_1, %c0_2] : memref<3x64xf32, #tpu.memory_space<vmem>>, vector<3x64xf32>
    %2 = vector.extract_strided_slice %0 {offsets = [0, 0], sizes = [128, 1], strides = [1, 1]} : vector<128x3xf32> to vector<128x1xf32>
    %3 = vector.extract_strided_slice %1 {offsets = [0, 0], sizes = [1, 64], strides = [1, 1]} : vector<3x64xf32> to vector<1x64xf32>
    %4 = vector.broadcast %2 : vector<128x1xf32> to vector<128x64xf32>
    %5 = vector.broadcast %3 : vector<1x64xf32> to vector<128x64xf32>
    %6 = arith.mulf %4, %5 : vector<128x64xf32>
    %7 = vector.extract_strided_slice %0 {offsets = [0, 1], sizes = [128, 1], strides = [1, 1]} : vector<128x3xf32> to vector<128x1xf32>
    %8 = vector.extract_strided_slice %1 {offsets = [1, 0], sizes = [1, 64], strides = [1, 1]} : vector<3x64xf32> to vector<1x64xf32>
    %9 = vector.broadcast %7 : vector<128x1xf32> to vector<128x64xf32>
    %10 = vector.broadcast %8 : vector<1x64xf32> to vector<128x64xf32>
    %11 = arith.mulf %9, %10 : vector<128x64xf32>
    %12 = arith.addf %6, %11 : vector<128x64xf32>
    %13 = vector.extract_strided_slice %0 {offsets = [0, 2], sizes = [128, 1], strides = [1, 1]} : vector<128x3xf32> to vector<128x1xf32>
    %14 = vector.extract_strided_slice %1 {offsets = [2, 0], sizes = [1, 64], strides = [1, 1]} : vector<3x64xf32> to vector<1x64xf32>
    %15 = vector.broadcast %13 : vector<128x1xf32> to vector<128x64xf32>
    %16 = vector.broadcast %14 : vector<1x64xf32> to vector<128x64xf32>
    %17 = arith.mulf %15, %16 : vector<128x64xf32>
    %18 = arith.addf %12, %17 : vector<128x64xf32>
    %c0_3 = arith.constant 0 : index
    %c0_4 = arith.constant 0 : index
    %19 = vector.load %arg3[%c0_3, %c0_4] : memref<1x64xf32, #tpu.memory_space<vmem>>, vector<1x64xf32>
    %20 = vector.broadcast %19 : vector<1x64xf32> to vector<128x64xf32>
    %21 = arith.addf %18, %20 : vector<128x64xf32>
    %cst = arith.constant 0.000000e+00 : f32
    %22 = vector.broadcast %cst : f32 to vector<128x64xf32>
    %23 = arith.maximumf %21, %22 : vector<128x64xf32>
    %24 = arith.truncf %23 : vector<128x64xf32> to vector<128x64xbf16>
    %c0_5 = arith.constant 0 : index
    %c0_6 = arith.constant 0 : index
    %25 = vector.load %arg4[%c0_5, %c0_6] : memref<64x128xbf16, #tpu.memory_space<vmem>>, vector<64x128xbf16>
    %cst_7 = arith.constant dense<0.000000e+00> : vector<128x128xf32>
    %26 = tpu.matmul %24, %25, %cst_7 {dimension_numbers = #tpu.dot_dimension_numbers<[1], [0], [0], [1], [0, 0, 1, 1], [], []>} : vector<128x64xbf16>, vector<64x128xbf16>, vector<128x128xf32> -> vector<128x128xf32>
    %c0_8 = arith.constant 0 : index
    %c0_9 = arith.constant 0 : index
    %27 = vector.load %arg5[%c0_8, %c0_9] : memref<1x128xf32, #tpu.memory_space<vmem>>, vector<1x128xf32>
    %28 = vector.broadcast %27 : vector<1x128xf32> to vector<128x128xf32>
    %29 = arith.addf %26, %28 : vector<128x128xf32>
    %cst_10 = arith.constant 0.000000e+00 : f32
    %30 = vector.broadcast %cst_10 : f32 to vector<128x128xf32>
    %31 = arith.maximumf %29, %30 : vector<128x128xf32>
    %32 = arith.truncf %31 : vector<128x128xf32> to vector<128x128xbf16>
    %c0_11 = arith.constant 0 : index
    %c0_12 = arith.constant 0 : index
    %33 = vector.load %arg6[%c0_11, %c0_12] : memref<128x1024xbf16, #tpu.memory_space<vmem>>, vector<128x1024xbf16>
    %cst_13 = arith.constant dense<0.000000e+00> : vector<128x1024xf32>
    %34 = tpu.matmul %32, %33, %cst_13 {dimension_numbers = #tpu.dot_dimension_numbers<[1], [0], [0], [1], [0, 0, 1, 1], [], []>} : vector<128x128xbf16>, vector<128x1024xbf16>, vector<128x1024xf32> -> vector<128x1024xf32>
    %c0_14 = arith.constant 0 : index
    %c0_15 = arith.constant 0 : index
    %35 = vector.load %arg7[%c0_14, %c0_15] : memref<1x1024xf32, #tpu.memory_space<vmem>>, vector<1x1024xf32>
    %36 = vector.broadcast %35 : vector<1x1024xf32> to vector<128x1024xf32>
    %37 = arith.addf %34, %36 : vector<128x1024xf32>
    %cst_16 = arith.constant 0.000000e+00 : f32
    %38 = vector.broadcast %cst_16 : f32 to vector<128x1024xf32>
    %39 = arith.maximumf %37, %38 : vector<128x1024xf32>
    %40 = vector.extract_strided_slice %39 {offsets = [0, 0], sizes = [64, 1024], strides = [1, 1]} : vector<128x1024xf32> to vector<64x1024xf32>
    %cst_17 = arith.constant dense<0xFF800000> : vector<1024xf32>
    %41 = vector.multi_reduction <maximumf>, %40, %cst_17 [0] : vector<64x1024xf32> to vector<1024xf32>
    %42 = vector.shape_cast %41 : vector<1024xf32> to vector<1x1024xf32>
    %43 = vector.extract_strided_slice %39 {offsets = [64, 0], sizes = [64, 1024], strides = [1, 1]} : vector<128x1024xf32> to vector<64x1024xf32>
    %cst_18 = arith.constant dense<0xFF800000> : vector<1024xf32>
    %44 = vector.multi_reduction <maximumf>, %43, %cst_18 [0] : vector<64x1024xf32> to vector<1024xf32>
    %45 = vector.shape_cast %44 : vector<1024xf32> to vector<1x1024xf32>
    %46 = tpu.concatenate %42, %45 in 0 : vector<1x1024xf32>, vector<1x1024xf32> -> vector<2x1024xf32>
    %c0_19 = arith.constant 0 : index
    %c0_20 = arith.constant 0 : index
    %47 = vector.load %arg8[%c0_19, %c0_20] : memref<64x1024xbf16, #tpu.memory_space<vmem>>, vector<64x1024xbf16>
    %cst_21 = arith.constant dense<0.000000e+00> : vector<128x1024xf32>
    %48 = tpu.matmul %24, %47, %cst_21 {dimension_numbers = #tpu.dot_dimension_numbers<[1], [0], [0], [1], [0, 0, 1, 1], [], []>} : vector<128x64xbf16>, vector<64x1024xbf16>, vector<128x1024xf32> -> vector<128x1024xf32>
    %49 = arith.truncf %46 : vector<2x1024xf32> to vector<2x1024xbf16>
    %c0_22 = arith.constant 0 : index
    %c0_23 = arith.constant 0 : index
    %50 = vector.load %arg9[%c0_22, %c0_23] : memref<1024x1024xbf16, #tpu.memory_space<vmem>>, vector<1024x1024xbf16>
    %cst_24 = arith.constant dense<0.000000e+00> : vector<2x1024xf32>
    %51 = tpu.matmul %49, %50, %cst_24 {dimension_numbers = #tpu.dot_dimension_numbers<[1], [0], [0], [1], [0, 0, 1, 1], [], []>} : vector<2x1024xbf16>, vector<1024x1024xbf16>, vector<2x1024xf32> -> vector<2x1024xf32>
    %52 = vector.extract_strided_slice %48 {offsets = [0, 0], sizes = [64, 1024], strides = [1, 1]} : vector<128x1024xf32> to vector<64x1024xf32>
    %53 = vector.extract_strided_slice %51 {offsets = [0, 0], sizes = [1, 1024], strides = [1, 1]} : vector<2x1024xf32> to vector<1x1024xf32>
    %54 = vector.broadcast %53 : vector<1x1024xf32> to vector<64x1024xf32>
    %55 = arith.addf %52, %54 : vector<64x1024xf32>
    %c0_25 = arith.constant 0 : index
    %c0_26 = arith.constant 0 : index
    %56 = vector.load %arg10[%c0_25, %c0_26] : memref<1x1024xf32, #tpu.memory_space<vmem>>, vector<1x1024xf32>
    %57 = vector.broadcast %56 : vector<1x1024xf32> to vector<64x1024xf32>
    %58 = arith.addf %55, %57 : vector<64x1024xf32>
    %cst_27 = arith.constant 0.000000e+00 : f32
    %59 = vector.broadcast %cst_27 : f32 to vector<64x1024xf32>
    %60 = arith.maximumf %58, %59 : vector<64x1024xf32>
    %61 = vector.extract_strided_slice %48 {offsets = [64, 0], sizes = [64, 1024], strides = [1, 1]} : vector<128x1024xf32> to vector<64x1024xf32>
    %62 = vector.extract_strided_slice %51 {offsets = [1, 0], sizes = [1, 1024], strides = [1, 1]} : vector<2x1024xf32> to vector<1x1024xf32>
    %63 = vector.broadcast %62 : vector<1x1024xf32> to vector<64x1024xf32>
    %64 = arith.addf %61, %63 : vector<64x1024xf32>
    %c0_28 = arith.constant 0 : index
    %c0_29 = arith.constant 0 : index
    %65 = vector.load %arg10[%c0_28, %c0_29] : memref<1x1024xf32, #tpu.memory_space<vmem>>, vector<1x1024xf32>
    %66 = vector.broadcast %65 : vector<1x1024xf32> to vector<64x1024xf32>
    %67 = arith.addf %64, %66 : vector<64x1024xf32>
    %cst_30 = arith.constant 0.000000e+00 : f32
    %68 = vector.broadcast %cst_30 : f32 to vector<64x1024xf32>
    %69 = arith.maximumf %67, %68 : vector<64x1024xf32>
    %70 = tpu.concatenate %60, %69 in 0 : vector<64x1024xf32>, vector<64x1024xf32> -> vector<128x1024xf32>
    %71 = arith.truncf %70 : vector<128x1024xf32> to vector<128x1024xbf16>
    %c0_31 = arith.constant 0 : index
    %c0_32 = arith.constant 0 : index
    %72 = vector.load %arg11[%c0_31, %c0_32] : memref<1024x512xbf16, #tpu.memory_space<vmem>>, vector<1024x512xbf16>
    %cst_33 = arith.constant dense<0.000000e+00> : vector<128x512xf32>
    %73 = tpu.matmul %71, %72, %cst_33 {dimension_numbers = #tpu.dot_dimension_numbers<[1], [0], [0], [1], [0, 0, 1, 1], [], []>} : vector<128x1024xbf16>, vector<1024x512xbf16>, vector<128x512xf32> -> vector<128x512xf32>
    %c0_34 = arith.constant 0 : index
    %c0_35 = arith.constant 0 : index
    %74 = vector.load %arg12[%c0_34, %c0_35] : memref<1x512xf32, #tpu.memory_space<vmem>>, vector<1x512xf32>
    %75 = vector.broadcast %74 : vector<1x512xf32> to vector<128x512xf32>
    %76 = arith.addf %73, %75 : vector<128x512xf32>
    %cst_36 = arith.constant 0.000000e+00 : f32
    %77 = vector.broadcast %cst_36 : f32 to vector<128x512xf32>
    %78 = arith.maximumf %76, %77 : vector<128x512xf32>
    %79 = vector.extract_strided_slice %78 {offsets = [0, 0], sizes = [64, 512], strides = [1, 1]} : vector<128x512xf32> to vector<64x512xf32>
    %cst_37 = arith.constant dense<0xFF800000> : vector<512xf32>
    %80 = vector.multi_reduction <maximumf>, %79, %cst_37 [0] : vector<64x512xf32> to vector<512xf32>
    %81 = vector.shape_cast %80 : vector<512xf32> to vector<1x512xf32>
    %82 = vector.extract_strided_slice %78 {offsets = [64, 0], sizes = [64, 512], strides = [1, 1]} : vector<128x512xf32> to vector<64x512xf32>
    %cst_38 = arith.constant dense<0xFF800000> : vector<512xf32>
    %83 = vector.multi_reduction <maximumf>, %82, %cst_38 [0] : vector<64x512xf32> to vector<512xf32>
    %84 = vector.shape_cast %83 : vector<512xf32> to vector<1x512xf32>
    %85 = tpu.concatenate %81, %84 in 0 : vector<1x512xf32>, vector<1x512xf32> -> vector<2x512xf32>
    %86 = vector.shape_cast %85 : vector<2x512xf32> to vector<2x1x512xf32>
    %c0_39 = arith.constant 0 : index
    %c0_40 = arith.constant 0 : index
    %c0_41 = arith.constant 0 : index
    %87 = vector.load %arg13[%c0_39, %c0_40, %c0_41] : memref<2x1x512xf32, #tpu.memory_space<vmem>>, vector<2x1x512xf32>
    tpu.vector_store %arg13[%c0_39, %c0_40, %c0_41], %86 {strides = array<i32>} : memref<2x1x512xf32, #tpu.memory_space<vmem>>, vector<2x1x512xf32>,
    return
  }
  func.func @transform_0(%arg0: i32) -> (i32, i32) {
    %c0_i32 = arith.constant 0 : i32
    %c0_i32_0 = arith.constant 0 : i32
    return %arg0, %c0_i32 : i32, i32
  }
  func.func @transform_1(%arg0: i32) -> (i32, i32) {
    %c0_i32 = arith.constant 0 : i32
    %c0_i32_0 = arith.constant 0 : i32
    %c0_i32_1 = arith.constant 0 : i32
    return %c0_i32, %c0_i32_0 : i32, i32
  }
  func.func @transform_2(%arg0: i32) -> (i32, i32) {
    %c0_i32 = arith.constant 0 : i32
    %c0_i32_0 = arith.constant 0 : i32
    %c0_i32_1 = arith.constant 0 : i32
    return %c0_i32, %c0_i32_0 : i32, i32
  }
  func.func @transform_3(%arg0: i32) -> (i32, i32) {
    %c0_i32 = arith.constant 0 : i32
    %c0_i32_0 = arith.constant 0 : i32
    %c0_i32_1 = arith.constant 0 : i32
    return %c0_i32, %c0_i32_0 : i32, i32
  }
  func.func @transform_4(%arg0: i32) -> (i32, i32) {
    %c0_i32 = arith.constant 0 : i32
    %c0_i32_0 = arith.constant 0 : i32
    %c0_i32_1 = arith.constant 0 : i32
    return %c0_i32, %c0_i32_0 : i32, i32
  }
  func.func @transform_5(%arg0: i32) -> (i32, i32) {
    %c0_i32 = arith.constant 0 : i32
    %c0_i32_0 = arith.constant 0 : i32
    %c0_i32_1 = arith.constant 0 : i32
    return %c0_i32, %c0_i32_0 : i32, i32
  }
  func.func @transform_6(%arg0: i32) -> (i32, i32) {
    %c0_i32 = arith.constant 0 : i32
    %c0_i32_0 = arith.constant 0 : i32
    %c0_i32_1 = arith.constant 0 : i32
    return %c0_i32, %c0_i32_0 : i32, i32
  }
  func.func @transform_7(%arg0: i32) -> (i32, i32) {
    %c0_i32 = arith.constant 0 : i32
    %c0_i32_0 = arith.constant 0 : i32
    %c0_i32_1 = arith.constant 0 : i32
    return %c0_i32, %c0_i32_0 : i32, i32
  }
  func.func @transform_8(%arg0: i32) -> (i32, i32) {
    %c0_i32 = arith.constant 0 : i32
    %c0_i32_0 = arith.constant 0 : i32
    %c0_i32_1 = arith.constant 0 : i32
    return %c0_i32, %c0_i32_0 : i32, i32
  }
  func.func @transform_9(%arg0: i32) -> (i32, i32) {
    %c0_i32 = arith.constant 0 : i32
    %c0_i32_0 = arith.constant 0 : i32
    %c0_i32_1 = arith.constant 0 : i32
    return %c0_i32, %c0_i32_0 : i32, i32
  }
  func.func @transform_10(%arg0: i32) -> (i32, i32) {
    %c0_i32 = arith.constant 0 : i32
    %c0_i32_0 = arith.constant 0 : i32
    %c0_i32_1 = arith.constant 0 : i32
    return %c0_i32, %c0_i32_0 : i32, i32
  }
  func.func @transform_11(%arg0: i32) -> (i32, i32) {
    %c0_i32 = arith.constant 0 : i32
    %c0_i32_0 = arith.constant 0 : i32
    %c0_i32_1 = arith.constant 0 : i32
    return %c0_i32, %c0_i32_0 : i32, i32
  }
  func.func @transform_12(%arg0: i32) -> (i32, i32, i32) {
    %c0_i32 = arith.constant 0 : i32
    %c0_i32_0 = arith.constant 0 : i32
    %c0_i32_1 = arith.constant 0 : i32
    return %arg0, %c0_i32, %c0_i32_0 : i32, i32, i32
  }
}

</mosaic_0001>

<bundles_post_ra>
// kernel: tpu_custom_call.1
= control target key start
LH: loop header
LB: loop body
LE: loop exit
PB: predicated region body
PF: predicated region fallthrough
CT: control target
= control target key end

     0   :  { %17 = vsyncpa [#allocation3], 0  ;;  %s14773_s0 = inlined_call_operand.vmem [shape: f32[128,3], index: 0, kind: input, shape index: {}]   ;;  %s14774_s1 = inlined_call_operand.hbm [shape: f32[3,64], index: 1, kind: input, shape index: {}]   ;;  %s14775_s2 = inlined_call_operand.hbm [shape: f32[1,64], index: 2, kind: input, shape index: {}]   ;;  %s14776_s3 = inlined_call_operand.hbm [shape: bf16[64,128], index: 3, kind: input, shape index: {}]   ;;  %s14777_s4 = inlined_call_operand.hbm [shape: f32[1,128], index: 4, kind: input, shape index: {}]   ;;  %s14778_s5 = inlined_call_operand.hbm [shape: bf16[128,1024], index: 5, kind: input, shape index: {}]   ;;  %s14779_s6 = inlined_call_operand.hbm [shape: f32[1,1024], index: 6, kind: input, shape index: {}]   ;;  %s14780_s7 = inlined_call_operand.hbm [shape: bf16[64,1024], index: 7, kind: input, shape index: {}]   ;;  %s14781_s8 = inlined_call_operand.hbm [shape: bf16[1024,1024], index: 8, kind: input, shape index: {}]   ;;  %s14782_s9 = inlined_call_operand.hbm [shape: f32[1,1024], index: 9, kind: input, shape index: {}]   ;;  %s14783_s10 = inlined_call_operand.hbm [shape: bf16[1024,512], index: 10, kind: input, shape index: {}]   ;;  %s14784_s11 = inlined_call_operand.hbm [shape: f32[1,512], index: 11, kind: input, shape index: {}]   ;;  %s14785_s12 = inlined_call_operand.hbm [shape: f32[2,1,512], index: 12, kind: output, shape index: {}]  }
   0x1   :  { %18 = vsyncpa [#allocation6], 0 }
   0x2   :  { %19 = vsyncpa [#allocation9], 0 }
   0x3   :  { %20 = vsyncpa [#allocation12], 0 }
   0x4   :  { %21 = vsyncpa [#allocation15], 0 }
   0x5   :  { %22 = vsyncpa [#allocation18], 0 }
   0x6   :  { %23 = vsyncpa [#allocation4], 0  ;;  %s11256_s21 = smov [#allocation5]   ;;  %s11257_s23 = smov [#allocation8]  }
   0x7   :  { %s42_s22 = sshll.u32 %s11256_s21, 4  ;;  %s64_s24 = sshll.u32 %s11257_s23, 4  ;;  %s43_s22 = int_to_ptr.vmem [resolvable:$true] %s42_s22  ;;  %s65_s24 = int_to_ptr.vmem [resolvable:$true] %s64_s24 }
   0x8   :  { %s11010_s25 = scalar_lea.vmem %s43_s22, 16  ;;  %s11014_s26 = scalar_lea.vmem %s43_s22, 32 }
   0x9   :  { %p11011_p0 = scmp.ne.s32.totalorder %s43_s22, %s11010_s25  ;;  %p11015_p1 = scmp.lt.s32.totalorder %s43_s22, %s43_s22 }
   0xa   :  { %p11016_p2 = scmp.lt.s32.totalorder %s11014_s26, %s11010_s25 }
   0xc   :  { %p11017_p3 = por %p11016_p2, %p11015_p1 }
   0xe   :  { %p11018_p4 = pnand %p11017_p3, %p11011_p0 }
  0x10   :  { %11021 = shalt.err (!%p11018_p4)
}
  0x11   :  { %45 = dma.hbm_to_vmem [thread:$0]  %s14775_s2, 16, %s43_s22, [#allocation6]  }
  0x12   :  { %s11030_s29 = scalar_lea.vmem %s65_s24, 16  ;;  %s11034_s30 = scalar_lea.vmem %s65_s24, 32 }
  0x13   :  { %p11031_p5 = scmp.ne.s32.totalorder %s65_s24, %s11030_s29  ;;  %p11035_p6 = scmp.lt.s32.totalorder %s65_s24, %s65_s24 }
  0x14   :  { %p11036_p7 = scmp.lt.s32.totalorder %s11034_s30, %s11030_s29 }
  0x16   :  { %p11037_p8 = por %p11036_p7, %p11035_p6 }
  0x18   :  { %p11038_p9 = pnand %p11037_p8, %p11031_p5 }
  0x1a   :  { %11041 = shalt.err (!%p11038_p9)
}
  0x1b   :  { %67 = dma.hbm_to_vmem [thread:$0]  %s14777_s4, 16, %s65_s24, [#allocation9]  }
  0x1c   :  { %s11258_s15 = smov [#allocation11]  }
  0x1d   :  { %s86_s16 = sshll.u32 %s11258_s15, 4  ;;  %s87_s16 = int_to_ptr.vmem [resolvable:$true] %s86_s16 }
  0x1e   :  { %s11050_s17 = scalar_lea.vmem %s87_s16, 128  ;;  %p11055_p11 = scmp.lt.s32.totalorder %s87_s16, %s87_s16 }
  0x1f   :  { %p11051_p10 = scmp.ne.s32.totalorder %s87_s16, %s11050_s17  ;;  %p11056_p12 = scmp.lt.s32.totalorder %s11050_s17, %s11050_s17 }
  0x21   :  { %p11057_p13 = por %p11056_p12, %p11055_p11 }
  0x23   :  { %p11058_p0 = pnand %p11057_p13, %p11051_p10 }
  0x25   :  { %11061 = shalt.err (!%p11058_p0)
}
  0x26   :  { %89 = dma.hbm_to_vmem [thread:$0]  %s14779_s6, 128, %s87_s16, [#allocation12]  }
  0x27   :  { %s11259_s19 = smov [#allocation14]   ;;  %s11260_s21 = smov [#allocation17]  }
  0x28   :  { %s107_s20 = sshll.u32 %s11259_s19, 4  ;;  %s129_s22 = sshll.u32 %s11260_s21, 4  ;;  %s108_s20 = int_to_ptr.vmem [resolvable:$true] %s107_s20  ;;  %s130_s22 = int_to_ptr.vmem [resolvable:$true] %s129_s22 }
  0x29   :  { %s11070_s4 = scalar_lea.vmem %s108_s20, 65536  ;;  %p11075_p2 = scmp.lt.s32.totalorder %s108_s20, %s108_s20 }
  0x2a   :  { %p11071_p1 = scmp.ne.s32.totalorder %s108_s20, %s11070_s4  ;;  %p11076_p3 = scmp.lt.s32.totalorder %s11070_s4, %s11070_s4 }
  0x2c   :  { %p11077_p4 = por %p11076_p3, %p11075_p2 }
  0x2e   :  { %p11078_p5 = pnand %p11077_p4, %p11071_p1 }
  0x30   :  { %11081 = shalt.err (!%p11078_p5)
}
  0x31   :  { %s11261_s23 = smov 512   ;;  %s11262_s24 = smov 32  }
  0x32   :  { %113 = dma.hbm_to_vmem [thread:$0]  %s14781_s8, 65536, %s108_s20, [#allocation15], %s11261_s23, %s11261_s23, %s11262_s24  }
  0x33   :  { %s11090_s6 = scalar_lea.vmem %s130_s22, 32768  ;;  %p11095_p7 = scmp.lt.s32.totalorder %s130_s22, %s130_s22 }
  0x34   :  { %p11091_p6 = scmp.ne.s32.totalorder %s130_s22, %s11090_s6  ;;  %p11096_p8 = scmp.lt.s32.totalorder %s11090_s6, %s11090_s6 }
  0x36   :  { %p11097_p9 = por %p11096_p8, %p11095_p7 }
  0x38   :  { %p11098_p10 = pnand %p11097_p9, %p11091_p6 }
  0x3a   :  { %11101 = shalt.err (!%p11098_p10)
}
  0x3b   :  { %s11263_s27 = smov 256   ;;  %s11264_s28 = smov 16  }
  0x3c   :  { %135 = dma.hbm_to_vmem [thread:$0]  %s14783_s10, 32768, %s130_s22, [#allocation18], %s11263_s27, %s11263_s27, %s11264_s28  }
  0x3d   :  { %s11265_s13 = smov [#allocation2]   ;;  %s11266_s15 = smov [#allocation7]  }
  0x3e   :  { %s32_s14 = sshll.u32 %s11265_s13, 4  ;;  %s51_s16 = sshll.u32 %s11266_s15, 4  ;;  %s33_s14 = int_to_ptr.vmem [resolvable:$true] %s32_s14  ;;  %s52_s16 = int_to_ptr.vmem [resolvable:$true] %s51_s16 }
  0x3f   :  { %s11110_s8 = scalar_lea.vmem %s33_s14, 64  ;;  %p11115_p12 = scmp.lt.s32.totalorder %s33_s14, %s33_s14 }
  0x40   :  { %p11111_p11 = scmp.ne.s32.totalorder %s33_s14, %s11110_s8  ;;  %p11116_p13 = scmp.lt.s32.totalorder %s11110_s8, %s11110_s8 }
  0x42   :  { %p11117_p0 = por %p11116_p13, %p11115_p12 }
  0x44   :  { %p11118_p1 = pnand %p11117_p0, %p11111_p11 }
  0x46   :  { %11121 = shalt.err (!%p11118_p1)
}
  0x47   :  { %35 = dma.hbm_to_vmem [thread:$0]  %s14774_s1, 64, %s33_s14, [#allocation3]  }
  0x48   :  { %s11130_s18 = scalar_lea.vmem %s52_s16, 512  ;;  %p11135_p3 = scmp.lt.s32.totalorder %s52_s16, %s52_s16 }
  0x49   :  { %p11131_p2 = scmp.ne.s32.totalorder %s52_s16, %s11130_s18  ;;  %p11136_p4 = scmp.lt.s32.totalorder %s11130_s18, %s11130_s18 }
  0x4b   :  { %p11137_p5 = por %p11136_p4, %p11135_p3 }
  0x4d   :  { %p11138_p6 = pnand %p11137_p5, %p11131_p2 }
  0x4f   :  { %11141 = shalt.err (!%p11138_p6)
}
  0x50   :  { %s11267_s10 = smov 64   ;;  %s11268_s19 = smov 4  }
  0x51   :  { %57 = dma.hbm_to_vmem [thread:$0]  %s14776_s3, 512, %s52_s16, [#allocation6], %s11267_s10, %s11267_s10, %s11268_s19  }
  0x52   :  { %s11269_s22 = smov [#allocation10]   ;;  %s11270_s1 = smov [#allocation13]  }
  0x53   :  { %s73_s4 = sshll.u32 %s11269_s22, 4  ;;  %s95_s25 = sshll.u32 %s11270_s1, 4  ;;  %s74_s4 = int_to_ptr.vmem [resolvable:$true] %s73_s4  ;;  %s96_s25 = int_to_ptr.vmem [resolvable:$true] %s95_s25 }
  0x54   :  { %s11150_s26 = scalar_lea.vmem %s74_s4, 8192  ;;  %p11155_p8 = scmp.lt.s32.totalorder %s74_s4, %s74_s4 }
  0x55   :  { %p11151_p7 = scmp.ne.s32.totalorder %s74_s4, %s11150_s26  ;;  %p11156_p9 = scmp.lt.s32.totalorder %s11150_s26, %s11150_s26 }
  0x57   :  { %p11157_p10 = por %p11156_p9, %p11155_p8 }
  0x59   :  { %p11158_p11 = pnand %p11157_p10, %p11151_p7 }
  0x5b   :  { %11161 = shalt.err (!%p11158_p11)
}
  0x5c   :  { %79 = dma.hbm_to_vmem [thread:$0]  %s14778_s5, 8192, %s74_s4, [#allocation9], %s11261_s23, %s11261_s23, %s11262_s24  }
  0x5d   :  { %s11170_s3 = scalar_lea.vmem %s96_s25, 4096  ;;  %p11175_p13 = scmp.lt.s32.totalorder %s96_s25, %s96_s25 }
  0x5e   :  { %p11171_p12 = scmp.ne.s32.totalorder %s96_s25, %s11170_s3  ;;  %p11176_p0 = scmp.lt.s32.totalorder %s11170_s3, %s11170_s3 }
  0x60   :  { %p11177_p1 = por %p11176_p0, %p11175_p13 }
  0x62   :  { %p11178_p2 = pnand %p11177_p1, %p11171_p12 }
  0x64   :  { %11181 = shalt.err (!%p11178_p2)
}
  0x65   :  { %101 = dma.hbm_to_vmem [thread:$0]  %s14780_s7, 4096, %s96_s25, [#allocation12], %s11261_s23, %s11261_s23, %s11262_s24  }
  0x66   :  { %s11271_s30 = smov [#allocation16]   ;;  %s11272_s14 = smov [#allocation19]  }
  0x67   :  { %s120_s13 = sshll.u32 %s11271_s30, 4  ;;  %s142_s5 = sshll.u32 %s11272_s14, 4  ;;  %s121_s13 = int_to_ptr.vmem [resolvable:$true] %s120_s13  ;;  %s143_s5 = int_to_ptr.vmem [resolvable:$true] %s142_s5 }
  0x68   :  { %s11190_s15 = scalar_lea.vmem %s121_s13, 128  ;;  %p11195_p4 = scmp.lt.s32.totalorder %s121_s13, %s121_s13 }
  0x69   :  { %p11191_p3 = scmp.ne.s32.totalorder %s121_s13, %s11190_s15  ;;  %p11196_p5 = scmp.lt.s32.totalorder %s11190_s15, %s11190_s15 }
  0x6b   :  { %p11197_p6 = por %p11196_p5, %p11195_p4 }
  0x6d   :  { %p11198_p7 = pnand %p11197_p6, %p11191_p3 }
  0x6f   :  { %11201 = shalt.err (!%p11198_p7)
}
  0x70   :  { %123 = dma.hbm_to_vmem [thread:$0]  %s14782_s9, 128, %s121_s13, [#allocation15]  }
  0x71   :  { %s11210_s17 = scalar_lea.vmem %s143_s5, 64  ;;  %p11215_p9 = scmp.lt.s32.totalorder %s143_s5, %s143_s5 }
  0x72   :  { %p11211_p8 = scmp.ne.s32.totalorder %s143_s5, %s11210_s17  ;;  %p11216_p10 = scmp.lt.s32.totalorder %s11210_s17, %s11210_s17 }
  0x74   :  { %p11217_p11 = por %p11216_p10, %p11215_p9 }
  0x76   :  { %p11218_p12 = pnand %p11217_p11, %p11211_p8 }
  0x78   :  { %11221 = shalt.err (!%p11218_p12)
}
  0x79   :  { %145 = dma.hbm_to_vmem [thread:$0]  %s14784_s11, 64, %s143_s5, [#allocation18]  }
  0x7a   :  { %11242 = dma.done.wait [#allocation3], 64  }
  0x7b   :  { %11243 = vsyncadd [#allocation3], 4294967232 }
  0x7c   :  { %11244 = dma.done.wait [#allocation6], 528  }
  0x7d   :  { %11245 = vsyncadd [#allocation6], 4294966768 }
  0x7e   :  { %11246 = dma.done.wait [#allocation9], 8208  }
  0x7f   :  { %11247 = vsyncadd [#allocation9], 4294959088 }
  0x80   :  { %11248 = dma.done.wait [#allocation12], 4224  }
  0x81   :  { %11249 = vsyncadd [#allocation12], 4294963072 }
  0x82   :  { %11250 = dma.done.wait [#allocation15], 65664  }
  0x83   :  { %11251 = vsyncadd [#allocation15], 4294901632 }
  0x84   :  { %11252 = dma.done.wait [#allocation18], 32832  }
  0x85   :  { %11253 = vsyncadd [#allocation18], 4294934464  ;;  %v11273_v0 = vmov 1   ;;  %v14787_v1 = vmov 0   ;;  %v180_v2 = vld [vmem:[%s14773_s0] sm:$0xff]  ;;  %v181_v3 = vld [vmem:[%s14773_s0 + $0x8] sm:$0xff]  ;;  %v14786_v25 = vlaneseq }
  0x86   :  { %10587 = vset.pattern.permute.xlu1 %v11273_v0  ;;  %10586 = vset.pattern.permute.xlu0 %v14787_v1  ;;  %v182_v4 = vld [vmem:[%s14773_s0 + $0x10] sm:$0xff]  ;;  %v183_v5 = vld [vmem:[%s14773_s0 + $0x18] sm:$0xff]  ;;  %v185_v6 = vld [vmem:[%s14773_s0 + $0x28] sm:$0xff]  ;;  %v11275_v9 = vmov 2   ;;  %vm583_vm0 = vcmask 523264   ;;  %vm1943_vm1 = vcmask 1040384  }
  0x87   :  { %1187 = vmatprep.mubr.bf16.mxu1 %v14787_v1  ;;  %298 = vperm.xlu1 %10587, %v180_v2   ;;  %v10611_v7 = vld [vmem:[#allocation7 + $0x18] sm:$0xff]   ;;  %v186_v8 = vld [vmem:[%s14773_s0 + $0x30] sm:$0xff]  ;;  %v10614_v13 = vld [vmem:[#allocation7] sm:$0xff]   ;;  %v11463_v28 = vshrl.u32 %v14786_v25, 7 }
  0x88   :  { %199 = vperm.xlu0 %10586, %v180_v2   ;;  %10508 = vmatprep.subr.bf16.mxu0 %v10611_v7  ;;  %v10612_v10 = vld [vmem:[#allocation7 + $0x10] sm:$0xff]   ;;  %v10613_v11 = vld [vmem:[#allocation7 + $0x8] sm:$0xff]   ;;  %v184_v12 = vld [vmem:[%s14773_s0 + $0x20] sm:$0xff] }
  0x89   :  { %10509 = vmatpush3.bf16.msra.mxu0 %v10611_v7  ;;  %v187_v14 = vld [vmem:[%s14773_s0 + $0x38] sm:$0xff]  ;;  %v189_v15 = vld [vmem:[%s14773_s0 + $0x48] sm:$0xff]  ;;  %v190_v16 = vld [vmem:[%s14773_s0 + $0x50] sm:$0xff]  ;;  %14977 = vst [vmem:[#allocation28_spill] sm:$0xff] %v11463_v28  ;;  %v11466_v31 = vsub.s32 1, %v11463_v28  ;;  %v11469_v32 = vsub.s32 0, %v11463_v28 }
  0x8a   :  { %10510 = vmatprep.subr.bf16.mxu0 %v10612_v10  ;;  %v192_v17 = vld [vmem:[%s14773_s0 + $0x60] sm:$0xff]  ;;  %v193_v18 = vld [vmem:[%s14773_s0 + $0x68] sm:$0xff]  ;;  %v194_v20 = vld [vmem:[%s14773_s0 + $0x70] sm:$0xff]  ;;  %v11472_v35 = vsub.s32 2, %v11463_v28 }
  0x8b   :  { %302 = vperm.xlu1 %10587, %v181_v3   ;;  %v188_v19 = vld [vmem:[%s14773_s0 + $0x40] sm:$0xff]  ;;  %v191_v21 = vld [vmem:[%s14773_s0 + $0x58] sm:$0xff]  ;;  %14978 = vst [vmem:[#allocation29_spill] sm:$0xff] %v11466_v31  ;;  %14979 = vst [vmem:[#allocation30_spill] sm:$0xff] %v11469_v32 }
  0x8c   :  { %204 = vperm.xlu0 %10586, %v181_v3   ;;  %v195_v22 = vld [vmem:[%s14773_s0 + $0x78] sm:$0xff]  ;;  %v196_v33 = vld [vmem:[#allocation2] sm:$0x7]  ;;  %14980 = vst [vmem:[#allocation31_spill] sm:$0xff] %v11472_v35  ;;  %v785_v36 = vld [vmem:[#allocation10 + $0x1c0] sm:$0xff]  ;;  %s11277_s0 = smov [#allocation20]  }
  0x8d   :  { %10511 = vmatpush3.bf16.msra.mxu0 %v10612_v10  ;;  %v789_v37 = vld [vmem:[#allocation10 + $0x1e0] sm:$0xff]  ;;  %v11474_v38 = vld [vmem:[#allocation10 + $0x1c8] sm:$0xff]  ;;  %v11479_v45 = vrot.slane %v196_v33, %v11466_v31  ;;  %v11482_v46 = vrot.slane %v196_v33, %v11469_v32  ;;  %v11489_v52 = vrot.slane %v196_v33, %v11472_v35  ;;  %s9569_s20 = sshll.u32 %s11277_s0, 4  ;;  %s9570_s20 = int_to_ptr.vmem [resolvable:$true] %s9569_s20 }
  0x8e   :  { %10512 = vmatprep.subr.bf16.mxu0 %v10613_v11  ;;  %v9657_v40 = vcombine.high %v785_v36, %v789_v37  ;;  %v11476_v41 = vld [vmem:[#allocation10 + $0x1e8] sm:$0xff]  ;;  %v9656_v42 = vcombine.low %v785_v36, %v789_v37  ;;  %v777_v43 = vld [vmem:[#allocation10 + $0x180] sm:$0xff]  ;;  %s11222_s21 = scalar_lea.vmem %s9570_s20, 128  ;;  %p11227_p0 = scmp.lt.s32.totalorder %s9570_s20, %s9570_s20 }
  0x8f   :  { %10588 = vset.pattern.permute.xlu1 %v14787_v1  ;;  %v781_v44 = vld [vmem:[#allocation10 + $0x1a0] sm:$0xff]  ;;  %v9659_v47 = vcombine.high %v11474_v38, %v11476_v41  ;;  %v11877_v25 = vld [vmem:[#allocation14 + $0xa0] sm:$0xff]  ;;  %p11223_p13 = scmp.ne.s32.totalorder %s9570_s20, %s11222_s21  ;;  %p11228_p1 = scmp.lt.s32.totalorder %s11222_s21, %s11222_s21 }
  0x90   :  { %209 = vperm.xlu0 %10586, %v182_v4   ;;  %214 = vperm.xlu1 %10588, %v183_v5   ;;  %v9649_v48 = vcombine.high %v777_v43, %v781_v44  ;;  %v769_v49 = vld [vmem:[#allocation10 + $0x140] sm:$0xff]  ;;  %v9648_v53 = vcombine.low %v777_v43, %v781_v44  ;;  %v782_v43 = vld [vmem:[#allocation10 + $0x1a8] sm:$0xff]  ;;  %14994 = vst [vmem:[#allocation45_spill] sm:$0xff] %v11877_v25 }
  0x91   :  { %10513 = vmatpush3.bf16.msra.mxu0 %v10613_v11  ;;  %1155 = vmatprep.subr.bf16.mxu1 %v9657_v40  ;;  %v773_v50 = vld [vmem:[#allocation10 + $0x160] sm:$0xff]  ;;  %v11971_v25 = vld [vmem:[#allocation14 + $0x7a0] sm:$0xff]  ;;  %p11229_p2 = por %p11228_p1, %p11227_p0 }
  0x92   :  { %10514 = vmatprep.subr.bf16.mxu0 %v10614_v13  ;;  %1156 = vmatpush1.bf16.msra.mxu1 %v9656_v42  ;;  %v9641_v56 = vcombine.high %v769_v49, %v773_v50  ;;  %v761_v60 = vld [vmem:[#allocation10 + $0x100] sm:$0xff]  ;;  %v778_v42 = vld [vmem:[#allocation10 + $0x188] sm:$0xff]  ;;  %15011 = vst [vmem:[#allocation61_spill] sm:$0xff] %v11971_v25 }
  0x93   :  { %1157 = vmatprep.subr.bf16.mxu1 %v9649_v48  ;;  %v765_v61 = vld [vmem:[#allocation10 + $0x120] sm:$0xff]  ;;  %p11230_p3 = pnand %p11229_p2, %p11223_p13 }
  0x94   :  { %10589 = vset.pattern.permute.xlu0 %v11273_v0  ;;  %10590 = vset.pattern.permute.xlu1 %v11273_v0 }
  0x95   :  { %306 = vperm.xlu0 %10589, %v182_v4   ;;  %310 = vperm.xlu1 %10590, %v183_v5  }
  0x96   :  { %10515 = vmatpush3.bf16.msra.mxu0 %v10614_v13  ;;  %1158 = vmatpush1.bf16.msra.mxu1 %v9648_v53  ;;  %v9632_v13 = vcombine.low %v761_v60, %v765_v61 }
  0x97   :  { %1268 = vmatprep.subr.bf16.mxu0 %v9659_v47  ;;  %1159 = vmatprep.subr.bf16.mxu1 %v9641_v56  ;;  %v770_v56 = vld [vmem:[#allocation10 + $0x148] sm:$0xff] }
  0x99   :  { %318 = vperm.xlu0 %10589, %v185_v6   ;;  %10591 = vset.pattern.permute.xlu1 %v11275_v9 }
  0x9a   :  { %398 = vperm.xlu1 %10591, %v180_v2  }
  0x9d   :  { %322 = vperm.xlu0 %10589, %v186_v8  }
  0x9e   :  { %406 = vperm.xlu1 %10591, %v182_v4  }
  0xa1   :  { %10595 = vset.pattern.permute.xlu0 %v11275_v9 }
  0xa2   :  { %402 = vperm.xlu0 %10595, %v181_v3   ;;  %410 = vperm.xlu1 %10591, %v183_v5   ;;  %v9633_v3 = vcombine.high %v761_v60, %v765_v61  ;;  %v762_v61 = vld [vmem:[#allocation10 + $0x108] sm:$0xff] }
  0xa6   :  { %414 = vperm.xlu0 %10595, %v184_v12   ;;  %10592 = vset.pattern.permute.xlu1 %v14787_v1 }
  0xa7   :  { %224 = vperm.xlu1 %10592, %v185_v6  }
  0xaa   :  { %426 = vperm.xlu0 %10595, %v187_v14  }
  0xab   :  { %10593 = vset.pattern.permute.xlu1 %v11273_v0 }
  0xac   :  { %314 = vperm.xlu1 %10593, %v184_v12  }
  0xae   :  { %434 = vperm.xlu0 %10595, %v189_v15  }
  0xb0   :  { %10594 = vset.pattern.permute.xlu1 %v14787_v1 }
  0xb1   :  { %229 = vperm.xlu1 %10594, %v186_v8  }
  0xb2   :  { %10603 = vset.pattern.permute.xlu0 %v14787_v1 }
  0xb3   :  { %219 = vperm.xlu0 %10603, %v184_v12  }
  0xb5   :  { %234 = vperm.xlu1 %10594, %v187_v14  }
  0xb7   :  { %244 = vperm.xlu0 %10603, %v189_v15  }
  0xb9   :  { %10596 = vset.pattern.permute.xlu1 %v11273_v0 }
  0xba   :  { %326 = vperm.xlu1 %10596, %v187_v14  }
  0xbb   :  { %249 = vperm.xlu0 %10603, %v190_v16  }
  0xbe   :  { %10597 = vset.pattern.permute.xlu1 %v11275_v9 }
  0xbf   :  { %259 = vperm.xlu0 %10603, %v192_v17   ;;  %418 = vperm.xlu1 %10597, %v185_v6  }
  0xc3   :  { %10604 = vset.pattern.permute.xlu0 %v11273_v0  ;;  %422 = vperm.xlu1 %10597, %v186_v8   ;;  %v753_v8 = vld [vmem:[#allocation10 + $0xc0] sm:$0xff] }
  0xc4   :  { %338 = vperm.xlu0 %10604, %v190_v16  }
  0xc7   :  { %10598 = vset.pattern.permute.xlu1 %v14787_v1 }
  0xc8   :  { %350 = vperm.xlu0 %10604, %v193_v18   ;;  %239 = vperm.xlu1 %10598, %v188_v19  }
  0xcc   :  { %354 = vperm.xlu0 %10604, %v194_v20   ;;  %10599 = vset.pattern.permute.xlu1 %v11273_v0 }
  0xcd   :  { %330 = vperm.xlu1 %10599, %v188_v19  }
  0xd0   :  { %10609 = vset.pattern.permute.xlu0 %v11275_v9 }
  0xd1   :  { %446 = vperm.xlu0 %10609, %v192_v17   ;;  %334 = vperm.xlu1 %10599, %v189_v15   ;;  %v11503_v15 = vld [vmem:[#allocation5] ss:$0 sm:$0xff] }
  0xd5   :  { %458 = vperm.xlu0 %10609, %v195_v22   ;;  %10600 = vset.pattern.permute.xlu1 %v14787_v1 }
  0xd6   :  { %254 = vperm.xlu1 %10600, %v191_v21  }
  0xda   :  { %10601 = vset.pattern.permute.xlu1 %v11273_v0 }
  0xdb   :  { %342 = vperm.xlu1 %10601, %v191_v21  }
  0xdf   :  { %10602 = vset.pattern.permute.xlu1 %v11275_v9 }
  0xe0   :  { %430 = vperm.xlu1 %10602, %v188_v19  }
  0xe4   :  { %438 = vperm.xlu1 %10602, %v190_v16  }
  0xe8   :  { %442 = vperm.xlu1 %10602, %v191_v21  }
  0xec   :  { %10605 = vset.pattern.permute.xlu1 %v14787_v1 }
  0xed   :  { %264 = vperm.xlu1 %10605, %v193_v18  }
  0xf1   :  { %10606 = vset.pattern.permute.xlu1 %v11273_v0 }
  0xf2   :  { %346 = vperm.xlu1 %10606, %v192_v17  }
  0xf6   :  { %10607 = vset.pattern.permute.xlu1 %v14787_v1 }
  0xf7   :  { %269 = vperm.xlu1 %10607, %v194_v20  }
  0xfb   :  { %274 = vperm.xlu1 %10607, %v195_v22  }
  0xff   :  { %10608 = vset.pattern.permute.xlu1 %v11273_v0  ;;  %v9640_v0 = vcombine.low %v769_v49, %v773_v50  ;;  %v9658_v50 = vcombine.low %v11474_v38, %v11476_v41  ;;  %v766_v38 = vld [vmem:[#allocation10 + $0x128] sm:$0xff] }
 0x100   :  { %358 = vperm.xlu1 %10608, %v195_v22  }
 0x101   :  { %1160 = vmatpush1.bf16.msra.mxu1 %v9640_v0 }
 0x102   :  { %v299_v23 = vpop.permute.xlu1 %298  ;;  %1161 = vmatprep.subr.bf16.mxu1 %v9633_v3  ;;  %v754_v3 = vld [vmem:[#allocation10 + $0xc8] sm:$0xff] }
 0x103   :  { %v200_v24 = vpop.permute.xlu0 %199  ;;  %v365_v57 = vmul.f32 %v11479_v45, %v299_v23 }
 0x104   :  { %10610 = vset.pattern.permute.xlu1 %v11275_v9  ;;  %v281_v58 = vmul.f32 %v11482_v46, %v200_v24  ;;  %v757_v9 = vld [vmem:[#allocation10 + $0xe0] sm:$0xff] }
 0x105   :  { %450 = vperm.xlu1 %10610, %v193_v18   ;;  %v9625_v18 = vcombine.high %v753_v8, %v757_v9  ;;  %1162 = vmatpush1.bf16.msra.mxu1 %v9632_v13 }
 0x106   :  { %v303_v26 = vpop.permute.xlu1 %302  ;;  %v381_v4 = vadd.f32 %v365_v57, %v281_v58  ;;  %v774_v57 = vld [vmem:[#allocation10 + $0x168] sm:$0xff] }
 0x107   :  { %v205_v27 = vpop.permute.xlu0 %204  ;;  %v366_v5 = vmul.f32 %v11479_v45, %v303_v26  ;;  %1163 = vmatprep.subr.bf16.mxu1 %v9625_v18  ;;  %v9643_v60 = vcombine.high %v770_v56, %v774_v57 }
 0x108   :  { %v282_v6 = vmul.f32 %v11482_v46, %v205_v27  ;;  %v9624_v27 = vcombine.low %v753_v8, %v757_v9 }
 0x109   :  { %454 = vperm.xlu1 %10610, %v194_v20  }
 0x10a   :  { %v382_v19 = vadd.f32 %v366_v5, %v282_v6  ;;  %1164 = vmatpush1.bf16.msra.mxu1 %v9624_v27 }
 0x10b   :  { %v210_v29 = vpop.permute.xlu0 %209  ;;  %v215_v30 = vpop.permute.xlu1 %214 }
 0x10c   :  { %v283_v54 = vmul.f32 %v11482_v46, %v210_v29  ;;  %v284_v14 = vmul.f32 %v11482_v46, %v215_v30 }
 0x110   :  { %v307_v34 = vpop.permute.xlu0 %306  ;;  %v311_v39 = vpop.permute.xlu1 %310 }
 0x111   :  { %v367_v55 = vmul.f32 %v11479_v45, %v307_v34  ;;  %v368_v10 = vmul.f32 %v11479_v45, %v311_v39 }
 0x113   :  { %v383_v2 = vadd.f32 %v367_v55, %v283_v54  ;;  %v384_v22 = vadd.f32 %v368_v10, %v284_v14  ;;  %v9651_v54 = vcombine.high %v778_v42, %v782_v43 }
 0x114   :  { %v11486_v51 = vpop.permute.xlu0 %318 }
 0x115   :  { %v399_v59 = vpop.permute.xlu1 %398 }
 0x116   :  { %v465_v62 = vmul.f32 %v11489_v52, %v399_v59  ;;  %v9650_v59 = vcombine.low %v778_v42, %v782_v43 }
 0x118   :  { %v11496_v63 = vpop.permute.xlu0 %322  ;;  %v481_v12 = vadd.f32 %v465_v62, %v381_v4  ;;  %v9642_v62 = vcombine.low %v770_v56, %v774_v57  ;;  %v758_v4 = vld [vmem:[#allocation10 + $0xe8] sm:$0xff] }
 0x119   :  { %v407_v7 = vpop.permute.xlu1 %406  ;;  %v9627_v8 = vcombine.high %v754_v3, %v758_v4  ;;  %v9626_v13 = vcombine.low %v754_v3, %v758_v4 }
 0x11a   :  { %v467_v11 = vmul.f32 %v11489_v52, %v407_v7  ;;  %v504_v24 = vadd.f32 %v11503_v15, %v481_v12  ;;  %v9634_v7 = vcombine.low %v762_v61, %v766_v38 }
 0x11c   :  { %v483_v16 = vadd.f32 %v467_v11, %v383_v2  ;;  %v520_v39 = vmax.f32 %v504_v24, 0.0  ;;  %v9635_v2 = vcombine.high %v762_v61, %v766_v38 }
 0x11d   :  { %v403_v17 = vpop.permute.xlu0 %402  ;;  %v411_v21 = vpop.permute.xlu1 %410 }
 0x11e   :  { %v466_v20 = vmul.f32 %v11489_v52, %v403_v17  ;;  %v468_v23 = vmul.f32 %v11489_v52, %v411_v21  ;;  %v506_v29 = vadd.f32 %v11503_v15, %v483_v16  ;;  %v370_v16 = vmul.f32 %v11479_v45, %v11486_v51 }
 0x120   :  { %v482_v26 = vadd.f32 %v466_v20, %v382_v19  ;;  %v484_v30 = vadd.f32 %v468_v23, %v384_v22  ;;  %v522_v44 = vmax.f32 %v506_v29, 0.0  ;;  %v371_v23 = vmul.f32 %v11479_v45, %v11496_v63 }
 0x121   :  { %v415_v33 = vpop.permute.xlu0 %414 }
 0x122   :  { %v505_v34 = vadd.f32 %v11503_v15, %v482_v26  ;;  %v507_v36 = vadd.f32 %v11503_v15, %v484_v30  ;;  %v225_v37 = vpop.permute.xlu1 %224  ;;  %v469_v10 = vmul.f32 %v11489_v52, %v415_v33 }
 0x123   :  { %v286_v17 = vmul.f32 %v11482_v46, %v225_v37 }
 0x124   :  { %v521_v40 = vmax.f32 %v505_v34, 0.0  ;;  %v523_v47 = vmax.f32 %v507_v36, 0.0 }
 0x125   :  { %v427_v48 = vpop.permute.xlu0 %426  ;;  %v386_v24 = vadd.f32 %v370_v16, %v286_v17 }
 0x126   :  { %v11511_v49 = vpack.c.bf16 %v521_v40, %v520_v39  ;;  %v11515_v53 = vpack.c.bf16 %v523_v47, %v522_v44  ;;  %v472_v19 = vmul.f32 %v11489_v52, %v427_v48 }
 0x127   :  { %v315_v55 = vpop.permute.xlu1 %314 }
 0x128   :  { %10516 = vmatprep.mubr.msk.bf16.mxu0 %vm583_vm0, %v11511_v49  ;;  %v369_v9 = vmul.f32 %v11479_v45, %v315_v55 }
 0x129   :  { %10517 = vmatmul.mubr.msk.bf16.vlgmr.msra.gmra.mxu0 %vm583_vm0, %v11515_v53  ;;  %v11521_v58 = vpop.permute.xlu0 %434 }
 0x12a   :  { %1269 = vmatpush1.bf16.msra.mxu0 %v9658_v50 }
 0x12b   :  { %1270 = vmatprep.subr.bf16.mxu0 %v9651_v54 }
 0x12c   :  { %v230_v41 = vpop.permute.xlu1 %229 }
 0x12d   :  { %v287_v26 = vmul.f32 %v11482_v46, %v230_v41 }
 0x12e   :  { %1271 = vmatpush1.bf16.msra.mxu0 %v9650_v59  ;;  %v220_v0 = vpop.permute.xlu0 %219 }
 0x12f   :  { %1272 = vmatprep.subr.bf16.mxu0 %v9643_v60  ;;  %v285_v6 = vmul.f32 %v11482_v46, %v220_v0  ;;  %v387_v34 = vadd.f32 %v371_v23, %v287_v26 }
 0x130   :  { %v235_v5 = vpop.permute.xlu1 %234 }
 0x131   :  { %v385_v11 = vadd.f32 %v369_v9, %v285_v6  ;;  %v288_v18 = vmul.f32 %v11482_v46, %v235_v5 }
 0x132   :  { %1273 = vmatpush1.bf16.msra.mxu0 %v9642_v62  ;;  %v245_v55 = vpop.permute.xlu0 %244  ;;  %v474_v62 = vmul.f32 %v11489_v52, %v11521_v58 }
 0x133   :  { %1274 = vmatprep.subr.bf16.mxu0 %v9635_v2  ;;  %v485_v20 = vadd.f32 %v469_v10, %v385_v11  ;;  %v290_v41 = vmul.f32 %v11482_v46, %v245_v55  ;;  %v741_v55 = vld [vmem:[#allocation10 + $0x60] sm:$0xff] }
 0x135   :  { %v327_v12 = vpop.permute.xlu1 %326  ;;  %v508_v51 = vadd.f32 %v11503_v15, %v485_v20 }
 0x136   :  { %1275 = vmatpush1.bf16.msra.mxu0 %v9634_v7  ;;  %v372_v14 = vmul.f32 %v11479_v45, %v327_v12  ;;  %v250_v57 = vpop.permute.xlu0 %249 }
 0x137   :  { %1276 = vmatprep.subr.bf16.mxu0 %v9627_v8  ;;  %v524_v39 = vmax.f32 %v508_v51, 0.0  ;;  %v291_v7 = vmul.f32 %v11482_v46, %v250_v57 }
 0x138   :  { %v388_v21 = vadd.f32 %v372_v14, %v288_v18 }
 0x13a   :  { %1277 = vmatpush1.bf16.msra.mxu0 %v9626_v13  ;;  %v419_v22 = vpop.permute.xlu1 %418  ;;  %v488_v29 = vadd.f32 %v472_v19, %v388_v21  ;;  %v11549_v61 = vpop.permute.xlu0 %259 }
 0x13b   :  { %v470_v27 = vmul.f32 %v11489_v52, %v419_v22 }
 0x13c   :  { %v511_v40 = vadd.f32 %v11503_v15, %v488_v29 }
 0x13d   :  { %v486_v30 = vadd.f32 %v470_v27, %v386_v24 }
 0x13e   :  { %v423_v33 = vpop.permute.xlu1 %422  ;;  %v527_v48 = vmax.f32 %v511_v40, 0.0 }
 0x13f   :  { %v509_v36 = vadd.f32 %v11503_v15, %v486_v30  ;;  %v471_v37 = vmul.f32 %v11489_v52, %v423_v33  ;;  %v339_v3 = vpop.permute.xlu0 %338  ;;  %v745_v30 = vld [vmem:[#allocation10 + $0x80] sm:$0xff] }
 0x140   :  { %v375_v8 = vmul.f32 %v11479_v45, %v339_v3  ;;  %v749_v33 = vld [vmem:[#allocation10 + $0xa0] sm:$0xff] }
 0x141   :  { %v525_v42 = vmax.f32 %v509_v36, 0.0  ;;  %v487_v63 = vadd.f32 %v471_v37, %v387_v34  ;;  %v746_v34 = vld [vmem:[#allocation10 + $0x88] sm:$0xff]  ;;  %v9617_v36 = vcombine.high %v745_v30, %v749_v33  ;;  %v729_v3 = vld [vmem:[#allocation10] sm:$0xff] }
 0x142   :  { %v391_v58 = vadd.f32 %v375_v8, %v291_v7  ;;  %v750_v37 = vld [vmem:[#allocation10 + $0xa8] sm:$0xff] }
 0x143   :  { %v11540_v43 = vpack.c.bf16 %v525_v42, %v524_v39  ;;  %v510_v44 = vadd.f32 %v11503_v15, %v487_v63  ;;  %v240_v47 = vpop.permute.xlu1 %239  ;;  %v9618_v42 = vcombine.low %v746_v34, %v750_v37  ;;  %v9619_v63 = vcombine.high %v746_v34, %v750_v37  ;;  %1165 = vmatprep.subr.bf16.mxu1 %v9617_v36  ;;  %v734_v7 = vld [vmem:[#allocation10 + $0x28] sm:$0xff] }
 0x144   :  { %v289_v5 = vmul.f32 %v11482_v46, %v240_v47 }
 0x145   :  { %14981 = vst [vmem:[#allocation32_spill] sm:$0xff] %v11540_v43  ;;  %v526_v50 = vmax.f32 %v510_v44, 0.0  ;;  %10520 = vmatprep.mubr.msk.bf16.mxu0 %vm583_vm0, %v11540_v43  ;;  %v9616_v44 = vcombine.low %v745_v30, %v749_v33  ;;  %1278 = vmatprep.subr.bf16.mxu0 %v9619_v63 }
 0x146   :  { %1279 = vmatpush1.bf16.msra.mxu0 %v9618_v42 }
 0x147   :  { %v11545_v54 = vpack.c.bf16 %v527_v48, %v526_v50  ;;  %1166 = vmatpush1.bf16.msra.mxu1 %v9616_v44  ;;  %v737_v50 = vld [vmem:[#allocation10 + $0x40] sm:$0xff] }
 0x148   :  { %v331_v56 = vpop.permute.xlu1 %330  ;;  %v9609_v57 = vcombine.high %v737_v50, %v741_v55 }
 0x149   :  { %14982 = vst [vmem:[#allocation33_spill] sm:$0xff] %v11545_v54  ;;  %10521 = vmatmul.mubr.msk.bf16.gmra.mxu0 %vm583_vm0, %v11545_v54  ;;  %v373_v4 = vmul.f32 %v11479_v45, %v331_v56  ;;  %v738_v56 = vld [vmem:[#allocation10 + $0x48] sm:$0xff] }
 0x14a   :  { %1167 = vmatprep.subr.bf16.mxu1 %v9609_v57 }
 0x14b   :  { %v389_v10 = vadd.f32 %v373_v4, %v289_v5  ;;  %v733_v4 = vld [vmem:[#allocation10 + $0x20] sm:$0xff]  ;;  %v730_v5 = vld [vmem:[#allocation10 + $0x8] sm:$0xff] }
 0x14c   :  { %v335_v59 = vpop.permute.xlu1 %334  ;;  %v9602_v8 = vcombine.low %v730_v5, %v734_v7 }
 0x14d   :  { %v374_v38 = vmul.f32 %v11479_v45, %v335_v59  ;;  %v742_v59 = vld [vmem:[#allocation10 + $0x68] sm:$0xff] }
 0x14f   :  { %v390_v0 = vadd.f32 %v374_v38, %v290_v41  ;;  %v351_v38 = vpop.permute.xlu0 %350  ;;  %v9610_v41 = vcombine.low %v738_v56, %v742_v59 }
 0x151   :  { %v255_v60 = vpop.permute.xlu1 %254  ;;  %v490_v6 = vadd.f32 %v474_v62, %v390_v0  ;;  %v9611_v62 = vcombine.high %v738_v56, %v742_v59  ;;  %v9608_v0 = vcombine.low %v737_v50, %v741_v55 }
 0x152   :  { %v292_v20 = vmul.f32 %v11482_v46, %v255_v60 }
 0x153   :  { %v513_v12 = vadd.f32 %v11503_v15, %v490_v6  ;;  %1280 = vmatprep.subr.bf16.mxu0 %v9611_v62  ;;  %1168 = vmatpush1.bf16.msra.mxu1 %v9608_v0  ;;  %v9601_v6 = vcombine.high %v729_v3, %v733_v4  ;;  %v788_v62 = vld [vmem:[#allocation10 + $0x1d8] sm:$0xff] }
 0x154   :  { %1281 = vmatpush1.bf16.msra.mxu0 %v9610_v41  ;;  %v791_v41 = vld [vmem:[#allocation10 + $0x1f0] sm:$0xff] }
 0x155   :  { %v529_v19 = vmax.f32 %v513_v12, 0.0  ;;  %1169 = vmatprep.subr.bf16.mxu1 %v9601_v6 }
 0x156   :  { %v343_v2 = vpop.permute.xlu1 %342 }
 0x157   :  { %v376_v16 = vmul.f32 %v11479_v45, %v343_v2 }
 0x159   :  { %v392_v24 = vadd.f32 %v376_v16, %v292_v20  ;;  %v293_v16 = vmul.f32 %v11482_v46, %v11549_v61 }
 0x15b   :  { %v431_v9 = vpop.permute.xlu1 %430 }
 0x15c   :  { %v473_v11 = vmul.f32 %v11489_v52, %v431_v9  ;;  %v9603_v9 = vcombine.high %v730_v5, %v734_v7  ;;  %v11602_v7 = vld [vmem:[#allocation8] ss:$0 sm:$0xff] }
 0x15e   :  { %v489_v13 = vadd.f32 %v473_v11, %v389_v10  ;;  %v9600_v10 = vcombine.low %v729_v3, %v733_v4  ;;  %v355_v11 = vpop.permute.xlu0 %354  ;;  %1282 = vmatprep.subr.bf16.mxu0 %v9603_v9  ;;  %v792_v3 = vld [vmem:[#allocation10 + $0x1f8] sm:$0xff] }
 0x15f   :  { %v439_v14 = vpop.permute.xlu1 %438  ;;  %1283 = vmatpush1.bf16.msra.mxu0 %v9602_v8  ;;  %v379_v61 = vmul.f32 %v11479_v45, %v355_v11  ;;  %v9662_v4 = vcombine.low %v788_v62, %v792_v3 }
 0x160   :  { %v512_v17 = vadd.f32 %v11503_v15, %v489_v13  ;;  %v475_v18 = vmul.f32 %v11489_v52, %v439_v14  ;;  %1170 = vmatpush1.bf16.msra.mxu1 %v9600_v10 }
 0x162   :  { %v528_v21 = vmax.f32 %v512_v17, 0.0  ;;  %v491_v22 = vadd.f32 %v475_v18, %v391_v58  ;;  %v447_v14 = vpop.permute.xlu0 %446 }
 0x163   :  { %v443_v23 = vpop.permute.xlu1 %442  ;;  %v477_v18 = vmul.f32 %v11489_v52, %v447_v14  ;;  %v783_v14 = vld [vmem:[#allocation10 + $0x1b0] sm:$0xff] }
 0x164   :  { %v11565_v26 = vpack.c.bf16 %v529_v19, %v528_v21  ;;  %v476_v27 = vmul.f32 %v11489_v52, %v443_v23  ;;  %v514_v51 = vadd.f32 %v11503_v15, %v491_v22  ;;  %v378_v22 = vmul.f32 %v11479_v45, %v351_v38 }
 0x166   :  { %14983 = vst [vmem:[#allocation34_spill] sm:$0xff] %v11565_v26  ;;  %v492_v29 = vadd.f32 %v476_v27, %v392_v24  ;;  %10524 = vmatprep.mubr.msk.bf16.mxu0 %vm583_vm0, %v11565_v26  ;;  %v530_v47 = vmax.f32 %v514_v51, 0.0  ;;  %v459_v21 = vpop.permute.xlu0 %458 }
 0x168   :  { %v515_v39 = vadd.f32 %v11503_v15, %v492_v29  ;;  %v265_v40 = vpop.permute.xlu1 %264  ;;  %v480_v29 = vmul.f32 %v11489_v52, %v459_v21 }
 0x169   :  { %v294_v23 = vmul.f32 %v11482_v46, %v265_v40 }
 0x16a   :  { %v531_v48 = vmax.f32 %v515_v39, 0.0 }
 0x16b   :  { %v394_v33 = vadd.f32 %v378_v22, %v294_v23  ;;  %v771_v22 = vld [vmem:[#allocation10 + $0x150] sm:$0xff] }
 0x16c   :  { %v11572_v60 = vpack.c.bf16 %v531_v48, %v530_v47 }
 0x16d   :  { %v347_v2 = vpop.permute.xlu1 %346 }
 0x16e   :  { %14984 = vst [vmem:[#allocation35_spill] sm:$0xff] %v11572_v60  ;;  %10525 = vmatmul.mubr.msk.bf16.gmra.mxu0 %vm583_vm0, %v11572_v60  ;;  %v377_v58 = vmul.f32 %v11479_v45, %v347_v2 }
 0x170   :  { %v393_v17 = vadd.f32 %v377_v58, %v293_v16  ;;  %v780_v16 = vld [vmem:[#allocation10 + $0x198] sm:$0xff] }
 0x172   :  { %v270_v12 = vpop.permute.xlu1 %269  ;;  %v493_v27 = vadd.f32 %v477_v18, %v393_v17  ;;  %v784_v17 = vld [vmem:[#allocation10 + $0x1b8] sm:$0xff] }
 0x173   :  { %v295_v34 = vmul.f32 %v11482_v46, %v270_v12  ;;  %v779_v12 = vld [vmem:[#allocation10 + $0x190] sm:$0xff]  ;;  %v9655_v21 = vcombine.high %v780_v16, %v784_v17 }
 0x174   :  { %v516_v37 = vadd.f32 %v11503_v15, %v493_v27  ;;  %v772_v27 = vld [vmem:[#allocation10 + $0x158] sm:$0xff] }
 0x175   :  { %v395_v40 = vadd.f32 %v379_v61, %v295_v34 }
 0x176   :  { %v275_v13 = vpop.permute.xlu1 %274  ;;  %v532_v48 = vmax.f32 %v516_v37, 0.0 }
 0x177   :  { %v296_v24 = vmul.f32 %v11482_v46, %v275_v13 }
 0x17b   :  { %v359_v19 = vpop.permute.xlu1 %358 }
 0x17c   :  { %v380_v20 = vmul.f32 %v11479_v45, %v359_v19 }
 0x17e   :  { %v396_v51 = vadd.f32 %v380_v20, %v296_v24  ;;  %v9653_v20 = vcombine.high %v779_v12, %v783_v14  ;;  %v775_v24 = vld [vmem:[#allocation10 + $0x170] sm:$0xff] }
 0x17f   :  { %v9645_v61 = vcombine.high %v771_v22, %v775_v24 }
 0x180   :  { %v451_v30 = vpop.permute.xlu1 %450  ;;  %v496_v39 = vadd.f32 %v480_v29, %v396_v51  ;;  %v776_v51 = vld [vmem:[#allocation10 + $0x178] sm:$0xff] }
 0x181   :  { %v478_v36 = vmul.f32 %v11489_v52, %v451_v30  ;;  %v9652_v30 = vcombine.low %v779_v12, %v783_v14  ;;  %v9647_v34 = vcombine.high %v772_v27, %v776_v51  ;;  %v739_v14 = vld [vmem:[#allocation10 + $0x50] sm:$0xff] }
 0x182   :  { %v519_v50 = vadd.f32 %v11503_v15, %v496_v39  ;;  %v767_v39 = vld [vmem:[#allocation10 + $0x130] sm:$0xff] }
 0x183   :  { %v494_v42 = vadd.f32 %v478_v36, %v394_v33  ;;  %v9654_v33 = vcombine.low %v780_v16, %v784_v17  ;;  %v763_v36 = vld [vmem:[#allocation10 + $0x110] sm:$0xff]  ;;  %v740_v17 = vld [vmem:[#allocation10 + $0x58] sm:$0xff] }
 0x184   :  { %v455_v63 = vpop.permute.xlu1 %454  ;;  %v535_v57 = vmax.f32 %v519_v50, 0.0  ;;  %v759_v50 = vld [vmem:[#allocation10 + $0xf0] sm:$0xff] }
 0x185   :  { %v517_v44 = vadd.f32 %v11503_v15, %v494_v42  ;;  %v479_v47 = vmul.f32 %v11489_v52, %v455_v63  ;;  %v787_v52 = vld [vmem:[#allocation10 + $0x1d0] sm:$0xff]  ;;  %v764_v42 = vld [vmem:[#allocation10 + $0x118] sm:$0xff] }
 0x186   :  { %v9660_v0 = vcombine.low %v787_v52, %v791_v41  ;;  %v9661_v2 = vcombine.high %v787_v52, %v791_v41  ;;  %v768_v63 = vld [vmem:[#allocation10 + $0x138] sm:$0xff]  ;;  %v743_v16 = vld [vmem:[#allocation10 + $0x70] sm:$0xff] }
 0x187   :  { %v533_v55 = vmax.f32 %v517_v44, 0.0  ;;  %v495_v56 = vadd.f32 %v479_v47, %v395_v40  ;;  %v9644_v44 = vcombine.low %v771_v22, %v775_v24  ;;  %v9646_v47 = vcombine.low %v772_v27, %v776_v51  ;;  %v756_v52 = vld [vmem:[#allocation10 + $0xd8] sm:$0xff]  ;;  %v731_v24 = vld [vmem:[#allocation10 + $0x10] sm:$0xff] }
 0x188   :  { %1381 = vmatprep.subr.bf16.mxu1 %v9661_v2  ;;  %v760_v41 = vld [vmem:[#allocation10 + $0xf8] sm:$0xff]  ;;  %v9613_v22 = vcombine.high %v739_v14, %v743_v16  ;;  %v735_v51 = vld [vmem:[#allocation10 + $0x30] sm:$0xff] }
 0x189   :  { %v11592_v45 = vpack.c.bf16 %v533_v55, %v532_v48  ;;  %v518_v46 = vadd.f32 %v11503_v15, %v495_v56  ;;  %v9663_v15 = vcombine.high %v788_v62, %v792_v3  ;;  %v755_v48 = vld [vmem:[#allocation10 + $0xd0] sm:$0xff]  ;;  %v9637_v55 = vcombine.high %v763_v36, %v767_v39 }
 0x18a   :  { %v9639_v56 = vcombine.high %v764_v42, %v768_v63  ;;  %v9636_v3 = vcombine.low %v763_v36, %v767_v39  ;;  %v9630_v12 = vcombine.low %v756_v52, %v760_v41  ;;  %v9605_v36 = vcombine.high %v731_v24, %v735_v51 }
 0x18b   :  { %14985 = vst [vmem:[#allocation36_spill] sm:$0xff] %v11592_v45  ;;  %v534_v59 = vmax.f32 %v518_v46, 0.0  ;;  %10528 = vmatprep.mubr.msk.bf16.mxu0 %vm583_vm0, %v11592_v45  ;;  %1494 = vmatprep.subr.bf16.mxu0 %v9663_v15  ;;  %v11616_v46 = vld [vmem:[#allocation13 + $0xc0] sm:$0xff]  ;;  %v9629_v15 = vcombine.high %v755_v48, %v759_v50 }
 0x18d   :  { %v11597_v38 = vpack.c.bf16 %v535_v57, %v534_v59  ;;  %v11618_v57 = vld [vmem:[#allocation13 + $0xe0] sm:$0xff]  ;;  %v11620_v59 = vld [vmem:[#allocation13 + $0xc8] sm:$0xff] }
 0x18e   :  { %v9688_v62 = vcombine.low %v11616_v46, %v11618_v57 }
 0x18f   :  { %14986 = vst [vmem:[#allocation37_spill] sm:$0xff] %v11597_v38  ;;  %10529 = vmatmul.mubr.msk.bf16.gmra.mxu0 %vm583_vm0, %v11597_v38 }
 0x190   :  { %1300 = vmatprep.mubr.bf16.mxu0 %v14787_v1 }
 0x1e9   :  { %v10518_v5 = vpop.f32.mrf.mxu0 }
 0x1ea   :  { %v651_v23 = vadd.f32 %v10518_v5, %v11602_v7  ;;  %v9631_v5 = vcombine.high %v756_v52, %v760_v41 }
 0x1eb   :  { %v642_v6 = vpop.f32.mrf.mxu0 }
 0x1ec   :  { %v643_v9 = vadd.f32 %v11602_v7, %v642_v6  ;;  %v707_v37 = vmax.f32 %v651_v23, 0.0  ;;  %v747_v6 = vld [vmem:[#allocation10 + $0x90] sm:$0xff] }
 0x1ed   :  { %v10519_v8 = vpop.f32.mrf.mxu0 }
 0x1ee   :  { %v705_v13 = vmax.f32 %v643_v9, 0.0  ;;  %v654_v18 = vadd.f32 %v10519_v8, %v11602_v7  ;;  %v751_v8 = vld [vmem:[#allocation10 + $0xb0] sm:$0xff]  ;;  %v748_v9 = vld [vmem:[#allocation10 + $0x98] sm:$0xff] }
 0x1ef   :  { %v645_v10 = vpop.f32.mrf.mxu0 }
 0x1f0   :  { %v646_v11 = vadd.f32 %v11602_v7, %v645_v10  ;;  %v708_v29 = vmax.f32 %v654_v18, 0.0  ;;  %v752_v10 = vld [vmem:[#allocation10 + $0xb8] sm:$0xff] }
 0x1f1   :  { %v744_v18 = vld [vmem:[#allocation10 + $0x78] sm:$0xff] }
 0x1f2   :  { %v706_v58 = vmax.f32 %v646_v11, 0.0  ;;  %v11614_v40 = vpack.c.bf16 %v708_v29, %v707_v37  ;;  %v9628_v11 = vcombine.low %v755_v48, %v759_v50  ;;  %v9615_v23 = vcombine.high %v740_v17, %v744_v18  ;;  %v732_v29 = vld [vmem:[#allocation10 + $0x18] sm:$0xff] }
 0x1f3   :  { %v9689_v50 = vcombine.high %v11616_v46, %v11618_v57 }
 0x1f4   :  { %v11607_v19 = vpack.c.bf16 %v706_v58, %v705_v13  ;;  %v9621_v13 = vcombine.high %v747_v6, %v751_v8  ;;  %v9623_v58 = vcombine.high %v748_v9, %v752_v10 }
 0x1f6   :  { %1188 = vmatmul.mubr.bf16.vlgmr.msra.gmra.mxu1 %v11607_v19  ;;  %1301 = vmatmul.mubr.bf16.vlgmr.msra.gmra.mxu0 %v11607_v19 }
 0x1f7   :  { %1197 = vmatprep.mubr.bf16.mxu1 %v14787_v1  ;;  %1310 = vmatprep.mubr.bf16.mxu0 %v14787_v1 }
 0x1f8   :  { %1382 = vmatpush1.bf16.msra.mxu1 %v9660_v0  ;;  %1495 = vmatpush1.bf16.msra.mxu0 %v9662_v4  ;;  %v11626_v0 = vld [vmem:[#allocation13 + $0xe8] sm:$0xff]  ;;  %v9638_v4 = vcombine.low %v764_v42, %v768_v63 }
 0x1f9   :  { %1383 = vmatprep.subr.bf16.mxu1 %v9653_v20  ;;  %1496 = vmatprep.subr.bf16.mxu0 %v9655_v21  ;;  %v9690_v2 = vcombine.low %v11620_v59, %v11626_v0  ;;  %v9620_v20 = vcombine.low %v747_v6, %v751_v8  ;;  %v9622_v21 = vcombine.low %v748_v9, %v752_v10 }
 0x1fc   :  { %1384 = vmatpush1.bf16.msra.mxu1 %v9652_v30  ;;  %1497 = vmatpush1.bf16.msra.mxu0 %v9654_v33  ;;  %v736_v30 = vld [vmem:[#allocation10 + $0x38] sm:$0xff] }
 0x1fd   :  { %1385 = vmatprep.subr.bf16.mxu1 %v9645_v61  ;;  %1498 = vmatprep.subr.bf16.mxu0 %v9647_v34  ;;  %v9612_v61 = vcombine.low %v739_v14, %v743_v16  ;;  %v9614_v34 = vcombine.low %v740_v17, %v744_v18  ;;  %v9607_v37 = vcombine.high %v732_v29, %v736_v30 }
 0x1fe   :  { %1198 = vmatmul.mubr.bf16.gmra.mxu1 %v11614_v40  ;;  %1311 = vmatmul.mubr.bf16.gmra.mxu0 %v11614_v40 }
 0x1ff   :  { %1207 = vmatprep.mubr.bf16.mxu1 %v14787_v1  ;;  %1320 = vmatprep.mubr.bf16.mxu0 %v14787_v1 }
 0x200   :  { %1386 = vmatpush1.bf16.msra.mxu1 %v9644_v44  ;;  %1499 = vmatpush1.bf16.msra.mxu0 %v9646_v47  ;;  %v9604_v44 = vcombine.low %v731_v24, %v735_v51  ;;  %v9606_v47 = vcombine.low %v732_v29, %v736_v30 }
 0x201   :  { %1387 = vmatprep.subr.bf16.mxu1 %v9637_v55  ;;  %1500 = vmatprep.subr.bf16.mxu0 %v9639_v56  ;;  %v9691_v55 = vcombine.high %v11620_v59, %v11626_v0  ;;  %v1978_v59 = vld [vmem:[#allocation13 + $0xd0] sm:$0xff]  ;;  %v1979_v0 = vld [vmem:[#allocation13 + $0xd8] sm:$0xff] }
 0x204   :  { %1388 = vmatpush1.bf16.msra.mxu1 %v9636_v3  ;;  %1501 = vmatpush1.bf16.msra.mxu0 %v9638_v4 }
 0x205   :  { %1389 = vmatprep.subr.bf16.mxu1 %v9629_v15  ;;  %1502 = vmatprep.subr.bf16.mxu0 %v9631_v5 }
 0x208   :  { %1390 = vmatpush1.bf16.msra.mxu1 %v9628_v11  ;;  %1503 = vmatpush1.bf16.msra.mxu0 %v9630_v12 }
 0x209   :  { %1391 = vmatprep.subr.bf16.mxu1 %v9621_v13  ;;  %1504 = vmatprep.subr.bf16.mxu0 %v9623_v58  ;;  %v10522_v27 = vpop.f32.mrf.mxu0 }
 0x20a   :  { %v667_v4 = vadd.f32 %v10522_v27, %v11602_v7 }
 0x20b   :  { %v658_v33 = vpop.f32.mrf.mxu0 }
 0x20c   :  { %1392 = vmatpush1.bf16.msra.mxu1 %v9620_v20  ;;  %1505 = vmatpush1.bf16.msra.mxu0 %v9622_v21  ;;  %v659_v42 = vadd.f32 %v11602_v7, %v658_v33  ;;  %v711_v5 = vmax.f32 %v667_v4, 0.0  ;;  %v1965_v4 = vld [vmem:[#allocation13 + $0x68] sm:$0xff] }
 0x20d   :  { %1393 = vmatprep.subr.bf16.mxu1 %v9613_v22  ;;  %1506 = vmatprep.subr.bf16.mxu0 %v9615_v23  ;;  %v10523_v39 = vpop.f32.mrf.mxu0 }
 0x20e   :  { %v709_v56 = vmax.f32 %v659_v42, 0.0  ;;  %v670_v41 = vadd.f32 %v10523_v39, %v11602_v7 }
 0x20f   :  { %v661_v63 = vpop.f32.mrf.mxu0 }
 0x210   :  { %1394 = vmatpush1.bf16.msra.mxu1 %v9612_v61  ;;  %1507 = vmatpush1.bf16.msra.mxu0 %v9614_v34  ;;  %v662_v48 = vadd.f32 %v11602_v7, %v661_v63  ;;  %v712_v15 = vmax.f32 %v670_v41, 0.0  ;;  %v1961_v41 = vld [vmem:[#allocation13 + $0x48] sm:$0xff] }
 0x211   :  { %1395 = vmatprep.subr.bf16.mxu1 %v9605_v36  ;;  %1508 = vmatprep.subr.bf16.mxu0 %v9607_v37 }
 0x212   :  { %v710_v52 = vmax.f32 %v662_v48, 0.0  ;;  %v11646_v6 = vpack.c.bf16 %v712_v15, %v711_v5  ;;  %v1973_v48 = vld [vmem:[#allocation13 + $0xa8] sm:$0xff] }
 0x214   :  { %1396 = vmatpush1.bf16.msra.mxu1 %v9604_v44  ;;  %1509 = vmatpush1.bf16.msra.mxu0 %v9606_v47  ;;  %v11639_v3 = vpack.c.bf16 %v710_v52, %v709_v56  ;;  %v1972_v44 = vld [vmem:[#allocation13 + $0xa0] sm:$0xff]  ;;  %v1969_v47 = vld [vmem:[#allocation13 + $0x88] sm:$0xff] }
 0x215   :  { %2152 = vmatprep.subr.bf16.mxu1 %v9689_v50  ;;  %2265 = vmatprep.subr.bf16.mxu0 %v9691_v55  ;;  %v9683_v55 = vcombine.high %v1969_v47, %v1973_v48  ;;  %v1960_v56 = vld [vmem:[#allocation13 + $0x40] sm:$0xff]  ;;  %v9682_v5 = vcombine.low %v1969_v47, %v1973_v48 }
 0x216   :  { %1208 = vmatmul.mubr.bf16.gmra.mxu1 %v11639_v3  ;;  %1321 = vmatmul.mubr.bf16.gmra.mxu0 %v11639_v3  ;;  %v1964_v52 = vld [vmem:[#allocation13 + $0x60] sm:$0xff] }
 0x217   :  { %1217 = vmatprep.mubr.bf16.mxu1 %v14787_v1  ;;  %1330 = vmatprep.mubr.bf16.mxu0 %v14787_v1 }
 0x21e   :  { %1218 = vmatmul.mubr.bf16.gmra.mxu1 %v11646_v6  ;;  %1331 = vmatmul.mubr.bf16.gmra.mxu0 %v11646_v6 }
 0x21f   :  { %1227 = vmatprep.mubr.bf16.mxu1 %v14787_v1  ;;  %1340 = vmatprep.mubr.bf16.mxu0 %v14787_v1 }
 0x22e   :  { %v10526_v8 = vpop.f32.mrf.mxu0 }
 0x22f   :  { %v683_v18 = vadd.f32 %v10526_v8, %v11602_v7  ;;  %v9675_v8 = vcombine.high %v1961_v41, %v1965_v4 }
 0x230   :  { %v674_v9 = vpop.f32.mrf.mxu0 }
 0x231   :  { %v675_v11 = vadd.f32 %v11602_v7, %v674_v9  ;;  %v715_v21 = vmax.f32 %v683_v18, 0.0  ;;  %v1952_v9 = vld [vmem:[#allocation13] sm:$0xff] }
 0x232   :  { %v10527_v10 = vpop.f32.mrf.mxu0 }
 0x233   :  { %v713_v58 = vmax.f32 %v675_v11, 0.0  ;;  %v686_v16 = vadd.f32 %v10527_v10, %v11602_v7  ;;  %v1956_v10 = vld [vmem:[#allocation13 + $0x20] sm:$0xff]  ;;  %v1953_v11 = vld [vmem:[#allocation13 + $0x8] sm:$0xff] }
 0x234   :  { %v677_v12 = vpop.f32.mrf.mxu0  ;;  %v9665_v46 = vcombine.high %v1952_v9, %v1956_v10 }
 0x235   :  { %v678_v13 = vadd.f32 %v11602_v7, %v677_v12  ;;  %v716_v20 = vmax.f32 %v686_v16, 0.0  ;;  %v1957_v12 = vld [vmem:[#allocation13 + $0x28] sm:$0xff] }
 0x236   :  { %v9667_v57 = vcombine.high %v1953_v11, %v1957_v12  ;;  %v9666_v16 = vcombine.low %v1953_v11, %v1957_v12 }
 0x237   :  { %v714_v14 = vmax.f32 %v678_v13, 0.0  ;;  %v11662_v22 = vpack.c.bf16 %v716_v20, %v715_v21  ;;  %v9672_v13 = vcombine.low %v1960_v56, %v1964_v52 }
 0x239   :  { %v11655_v17 = vpack.c.bf16 %v714_v14, %v713_v58  ;;  %v9674_v58 = vcombine.low %v1961_v41, %v1965_v4  ;;  %v9664_v14 = vcombine.low %v1952_v9, %v1956_v10 }
 0x23b   :  { %1228 = vmatmul.mubr.bf16.gmra.mxu1 %v11655_v17  ;;  %1341 = vmatmul.mubr.bf16.gmra.mxu0 %v11655_v17 }
 0x23c   :  { %1237 = vmatprep.mubr.bf16.mxu1 %v14787_v1  ;;  %1350 = vmatprep.mubr.bf16.mxu0 %v14787_v1 }
 0x243   :  { %1238 = vmatmul.mubr.bf16.gmra.mxu1 %v11662_v22  ;;  %1351 = vmatmul.mubr.bf16.gmra.mxu0 %v11662_v22 }
 0x244   :  { %1247 = vmatprep.mubr.bf16.mxu1 %v14787_v1  ;;  %1360 = vmatprep.mubr.bf16.mxu0 %v14787_v1 }
 0x24f   :  { %v10530_v23 = vpop.f32.mrf.mxu0 }
 0x250   :  { %v699_v37 = vadd.f32 %v10530_v23, %v11602_v7 }
 0x251   :  { %v690_v24 = vpop.f32.mrf.mxu0 }
 0x252   :  { %v691_v51 = vadd.f32 %v11602_v7, %v690_v24  ;;  %v719_v42 = vmax.f32 %v699_v37, 0.0  ;;  %v1954_v37 = vld [vmem:[#allocation13 + $0x10] sm:$0xff] }
 0x253   :  { %v10531_v27 = vpop.f32.mrf.mxu0 }
 0x254   :  { %v717_v33 = vmax.f32 %v691_v51, 0.0  ;;  %v702_v34 = vadd.f32 %v10531_v27, %v11602_v7  ;;  %v1962_v27 = vld [vmem:[#allocation13 + $0x50] sm:$0xff] }
 0x255   :  { %v693_v29 = vpop.f32.mrf.mxu0  ;;  %v1966_v51 = vld [vmem:[#allocation13 + $0x70] sm:$0xff] }
 0x256   :  { %v694_v30 = vadd.f32 %v11602_v7, %v693_v29  ;;  %v720_v39 = vmax.f32 %v702_v34, 0.0  ;;  %v1968_v7 = vld [vmem:[#allocation13 + $0x80] sm:$0xff]  ;;  %v1963_v29 = vld [vmem:[#allocation13 + $0x58] sm:$0xff]  ;;  %v9677_v34 = vcombine.high %v1962_v27, %v1966_v51 }
 0x257   :  { %v9681_v50 = vcombine.high %v1968_v7, %v1972_v44  ;;  %v9680_v15 = vcombine.low %v1968_v7, %v1972_v44  ;;  %v9676_v7 = vcombine.low %v1962_v27, %v1966_v51  ;;  %v11829_v27 = vld [vmem:[#allocation14 + $0x100] sm:$0xff] }
 0x258   :  { %v718_v61 = vmax.f32 %v694_v30, 0.0  ;;  %v11678_v63 = vpack.c.bf16 %v720_v39, %v719_v42  ;;  %v1967_v30 = vld [vmem:[#allocation13 + $0x78] sm:$0xff]  ;;  %v1958_v39 = vld [vmem:[#allocation13 + $0x30] sm:$0xff] }
 0x259   :  { %v1955_v42 = vld [vmem:[#allocation13 + $0x18] sm:$0xff]  ;;  %v9678_v44 = vcombine.low %v1963_v29, %v1967_v30  ;;  %v9669_v47 = vcombine.high %v1954_v37, %v1958_v39  ;;  %v9668_v41 = vcombine.low %v1954_v37, %v1958_v39 }
 0x25a   :  { %v11671_v36 = vpack.c.bf16 %v718_v61, %v717_v33 }
 0x25c   :  { %1248 = vmatmul.mubr.bf16.gmra.mxu1 %v11671_v36  ;;  %1361 = vmatmul.mubr.bf16.gmra.mxu0 %v11671_v36 }
 0x25d   :  { %1257 = vmatprep.mubr.bf16.mxu1 %v14787_v1  ;;  %1370 = vmatprep.mubr.bf16.mxu0 %v14787_v1 }
 0x264   :  { %1258 = vmatmul.mubr.bf16.gmra.mxu1 %v11678_v63  ;;  %1371 = vmatmul.mubr.bf16.gmra.mxu0 %v11678_v63 }
 0x265   :  { %1413 = vmatprep.mubr.bf16.mxu1 %v14787_v1  ;;  %1526 = vmatprep.mubr.bf16.mxu0 %v14787_v1 }
 0x26c   :  { %1414 = vmatmul.mubr.bf16.vlgmr.msra.gmra.mxu1 %v11607_v19  ;;  %1527 = vmatmul.mubr.bf16.vlgmr.msra.gmra.mxu0 %v11607_v19  ;;  %v9673_v19 = vcombine.high %v1960_v56, %v1964_v52  ;;  %v11736_v56 = vld [vmem:[#allocation14 + $0x5c0] sm:$0xff] }
 0x26d   :  { %1423 = vmatprep.mubr.bf16.mxu1 %v14787_v1  ;;  %1536 = vmatprep.mubr.bf16.mxu0 %v14787_v1  ;;  %v11738_v52 = vld [vmem:[#allocation14 + $0x5e0] sm:$0xff] }
 0x26e   :  { %2153 = vmatpush1.bf16.msra.mxu1 %v9688_v62  ;;  %2266 = vmatpush1.bf16.msra.mxu0 %v9690_v2  ;;  %v1982_v62 = vld [vmem:[#allocation13 + $0xf0] sm:$0xff]  ;;  %v1983_v2 = vld [vmem:[#allocation13 + $0xf8] sm:$0xff] }
 0x26f   :  { %2154 = vmatprep.subr.bf16.mxu1 %v9681_v50  ;;  %2267 = vmatprep.subr.bf16.mxu0 %v9683_v55  ;;  %v9693_v18 = vcombine.high %v1978_v59, %v1982_v62  ;;  %v9695_v20 = vcombine.high %v1979_v0, %v1983_v2  ;;  %v9692_v21 = vcombine.low %v1978_v59, %v1982_v62  ;;  %v11728_v50 = vld [vmem:[#allocation14 + $0x1c0] sm:$0xff] }
 0x270   :  { %v11734_v55 = vld [vmem:[#allocation14 + $0x1e0] sm:$0xff] }
 0x272   :  { %2155 = vmatpush1.bf16.msra.mxu1 %v9680_v15  ;;  %2268 = vmatpush1.bf16.msra.mxu0 %v9682_v5  ;;  %v9785_v15 = vcombine.high %v11728_v50, %v11734_v55  ;;  %v9913_v5 = vcombine.high %v11736_v56, %v11738_v52 }
 0x273   :  { %2156 = vmatprep.subr.bf16.mxu1 %v9673_v19  ;;  %2269 = vmatprep.subr.bf16.mxu0 %v9675_v8 }
 0x274   :  { %1424 = vmatmul.mubr.bf16.gmra.mxu1 %v11614_v40  ;;  %1537 = vmatmul.mubr.bf16.gmra.mxu0 %v11614_v40  ;;  %v1970_v40 = vld [vmem:[#allocation13 + $0x90] sm:$0xff] }
 0x275   :  { %1433 = vmatprep.mubr.bf16.mxu1 %v14787_v1  ;;  %1546 = vmatprep.mubr.bf16.mxu0 %v14787_v1 }
 0x276   :  { %2157 = vmatpush1.bf16.msra.mxu1 %v9672_v13  ;;  %2270 = vmatpush1.bf16.msra.mxu0 %v9674_v58 }
 0x277   :  { %2158 = vmatprep.subr.bf16.mxu1 %v9665_v46  ;;  %2271 = vmatprep.subr.bf16.mxu0 %v9667_v57 }
 0x27a   :  { %2159 = vmatpush1.bf16.msra.mxu1 %v9664_v14  ;;  %2272 = vmatpush1.bf16.msra.mxu0 %v9666_v16  ;;  %v11798_v14 = vld [vmem:[#allocation11] sm:$0xff]  ;;  %v11801_v16 = vsub.s32 3, %v11463_v28 }
 0x27b   :  { %2378 = vmatprep.subr.bf16.mxu1 %v9693_v18  ;;  %2491 = vmatprep.subr.bf16.mxu0 %v9695_v20  ;;  %v11807_v18 = vld [vmem:[#allocation14 + $0x180] sm:$0xff]  ;;  %v11833_v51 = vrot.slane %v11798_v14, %v11469_v32  ;;  %v11851_v37 = vrot.slane %v11798_v14, %v11466_v31 }
 0x27c   :  { %1434 = vmatmul.mubr.bf16.gmra.mxu1 %v11639_v3  ;;  %1547 = vmatmul.mubr.bf16.gmra.mxu0 %v11639_v3  ;;  %v1974_v3 = vld [vmem:[#allocation13 + $0xb0] sm:$0xff]  ;;  %14987 = vst [vmem:[#allocation38_spill] sm:$0xff] %v11801_v16  ;;  %v11809_v20 = vld [vmem:[#allocation14 + $0x1a0] sm:$0xff]  ;;  %v11855_v39 = vrot.slane %v11798_v14, %v11801_v16 }
 0x27d   :  { %1443 = vmatprep.mubr.bf16.mxu1 %v14787_v1  ;;  %1556 = vmatprep.mubr.bf16.mxu0 %v14787_v1  ;;  %v9685_v23 = vcombine.high %v1970_v40, %v1974_v3  ;;  %v9684_v33 = vcombine.low %v1970_v40, %v1974_v3  ;;  %v11811_v40 = vld [vmem:[#allocation14 + $0x580] sm:$0xff] }
 0x27e   :  { %v11905_v32 = vld [vmem:[#allocation14 + $0x60] sm:$0xff] }
 0x284   :  { %1444 = vmatmul.mubr.bf16.gmra.mxu1 %v11646_v6  ;;  %1557 = vmatmul.mubr.bf16.gmra.mxu0 %v11646_v6  ;;  %v1971_v6 = vld [vmem:[#allocation13 + $0x98] sm:$0xff] }
 0x285   :  { %1453 = vmatprep.mubr.bf16.mxu1 %v14787_v1  ;;  %1566 = vmatprep.mubr.bf16.mxu0 %v14787_v1 }
 0x28c   :  { %1454 = vmatmul.mubr.bf16.gmra.mxu1 %v11655_v17  ;;  %1567 = vmatmul.mubr.bf16.gmra.mxu0 %v11655_v17  ;;  %v1975_v17 = vld [vmem:[#allocation13 + $0xb8] sm:$0xff] }
 0x28d   :  { %1463 = vmatprep.mubr.bf16.mxu1 %v14787_v1  ;;  %1576 = vmatprep.mubr.bf16.mxu0 %v14787_v1  ;;  %v9687_v24 = vcombine.high %v1971_v6, %v1975_v17  ;;  %v9686_v61 = vcombine.low %v1971_v6, %v1975_v17  ;;  %v11818_v17 = vld [vmem:[#allocation14 + $0x5a0] sm:$0xff] }
 0x294   :  { %1464 = vmatmul.mubr.bf16.gmra.mxu1 %v11662_v22  ;;  %1577 = vmatmul.mubr.bf16.gmra.mxu0 %v11662_v22  ;;  %v9694_v22 = vcombine.low %v1979_v0, %v1983_v2 }
 0x295   :  { %1473 = vmatprep.mubr.bf16.mxu1 %v14787_v1  ;;  %1586 = vmatprep.mubr.bf16.mxu0 %v14787_v1 }
 0x29c   :  { %1474 = vmatmul.mubr.bf16.gmra.mxu1 %v11671_v36  ;;  %1587 = vmatmul.mubr.bf16.gmra.mxu0 %v11671_v36  ;;  %v9679_v36 = vcombine.high %v1963_v29, %v1967_v30 }
 0x29d   :  { %1483 = vmatprep.mubr.bf16.mxu1 %v14787_v1  ;;  %1596 = vmatprep.mubr.bf16.mxu0 %v14787_v1 }
 0x2a4   :  { %1484 = vmatmul.mubr.bf16.gmra.mxu1 %v11678_v63  ;;  %1597 = vmatmul.mubr.bf16.gmra.mxu0 %v11678_v63  ;;  %v1959_v63 = vld [vmem:[#allocation13 + $0x38] sm:$0xff] }
 0x2a5   :  { %2176 = vmatprep.mubr.bf16.mxu1 %v14787_v1  ;;  %2289 = vmatprep.mubr.bf16.mxu0 %v14787_v1  ;;  %v9671_v48 = vcombine.high %v1955_v42, %v1959_v63  ;;  %v9670_v4 = vcombine.low %v1955_v42, %v1959_v63  ;;  %v11859_v63 = vld [vmem:[#allocation14 + $0xc0] sm:$0xff] }
 0x2a6   :  { %14990 = vst [vmem:[#allocation41_spill] sm:$0xff] %v11859_v63  ;;  %v11921_v42 = vld [vmem:[#allocation14] sm:$0xff] }
 0x2ac   :  { %9696 = vmatmul.mubr.msk.bf16.vlgmr.msra.gmra.mxu1 %vm583_vm0, %v11511_v49  ;;  %9704 = vmatmul.mubr.msk.bf16.vlgmr.msra.gmra.mxu0 %vm583_vm0, %v11511_v49 }
 0x2ad   :  { %2186 = vmatprep.mubr.bf16.mxu1 %v14787_v1  ;;  %2299 = vmatprep.mubr.bf16.mxu0 %v14787_v1 }
 0x2ae   :  { %2379 = vmatpush1.bf16.msra.mxu1 %v9692_v21  ;;  %2492 = vmatpush1.bf16.msra.mxu0 %v9694_v22  ;;  %v11820_v21 = vld [vmem:[#allocation14 + $0x140] sm:$0xff] }
 0x2af   :  { %2380 = vmatprep.subr.bf16.mxu1 %v9685_v23  ;;  %2493 = vmatprep.subr.bf16.mxu0 %v9687_v24  ;;  %v11822_v22 = vld [vmem:[#allocation14 + $0x160] sm:$0xff] }
 0x2b0   :  { %v11825_v23 = vld [vmem:[#allocation14 + $0x540] sm:$0xff] }
 0x2b1   :  { %v11827_v24 = vld [vmem:[#allocation14 + $0x560] sm:$0xff] }
 0x2b2   :  { %2381 = vmatpush1.bf16.msra.mxu1 %v9684_v33  ;;  %2494 = vmatpush1.bf16.msra.mxu0 %v9686_v61  ;;  %v11839_v33 = vld [vmem:[#allocation14 + $0x120] sm:$0xff] }
 0x2b3   :  { %2382 = vmatprep.subr.bf16.mxu1 %v9677_v34  ;;  %2495 = vmatprep.subr.bf16.mxu0 %v9679_v36  ;;  %v11841_v61 = vld [vmem:[#allocation14 + $0x500] sm:$0xff]  ;;  %v11847_v36 = vrot.slane %v11798_v14, %v11472_v35 }
 0x2b4   :  { %9697 = vmatmul.mubr.msk.bf16.gmra.mxu1 %vm583_vm0, %v11515_v53  ;;  %9705 = vmatmul.mubr.msk.bf16.gmra.mxu0 %vm583_vm0, %v11515_v53  ;;  %v11843_v34 = vld [vmem:[#allocation14 + $0x520] sm:$0xff] }
 0x2b5   :  { %2196 = vmatprep.mubr.bf16.mxu1 %v14787_v1  ;;  %2309 = vmatprep.mubr.bf16.mxu0 %v14787_v1  ;;  %v11891_v35 = vld [vmem:[#allocation14 + $0x40] sm:$0xff] }
 0x2b6   :  { %2383 = vmatpush1.bf16.msra.mxu1 %v9676_v7  ;;  %2496 = vmatpush1.bf16.msra.mxu0 %v9678_v44  ;;  %v11752_v19 = vpop.f32.mrf.mxu1  ;;  %v11754_v8 = vpop.f32.mrf.mxu0  ;;  %v11861_v7 = vld [vmem:[#allocation14 + $0xe0] sm:$0xff] }
 0x2b7   :  { %2384 = vmatprep.subr.bf16.mxu1 %v9669_v47  ;;  %2497 = vmatprep.subr.bf16.mxu0 %v9671_v48  ;;  %14991 = vst [vmem:[#allocation42_spill] sm:$0xff] %v11861_v7  ;;  %v11863_v44 = vld [vmem:[#allocation14 + $0x4c0] sm:$0xff]  ;;  %v1303_v25 = vadd.f32 %v11754_v8, %v11847_v36 }
 0x2b8   :  { %v11760_v9 = vpop.f32.mrf.mxu1  ;;  %v11762_v10 = vpop.f32.mrf.mxu0  ;;  %14992 = vst [vmem:[#allocation43_spill] sm:$0xff] %v11863_v44  ;;  %v11951_v48 = vld [vmem:[#allocation14 + $0x7e0] sm:$0xff] }
 0x2b9   :  { %v11953_v44 = vld [vmem:[#allocation14 + $0x380] sm:$0xff] }
 0x2ba   :  { %2385 = vmatpush1.bf16.msra.mxu1 %v9668_v41  ;;  %2498 = vmatpush1.bf16.msra.mxu0 %v9670_v4  ;;  %v11766_v11 = vpop.f32.mrf.mxu1  ;;  %v11768_v12 = vpop.f32.mrf.mxu0  ;;  %v11889_v4 = vld [vmem:[#allocation14 + $0x4a0] sm:$0xff] }
 0x2bb   :  { %5676 = vmatprep.subr.bf16.mxu1 %v9785_v15  ;;  %5717 = vmatprep.subr.bf16.mxu0 %v9913_v5  ;;  %v11873_v15 = vld [vmem:[#allocation14 + $0x4e0] sm:$0xff]  ;;  %14996 = vst [vmem:[#allocation47_spill] sm:$0xff] %v11889_v4 }
 0x2bc   :  { %9698 = vmatmul.mubr.msk.bf16.gmra.mxu1 %vm583_vm0, %v11540_v43  ;;  %9706 = vmatmul.mubr.msk.bf16.gmra.mxu0 %vm583_vm0, %v11540_v43  ;;  %v11774_v13 = vpop.f32.mrf.mxu1  ;;  %v11776_v58 = vpop.f32.mrf.mxu0  ;;  %14993 = vst [vmem:[#allocation44_spill] sm:$0xff] %v11873_v15  ;;  %v11875_v5 = vld [vmem:[#allocation14 + $0x80] sm:$0xff] }
 0x2bd   :  { %2206 = vmatprep.mubr.bf16.mxu1 %v14787_v1  ;;  %2319 = vmatprep.mubr.bf16.mxu0 %v14787_v1  ;;  %v11935_v41 = vld [vmem:[#allocation14 + $0x420] sm:$0xff] }
 0x2be   :  { %v11780_v46 = vpop.f32.mrf.mxu1  ;;  %v11782_v57 = vpop.f32.mrf.mxu0  ;;  %15004 = vst [vmem:[#allocation54_spill] sm:$0xff] %v11935_v41  ;;  %v11949_v15 = vld [vmem:[#allocation14 + $0x7c0] sm:$0xff] }
 0x2bf   :  { %v11967_v4 = vld [vmem:[#allocation14 + $0x3a0] sm:$0xff] }
 0x2c0   :  { %v11788_v59 = vpop.f32.mrf.mxu1  ;;  %v11790_v62 = vpop.f32.mrf.mxu0  ;;  %15009 = vst [vmem:[#allocation59_spill] sm:$0xff] %v11967_v4  ;;  %v11983_v47 = vld [vmem:[#allocation14 + $0x360] sm:$0xff]  ;;  %v15016_v4 = vsub.s32 4, %v11463_v28 }
 0x2c1   :  { %15013 = vst [vmem:[#allocation63_spill] sm:$0xff] %v11983_v47  ;;  %v12015_v43 = vld [vmem:[#allocation14 + $0x700] sm:$0xff]  ;;  %v15020_v47 = vcombine.low %v11728_v50, %v11734_v55  ;;  %v15022_v50 = vcombine.high %v11807_v18, %v11809_v20  ;;  %v15023_v55 = vcombine.high %v11811_v40, %v11818_v17 }
 0x2c2   :  { %v11794_v0 = vpop.f32.mrf.mxu1  ;;  %v11796_v2 = vpop.f32.mrf.mxu0 }
 0x2c4   :  { %9699 = vmatmul.mubr.msk.bf16.gmra.mxu1 %vm583_vm0, %v11545_v54  ;;  %9707 = vmatmul.mubr.msk.bf16.gmra.mxu0 %vm583_vm0, %v11545_v54  ;;  %v11813_v3 = vpop.f32.mrf.mxu1  ;;  %v11815_v6 = vpop.f32.mrf.mxu0  ;;  %v11925_v54 = vld [vmem:[#allocation14 + $0x400] sm:$0xff] }
 0x2c5   :  { %2216 = vmatprep.mubr.bf16.mxu1 %v14787_v1  ;;  %2329 = vmatprep.mubr.bf16.mxu0 %v14787_v1  ;;  %15002 = vst [vmem:[#allocation53_spill] sm:$0xff] %v11925_v54 }
 0x2cc   :  { %9700 = vmatmul.mubr.msk.bf16.gmra.mxu1 %vm583_vm0, %v11565_v26  ;;  %9708 = vmatmul.mubr.msk.bf16.gmra.mxu0 %vm583_vm0, %v11565_v26  ;;  %v11923_v26 = vld [vmem:[#allocation14 + $0x20] sm:$0xff] }
 0x2cd   :  { %2226 = vmatprep.mubr.bf16.mxu1 %v14787_v1  ;;  %2339 = vmatprep.mubr.bf16.mxu0 %v14787_v1  ;;  %15001 = vst [vmem:[#allocation52_spill] sm:$0xff] %v11923_v26  ;;  %v11991_v26 = vld [vmem:[#allocation14 + $0x760] sm:$0xff] }
 0x2ce   :  { %15015 = vst [vmem:[#allocation65_spill] sm:$0xff] %v11991_v26  ;;  %v12049_v26 = vld [vmem:[#allocation14 + $0x6c0] sm:$0xff] }
 0x2d4   :  { %9701 = vmatmul.mubr.msk.bf16.gmra.mxu1 %vm583_vm0, %v11572_v60  ;;  %9709 = vmatmul.mubr.msk.bf16.gmra.mxu0 %vm583_vm0, %v11572_v60  ;;  %v11909_v60 = vld [vmem:[#allocation14 + $0x460] sm:$0xff] }
 0x2d5   :  { %2236 = vmatprep.mubr.bf16.mxu1 %v14787_v1  ;;  %2349 = vmatprep.mubr.bf16.mxu0 %v14787_v1  ;;  %15000 = vst [vmem:[#allocation51_spill] sm:$0xff] %v11909_v60  ;;  %v12017_v60 = vld [vmem:[#allocation14 + $0x720] sm:$0xff] }
 0x2d6   :  { %v11835_v29 = vpop.f32.mrf.mxu1  ;;  %v11837_v30 = vpop.f32.mrf.mxu0 }
 0x2d7   :  { %14988 = vst [vmem:[#allocation39_spill] sm:$0xff] %v11835_v29  ;;  %14989 = vst [vmem:[#allocation40_spill] sm:$0xff] %v11837_v30  ;;  %v11939_v30 = vld [vmem:[#allocation14 + $0x3e0] sm:$0xff] }
 0x2d8   :  { %v11893_v16 = vpop.f32.mrf.mxu1  ;;  %v11895_v31 = vpop.f32.mrf.mxu0  ;;  %15006 = vst [vmem:[#allocation56_spill] sm:$0xff] %v11939_v30  ;;  %v12003_v30 = vld [vmem:[#allocation14 + $0x300] sm:$0xff] }
 0x2d9   :  { %14997 = vst [vmem:[#allocation48_spill] sm:$0xff] %v11893_v16  ;;  %14998 = vst [vmem:[#allocation49_spill] sm:$0xff] %v11895_v31  ;;  %v15003_v31 = vmov 0   ;;  %v11937_v16 = vld [vmem:[#allocation14 + $0x3c0] sm:$0xff] }
 0x2da   :  { %15005 = vst [vmem:[#allocation55_spill] sm:$0xff] %v11937_v16  ;;  %v11955_v7 = vpop.f32.mrf.mxu1  ;;  %v11957_v63 = vpop.f32.mrf.mxu0  ;;  %v12005_v16 = vld [vmem:[#allocation14 + $0x320] sm:$0xff] }
 0x2db   :  { %15007 = vst [vmem:[#allocation57_spill] sm:$0xff] %v11955_v7  ;;  %15008 = vst [vmem:[#allocation58_spill] sm:$0xff] %v11957_v63  ;;  %v11981_v7 = vld [vmem:[#allocation14 + $0x340] sm:$0xff] }
 0x2dc   :  { %9702 = vmatmul.mubr.msk.bf16.gmra.mxu1 %vm583_vm0, %v11592_v45  ;;  %9710 = vmatmul.mubr.msk.bf16.gmra.mxu0 %vm583_vm0, %v11592_v45  ;;  %v11907_v45 = vld [vmem:[#allocation14 + $0x440] sm:$0xff]  ;;  %15012 = vst [vmem:[#allocation62_spill] sm:$0xff] %v11981_v7  ;;  %v12007_v54 = vpop.f32.mrf.mxu1  ;;  %v12009_v29 = vpop.f32.mrf.mxu0 }
 0x2dd   :  { %2246 = vmatprep.mubr.bf16.mxu1 %v14787_v1  ;;  %2359 = vmatprep.mubr.bf16.mxu0 %v14787_v1  ;;  %v11887_v1 = vld [vmem:[#allocation14 + $0x480] sm:$0xff]  ;;  %14999 = vst [vmem:[#allocation50_spill] sm:$0xff] %v11907_v45 }
 0x2de   :  { %14995 = vst [vmem:[#allocation46_spill] sm:$0xff] %v11887_v1  ;;  %v11969_v1 = vld [vmem:[#allocation14 + $0x780] sm:$0xff]  ;;  %v12067_v7 = vpop.f32.mrf.mxu0 }
 0x2df   :  { %15010 = vst [vmem:[#allocation60_spill] sm:$0xff] %v11969_v1  ;;  %v11989_v63 = vld [vmem:[#allocation14 + $0x740] sm:$0xff] }
 0x2e0   :  { %15014 = vst [vmem:[#allocation64_spill] sm:$0xff] %v11989_v63  ;;  %v12031_v1 = vld [vmem:[#allocation14 + $0x2c0] sm:$0xff] }
 0x2e1   :  { %v12033_v45 = vld [vmem:[#allocation14 + $0x2e0] sm:$0xff] }
 0x2e2   :  { %v12051_v63 = vld [vmem:[#allocation14 + $0x6e0] sm:$0xff] }
 0x2e4   :  { %9703 = vmatmul.mubr.msk.bf16.gmra.mxu1 %vm583_vm0, %v11597_v38  ;;  %9711 = vmatmul.mubr.msk.bf16.gmra.mxu0 %vm583_vm0, %v11597_v38  ;;  %v15018_v38 = vsub.s32 6, %v11463_v28 }
 0x2e5   :  { %2402 = vmatprep.mubr.bf16.mxu1 %v15003_v31  ;;  %2515 = vmatprep.mubr.bf16.mxu0 %v15003_v31 }
 0x2e6   :  { %v12045_v41 = vrot.slane %v11798_v14, %v15018_v38  ;;  %v1192_v38 = vadd.f32 %v11760_v9, %v11851_v37  ;;  %v15033_v9 = vcombine.low %v11811_v40, %v11818_v17 }
 0x2e8   :  { %15019 = vst [vmem:[#allocation67_spill] sm:$0xff] %v12045_v41  ;;  %v12065_v41 = vpop.f32.mrf.mxu1 }
 0x2ea   :  { %v12125_v8 = vpop.f32.mrf.mxu1 }
 0x2ec   :  { %9712 = vmatmul.mubr.msk.bf16.vlgmr.msra.gmra.mxu1 %vm583_vm0, %v11511_v49  ;;  %9720 = vmatmul.mubr.msk.bf16.vlgmr.msra.gmra.mxu0 %vm583_vm0, %v11511_v49  ;;  %v12040_v49 = vrot.slane %v11798_v14, %v15016_v4  ;;  %v15021_v4 = vcombine.low %v11736_v56, %v11738_v52  ;;  %v15024_v56 = vsub.s32 5, %v11463_v28 }
 0x2ed   :  { %2412 = vmatprep.mubr.bf16.mxu1 %v15003_v31  ;;  %2525 = vmatprep.mubr.bf16.mxu0 %v15003_v31 }
 0x2ee   :  { %15017 = vst [vmem:[#allocation66_spill] sm:$0xff] %v12040_v49  ;;  %5677 = vmatpush1.bf16.msra.mxu1 %v15020_v47  ;;  %5718 = vmatpush1.bf16.msra.mxu0 %v15021_v4  ;;  %v12078_v52 = vrot.slane %v11798_v14, %v15024_v56  ;;  %v15026_v47 = vsub.s32 7, %v11463_v28  ;;  %v12087_v49 = vld [vmem:[#allocation14 + $0x280] sm:$0xff]  ;;  %v1305_v56 = vadd.f32 %v11762_v10, %v11855_v39  ;;  %v12127_v10 = vpop.f32.mrf.mxu0 }
 0x2ef   :  { %5678 = vmatprep.subr.bf16.mxu1 %v15022_v50  ;;  %5719 = vmatprep.subr.bf16.mxu0 %v15023_v55  ;;  %15028 = vst [vmem:[#allocation70_spill] sm:$0xff] %v12087_v49  ;;  %v12089_v50 = vld [vmem:[#allocation14 + $0x2a0] sm:$0xff]  ;;  %v1190_v55 = vadd.f32 %v11752_v19, %v11833_v51  ;;  %v1307_v19 = vadd.f32 %v11768_v12, %v11847_v36 }
 0x2f0   :  { %15025 = vst [vmem:[#allocation68_spill] sm:$0xff] %v12078_v52  ;;  %v12083_v4 = vrot.slane %v11798_v14, %v15026_v47  ;;  %15029 = vst [vmem:[#allocation71_spill] sm:$0xff] %v12089_v50  ;;  %v12099_v47 = vld [vmem:[#allocation14 + $0x680] sm:$0xff]  ;;  %v1196_v14 = vadd.f32 %v11774_v13, %v11851_v37  ;;  %v15032_v52 = vcombine.low %v11807_v18, %v11809_v20  ;;  %v1608_v20 = vmax.f32 %v1192_v38, 0.0 }
 0x2f1   :  { %15030 = vst [vmem:[#allocation72_spill] sm:$0xff] %v12099_v47  ;;  %v12101_v28 = vld [vmem:[#allocation14 + $0x6a0] sm:$0xff]  ;;  %v1309_v12 = vadd.f32 %v11776_v58, %v11855_v39  ;;  %v15034_v13 = vcombine.high %v11820_v21, %v11822_v22  ;;  %v15035_v18 = vcombine.high %v11825_v23, %v11827_v24  ;;  %v1607_v17 = vmax.f32 %v1190_v55, 0.0 }
 0x2f2   :  { %15027 = vst [vmem:[#allocation69_spill] sm:$0xff] %v12083_v4  ;;  %15031 = vst [vmem:[#allocation73_spill] sm:$0xff] %v12101_v28  ;;  %v1194_v4 = vadd.f32 %v11766_v11, %v11833_v51  ;;  %5679 = vmatpush1.bf16.msra.mxu1 %v15032_v52  ;;  %5720 = vmatpush1.bf16.msra.mxu0 %v15033_v9  ;;  %v1609_v58 = vmax.f32 %v1303_v25, 0.0  ;;  %v1200_v52 = vadd.f32 %v11780_v46, %v11833_v51  ;;  %v12175_v28 = vpop.f32.mrf.mxu0 }
 0x2f3   :  { %5680 = vmatprep.subr.bf16.mxu1 %v15034_v13  ;;  %5721 = vmatprep.subr.bf16.mxu0 %v15035_v18  ;;  %v12147_v13 = vld [vmem:[#allocation14 + $0x240] sm:$0xff]  ;;  %v1617_v55 = vmax.f32 %v1307_v19, 0.0  ;;  %v1313_v25 = vadd.f32 %v11782_v57, %v11847_v36  ;;  %v1610_v46 = vmax.f32 %v1305_v56, 0.0  ;;  %v1616_v11 = vmax.f32 %v1196_v14, 0.0 }
 0x2f4   :  { %9713 = vmatmul.mubr.msk.bf16.gmra.mxu1 %vm583_vm0, %v11515_v53  ;;  %9721 = vmatmul.mubr.msk.bf16.gmra.mxu0 %vm583_vm0, %v11515_v53  ;;  %v12149_v18 = vld [vmem:[#allocation14 + $0x260] sm:$0xff]  ;;  %v1615_v40 = vmax.f32 %v1194_v4, 0.0  ;;  %v1202_v53 = vadd.f32 %v11788_v59, %v11851_v37  ;;  %v1315_v9 = vadd.f32 %v11790_v62, %v11855_v39  ;;  %v15036_v38 = vcombine.low %v11820_v21, %v11822_v22  ;;  %v12173_v62 = vpop.f32.mrf.mxu1 }
 0x2f5   :  { %2422 = vmatprep.mubr.bf16.mxu1 %v15003_v31  ;;  %2535 = vmatprep.mubr.bf16.mxu0 %v15003_v31  ;;  %v15037_v4 = vcombine.low %v11825_v23, %v11827_v24  ;;  %v12165_v57 = vld [vmem:[#allocation14 + $0x640] sm:$0xff]  ;;  %v1618_v56 = vmax.f32 %v1309_v12, 0.0  ;;  %v1204_v14 = vadd.f32 %v11794_v0, %v11833_v51  ;;  %v1317_v59 = vadd.f32 %v11796_v2, %v11847_v36  ;;  %v15056_v23 = vld [vmem:[#allocation32_spill] sm:$0xff] }
 0x2f6   :  { %5681 = vmatpush1.bf16.msra.mxu1 %v15036_v38  ;;  %15038 = vst [vmem:[#allocation74_spill] sm:$0xff] %v12165_v57  ;;  %v12167_v19 = vld [vmem:[#allocation14 + $0x660] sm:$0xff]  ;;  %v15040_v21 = vcombine.high %v11829_v27, %v11839_v33  ;;  %v15041_v22 = vcombine.high %v11841_v61, %v11843_v34  ;;  %v1623_v24 = vmax.f32 %v1200_v52, 0.0  ;;  %v1206_v0 = vadd.f32 %v11813_v3, %v11851_v37 }
 0x2f7   :  { %5722 = vmatpush1.bf16.msra.mxu0 %v15037_v4  ;;  %15039 = vst [vmem:[#allocation75_spill] sm:$0xff] %v12167_v19  ;;  %v1319_v2 = vadd.f32 %v11815_v6, %v11855_v39  ;;  %v12191_v38 = vld [vmem:[#allocation14 + $0x200] sm:$0xff]  ;;  %v1761_v47 = vmax.f32 %v1609_v58, %v1617_v55  ;;  %v1748_v52 = vmax.f32 %v1608_v20, %v1616_v11  ;;  %v1624_v50 = vmax.f32 %v1202_v53, 0.0  ;;  %v12209_v20 = vpop.f32.mrf.mxu1 }
 0x2f8   :  { %5682 = vmatprep.subr.bf16.mxu1 %v15040_v21  ;;  %5723 = vmatprep.subr.bf16.mxu0 %v15041_v22  ;;  %15042 = vst [vmem:[#allocation76_spill] sm:$0xff] %v12191_v38  ;;  %v12193_v4 = vld [vmem:[#allocation14 + $0x220] sm:$0xff]  ;;  %v1735_v21 = vmax.f32 %v1607_v17, %v1615_v40  ;;  %v1625_v22 = vmax.f32 %v1313_v25, 0.0  ;;  %v1626_v49 = vmax.f32 %v1315_v9, 0.0  ;;  %v15044_v3 = vcombine.low %v11829_v27, %v11839_v33  ;;  %v12211_v9 = vpop.f32.mrf.mxu0 }
 0x2f9   :  { %15043 = vst [vmem:[#allocation77_spill] sm:$0xff] %v12193_v4  ;;  %v15045_v6 = vcombine.low %v11841_v61, %v11843_v34  ;;  %v12205_v40 = vld [vmem:[#allocation14 + $0x600] sm:$0xff]  ;;  %v1774_v58 = vmax.f32 %v1610_v46, %v1618_v56  ;;  %v1631_v55 = vmax.f32 %v1204_v14, 0.0  ;;  %v1633_v11 = vmax.f32 %v1317_v59, 0.0  ;;  %v15051_v61 = vld [vmem:[#allocation43_spill] sm:$0xff]  ;;  %v15052_v34 = vld [vmem:[#allocation44_spill] sm:$0xff] }
 0x2fa   :  { %5683 = vmatpush1.bf16.msra.mxu1 %v15044_v3  ;;  %15046 = vst [vmem:[#allocation78_spill] sm:$0xff] %v12205_v40  ;;  %v12207_v17 = vld [vmem:[#allocation14 + $0x620] sm:$0xff]  ;;  %v15053_v53 = vcombine.high %v15051_v61, %v15052_v34  ;;  %v1736_v56 = vmax.f32 %v1735_v21, %v1623_v24  ;;  %v1632_v14 = vmax.f32 %v1206_v0, 0.0  ;;  %v1634_v59 = vmax.f32 %v1319_v2, 0.0 }
 0x2fb   :  { %5724 = vmatpush1.bf16.msra.mxu0 %v15045_v6  ;;  %15047 = vst [vmem:[#allocation79_spill] sm:$0xff] %v12207_v17  ;;  %v15048_v27 = vld [vmem:[#allocation41_spill] sm:$0xff]  ;;  %v15049_v33 = vld [vmem:[#allocation42_spill] sm:$0xff]  ;;  %v12231_v12 = vpop.f32.mrf.mxu1  ;;  %v12233_v3 = vpop.f32.mrf.mxu0  ;;  %v15061_v4 = vcombine.low %v15051_v61, %v15052_v34 }
 0x2fc   :  { %v15050_v25 = vcombine.high %v15048_v27, %v15049_v33  ;;  %5725 = vmatprep.subr.bf16.mxu0 %v15053_v53  ;;  %v12221_v6 = vld [vmem:[#allocation14 + $0x9c0] sm:$0xff]  ;;  %9714 = vmatmul.mubr.msk.bf16.gmra.mxu1 %vm583_vm0, %v15056_v23  ;;  %v1762_v53 = vmax.f32 %v1761_v47, %v1625_v22  ;;  %v1749_v47 = vmax.f32 %v1748_v52, %v1624_v50 }
 0x2fd   :  { %15054 = vst [vmem:[#allocation41_spill] sm:$0xff] %v12221_v6  ;;  %v12223_v46 = vld [vmem:[#allocation14 + $0x9e0] sm:$0xff]  ;;  %9722 = vmatmul.mubr.msk.bf16.gmra.mxu0 %vm583_vm0, %v15056_v23  ;;  %2432 = vmatprep.mubr.bf16.mxu1 %v15003_v31  ;;  %v1775_v22 = vmax.f32 %v1774_v58, %v1626_v49  ;;  %v12261_v38 = vmax.f32 %v1736_v56, %v1631_v55  ;;  %v12291_v24 = vpop.f32.mrf.mxu0 }
 0x2fe   :  { %5684 = vmatprep.subr.bf16.mxu1 %v15050_v25  ;;  %15055 = vst [vmem:[#allocation42_spill] sm:$0xff] %v12223_v46  ;;  %2545 = vmatprep.mubr.bf16.mxu0 %v15003_v31  ;;  %v12241_v2 = vld [vmem:[#allocation14 + $0xdc0] sm:$0xff]  ;;  %v15060_v25 = vcombine.low %v15048_v27, %v15049_v33  ;;  %v12263_v49 = vmax.f32 %v1762_v53, %v1633_v11  ;;  %v15068_v27 = vld [vmem:[#allocation47_spill] sm:$0xff]  ;;  %v12289_v33 = vpop.f32.mrf.mxu1 }
 0x2ff   :  { %15057 = vst [vmem:[#allocation43_spill] sm:$0xff] %v12241_v2  ;;  %v12243_v23 = vld [vmem:[#allocation14 + $0xde0] sm:$0xff]  ;;  %5726 = vmatpush1.bf16.msra.mxu0 %v15061_v4  ;;  %v12279_v55 = vmax.f32 %v1775_v22, %v1634_v59  ;;  %v12351_v6 = vpop.f32.mrf.mxu0 }
 0x300   :  { %15058 = vst [vmem:[#allocation44_spill] sm:$0xff] %v12243_v23  ;;  %v12245_v21 = vld [vmem:[#allocation14 + $0x980] sm:$0xff]  ;;  %5685 = vmatpush1.bf16.msra.mxu1 %v15060_v25  ;;  %v12277_v25 = vmax.f32 %v1749_v47, %v1632_v14 }
 0x301   :  { %15059 = vst [vmem:[#allocation32_spill] sm:$0xff] %v12245_v21  ;;  %v12255_v0 = vld [vmem:[#allocation14 + $0x9a0] sm:$0xff] }
 0x302   :  { %15062 = vst [vmem:[#allocation80_spill] sm:$0xff] %v12255_v0  ;;  %v12257_v17 = vld [vmem:[#allocation14 + $0xd80] sm:$0xff] }
 0x303   :  { %15063 = vst [vmem:[#allocation81_spill] sm:$0xff] %v12257_v17  ;;  %v12259_v40 = vld [vmem:[#allocation14 + $0xda0] sm:$0xff] }
 0x304   :  { %15064 = vst [vmem:[#allocation82_spill] sm:$0xff] %v12259_v40  ;;  %v15065_v50 = vld [vmem:[#allocation45_spill] sm:$0xff]  ;;  %v15067_v58 = vld [vmem:[#allocation46_spill] sm:$0xff] }
 0x305   :  { %v15066_v52 = vcombine.high %v11875_v5, %v15065_v50  ;;  %v15069_v4 = vcombine.high %v15067_v58, %v15068_v27  ;;  %v12273_v61 = vld [vmem:[#allocation14 + $0x940] sm:$0xff]  ;;  %v15078_v2 = vcombine.low %v11875_v5, %v15065_v50  ;;  %v15079_v14 = vcombine.low %v15067_v58, %v15068_v27  ;;  %v15085_v27 = vld [vmem:[#allocation51_spill] sm:$0xff] }
 0x306   :  { %15070 = vst [vmem:[#allocation45_spill] sm:$0xff] %v12273_v61  ;;  %v12275_v34 = vld [vmem:[#allocation14 + $0x960] sm:$0xff]  ;;  %v15083_v50 = vcombine.high %v11891_v35, %v11905_v32  ;;  %v12349_v61 = vpop.f32.mrf.mxu1 }
 0x307   :  { %5686 = vmatprep.subr.bf16.mxu1 %v15066_v52  ;;  %5727 = vmatprep.subr.bf16.mxu0 %v15069_v4  ;;  %15071 = vst [vmem:[#allocation46_spill] sm:$0xff] %v12275_v34  ;;  %v12285_v53 = vld [vmem:[#allocation14 + $0xd40] sm:$0xff]  ;;  %v15073_v52 = vld [vmem:[#allocation39_spill] sm:$0xff] }
 0x308   :  { %15072 = vst [vmem:[#allocation47_spill] sm:$0xff] %v12285_v53  ;;  %v1210_v4 = vadd.f32 %v15073_v52, %v11833_v51  ;;  %v12299_v22 = vld [vmem:[#allocation14 + $0xd60] sm:$0xff]  ;;  %v15077_v52 = vld [vmem:[#allocation40_spill] sm:$0xff]  ;;  %5687 = vmatpush1.bf16.msra.mxu1 %v15078_v2  ;;  %5728 = vmatpush1.bf16.msra.mxu0 %v15079_v14  ;;  %v15094_v53 = vcombine.low %v11891_v35, %v11905_v32 }
 0x309   :  { %15074 = vst [vmem:[#allocation39_spill] sm:$0xff] %v12299_v22  ;;  %v12301_v11 = vld [vmem:[#allocation14 + $0x900] sm:$0xff]  ;;  %v1323_v23 = vadd.f32 %v15077_v52, %v11847_v36  ;;  %v15081_v52 = vld [vmem:[#allocation48_spill] sm:$0xff]  ;;  %5688 = vmatprep.subr.bf16.mxu1 %v15083_v50 }
 0x30a   :  { %15075 = vst [vmem:[#allocation83_spill] sm:$0xff] %v12301_v11  ;;  %v12303_v56 = vld [vmem:[#allocation14 + $0x920] sm:$0xff]  ;;  %v1212_v46 = vadd.f32 %v15081_v52, %v11851_v37  ;;  %v15096_v32 = vld [vmem:[#allocation52_spill] sm:$0xff] }
 0x30b   :  { %15076 = vst [vmem:[#allocation84_spill] sm:$0xff] %v12303_v56  ;;  %v12317_v0 = vld [vmem:[#allocation14 + $0xd00] sm:$0xff]  ;;  %v1641_v50 = vmax.f32 %v1323_v23, 0.0  ;;  %v1216_v23 = vadd.f32 %v12007_v54, %v11851_v37  ;;  %v15097_v35 = vcombine.high %v11921_v42, %v15096_v32 }
 0x30c   :  { %v12319_v21 = vld [vmem:[#allocation14 + $0xd20] sm:$0xff]  ;;  %5689 = vmatpush1.bf16.msra.mxu1 %v15094_v53  ;;  %v1640_v11 = vmax.f32 %v1212_v46, 0.0  ;;  %v1220_v46 = vadd.f32 %v12065_v41, %v11833_v51  ;;  %v1333_v53 = vadd.f32 %v12067_v7, %v11847_v36  ;;  %v1224_v7 = vadd.f32 %v12173_v62, %v11833_v51 }
 0x30d   :  { %15080 = vst [vmem:[#allocation40_spill] sm:$0xff] %v12319_v21  ;;  %v15082_v5 = vld [vmem:[#allocation49_spill] sm:$0xff]  ;;  %v15084_v58 = vld [vmem:[#allocation50_spill] sm:$0xff]  ;;  %5690 = vmatprep.subr.bf16.mxu1 %v15097_v35 }
 0x30e   :  { %v1325_v2 = vadd.f32 %v15082_v5, %v11855_v39  ;;  %v15086_v14 = vcombine.high %v15084_v58, %v15085_v27  ;;  %v12333_v47 = vld [vmem:[#allocation14 + $0x8c0] sm:$0xff]  ;;  %v1655_v21 = vmax.f32 %v1220_v46, 0.0 }
 0x30f   :  { %15087 = vst [vmem:[#allocation48_spill] sm:$0xff] %v12333_v47  ;;  %v12335_v40 = vld [vmem:[#allocation14 + $0x8e0] sm:$0xff] }
 0x310   :  { %5729 = vmatprep.subr.bf16.mxu0 %v15086_v14  ;;  %15088 = vst [vmem:[#allocation49_spill] sm:$0xff] %v12335_v40  ;;  %v15089_v17 = vld [vmem:[#allocation33_spill] sm:$0xff]  ;;  %v1639_v14 = vmax.f32 %v1210_v4, 0.0  ;;  %v1642_v57 = vmax.f32 %v1325_v2, 0.0  ;;  %v15099_v19 = vld [vmem:[#allocation54_spill] sm:$0xff]  ;;  %v12402_v40 = vpop.f32.mrf.mxu0 }
 0x311   :  { %9715 = vmatmul.mubr.msk.bf16.gmra.mxu1 %vm583_vm0, %v15089_v17  ;;  %9723 = vmatmul.mubr.msk.bf16.gmra.mxu0 %vm583_vm0, %v15089_v17  ;;  %v15090_v59 = vld [vmem:[#allocation57_spill] sm:$0xff]  ;;  %v1329_v17 = vadd.f32 %v12009_v29, %v11855_v39  ;;  %v12400_v29 = vpop.f32.mrf.mxu1 }
 0x312   :  { %v1214_v34 = vadd.f32 %v15090_v59, %v11833_v51  ;;  %2442 = vmatprep.mubr.bf16.mxu1 %v15003_v31  ;;  %2555 = vmatprep.mubr.bf16.mxu0 %v15003_v31  ;;  %v12359_v5 = vld [vmem:[#allocation14 + $0xcc0] sm:$0xff]  ;;  %v1777_v41 = vmax.f32 %v12279_v55, %v1642_v57  ;;  %v1352_v46 = vpop.f32.mrf.mxu0  ;;  %v15110_v57 = vcombine.low %v11949_v15, %v11951_v48 }
 0x313   :  { %15091 = vst [vmem:[#allocation50_spill] sm:$0xff] %v12359_v5  ;;  %v12361_v4 = vld [vmem:[#allocation14 + $0xce0] sm:$0xff]  ;;  %v1650_v62 = vmax.f32 %v1329_v17, 0.0  ;;  %v1335_v17 = vadd.f32 %v12127_v10, %v11855_v39  ;;  %v15108_v10 = vcombine.high %v11949_v15, %v11951_v48 }
 0x314   :  { %15092 = vst [vmem:[#allocation51_spill] sm:$0xff] %v12361_v4  ;;  %v15093_v59 = vld [vmem:[#allocation58_spill] sm:$0xff]  ;;  %v15098_v2 = vld [vmem:[#allocation53_spill] sm:$0xff]  ;;  %v1647_v35 = vmax.f32 %v1214_v34, 0.0  ;;  %v15101_v34 = vcombine.low %v11921_v42, %v15096_v32  ;;  %v1648_v4 = vmax.f32 %v1216_v23, 0.0  ;;  %v1337_v23 = vadd.f32 %v12175_v28, %v11847_v36  ;;  %v1239_v32 = vpop.f32.mrf.mxu1 }
 0x315   :  { %v1327_v22 = vadd.f32 %v15093_v59, %v11847_v36  ;;  %v12372_v56 = vld [vmem:[#allocation14 + $0x880] sm:$0xff]  ;;  %v15095_v59 = vcombine.low %v15084_v58, %v15085_v27  ;;  %v15100_v54 = vcombine.high %v15098_v2, %v15099_v19  ;;  %v1764_v58 = vmax.f32 %v12263_v49, %v1641_v50  ;;  %v15103_v49 = vld [vmem:[#allocation55_spill] sm:$0xff] }
 0x316   :  { %v12374_v52 = vld [vmem:[#allocation14 + $0x8a0] sm:$0xff]  ;;  %5691 = vmatpush1.bf16.msra.mxu1 %v15101_v34  ;;  %v15102_v5 = vcombine.low %v15098_v2, %v15099_v19 }
 0x317   :  { %5730 = vmatpush1.bf16.msra.mxu0 %v15095_v59  ;;  %v1738_v59 = vmax.f32 %v12261_v38, %v1639_v14  ;;  %v12408_v47 = vld [vmem:[#allocation14 + $0xca0] sm:$0xff]  ;;  %v1649_v27 = vmax.f32 %v1327_v22, 0.0  ;;  %v1222_v38 = vadd.f32 %v12125_v8, %v11851_v37  ;;  %v1751_v14 = vmax.f32 %v12277_v25, %v1640_v11  ;;  %v15104_v22 = vld [vmem:[#allocation56_spill] sm:$0xff] }
 0x318   :  { %5731 = vmatprep.subr.bf16.mxu0 %v15100_v54  ;;  %v12406_v54 = vld [vmem:[#allocation14 + $0xc80] sm:$0xff]  ;;  %v15105_v50 = vcombine.high %v15103_v49, %v15104_v22  ;;  %v15109_v28 = vcombine.low %v15103_v49, %v15104_v22  ;;  %v15113_v8 = vld [vmem:[#allocation60_spill] sm:$0xff] }
 0x319   :  { %v15106_v42 = vld [vmem:[#allocation34_spill] sm:$0xff]  ;;  %v1739_v11 = vmax.f32 %v1738_v59, %v1647_v35  ;;  %v1663_v59 = vmax.f32 %v1224_v7, 0.0  ;;  %v1752_v35 = vmax.f32 %v1751_v14, %v1648_v4  ;;  %v1778_v7 = vmax.f32 %v1777_v41, %v1650_v62  ;;  %v15114_v49 = vld [vmem:[#allocation61_spill] sm:$0xff] }
 0x31a   :  { %5692 = vmatprep.subr.bf16.mxu1 %v15105_v50  ;;  %9716 = vmatmul.mubr.msk.bf16.gmra.mxu1 %vm583_vm0, %v15106_v42  ;;  %v12436_v25 = vld [vmem:[#allocation14 + $0x840] sm:$0xff]  ;;  %v1765_v50 = vmax.f32 %v1764_v58, %v1649_v27  ;;  %v15111_v58 = vld [vmem:[#allocation59_spill] sm:$0xff]  ;;  %v15115_v22 = vcombine.high %v15113_v8, %v15114_v49  ;;  %v1658_v14 = vmax.f32 %v1335_v17, 0.0  ;;  %v1234_v17 = vadd.f32 %v12349_v61, %v11833_v51 }
 0x31b   :  { %5732 = vmatpush1.bf16.msra.mxu0 %v15102_v5  ;;  %v12438_v55 = vld [vmem:[#allocation14 + $0x860] sm:$0xff]  ;;  %v1657_v5 = vmax.f32 %v1333_v53, 0.0  ;;  %2452 = vmatprep.mubr.bf16.mxu1 %v15003_v31  ;;  %v1226_v53 = vadd.f32 %v12209_v20, %v11851_v37  ;;  %v15112_v27 = vcombine.high %v11953_v44, %v15111_v58  ;;  %v1354_v20 = vpop.f32.mrf.mxu0  ;;  %v1232_v61 = vadd.f32 %v12289_v33, %v11851_v37 }
 0x31c   :  { %9724 = vmatmul.mubr.msk.bf16.gmra.mxu0 %vm583_vm0, %v15106_v42  ;;  %v12446_v2 = vld [vmem:[#allocation14 + $0xc40] sm:$0xff]  ;;  %v1656_v42 = vmax.f32 %v1222_v38, 0.0  ;;  %5733 = vmatprep.subr.bf16.mxu0 %v15108_v10  ;;  %v1740_v10 = vmax.f32 %v1739_v11, %v1655_v21  ;;  %v1230_v11 = vadd.f32 %v12231_v12, %v11833_v51  ;;  %v15119_v12 = vcombine.low %v15113_v8, %v15114_v49 }
 0x31d   :  { %2565 = vmatprep.mubr.bf16.mxu0 %v15003_v31  ;;  %v12448_v34 = vld [vmem:[#allocation14 + $0xc60] sm:$0xff]  ;;  %5693 = vmatpush2.bf16.msra.mxu1 %v15109_v28  ;;  %v1766_v4 = vmax.f32 %v1765_v50, %v1657_v5  ;;  %v1339_v28 = vadd.f32 %v12211_v9, %v11855_v39  ;;  %v1664_v62 = vmax.f32 %v1226_v53, 0.0  ;;  %v1347_v9 = vadd.f32 %v12351_v6, %v11847_v36  ;;  %v15123_v53 = vld [vmem:[#allocation35_spill] sm:$0xff] }
 0x31e   :  { %15107 = vst [vmem:[#allocation33_spill] sm:$0xff] %v12448_v34  ;;  %5694 = vmatprep.subr.bf16.mxu1 %v15112_v27  ;;  %v1241_v27 = vpop.f32.mrf.mxu1  ;;  %v1753_v41 = vmax.f32 %v1752_v35, %v1656_v42  ;;  %v1741_v21 = vmax.f32 %v1740_v10, %v1663_v59  ;;  %v12482_v48 = vld [vmem:[#allocation14 + $0x800] sm:$0xff]  ;;  %v1343_v59 = vadd.f32 %v12233_v3, %v11847_v36  ;;  %v1356_v10 = vpop.f32.mrf.mxu0 }
 0x31f   :  { %5734 = vmatpush2.bf16.msra.mxu0 %v15110_v57  ;;  %v1665_v57 = vmax.f32 %v1337_v23, 0.0  ;;  %15117 = vst [vmem:[#allocation57_spill] sm:$0xff] %v12482_v48  ;;  %v12484_v5 = vld [vmem:[#allocation14 + $0x820] sm:$0xff]  ;;  %v1236_v23 = vadd.f32 %v12400_v29, %v11851_v37  ;;  %v1349_v6 = vadd.f32 %v12402_v40, %v11855_v39  ;;  %v1779_v29 = vmax.f32 %v1778_v7, %v1658_v14 }
 0x320   :  { %5735 = vmatprep.subr.bf16.mxu0 %v15115_v22  ;;  %v15116_v22 = vcombine.low %v11953_v44, %v15111_v58  ;;  %15118 = vst [vmem:[#allocation58_spill] sm:$0xff] %v12484_v5  ;;  %v15120_v50 = vld [vmem:[#allocation62_spill] sm:$0xff]  ;;  %v15121_v44 = vld [vmem:[#allocation63_spill] sm:$0xff]  ;;  %v1666_v35 = vmax.f32 %v1339_v28, 0.0  ;;  %v1243_v58 = vpop.f32.mrf.mxu1  ;;  %v1742_v40 = vrot.slane %v1741_v21, 4  ;;  %v12514_v33 = vmax.f32 %v1753_v41, %v1664_v62  ;;  %v15125_v14 = vld [vmem:[#allocation65_spill] sm:$0xff] }
 0x321   :  { %v15122_v42 = vcombine.high %v15120_v50, %v15121_v44  ;;  %v12508_v8 = vmax.f32 %v1766_v4, %v1665_v57  ;;  %v1345_v49 = vadd.f32 %v12291_v24, %v11855_v39  ;;  %v1240_v7 = vadd.f32 %v1239_v32, %v11833_v51  ;;  %v15124_v4 = vld [vmem:[#allocation64_spill] sm:$0xff] }
 0x322   :  { %5695 = vmatpush2.bf16.msra.mxu1 %v15116_v22  ;;  %v15126_v57 = vcombine.high %v15124_v4, %v15125_v14  ;;  %v15127_v28 = vcombine.low %v15120_v50, %v15121_v44  ;;  %v1679_v22 = vmax.f32 %v1234_v17, 0.0  ;;  %v15128_v41 = vcombine.low %v15124_v4, %v15125_v14  ;;  %v1245_v44 = vpop.f32.mrf.mxu1  ;;  %v1358_v4 = vpop.f32.mrf.mxu0 }
 0x323   :  { %5736 = vmatpush2.bf16.msra.mxu0 %v15119_v12  ;;  %5696 = vmatprep.subr.bf16.mxu1 %v15122_v42  ;;  %v1681_v12 = vmax.f32 %v1347_v9, 0.0  ;;  %v1680_v42 = vmax.f32 %v1236_v23, 0.0  ;;  %v15129_v24 = vcombine.high %v12003_v30, %v12005_v16  ;;  %v1671_v32 = vmax.f32 %v1230_v11, 0.0 }
 0x324   :  { %9717 = vmatmul.mubr.msk.bf16.gmra.mxu1 %vm583_vm0, %v15123_v53  ;;  %9725 = vmatmul.mubr.msk.bf16.gmra.mxu0 %vm583_vm0, %v15123_v53  ;;  %v1353_v53 = vadd.f32 %v1352_v46, %v11847_v36  ;;  %v1673_v62 = vmax.f32 %v1343_v59, 0.0  ;;  %v1682_v3 = vmax.f32 %v1349_v6, 0.0  ;;  %v15130_v50 = vcombine.high %v12015_v43, %v12017_v60 }
 0x325   :  { %2462 = vmatprep.mubr.bf16.mxu1 %v15003_v31  ;;  %2575 = vmatprep.mubr.bf16.mxu0 %v15003_v31  ;;  %v1242_v17 = vadd.f32 %v1241_v27, %v11851_v37  ;;  %v1355_v46 = vadd.f32 %v1354_v20, %v11855_v39  ;;  %v1244_v9 = vadd.f32 %v1243_v58, %v11833_v51  ;;  %v1674_v59 = vmax.f32 %v1345_v49, 0.0  ;;  %v15134_v49 = vld [vmem:[#allocation36_spill] sm:$0xff] }
 0x326   :  { %5737 = vmatprep.subr.bf16.mxu0 %v15126_v57  ;;  %5697 = vmatpush2.bf16.msra.mxu1 %v15127_v28  ;;  %v1672_v57 = vmax.f32 %v1232_v61, 0.0  ;;  %v1357_v23 = vadd.f32 %v1356_v10, %v11847_v36  ;;  %v12539_v14 = vmax.f32 %v1741_v21, %v1742_v40  ;;  %v12541_v11 = vmax.f32 %v1779_v29, %v1666_v35  ;;  %v1362_v40 = vpop.f32.mrf.mxu0 }
 0x327   :  { %5738 = vmatpush2.bf16.msra.mxu0 %v15128_v41  ;;  %5698 = vmatprep.subr.bf16.mxu1 %v15129_v24  ;;  %v1687_v61 = vmax.f32 %v1240_v7, 0.0  ;;  %v15131_v6 = vcombine.low %v12003_v30, %v12005_v16  ;;  %v1839_v28 = vmax.f32 %v1671_v32, %v1679_v22  ;;  %v1865_v27 = vmax.f32 %v1673_v62, %v1681_v12  ;;  %v1249_v30 = vpop.f32.mrf.mxu1 }
 0x328   :  { %5739 = vmatprep.subr.bf16.mxu0 %v15130_v50  ;;  %v1852_v41 = vmax.f32 %v1672_v57, %v1680_v42  ;;  %v1689_v20 = vmax.f32 %v1353_v53, 0.0  ;;  %v15132_v58 = vcombine.low %v12015_v43, %v12017_v60  ;;  %v15133_v21 = vcombine.high %v12031_v1, %v12033_v45  ;;  %v1364_v24 = vpop.f32.mrf.mxu0 }
 0x329   :  { %v1768_v29 = vrot.slane %v12508_v8, 4  ;;  %v1878_v35 = vmax.f32 %v1674_v59, %v1682_v3  ;;  %v1246_v10 = vadd.f32 %v1245_v44, %v11851_v37  ;;  %v1359_v16 = vadd.f32 %v1358_v4, %v11855_v39  ;;  %v1251_v53 = vpop.f32.mrf.mxu1 }
 0x32a   :  { %5699 = vmatpush2.bf16.msra.mxu1 %v15131_v6  ;;  %v1688_v43 = vmax.f32 %v1242_v17, 0.0  ;;  %v1690_v60 = vmax.f32 %v1355_v46, 0.0  ;;  %v1695_v7 = vmax.f32 %v1244_v9, 0.0  ;;  %v1697_v22 = vmax.f32 %v1357_v23, 0.0  ;;  %v15138_v46 = vld [vmem:[#allocation70_spill] sm:$0xff]  ;;  %v15139_v9 = vld [vmem:[#allocation71_spill] sm:$0xff] }
 0x32b   :  { %5740 = vmatpush2.bf16.msra.mxu0 %v15132_v58  ;;  %5700 = vmatprep.subr.bf16.mxu1 %v15133_v21  ;;  %v1840_v3 = vmax.f32 %v1839_v28, %v1687_v61  ;;  %v1250_v12 = vadd.f32 %v1249_v30, %v11833_v51  ;;  %v1363_v42 = vadd.f32 %v1362_v40, %v11847_v36  ;;  %v1755_v4 = vrot.slane %v12514_v33, 4  ;;  %v1253_v59 = vpop.f32.mrf.mxu1  ;;  %v1366_v61 = vpop.f32.mrf.mxu0  ;;  %v15141_v6 = vld [vmem:[#allocation72_spill] sm:$0xff]  ;;  %v15142_v28 = vld [vmem:[#allocation73_spill] sm:$0xff] }
 0x32c   :  { %9718 = vmatmul.mubr.msk.bf16.gmra.mxu1 %vm583_vm0, %v15134_v49  ;;  %9726 = vmatmul.mubr.msk.bf16.gmra.mxu0 %vm583_vm0, %v15134_v49  ;;  %v15135_v32 = vcombine.high %v12049_v26, %v12051_v63  ;;  %v15136_v62 = vcombine.low %v12031_v1, %v12033_v45  ;;  %v1866_v57 = vmax.f32 %v1865_v27, %v1689_v20  ;;  %v1696_v1 = vmax.f32 %v1246_v10, 0.0 }
 0x32d   :  { %2472 = vmatprep.mubr.bf16.mxu1 %v15003_v31  ;;  %2585 = vmatprep.mubr.bf16.mxu0 %v15003_v31  ;;  %v1252_v50 = vadd.f32 %v1251_v53, %v11851_v37  ;;  %v1365_v31 = vadd.f32 %v1364_v24, %v11855_v39  ;;  %v15137_v17 = vcombine.low %v12049_v26, %v12051_v63  ;;  %v1698_v45 = vmax.f32 %v1359_v16, 0.0  ;;  %v1368_v49 = vpop.f32.mrf.mxu0 }
 0x32e   :  { %5741 = vmatprep.subr.bf16.mxu0 %v15135_v32  ;;  %5701 = vmatpush2.bf16.msra.mxu1 %v15136_v62  ;;  %v15140_v23 = vcombine.high %v15138_v46, %v15139_v9  ;;  %v12578_v44 = vmax.f32 %v12508_v8, %v1768_v29  ;;  %v15143_v27 = vcombine.high %v15141_v6, %v15142_v28  ;;  %v1703_v21 = vmax.f32 %v1250_v12, 0.0  ;;  %v1255_v29 = vpop.f32.mrf.mxu1 }
 0x32f   :  { %5742 = vmatpush2.bf16.msra.mxu0 %v15137_v17  ;;  %v1853_v20 = vmax.f32 %v1852_v41, %v1688_v43  ;;  %v1879_v26 = vmax.f32 %v1878_v35, %v1690_v60  ;;  %v1841_v63 = vmax.f32 %v1840_v3, %v1695_v7  ;;  %v1867_v58 = vmax.f32 %v1866_v57, %v1697_v22  ;;  %v1372_v12 = vpop.f32.mrf.mxu0  ;;  %v15148_v17 = vld [vmem:[#allocation74_spill] sm:$0xff] }
 0x330   :  { %5702 = vmatprep.subr.bf16.mxu1 %v15140_v23  ;;  %5743 = vmatprep.subr.bf16.mxu0 %v15143_v27  ;;  %v1705_v30 = vmax.f32 %v1363_v42, 0.0  ;;  %v1254_v40 = vadd.f32 %v1253_v59, %v11833_v51  ;;  %v1367_v8 = vadd.f32 %v1366_v61, %v11847_v36  ;;  %v15144_v10 = vcombine.low %v15138_v46, %v15139_v9  ;;  %v1259_v3 = vpop.f32.mrf.mxu1  ;;  %v15146_v42 = vld [vmem:[#allocation37_spill] sm:$0xff]  ;;  %v15149_v46 = vld [vmem:[#allocation75_spill] sm:$0xff] }
 0x331   :  { %v1704_v16 = vmax.f32 %v1252_v50, 0.0  ;;  %v1706_v53 = vmax.f32 %v1365_v31, 0.0  ;;  %v1256_v24 = vadd.f32 %v1255_v29, %v11851_v37  ;;  %v1369_v41 = vadd.f32 %v1368_v49, %v11855_v39  ;;  %v15156_v49 = vld [vmem:[#allocation78_spill] sm:$0xff] }
 0x332   :  { %5703 = vmatpush2.bf16.msra.mxu1 %v15144_v10  ;;  %v15145_v35 = vcombine.low %v15141_v6, %v15142_v28  ;;  %v1854_v43 = vmax.f32 %v1853_v20, %v1696_v1  ;;  %v1880_v60 = vmax.f32 %v1879_v26, %v1698_v45  ;;  %v1711_v7 = vmax.f32 %v1254_v40, 0.0  ;;  %v1261_v61 = vpop.f32.mrf.mxu1  ;;  %v1374_v6 = vpop.f32.mrf.mxu0  ;;  %v15157_v10 = vld [vmem:[#allocation79_spill] sm:$0xff] }
 0x333   :  { %v1713_v22 = vmax.f32 %v1367_v8, 0.0  ;;  %v1712_v32 = vmax.f32 %v1256_v24, 0.0  ;;  %v1714_v62 = vmax.f32 %v1369_v41, 0.0  ;;  %v1260_v57 = vadd.f32 %v1259_v3, %v11833_v51 }
 0x334   :  { %5744 = vmatpush2.bf16.msra.mxu0 %v15145_v35  ;;  %9719 = vmatmul.mubr.msk.bf16.gmra.mxu1 %vm583_vm0, %v15146_v42  ;;  %v1373_v50 = vadd.f32 %v1372_v12, %v11847_v36  ;;  %v15147_v31 = vcombine.high %v12147_v13, %v12149_v18  ;;  %v15150_v9 = vcombine.high %v15148_v17, %v15149_v46  ;;  %v1781_v1 = vrot.slane %v12541_v11, 4 }
 0x335   :  { %9727 = vmatmul.mubr.msk.bf16.gmra.mxu0 %vm583_vm0, %v15146_v42  ;;  %v12607_v23 = vmax.f32 %v12514_v33, %v1755_v4  ;;  %v1842_v45 = vmax.f32 %v1841_v63, %v1703_v21  ;;  %v1868_v59 = vmax.f32 %v1867_v58, %v1705_v30  ;;  %v15151_v28 = vcombine.low %v12147_v13, %v12149_v18  ;;  %v15153_v33 = vld [vmem:[#allocation76_spill] sm:$0xff]  ;;  %v15154_v4 = vld [vmem:[#allocation77_spill] sm:$0xff]  ;;  %v1263_v13 = vpop.f32.mrf.mxu1  ;;  %v1376_v18 = vpop.f32.mrf.mxu0 }
 0x336   :  { %5704 = vmatprep.subr.bf16.mxu1 %v15147_v31  ;;  %5745 = vmatprep.subr.bf16.mxu0 %v15150_v9  ;;  %v1855_v27 = vmax.f32 %v1854_v43, %v1704_v16  ;;  %v1881_v20 = vmax.f32 %v1880_v60, %v1706_v53  ;;  %v1719_v26 = vmax.f32 %v1260_v57, 0.0  ;;  %v1721_v40 = vmax.f32 %v1373_v50, 0.0  ;;  %v12639_v9 = vld [vmem:[#allocation14 + $0xc20] sm:$0xff] }
 0x337   :  { %5705 = vmatpush2.bf16.msra.mxu1 %v15151_v28  ;;  %v15152_v8 = vcombine.low %v15148_v17, %v15149_v46  ;;  %v15155_v29 = vcombine.high %v15153_v33, %v15154_v4  ;;  %v1843_v63 = vmax.f32 %v1842_v45, %v1711_v7  ;;  %v1869_v58 = vmax.f32 %v1868_v59, %v1713_v22  ;;  %v1265_v3 = vpop.f32.mrf.mxu1  ;;  %v1378_v12 = vpop.f32.mrf.mxu0  ;;  %v12637_v46 = vld [vmem:[#allocation14 + $0xc00] sm:$0xff]  ;;  %v15167_v28 = vld [vmem:[#allocation44_spill] sm:$0xff] }
 0x338   :  { %v1262_v21 = vadd.f32 %v1261_v61, %v11851_v37  ;;  %v1375_v30 = vadd.f32 %v1374_v6, %v11855_v39  ;;  %v15158_v16 = vcombine.high %v15156_v49, %v15157_v10  ;;  %v1856_v53 = vmax.f32 %v1855_v27, %v1712_v32  ;;  %15164 = vst [vmem:[#allocation52_spill] sm:$0xff] %v12637_v46 }
 0x339   :  { %5746 = vmatpush2.bf16.msra.mxu0 %v15152_v8  ;;  %5706 = vmatprep.subr.bf16.mxu1 %v15155_v29  ;;  %v1882_v24 = vmax.f32 %v1881_v20, %v1714_v62  ;;  %v1264_v41 = vadd.f32 %v1263_v13, %v11833_v51  ;;  %v1377_v35 = vadd.f32 %v1376_v18, %v11847_v36  ;;  %v15161_v36 = vld [vmem:[#allocation41_spill] sm:$0xff]  ;;  %v15162_v62 = vld [vmem:[#allocation42_spill] sm:$0xff]  ;;  %v12642_v6 = vpop.f32.mrf.mxu1  ;;  %v1770_v29 = vrot.slane %v12578_v44, 2 }
 0x33a   :  { %5747 = vmatprep.subr.bf16.mxu0 %v15158_v16  ;;  %v1844_v43 = vmax.f32 %v1843_v63, %v1719_v26  ;;  %v1870_v60 = vmax.f32 %v1869_v58, %v1721_v40  ;;  %v1720_v7 = vmax.f32 %v1262_v21, 0.0  ;;  %v1722_v22 = vmax.f32 %v1375_v30, 0.0  ;;  %15165 = vst [vmem:[#allocation53_spill] sm:$0xff] %v12639_v9  ;;  %v12664_v16 = vld [vmem:[#allocation14 + $0xfc0] sm:$0xff] }
 0x33b   :  { %v15159_v42 = vcombine.low %v15153_v33, %v15154_v4  ;;  %v1727_v57 = vmax.f32 %v1264_v41, 0.0  ;;  %v1729_v50 = vmax.f32 %v1377_v35, 0.0  ;;  %v1266_v31 = vadd.f32 %v1265_v3, %v11851_v37  ;;  %v12644_v37 = vpop.f32.mrf.mxu0  ;;  %v12651_v4 = vld [vmem:[#allocation14 + $0xbc0] sm:$0xff]  ;;  %v12658_v58 = vpop.f32.mrf.mxu1  ;;  %15171 = vst [vmem:[#allocation56_spill] sm:$0xff] %v12664_v16 }
 0x33c   :  { %v1379_v32 = vadd.f32 %v1378_v12, %v11855_v39  ;;  %v15160_v51 = vcombine.low %v15156_v49, %v15157_v10  ;;  %v15163_v17 = vcombine.high %v15161_v36, %v15162_v62  ;;  %v1782_v45 = vmax.f32 %v12541_v11, %v1781_v1  ;;  %v15166_v39 = vld [vmem:[#allocation43_spill] sm:$0xff]  ;;  %15169 = vst [vmem:[#allocation54_spill] sm:$0xff] %v12651_v4  ;;  %v12653_v11 = vld [vmem:[#allocation14 + $0xbe0] sm:$0xff] }
 0x33d   :  { %5707 = vmatpush2.bf16.msra.mxu1 %v15159_v42  ;;  %v1857_v59 = vmax.f32 %v1856_v53, %v1720_v7  ;;  %v1883_v61 = vmax.f32 %v1882_v24, %v1722_v22  ;;  %v15168_v27 = vcombine.high %v15166_v39, %v15167_v28  ;;  %v1845_v26 = vmax.f32 %v1844_v43, %v1727_v57  ;;  %v12660_v21 = vpop.f32.mrf.mxu0  ;;  %v12666_v53 = vld [vmem:[#allocation14 + $0xfe0] sm:$0xff]  ;;  %v1419_v41 = vpop.f32.mrf.mxu1 }
 0x33e   :  { %5748 = vmatpush2.bf16.msra.mxu0 %v15160_v51  ;;  %5758 = vmatprep.subr.bf16.mxu1 %v15163_v17  ;;  %v1871_v40 = vmax.f32 %v1870_v60, %v1729_v50  ;;  %v1728_v8 = vmax.f32 %v1266_v31, 0.0  ;;  %v1730_v33 = vmax.f32 %v1379_v32, 0.0  ;;  %15170 = vst [vmem:[#allocation55_spill] sm:$0xff] %v12653_v11  ;;  %v1744_v1 = vrot.slane %v12539_v14, 2  ;;  %15172 = vst [vmem:[#allocation34_spill] sm:$0xff] %v12666_v53  ;;  %v12674_v22 = vld [vmem:[#allocation14 + $0xb80] sm:$0xff] }
 0x33f   :  { %5799 = vmatprep.subr.bf16.mxu0 %v15168_v27  ;;  %v1757_v63 = vrot.slane %v12607_v23, 2  ;;  %v1846_v13 = vrot.slane %v1845_v26, 4  ;;  %v1783_v24 = vrot.slane %v1782_v45, 2  ;;  %v1532_v35 = vpop.f32.mrf.mxu0  ;;  %15173 = vst [vmem:[#allocation59_spill] sm:$0xff] %v12674_v22  ;;  %v12676_v50 = vld [vmem:[#allocation14 + $0xba0] sm:$0xff]  ;;  %v1771_v17 = vmax.f32 %v12578_v44, %v1770_v29 }
 0x340   :  { %v1872_v18 = vrot.slane %v1871_v40, 4  ;;  %v1858_v49 = vmax.f32 %v1857_v59, %v1728_v8  ;;  %v1884_v10 = vmax.f32 %v1883_v61, %v1730_v33  ;;  %15174 = vst [vmem:[#allocation60_spill] sm:$0xff] %v12676_v50  ;;  %v12678_v31 = vld [vmem:[#allocation14 + $0xf80] sm:$0xff]  ;;  %v1745_v51 = vmax.f32 %v12539_v14, %v1744_v1  ;;  %v1421_v61 = vpop.f32.mrf.mxu1 }
 0x341   :  { %v1847_v3 = vmax.f32 %v1845_v26, %v1846_v13  ;;  %15175 = vst [vmem:[#allocation61_spill] sm:$0xff] %v12678_v31  ;;  %v12680_v32 = vld [vmem:[#allocation14 + $0xfa0] sm:$0xff]  ;;  %v1758_v59 = vmax.f32 %v12607_v23, %v1757_v63  ;;  %v1534_v27 = vpop.f32.mrf.mxu0  ;;  %v1772_v14 = vrot.slane %v1771_v17, 1  ;;  %v15182_v23 = vld [vmem:[#allocation67_spill] sm:$0xff] }
 0x342   :  { %v1873_v12 = vmax.f32 %v1871_v40, %v1872_v18  ;;  %v1859_v42 = vrot.slane %v1858_v49, 4  ;;  %v1885_v57 = vrot.slane %v1884_v10, 4  ;;  %15176 = vst [vmem:[#allocation62_spill] sm:$0xff] %v12680_v32  ;;  %v12687_v18 = vld [vmem:[#allocation14 + $0xb40] sm:$0xff]  ;;  %v1425_v7 = vpop.f32.mrf.mxu1  ;;  %v1746_v26 = vrot.slane %v1745_v51, 1 }
 0x343   :  { %v1848_v40 = vrot.slane %v1847_v3, 2  ;;  %15177 = vst [vmem:[#allocation63_spill] sm:$0xff] %v12687_v18  ;;  %v12689_v60 = vld [vmem:[#allocation14 + $0xb60] sm:$0xff]  ;;  %v1538_v30 = vpop.f32.mrf.mxu0  ;;  %v1759_v1 = vrot.slane %v1758_v59, 1  ;;  %v1533_v53 = vadd.f32 %v1532_v35, %v15182_v23  ;;  %v1773_v38 = vmax.f32 %v1771_v17, %v1772_v14 }
 0x344   :  { %v1874_v8 = vrot.slane %v1873_v12, 2  ;;  %v1860_v33 = vmax.f32 %v1858_v49, %v1859_v42  ;;  %v1886_v13 = vmax.f32 %v1884_v10, %v1885_v57  ;;  %15178 = vst [vmem:[#allocation35_spill] sm:$0xff] %v12689_v60  ;;  %v12699_v29 = vld [vmem:[#allocation14 + $0xf40] sm:$0xff]  ;;  %v1784_v49 = vmax.f32 %v1782_v45, %v1783_v24  ;;  %v1427_v43 = vpop.f32.mrf.mxu1 }
 0x345   :  { %15179 = vst [vmem:[#allocation64_spill] sm:$0xff] %v12699_v29  ;;  %v12701_v63 = vld [vmem:[#allocation14 + $0xf60] sm:$0xff]  ;;  %v1849_v10 = vmax.f32 %v1847_v3, %v1848_v40  ;;  %v1540_v20 = vpop.f32.mrf.mxu0  ;;  %v1747_v16 = vmax.f32 %v1745_v51, %v1746_v26  ;;  %v1529_v22 = vadd.f32 %v12644_v37, %v15182_v23  ;;  %v1621_v14 = vmax.f32 %v1533_v53, 0.0 }
 0x346   :  { %15180 = vst [vmem:[#allocation65_spill] sm:$0xff] %v12701_v63  ;;  %v1861_v42 = vrot.slane %v1860_v33, 2  ;;  %v1887_v57 = vrot.slane %v1886_v13, 2  ;;  %v1875_v15 = vmax.f32 %v1873_v12, %v1874_v8  ;;  %v1429_v19 = vpop.f32.mrf.mxu1  ;;  %v1785_v44 = vrot.slane %v1784_v49, 1  ;;  %v15181_v32 = vld [vmem:[#allocation66_spill] sm:$0xff]  ;;  %v15183_v12 = vld [vmem:[#allocation68_spill] sm:$0xff] }
 0x347   :  { %v1850_v24 = vrot.slane %v1849_v10, 1  ;;  %v1542_v50 = vpop.f32.mrf.mxu0  ;;  %v1420_v31 = vadd.f32 %v1419_v41, %v15181_v32  ;;  %v1422_v8 = vadd.f32 %v1421_v61, %v15183_v12  ;;  %v1416_v45 = vadd.f32 %v12642_v6, %v15181_v32  ;;  %v15184_v60 = vld [vmem:[#allocation69_spill] sm:$0xff] }
 0x348   :  { %v1862_v3 = vmax.f32 %v1860_v33, %v1861_v42  ;;  %v1888_v40 = vmax.f32 %v1886_v13, %v1887_v57  ;;  %v1535_v33 = vadd.f32 %v1534_v27, %v15184_v60  ;;  %v1431_v13 = vpop.f32.mrf.mxu1  ;;  %v1760_v57 = vmax.f32 %v1758_v59, %v1759_v1 }
 0x349   :  { %v1544_v42 = vpop.f32.mrf.mxu0  ;;  %v1876_v18 = vrot.slane %v1875_v15, 1  ;;  %v1418_v41 = vadd.f32 %v12658_v58, %v15183_v12  ;;  %v1851_v35 = vmax.f32 %v1849_v10, %v1850_v24  ;;  %v1531_v51 = vadd.f32 %v12660_v21, %v15184_v60 }
 0x34a   :  { %v1863_v63 = vrot.slane %v1862_v3, 1  ;;  %v1889_v61 = vrot.slane %v1888_v40, 1  ;;  %v1435_v17 = vpop.f32.mrf.mxu1  ;;  %v1786_v26 = vmax.f32 %v1784_v49, %v1785_v44  ;;  %v1619_v27 = vmax.f32 %v1420_v31, 0.0 }
 0x34b   :  { %v1548_v6 = vpop.f32.mrf.mxu0  ;;  %v1620_v29 = vmax.f32 %v1422_v8, 0.0  ;;  %v1611_v59 = vmax.f32 %v1416_v45, 0.0  ;;  %v1622_v1 = vmax.f32 %v1535_v33, 0.0  ;;  %v1426_v11 = vadd.f32 %v1425_v7, %v15181_v32 }
 0x34c   :  { %v1539_v37 = vadd.f32 %v1538_v30, %v15182_v23  ;;  %v1437_v4 = vpop.f32.mrf.mxu1  ;;  %v1877_v10 = vmax.f32 %v1875_v15, %v1876_v18  ;;  %v1613_v24 = vmax.f32 %v1529_v22, 0.0  ;;  %v1612_v9 = vmax.f32 %v1418_v41, 0.0 }
 0x34d   :  { %v1550_v58 = vpop.f32.mrf.mxu0  ;;  %v1428_v46 = vadd.f32 %v1427_v43, %v15183_v12  ;;  %v1944_v21 = vsel %vm1943_vm1, %v1747_v16, %v1851_v35  ;;  %v1864_v5 = vmax.f32 %v1862_v3, %v1863_v63  ;;  %v1890_v44 = vmax.f32 %v1888_v40, %v1889_v61 }
 0x34e   :  { %v1614_v31 = vmax.f32 %v1531_v51, 0.0  ;;  %v1439_v53 = vpop.f32.mrf.mxu1  ;;  %v1787_v45 = vmax.f32 %v1611_v59, %v1619_v27  ;;  %v1813_v8 = vmax.f32 %v1613_v24, %v1621_v14  ;;  %v1800_v33 = vmax.f32 %v1612_v9, %v1620_v29 }
 0x34f   :  { %v1552_v49 = vpop.f32.mrf.mxu0  ;;  %v1541_v7 = vadd.f32 %v1540_v20, %v15184_v60  ;;  %v1627_v48 = vmax.f32 %v1426_v11, 0.0  ;;  %v1629_v34 = vmax.f32 %v1539_v37, 0.0  ;;  %v1430_v15 = vadd.f32 %v1429_v19, %v15181_v32 }
 0x350   :  { %v1826_v30 = vmax.f32 %v1614_v31, %v1622_v1  ;;  %v1441_v22 = vpop.f32.mrf.mxu1  ;;  %v12731_v43 = vpack.c.bf16 %v1944_v21, %v1944_v21  ;;  %v1946_v16 = vsel %vm1943_vm1, %v1773_v38, %v1877_v10  ;;  %v1628_v63 = vmax.f32 %v1428_v46, 0.0 }
 0x351   :  { %v1554_v18 = vpop.f32.mrf.mxu0  ;;  %v1543_v3 = vadd.f32 %v1542_v50, %v15182_v23  ;;  %v1432_v40 = vadd.f32 %v1431_v13, %v15183_v12  ;;  %v1545_v9 = vadd.f32 %v1544_v42, %v15184_v60  ;;  %v1945_v20 = vsel %vm1943_vm1, %v1760_v57, %v1864_v5 }
 0x352   :  { %v1947_v11 = vsel %vm1943_vm1, %v1786_v26, %v1890_v44  ;;  %v1445_v29 = vpop.f32.mrf.mxu1  ;;  %v1630_v19 = vmax.f32 %v1541_v7, 0.0  ;;  %v1436_v35 = vadd.f32 %v1435_v17, %v15181_v32  ;;  %v12740_v61 = vpack.c.bf16 %v1945_v20, %v1945_v20 }
 0x353   :  { %v1558_v41 = vpop.f32.mrf.mxu0  ;;  %v12742_v51 = vpack.c.bf16 %v1947_v11, %v1947_v11  ;;  %v12744_v38 = vpack.c.bf16 %v1946_v16, %v1946_v16  ;;  %v1788_v46 = vmax.f32 %v1787_v45, %v1627_v48  ;;  %v1635_v50 = vmax.f32 %v1430_v15, 0.0 }
 0x354   :  { %v1549_v13 = vadd.f32 %v1548_v6, %v15182_v23  ;;  %v1447_v42 = vpop.f32.mrf.mxu1  ;;  %v1814_v5 = vmax.f32 %v1813_v8, %v1629_v34  ;;  %v1801_v57 = vmax.f32 %v1800_v33, %v1628_v63  ;;  %v1637_v26 = vmax.f32 %v1543_v3, 0.0  ;;  %5708 = vmatprep.mubr.bf16.mxu1 %v12740_v61  ;;  %v15187_v8 = vld [vmem:[#allocation32_spill] sm:$0xff] }
 0x355   :  { %v1560_v27 = vpop.f32.mrf.mxu0  ;;  %v1438_v14 = vadd.f32 %v1437_v4, %v15183_v12  ;;  %5749 = vmatprep.mubr.bf16.mxu0 %v12742_v51  ;;  %v1636_v17 = vmax.f32 %v1432_v40, 0.0  ;;  %v1638_v59 = vmax.f32 %v1545_v9, 0.0  ;;  %v1551_v1 = vadd.f32 %v1550_v58, %v15184_v60  ;;  %5709 = vmatmul.mubr.bf16.vlgmr.msra.gmra.mxu1 %v12731_v43  ;;  %v15188_v33 = vld [vmem:[#allocation80_spill] sm:$0xff] }
 0x356   :  { %v1440_v48 = vadd.f32 %v1439_v53, %v15181_v32  ;;  %5750 = vmatmul.mubr.bf16.vlgmr.msra.gmra.mxu0 %v12744_v38  ;;  %v1449_v6 = vpop.f32.mrf.mxu1  ;;  %v1827_v37 = vmax.f32 %v1826_v30, %v1630_v19  ;;  %v1643_v10 = vmax.f32 %v1436_v35, 0.0  ;;  %v1553_v4 = vadd.f32 %v1552_v49, %v15182_v23  ;;  %v15190_v49 = vld [vmem:[#allocation81_spill] sm:$0xff]  ;;  %v15191_v30 = vld [vmem:[#allocation82_spill] sm:$0xff] }
 0x357   :  { %v1562_v34 = vpop.f32.mrf.mxu0  ;;  %v15185_v24 = vcombine.low %v15161_v36, %v15162_v62  ;;  %v15186_v21 = vcombine.low %v15166_v39, %v15167_v28  ;;  %v1442_v58 = vadd.f32 %v1441_v22, %v15183_v12  ;;  %v1789_v44 = vmax.f32 %v1788_v46, %v1635_v50  ;;  %v12779_v50 = vld [vmem:[#allocation14 + $0xb00] sm:$0xff] }
 0x358   :  { %v1645_v31 = vmax.f32 %v1549_v13, 0.0  ;;  %v1555_v53 = vadd.f32 %v1554_v18, %v15184_v60  ;;  %v1446_v45 = vadd.f32 %v1445_v29, %v15181_v32  ;;  %v15189_v7 = vcombine.high %v15187_v8, %v15188_v33  ;;  %v1451_v62 = vpop.f32.mrf.mxu1  ;;  %v12781_v13 = vld [vmem:[#allocation14 + $0xb20] sm:$0xff] }
 0x359   :  { %5759 = vmatpush1.bf16.msra.mxu1 %v15185_v24  ;;  %5800 = vmatpush1.bf16.msra.mxu0 %v15186_v21  ;;  %v15192_v36 = vcombine.high %v15190_v49, %v15191_v30  ;;  %v1564_v15 = vpop.f32.mrf.mxu0  ;;  %v1815_v39 = vmax.f32 %v1814_v5, %v1637_v26  ;;  %v1644_v28 = vmax.f32 %v1438_v14, 0.0  ;;  %v1559_v22 = vadd.f32 %v1558_v41, %v15182_v23  ;;  %v15195_v14 = vld [vmem:[#allocation45_spill] sm:$0xff] }
 0x35a   :  { %5760 = vmatprep.subr.bf16.mxu1 %v15189_v7  ;;  %v1448_v16 = vadd.f32 %v1447_v42, %v15183_v12  ;;  %v1802_v63 = vmax.f32 %v1801_v57, %v1636_v17  ;;  %v1828_v18 = vmax.f32 %v1827_v37, %v1638_v59  ;;  %v1646_v3 = vmax.f32 %v1551_v1, 0.0  ;;  %v1455_v9 = vpop.f32.mrf.mxu1  ;;  %v15196_v17 = vld [vmem:[#allocation46_spill] sm:$0xff]  ;;  %v15198_v1 = vld [vmem:[#allocation47_spill] sm:$0xff] }
 0x35b   :  { %5801 = vmatprep.subr.bf16.mxu0 %v15192_v36  ;;  %v1651_v40 = vmax.f32 %v1440_v48, 0.0  ;;  %v1568_v20 = vpop.f32.mrf.mxu0  ;;  %v1790_v11 = vmax.f32 %v1789_v44, %v1643_v10  ;;  %v1653_v29 = vmax.f32 %v1553_v4, 0.0  ;;  %v1652_v19 = vmax.f32 %v1442_v58, 0.0  ;;  %v15199_v48 = vld [vmem:[#allocation39_spill] sm:$0xff] }
 0x35c   :  { %v15193_v35 = vcombine.low %v15187_v8, %v15188_v33  ;;  %v15194_v46 = vcombine.low %v15190_v49, %v15191_v30  ;;  %v1452_v41 = vadd.f32 %v1451_v62, %v15183_v12  ;;  %v1654_v42 = vmax.f32 %v1555_v53, 0.0  ;;  %v1457_v10 = vpop.f32.mrf.mxu1 }
 0x35d   :  { %v1659_v5 = vmax.f32 %v1446_v45, 0.0  ;;  %v1561_v57 = vadd.f32 %v1560_v27, %v15184_v60  ;;  %v1450_v26 = vadd.f32 %v1449_v6, %v15181_v32  ;;  %v15197_v59 = vcombine.high %v15195_v14, %v15196_v17  ;;  %v1570_v4 = vpop.f32.mrf.mxu0 }
 0x35e   :  { %5761 = vmatpush1.bf16.msra.mxu1 %v15193_v35  ;;  %5802 = vmatpush1.bf16.msra.mxu0 %v15194_v46  ;;  %v15200_v37 = vcombine.high %v15198_v1, %v15199_v48  ;;  %v1816_v24 = vmax.f32 %v1815_v39, %v1645_v31  ;;  %v1803_v21 = vmax.f32 %v1802_v63, %v1644_v28  ;;  %v1661_v58 = vmax.f32 %v1559_v22, 0.0  ;;  %v1459_v8 = vpop.f32.mrf.mxu1  ;;  %v15204_v63 = vld [vmem:[#allocation84_spill] sm:$0xff] }
 0x35f   :  { %5762 = vmatprep.subr.bf16.mxu1 %v15197_v59  ;;  %v1660_v44 = vmax.f32 %v1448_v16, 0.0  ;;  %v1829_v53 = vmax.f32 %v1828_v18, %v1646_v3  ;;  %v1791_v45 = vmax.f32 %v1790_v11, %v1651_v40  ;;  %v1563_v27 = vadd.f32 %v1562_v34, %v15182_v23  ;;  %v1572_v6 = vpop.f32.mrf.mxu0  ;;  %v15203_v16 = vld [vmem:[#allocation83_spill] sm:$0xff]  ;;  %v15206_v3 = vld [vmem:[#allocation40_spill] sm:$0xff] }
 0x360   :  { %5803 = vmatprep.subr.bf16.mxu0 %v15200_v37  ;;  %v10081_v33 = vcombine.high %v12779_v50, %v12781_v13  ;;  %v1817_v7 = vmax.f32 %v1816_v24, %v1653_v29  ;;  %v1804_v49 = vmax.f32 %v1803_v21, %v1652_v19  ;;  %v15201_v30 = vcombine.low %v15195_v14, %v15196_v17  ;;  %v1461_v11 = vpop.f32.mrf.mxu1  ;;  %v15210_v21 = vld [vmem:[#allocation48_spill] sm:$0xff] }
 0x361   :  { %v15202_v31 = vcombine.low %v15198_v1, %v15199_v48  ;;  %v1668_v36 = vmax.f32 %v1452_v41, 0.0  ;;  %v1565_v62 = vadd.f32 %v1564_v15, %v15184_v60  ;;  %v1830_v39 = vmax.f32 %v1829_v53, %v1654_v42  ;;  %v1574_v29 = vpop.f32.mrf.mxu0  ;;  %v15213_v53 = vld [vmem:[#allocation50_spill] sm:$0xff] }
 0x362   :  { %5763 = vmatpush1.bf16.msra.mxu1 %v15201_v30  ;;  %v1792_v34 = vmax.f32 %v1791_v45, %v1659_v5  ;;  %v1662_v28 = vmax.f32 %v1561_v57, 0.0  ;;  %v1667_v22 = vmax.f32 %v1450_v26, 0.0  ;;  %v15205_v18 = vcombine.high %v15203_v16, %v15204_v63  ;;  %v1465_v26 = vpop.f32.mrf.mxu1  ;;  %v15214_v45 = vld [vmem:[#allocation51_spill] sm:$0xff] }
 0x363   :  { %5804 = vmatpush1.bf16.msra.mxu0 %v15202_v31  ;;  %v15207_v40 = vcombine.high %v12317_v0, %v15206_v3  ;;  %v1818_v19 = vmax.f32 %v1817_v7, %v1661_v58  ;;  %v1805_v35 = vmax.f32 %v1804_v49, %v1660_v44  ;;  %v1460_v46 = vadd.f32 %v1459_v8, %v15181_v32  ;;  %v1578_v14 = vpop.f32.mrf.mxu0  ;;  %v15211_v58 = vld [vmem:[#allocation49_spill] sm:$0xff] }
 0x364   :  { %5764 = vmatprep.subr.bf16.mxu1 %v15205_v18  ;;  %v1573_v15 = vadd.f32 %v1572_v6, %v15182_v23  ;;  %v1669_v41 = vmax.f32 %v1563_v27, 0.0  ;;  %v1456_v42 = vadd.f32 %v1455_v9, %v15181_v32  ;;  %v1569_v5 = vadd.f32 %v1568_v20, %v15182_v23  ;;  %v1467_v6 = vpop.f32.mrf.mxu1 }
 0x365   :  { %5805 = vmatprep.subr.bf16.mxu0 %v15207_v40  ;;  %v1462_v57 = vadd.f32 %v1461_v11, %v15183_v12  ;;  %v12812_v17 = vmax.f32 %v1805_v35, %v1668_v36  ;;  %v1670_v59 = vmax.f32 %v1565_v62, 0.0  ;;  %v15208_v1 = vcombine.low %v15203_v16, %v15204_v63 }
 0x366   :  { %v15209_v48 = vcombine.low %v12317_v0, %v15206_v3  ;;  %v1458_v37 = vadd.f32 %v1457_v10, %v15183_v12  ;;  %v1571_v9 = vadd.f32 %v1570_v4, %v15184_v60  ;;  %v1831_v20 = vmax.f32 %v1830_v39, %v1662_v28  ;;  %v1580_v0 = vpop.f32.mrf.mxu0  ;;  %v1469_v39 = vpop.f32.mrf.mxu1 }
 0x367   :  { %5765 = vmatpush1.bf16.msra.mxu1 %v15208_v1  ;;  %v12822_v24 = vmax.f32 %v1792_v34, %v1667_v22  ;;  %v15212_v44 = vcombine.high %v15210_v21, %v15211_v58  ;;  %v15215_v27 = vcombine.high %v15213_v53, %v15214_v45  ;;  %v1575_v8 = vadd.f32 %v1574_v29, %v15184_v60 }
 0x368   :  { %5806 = vmatpush1.bf16.msra.mxu0 %v15209_v48  ;;  %v1683_v7 = vmax.f32 %v1460_v46, 0.0  ;;  %v1685_v49 = vmax.f32 %v1573_v15, 0.0  ;;  %v1466_v10 = vadd.f32 %v1465_v26, %v15181_v32  ;;  %v1579_v4 = vadd.f32 %v1578_v14, %v15182_v23  ;;  %v1582_v34 = vpop.f32.mrf.mxu0  ;;  %v1471_v15 = vpop.f32.mrf.mxu1 }
 0x369   :  { %5766 = vmatprep.subr.bf16.mxu1 %v15212_v44  ;;  %5807 = vmatprep.subr.bf16.mxu0 %v15215_v27  ;;  %v12833_v30 = vmax.f32 %v1818_v19, %v1669_v41  ;;  %v1675_v31 = vmax.f32 %v1456_v42, 0.0  ;;  %v1677_v36 = vmax.f32 %v1569_v5, 0.0  ;;  %v1684_v62 = vmax.f32 %v1462_v57, 0.0 }
 0x36a   :  { %v1807_v28 = vrot.slane %v12812_v17, 4  ;;  %v12836_v22 = vmax.f32 %v1831_v20, %v1670_v59  ;;  %v1676_v16 = vmax.f32 %v1458_v37, 0.0  ;;  %v1678_v63 = vmax.f32 %v1571_v9, 0.0  ;;  %v1584_v41 = vpop.f32.mrf.mxu0  ;;  %v1475_v37 = vpop.f32.mrf.mxu1 }
 0x36b   :  { %v15216_v18 = vcombine.low %v15210_v21, %v15211_v58  ;;  %v15217_v3 = vcombine.low %v15213_v53, %v15214_v45  ;;  %v1686_v40 = vmax.f32 %v1575_v8, 0.0  ;;  %v1691_v11 = vmax.f32 %v1466_v10, 0.0 }
 0x36c   :  { %v15218_v29 = vcombine.high %v12372_v56, %v12374_v52  ;;  %v15219_v19 = vcombine.high %v12406_v54, %v12408_v47  ;;  %v1468_v35 = vadd.f32 %v1467_v6, %v15183_v12  ;;  %v1581_v46 = vadd.f32 %v1580_v0, %v15184_v60  ;;  %v1588_v9 = vpop.f32.mrf.mxu0 }
 0x36d   :  { %5767 = vmatpush1.bf16.msra.mxu1 %v15216_v18  ;;  %5808 = vmatpush1.bf16.msra.mxu0 %v15217_v3  ;;  %v1891_v42 = vmax.f32 %v1675_v31, %v1683_v7  ;;  %v1917_v5 = vmax.f32 %v1677_v36, %v1685_v49  ;;  %v1693_v57 = vmax.f32 %v1579_v4, 0.0  ;;  %v1470_v26 = vadd.f32 %v1469_v39, %v15181_v32 }
 0x36e   :  { %5768 = vmatprep.subr.bf16.mxu1 %v15218_v29  ;;  %5809 = vmatprep.subr.bf16.mxu0 %v15219_v19  ;;  %v1904_v14 = vmax.f32 %v1676_v16, %v1684_v62  ;;  %v1692_v59 = vmax.f32 %v1468_v35, 0.0  ;;  %v1694_v1 = vmax.f32 %v1581_v46, 0.0  ;;  %v1583_v48 = vadd.f32 %v1582_v34, %v15182_v23  ;;  %v1590_v7 = vpop.f32.mrf.mxu0 }
 0x36f   :  { %v15220_v20 = vcombine.low %v12372_v56, %v12374_v52  ;;  %v15221_v21 = vcombine.low %v12406_v54, %v12408_v47  ;;  %v1699_v58 = vmax.f32 %v1470_v26, 0.0  ;;  %v1472_v44 = vadd.f32 %v1471_v15, %v15183_v12  ;;  %v15223_v56 = vld [vmem:[#allocation33_spill] sm:$0xff]  ;;  %v1477_v54 = vpop.f32.mrf.mxu1 }
 0x370   :  { %v1585_v53 = vadd.f32 %v1584_v41, %v15184_v60  ;;  %v1476_v45 = vadd.f32 %v1475_v37, %v15181_v32  ;;  %v1930_v27 = vmax.f32 %v1678_v63, %v1686_v40  ;;  %v1892_v8 = vmax.f32 %v1891_v42, %v1691_v11  ;;  %v1592_v63 = vpop.f32.mrf.mxu0  ;;  %v15227_v15 = vld [vmem:[#allocation57_spill] sm:$0xff]  ;;  %v15228_v41 = vld [vmem:[#allocation58_spill] sm:$0xff] }
 0x371   :  { %5769 = vmatpush1.bf16.msra.mxu1 %v15220_v20  ;;  %5810 = vmatpush1.bf16.msra.mxu0 %v15221_v21  ;;  %v1701_v6 = vmax.f32 %v1583_v48, 0.0  ;;  %v15222_v0 = vcombine.high %v12436_v25, %v12438_v55  ;;  %v15224_v52 = vcombine.high %v12446_v2, %v15223_v56  ;;  %v1589_v47 = vadd.f32 %v1588_v9, %v15182_v23  ;;  %v1479_v16 = vpop.f32.mrf.mxu1 }
 0x372   :  { %v1918_v49 = vmax.f32 %v1917_v5, %v1693_v57  ;;  %v1905_v10 = vmax.f32 %v1904_v14, %v1692_v59  ;;  %v1700_v4 = vmax.f32 %v1472_v44, 0.0  ;;  %v1702_v31 = vmax.f32 %v1585_v53, 0.0 }
 0x373   :  { %5770 = vmatprep.subr.bf16.mxu1 %v15222_v0  ;;  %5811 = vmatprep.subr.bf16.mxu0 %v15224_v52  ;;  %v1707_v36 = vmax.f32 %v1476_v45, 0.0  ;;  %v1709_v62 = vmax.f32 %v1589_v47, 0.0  ;;  %v1478_v39 = vadd.f32 %v1477_v54, %v15183_v12  ;;  %v1591_v34 = vadd.f32 %v1590_v7, %v15184_v60  ;;  %v1481_v14 = vpop.f32.mrf.mxu1  ;;  %v15235_v52 = vld [vmem:[#allocation54_spill] sm:$0xff]  ;;  %v15236_v47 = vld [vmem:[#allocation55_spill] sm:$0xff]  ;;  %v15238_v7 = vld [vmem:[#allocation56_spill] sm:$0xff] }
 0x374   :  { %v12873_v18 = vmax.f32 %v12812_v17, %v1807_v28  ;;  %v1833_v3 = vrot.slane %v12836_v22, 4  ;;  %v1931_v40 = vmax.f32 %v1930_v27, %v1694_v1  ;;  %v1893_v11 = vmax.f32 %v1892_v8, %v1699_v58  ;;  %v15230_v17 = vld [vmem:[#allocation52_spill] sm:$0xff]  ;;  %v15231_v28 = vld [vmem:[#allocation53_spill] sm:$0xff] }
 0x375   :  { %v15225_v29 = vcombine.low %v12436_v25, %v12438_v55  ;;  %v15226_v19 = vcombine.low %v12446_v2, %v15223_v56  ;;  %v1919_v35 = vmax.f32 %v1918_v49, %v1701_v6  ;;  %v1906_v46 = vmax.f32 %v1905_v10, %v1700_v4  ;;  %v1594_v25 = vpop.f32.mrf.mxu0  ;;  %v1485_v21 = vpop.f32.mrf.mxu1  ;;  %v15239_v49 = vld [vmem:[#allocation34_spill] sm:$0xff] }
 0x376   :  { %v15229_v42 = vcombine.high %v15227_v15, %v15228_v41  ;;  %v15232_v5 = vcombine.high %v15230_v17, %v15231_v28  ;;  %v1708_v57 = vmax.f32 %v1478_v39, 0.0  ;;  %v1480_v26 = vadd.f32 %v1479_v16, %v15181_v32 }
 0x377   :  { %5771 = vmatpush1.bf16.msra.mxu1 %v15225_v29  ;;  %5812 = vmatpush1.bf16.msra.mxu0 %v15226_v19  ;;  %v1710_v55 = vmax.f32 %v1591_v34, 0.0  ;;  %v1593_v59 = vadd.f32 %v1592_v63, %v15182_v23  ;;  %v1482_v2 = vadd.f32 %v1481_v14, %v15183_v12  ;;  %v1595_v1 = vadd.f32 %v1594_v25, %v15184_v60  ;;  %v1598_v58 = vpop.f32.mrf.mxu0  ;;  %v15247_v14 = vld [vmem:[#allocation62_spill] sm:$0xff] }
 0x378   :  { %5772 = vmatprep.subr.bf16.mxu1 %v15229_v42  ;;  %5813 = vmatprep.subr.bf16.mxu0 %v15232_v5  ;;  %v1932_v48 = vmax.f32 %v1931_v40, %v1702_v31  ;;  %v1894_v37 = vmax.f32 %v1893_v11, %v1707_v36  ;;  %v1920_v9 = vmax.f32 %v1919_v35, %v1709_v62  ;;  %v1715_v20 = vmax.f32 %v1480_v26, 0.0  ;;  %v1487_v31 = vpop.f32.mrf.mxu1  ;;  %v15244_v5 = vld [vmem:[#allocation60_spill] sm:$0xff]  ;;  %v15246_v26 = vld [vmem:[#allocation61_spill] sm:$0xff] }
 0x379   :  { %v15233_v44 = vcombine.low %v15227_v15, %v15228_v41  ;;  %v15234_v53 = vcombine.low %v15230_v17, %v15231_v28  ;;  %v1717_v45 = vmax.f32 %v1593_v59, 0.0  ;;  %v1716_v27 = vmax.f32 %v1482_v2, 0.0  ;;  %v1600_v36 = vpop.f32.mrf.mxu0  ;;  %v15243_v28 = vld [vmem:[#allocation59_spill] sm:$0xff] }
 0x37a   :  { %v1718_v8 = vmax.f32 %v1595_v1, 0.0  ;;  %v1486_v6 = vadd.f32 %v1485_v21, %v15181_v32  ;;  %v12900_v0 = vmax.f32 %v12836_v22, %v1833_v3  ;;  %v1907_v56 = vmax.f32 %v1906_v46, %v1708_v57  ;;  %v1489_v11 = vpop.f32.mrf.mxu1 }
 0x37b   :  { %5773 = vmatpush1.bf16.msra.mxu1 %v15233_v44  ;;  %5814 = vmatpush1.bf16.msra.mxu0 %v15234_v53  ;;  %v15237_v54 = vcombine.high %v15235_v52, %v15236_v47  ;;  %v15240_v10 = vcombine.high %v15238_v7, %v15239_v49  ;;  %v1599_v4 = vadd.f32 %v1598_v58, %v15182_v23  ;;  %v1602_v29 = vpop.f32.mrf.mxu0  ;;  %v1794_v21 = vrot.slane %v12822_v24, 4 }
 0x37c   :  { %v1933_v62 = vmax.f32 %v1932_v48, %v1710_v55  ;;  %v1895_v39 = vmax.f32 %v1894_v37, %v1715_v20  ;;  %v1921_v34 = vmax.f32 %v1920_v9, %v1717_v45  ;;  %v1723_v16 = vmax.f32 %v1486_v6, 0.0  ;;  %v1491_v2 = vpop.f32.mrf.mxu1  ;;  %v12927_v9 = vld [vmem:[#allocation14 + $0xf00] sm:$0xff] }
 0x37d   :  { %5774 = vmatprep.subr.bf16.mxu1 %v15237_v54  ;;  %5815 = vmatprep.subr.bf16.mxu0 %v15240_v10  ;;  %v1908_v63 = vmax.f32 %v1907_v56, %v1716_v27  ;;  %v1725_v22 = vmax.f32 %v1599_v4, 0.0  ;;  %v1488_v3 = vadd.f32 %v1487_v31, %v15183_v12  ;;  %v1601_v40 = vadd.f32 %v1600_v36, %v15184_v60  ;;  %v1604_v1 = vpop.f32.mrf.mxu0  ;;  %v12929_v20 = vld [vmem:[#allocation14 + $0xf20] sm:$0xff]  ;;  %v15253_v10 = vld [vmem:[#allocation63_spill] sm:$0xff]  ;;  %v15256_v36 = vld [vmem:[#allocation64_spill] sm:$0xff] }
 0x37e   :  { %v15241_v19 = vcombine.low %v15235_v52, %v15236_v47  ;;  %v15242_v35 = vcombine.low %v15238_v7, %v15239_v49  ;;  %v1934_v46 = vmax.f32 %v1933_v62, %v1718_v8  ;;  %v1490_v15 = vadd.f32 %v1489_v11, %v15181_v32  ;;  %v12933_v45 = vpop.f32.mrf.mxu1  ;;  %v12943_v47 = vld [vmem:[#allocation14 + $0xac0] sm:$0xff]  ;;  %v15254_v4 = vld [vmem:[#allocation35_spill] sm:$0xff] }
 0x37f   :  { %v1603_v41 = vadd.f32 %v1602_v29, %v15182_v23  ;;  %v1896_v42 = vmax.f32 %v1895_v39, %v1723_v16  ;;  %v1922_v17 = vmax.f32 %v1921_v34, %v1725_v22  ;;  %v15245_v57 = vcombine.high %v15243_v28, %v15244_v5  ;;  %15249 = vst [vmem:[#allocation36_spill] sm:$0xff] %v12933_v45  ;;  %v12935_v27 = vpop.f32.mrf.mxu0  ;;  %v12945_v54 = vld [vmem:[#allocation14 + $0xae0] sm:$0xff]  ;;  %v2825_v45 = vld [vmem:[#allocation14 + $0x6e8] sm:$0xff] }
 0x380   :  { %5775 = vmatpush2.bf16.msra.mxu1 %v15241_v19  ;;  %5816 = vmatpush2.bf16.msra.mxu0 %v15242_v35  ;;  %v15248_v25 = vcombine.high %v15246_v26, %v15247_v14  ;;  %v1724_v55 = vmax.f32 %v1488_v3, 0.0  ;;  %v1726_v59 = vmax.f32 %v1601_v40, 0.0  ;;  %v1731_v48 = vmax.f32 %v1490_v15, 0.0  ;;  %15250 = vst [vmem:[#allocation70_spill] sm:$0xff] %v12935_v27  ;;  %v15257_v62 = vld [vmem:[#allocation65_spill] sm:$0xff]  ;;  %v2857_v27 = vld [vmem:[#allocation14 + $0x7e8] sm:$0xff] }
 0x381   :  { %5776 = vmatprep.subr.bf16.mxu1 %v15245_v57  ;;  %v1733_v37 = vmax.f32 %v1603_v41, 0.0  ;;  %v1492_v32 = vadd.f32 %v1491_v2, %v15183_v12  ;;  %v1605_v23 = vadd.f32 %v1604_v1, %v15184_v60  ;;  %v1820_v58 = vrot.slane %v12833_v30, 4  ;;  %v12961_v22 = vpop.f32.mrf.mxu0  ;;  %v12963_v19 = vld [vmem:[#allocation14 + $0xec0] sm:$0xff] }
 0x382   :  { %5817 = vmatprep.subr.bf16.mxu0 %v15248_v25  ;;  %v1909_v44 = vmax.f32 %v1908_v63, %v1724_v55  ;;  %v1935_v53 = vmax.f32 %v1934_v46, %v1726_v59  ;;  %v15251_v8 = vcombine.low %v15243_v28, %v15244_v5  ;;  %v15252_v60 = vcombine.low %v15246_v26, %v15247_v14  ;;  %v12959_v63 = vpop.f32.mrf.mxu1  ;;  %v12965_v35 = vld [vmem:[#allocation14 + $0xee0] sm:$0xff] }
 0x383   :  { %v1897_v12 = vmax.f32 %v1896_v42, %v1731_v48  ;;  %v1923_v6 = vmax.f32 %v1922_v17, %v1733_v37  ;;  %v1732_v56 = vmax.f32 %v1492_v32, 0.0  ;;  %v1734_v52 = vmax.f32 %v1605_v23, 0.0  ;;  %15259 = vst [vmem:[#allocation71_spill] sm:$0xff] %v12959_v63  ;;  %15260 = vst [vmem:[#allocation72_spill] sm:$0xff] %v12961_v22  ;;  %v12973_v17 = vpop.f32.mrf.mxu0  ;;  %v12994_v48 = vld [vmem:[#allocation14 + $0xa80] sm:$0xff]  ;;  %v2758_v22 = vld [vmem:[#allocation14 + $0x4d0] sm:$0xff] }
 0x384   :  { %5777 = vmatpush2.bf16.msra.mxu1 %v15251_v8  ;;  %5818 = vmatpush2.bf16.msra.mxu0 %v15252_v60  ;;  %v1809_v7 = vrot.slane %v12873_v18, 2  ;;  %v1835_v49 = vrot.slane %v12900_v0, 2  ;;  %v15255_v31 = vcombine.high %v15253_v10, %v15254_v4  ;;  %v15258_v39 = vcombine.high %v15256_v36, %v15257_v62  ;;  %v12971_v42 = vpop.f32.mrf.mxu1  ;;  %15262 = vst [vmem:[#allocation37_spill] sm:$0xff] %v12973_v17  ;;  %v13004_v60 = vld [vmem:[#allocation14 + $0xa40] sm:$0xff]  ;;  %v3002_v63 = vld [vmem:[#allocation14 + $0xc70] sm:$0xff] }
 0x385   :  { %v10080_v34 = vcombine.low %v12779_v50, %v12781_v13  ;;  %v10209_v16 = vcombine.high %v12927_v9, %v12929_v20  ;;  %v1898_v3 = vrot.slane %v1897_v12, 4  ;;  %v1924_v40 = vrot.slane %v1923_v6, 4  ;;  %15261 = vst [vmem:[#allocation73_spill] sm:$0xff] %v12971_v42  ;;  %v12992_v1 = vpop.f32.mrf.mxu0 }
 0x386   :  { %5778 = vmatprep.subr.bf16.mxu1 %v15255_v31  ;;  %5819 = vmatprep.subr.bf16.mxu0 %v15258_v39  ;;  %v1910_v11 = vmax.f32 %v1909_v44, %v1732_v56  ;;  %v1936_v29 = vmax.f32 %v1935_v53, %v1734_v52  ;;  %v1795_v46 = vmax.f32 %v12822_v24, %v1794_v21  ;;  %v12990_v2 = vpop.f32.mrf.mxu1 }
 0x387   :  { %v1821_v15 = vmax.f32 %v12833_v30, %v1820_v58  ;;  %v10208_v41 = vcombine.low %v12927_v9, %v12929_v20  ;;  %v10073_v28 = vcombine.high %v12943_v47, %v12945_v54  ;;  %v1899_v5 = vmax.f32 %v1897_v12, %v1898_v3  ;;  %15265 = vst [vmem:[#allocation74_spill] sm:$0xff] %v12990_v2  ;;  %v2944_v9 = vld [vmem:[#allocation14 + $0xaa0] sm:$0xff]  ;;  %v13002_v21 = vpop.f32.mrf.mxu0  ;;  %v2762_v2 = vld [vmem:[#allocation14 + $0x4f0] sm:$0xff] }
 0x388   :  { %v1925_v57 = vmax.f32 %v1923_v6, %v1924_v40  ;;  %v15263_v26 = vcombine.low %v15253_v10, %v15254_v4  ;;  %v15264_v24 = vcombine.low %v15256_v36, %v15257_v62  ;;  %v1911_v30 = vrot.slane %v1910_v11, 4  ;;  %15266 = vst [vmem:[#allocation75_spill] sm:$0xff] %v12992_v1  ;;  %v3072_v20 = vld [vmem:[#allocation14 + $0xea0] sm:$0xff]  ;;  %15268 = vst [vmem:[#allocation77_spill] sm:$0xff] %v13002_v21  ;;  %v2745_v21 = vld [vmem:[#allocation14 + $0x468] sm:$0xff] }
 0x389   :  { %v1937_v14 = vrot.slane %v1936_v29, 4  ;;  %v1810_v25 = vmax.f32 %v12873_v18, %v1809_v7  ;;  %v1836_v55 = vmax.f32 %v12900_v0, %v1835_v49  ;;  %v10201_v59 = vcombine.high %v12963_v19, %v12965_v35  ;;  %v3068_v0 = vld [vmem:[#allocation14 + $0xe80] sm:$0xff]  ;;  %v13011_v7 = vpop.f32.mrf.mxu0 }
 0x38a   :  { %5779 = vmatpush2.bf16.msra.mxu1 %v15263_v26  ;;  %5820 = vmatpush2.bf16.msra.mxu0 %v15264_v24  ;;  %v1900_v37 = vrot.slane %v1899_v5, 2  ;;  %v1926_v32 = vrot.slane %v1925_v57, 2  ;;  %v1912_v23 = vmax.f32 %v1910_v11, %v1911_v30  ;;  %v10072_v50 = vcombine.low %v12943_v47, %v12945_v54  ;;  %v13006_v12 = vld [vmem:[#allocation14 + $0xa60] sm:$0xff] }
 0x38b   :  { %5780 = vmatprep.subr.bf16.mxu1 %v10081_v33  ;;  %5821 = vmatprep.subr.bf16.mxu0 %v10209_v16  ;;  %v1938_v18 = vmax.f32 %v1936_v29, %v1937_v14  ;;  %v10200_v13 = vcombine.low %v12963_v19, %v12965_v35  ;;  %v13000_v33 = vpop.f32.mrf.mxu1  ;;  %v1796_v58 = vrot.slane %v1795_v46, 2  ;;  %v1822_v44 = vrot.slane %v1821_v15, 2  ;;  %v3060_v36 = vld [vmem:[#allocation14 + $0xe40] sm:$0xff]  ;;  %v13016_v3 = vpop.f32.mrf.mxu0 }
 0x38c   :  { %15267 = vst [vmem:[#allocation76_spill] sm:$0xff] %v13000_v33  ;;  %v1913_v53 = vrot.slane %v1912_v23, 2  ;;  %v1811_v6 = vrot.slane %v1810_v25, 1  ;;  %v1837_v56 = vrot.slane %v1836_v55, 1  ;;  %v10065_v52 = vcombine.high %v12994_v48, %v2944_v9  ;;  %v3064_v62 = vld [vmem:[#allocation14 + $0xe60] sm:$0xff]  ;;  %15270 = vst [vmem:[#allocation79_spill] sm:$0xff] %v13016_v3 }
 0x38d   :  { %v1939_v8 = vrot.slane %v1938_v18, 2  ;;  %v10193_v47 = vcombine.high %v3068_v0, %v3072_v20  ;;  %v13009_v54 = vpop.f32.mrf.mxu1  ;;  %v1901_v49 = vmax.f32 %v1899_v5, %v1900_v37  ;;  %v1927_v10 = vmax.f32 %v1925_v57, %v1926_v32  ;;  %v13024_v30 = vpop.f32.mrf.mxu0  ;;  %v3056_v37 = vld [vmem:[#allocation14 + $0xe20] sm:$0xff]  ;;  %v2833_v33 = vld [vmem:[#allocation14 + $0x728] sm:$0xff] }
 0x38e   :  { %5781 = vmatpush2.bf16.msra.mxu1 %v10080_v34  ;;  %5822 = vmatpush2.bf16.msra.mxu0 %v10208_v41  ;;  %v1914_v4 = vmax.f32 %v1912_v23, %v1913_v53  ;;  %v10064_v39 = vcombine.low %v12994_v48, %v2944_v9  ;;  %v10192_v34 = vcombine.low %v3068_v0, %v3072_v20  ;;  %v13020_v41 = vld [vmem:[#allocation14 + $0xa00] sm:$0xff] }
 0x38f   :  { %5782 = vmatprep.subr.bf16.mxu1 %v10073_v28  ;;  %5823 = vmatprep.subr.bf16.mxu0 %v10201_v59  ;;  %v1940_v31 = vmax.f32 %v1938_v18, %v1939_v8  ;;  %v13014_v16 = vpop.f32.mrf.mxu1  ;;  %v10057_v40 = vcombine.high %v13004_v60, %v13006_v12  ;;  %v1797_v11 = vmax.f32 %v1795_v46, %v1796_v58  ;;  %v2928_v28 = vld [vmem:[#allocation14 + $0xa20] sm:$0xff]  ;;  %v1902_v14 = vrot.slane %v1901_v49, 1 }
 0x390   :  { %15269 = vst [vmem:[#allocation78_spill] sm:$0xff] %v13014_v16  ;;  %v1823_v29 = vmax.f32 %v1821_v15, %v1822_v44  ;;  %v1915_v19 = vrot.slane %v1914_v4, 1  ;;  %v1812_v5 = vmax.f32 %v1810_v25, %v1811_v6  ;;  %v1838_v57 = vmax.f32 %v1836_v55, %v1837_v56  ;;  %v3052_v48 = vld [vmem:[#allocation14 + $0xe00] sm:$0xff]  ;;  %v13030_v25 = vpop.f32.mrf.mxu0  ;;  %v2665_v56 = vld [vmem:[#allocation14 + $0x1e8] sm:$0xff] }
 0x391   :  { %v1941_v35 = vrot.slane %v1940_v31, 1  ;;  %v10185_v26 = vcombine.high %v3060_v36, %v3064_v62  ;;  %v13022_v24 = vpop.f32.mrf.mxu1  ;;  %v1928_v59 = vrot.slane %v1927_v10, 1  ;;  %v10056_v32 = vcombine.low %v13004_v60, %v13006_v12  ;;  %15272 = vst [vmem:[#allocation42_spill] sm:$0xff] %v13030_v25  ;;  %v2661_v60 = vld [vmem:[#allocation14 + $0x1c8] sm:$0xff] }
 0x392   :  { %5783 = vmatpush2.bf16.msra.mxu1 %v10072_v50  ;;  %5824 = vmatpush2.bf16.msra.mxu0 %v10200_v13  ;;  %v1916_v46 = vmax.f32 %v1914_v4, %v1915_v19  ;;  %v10184_v23 = vcombine.low %v3060_v36, %v3064_v62  ;;  %v10049_v55 = vcombine.high %v13020_v41, %v2928_v28  ;;  %v1798_v9 = vrot.slane %v1797_v11, 1  ;;  %v13037_v44 = vpop.f32.mrf.mxu0 }
 0x393   :  { %5784 = vmatprep.subr.bf16.mxu1 %v10065_v52  ;;  %5825 = vmatprep.subr.bf16.mxu0 %v10193_v47  ;;  %v1942_v15 = vmax.f32 %v1940_v31, %v1941_v35  ;;  %v13028_v18 = vpop.f32.mrf.mxu1  ;;  %v1824_v0 = vrot.slane %v1823_v29, 1  ;;  %v10177_v13 = vcombine.high %v3052_v48, %v3056_v37  ;;  %v1903_v12 = vmax.f32 %v1901_v49, %v1902_v14  ;;  %v2789_v52 = vld [vmem:[#allocation14 + $0x5c8] sm:$0xff] }
 0x394   :  { %15271 = vst [vmem:[#allocation41_spill] sm:$0xff] %v13028_v18  ;;  %v1949_v20 = vsel %vm1943_vm1, %v1812_v5, %v1916_v46  ;;  %v1929_v6 = vmax.f32 %v1927_v10, %v1928_v59  ;;  %v2793_v47 = vld [vmem:[#allocation14 + $0x5e8] sm:$0xff]  ;;  %v10048_v4 = vcombine.low %v13020_v41, %v2928_v28  ;;  %v13046_v36 = vpop.f32.mrf.mxu0  ;;  %v1799_v62 = vmax.f32 %v1797_v11, %v1798_v9 }
 0x395   :  { %v1951_v50 = vsel %vm1943_vm1, %v1838_v57, %v1942_v15  ;;  %v13035_v58 = vpop.f32.mrf.mxu1  ;;  %v13039_v53 = vpack.c.bf16 %v1949_v20, %v1949_v20  ;;  %15274 = vst [vmem:[#allocation44_spill] sm:$0xff] %v13046_v36  ;;  %v9787_v49 = vcombine.high %v2661_v60, %v2665_v56  ;;  %v9915_v10 = vcombine.high %v2789_v52, %v2793_v47  ;;  %v2653_v28 = vld [vmem:[#allocation14 + $0x188] sm:$0xff] }
 0x396   :  { %5785 = vmatpush2.bf16.msra.mxu1 %v10064_v39  ;;  %5826 = vmatpush2.bf16.msra.mxu0 %v10192_v34  ;;  %v13041_v8 = vpack.c.bf16 %v1951_v50, %v1951_v50  ;;  %v1825_v39 = vmax.f32 %v1823_v29, %v1824_v0  ;;  %v10176_v34 = vcombine.low %v3052_v48, %v3056_v37  ;;  %v13052_v19 = vpop.f32.mrf.mxu0  ;;  %v2657_v29 = vld [vmem:[#allocation14 + $0x1a8] sm:$0xff] }
 0x397   :  { %5786 = vmatprep.subr.bf16.mxu1 %v10057_v40  ;;  %5827 = vmatprep.subr.bf16.mxu0 %v10185_v26  ;;  %v13044_v31 = vpop.f32.mrf.mxu1  ;;  %v1948_v35 = vsel %vm1943_vm1, %v1799_v62, %v1903_v12  ;;  %v2781_v57 = vld [vmem:[#allocation14 + $0x588] sm:$0xff]  ;;  %v9786_v14 = vcombine.low %v2661_v60, %v2665_v56  ;;  %v9914_v59 = vcombine.low %v2789_v52, %v2793_v47 }
 0x398   :  { %15273 = vst [vmem:[#allocation43_spill] sm:$0xff] %v13044_v31  ;;  %5790 = vmatprep.mubr.bf16.mxu1 %v13039_v53  ;;  %5831 = vmatprep.mubr.bf16.mxu0 %v13041_v8  ;;  %v1950_v41 = vsel %vm1943_vm1, %v1825_v39, %v1929_v6  ;;  %v13058_v11 = vpop.f32.mrf.mxu0  ;;  %v2785_v26 = vld [vmem:[#allocation14 + $0x5a8] sm:$0xff]  ;;  %v13060_v46 = vpack.c.bf16 %v1948_v35, %v1948_v35 }
 0x399   :  { %v13050_v40 = vpop.f32.mrf.mxu1  ;;  %15276 = vst [vmem:[#allocation67_spill] sm:$0xff] %v13058_v11  ;;  %v13062_v15 = vpack.c.bf16 %v1950_v41, %v1950_v41  ;;  %v2649_v9 = vld [vmem:[#allocation14 + $0x168] sm:$0xff]  ;;  %v9778_v60 = vcombine.low %v2653_v28, %v2657_v29  ;;  %v9906_v12 = vcombine.low %v2781_v57, %v2785_v26 }
 0x39a   :  { %5787 = vmatpush2.bf16.msra.mxu1 %v10056_v32  ;;  %5828 = vmatpush2.bf16.msra.mxu0 %v10184_v23  ;;  %v13066_v37 = vpop.f32.mrf.mxu0  ;;  %v2645_v32 = vld [vmem:[#allocation14 + $0x148] sm:$0xff]  ;;  %v9779_v23 = vcombine.high %v2653_v28, %v2657_v29 }
 0x39b   :  { %5788 = vmatprep.subr.bf16.mxu1 %v10049_v55  ;;  %5829 = vmatprep.subr.bf16.mxu0 %v10177_v13  ;;  %v13056_v5 = vpop.f32.mrf.mxu1  ;;  %v9907_v55 = vcombine.high %v2781_v57, %v2785_v26  ;;  %v2773_v0 = vld [vmem:[#allocation14 + $0x548] sm:$0xff]  ;;  %v9771_v6 = vcombine.high %v2645_v32, %v2649_v9  ;;  %v9770_v35 = vcombine.low %v2645_v32, %v2649_v9 }
 0x39c   :  { %15275 = vst [vmem:[#allocation66_spill] sm:$0xff] %v13056_v5  ;;  %v2777_v20 = vld [vmem:[#allocation14 + $0x568] sm:$0xff]  ;;  %v13072_v13 = vpop.f32.mrf.mxu0 }
 0x39d   :  { %v13064_v48 = vpop.f32.mrf.mxu1  ;;  %15278 = vst [vmem:[#allocation69_spill] sm:$0xff] %v13072_v13  ;;  %v9899_v56 = vcombine.high %v2773_v0, %v2777_v20  ;;  %v2641_v62 = vld [vmem:[#allocation14 + $0x128] sm:$0xff]  ;;  %v9898_v41 = vcombine.low %v2773_v0, %v2777_v20 }
 0x39e   :  { %5789 = vmatpush2.bf16.msra.mxu1 %v10048_v4  ;;  %5830 = vmatpush2.bf16.msra.mxu0 %v10176_v34  ;;  %v13078_v47 = vpop.f32.mrf.mxu0  ;;  %v2637_v4 = vld [vmem:[#allocation14 + $0x108] sm:$0xff] }
 0x39f   :  { %5840 = vmatprep.subr.bf16.mxu1 %v9787_v49  ;;  %5881 = vmatprep.subr.bf16.mxu0 %v9915_v10  ;;  %v13070_v50 = vpop.f32.mrf.mxu1  ;;  %v2765_v39 = vld [vmem:[#allocation14 + $0x508] sm:$0xff]  ;;  %v9763_v28 = vcombine.high %v2637_v4, %v2641_v62  ;;  %v9762_v32 = vcombine.low %v2637_v4, %v2641_v62 }
 0x3a0   :  { %15277 = vst [vmem:[#allocation68_spill] sm:$0xff] %v13070_v50  ;;  %v2769_v34 = vld [vmem:[#allocation14 + $0x528] sm:$0xff]  ;;  %v13082_v10 = vpop.f32.mrf.mxu0 }
 0x3a1   :  { %5791 = vmatmul.mubr.bf16.vlgmr.msra.gmra.mxu1 %v13060_v46  ;;  %5832 = vmatmul.mubr.bf16.vlgmr.msra.gmra.mxu0 %v13062_v15  ;;  %v13076_v52 = vpop.f32.mrf.mxu1  ;;  %15280 = vst [vmem:[#allocation80_spill] sm:$0xff] %v13082_v10  ;;  %v9891_v29 = vcombine.high %v2765_v39, %v2769_v34  ;;  %v9890_v9 = vcombine.low %v2765_v39, %v2769_v34  ;;  %v2749_v10 = vld [vmem:[#allocation14 + $0x488] sm:$0xff] }
 0x3a2   :  { %5841 = vmatpush1.bf16.msra.mxu1 %v9786_v14  ;;  %5882 = vmatpush1.bf16.msra.mxu0 %v9914_v59  ;;  %v13086_v26 = vpop.f32.mrf.mxu0  ;;  %v2629_v14 = vld [vmem:[#allocation14 + $0xc8] sm:$0xff] }
 0x3a3   :  { %5872 = vmatprep.mubr.bf16.mxu1 %v12740_v61  ;;  %5913 = vmatprep.mubr.bf16.mxu0 %v12742_v51  ;;  %v13080_v49 = vpop.f32.mrf.mxu1  ;;  %v2633_v59 = vld [vmem:[#allocation14 + $0xe8] sm:$0xff] }
 0x3a4   :  { %5842 = vmatprep.subr.bf16.mxu1 %v9779_v23  ;;  %5883 = vmatprep.subr.bf16.mxu0 %v9907_v55  ;;  %15279 = vst [vmem:[#allocation32_spill] sm:$0xff] %v13080_v49  ;;  %v2757_v23 = vld [vmem:[#allocation14 + $0x4c8] sm:$0xff]  ;;  %v13090_v11 = vpop.f32.mrf.mxu0  ;;  %v9755_v0 = vcombine.high %v2629_v14, %v2633_v59  ;;  %v9754_v4 = vcombine.low %v2629_v14, %v2633_v59 }
 0x3a5   :  { %v13084_v57 = vpop.f32.mrf.mxu1  ;;  %v2761_v55 = vld [vmem:[#allocation14 + $0x4e8] sm:$0xff]  ;;  %15282 = vst [vmem:[#allocation82_spill] sm:$0xff] %v13090_v11 }
 0x3a6   :  { %5843 = vmatpush1.bf16.msra.mxu1 %v9778_v60  ;;  %5884 = vmatpush1.bf16.msra.mxu0 %v9906_v12  ;;  %v9883_v20 = vcombine.high %v2757_v23, %v2761_v55  ;;  %v13094_v12 = vpop.f32.mrf.mxu0  ;;  %v2753_v36 = vld [vmem:[#allocation14 + $0x4a8] sm:$0xff]  ;;  %v9882_v62 = vcombine.low %v2757_v23, %v2761_v55 }
 0x3a7   :  { %5844 = vmatprep.subr.bf16.mxu1 %v9771_v6  ;;  %5885 = vmatprep.subr.bf16.mxu0 %v9899_v56  ;;  %v13088_v13 = vpop.f32.mrf.mxu1  ;;  %v2621_v6 = vld [vmem:[#allocation14 + $0x88] sm:$0xff]  ;;  %v9875_v34 = vcombine.high %v2749_v10, %v2753_v36  ;;  %v9874_v59 = vcombine.low %v2749_v10, %v2753_v36 }
 0x3a8   :  { %15281 = vst [vmem:[#allocation81_spill] sm:$0xff] %v13088_v13  ;;  %v2625_v56 = vld [vmem:[#allocation14 + $0xa8] sm:$0xff]  ;;  %v13098_v3 = vpop.f32.mrf.mxu0 }
 0x3a9   :  { %v13092_v60 = vpop.f32.mrf.mxu1  ;;  %15284 = vst [vmem:[#allocation46_spill] sm:$0xff] %v13098_v3  ;;  %v9747_v39 = vcombine.high %v2621_v6, %v2625_v56  ;;  %v2741_v11 = vld [vmem:[#allocation14 + $0x448] sm:$0xff]  ;;  %v9746_v14 = vcombine.low %v2621_v6, %v2625_v56 }
 0x3aa   :  { %5845 = vmatpush1.bf16.msra.mxu1 %v9770_v35  ;;  %5886 = vmatpush1.bf16.msra.mxu0 %v9898_v41  ;;  %v13102_v41 = vpop.f32.mrf.mxu0  ;;  %v9867_v55 = vcombine.high %v2741_v11, %v2745_v21  ;;  %v2733_v3 = vld [vmem:[#allocation14 + $0x408] sm:$0xff]  ;;  %v9866_v36 = vcombine.low %v2741_v11, %v2745_v21 }
 0x3ab   :  { %5846 = vmatprep.subr.bf16.mxu1 %v9763_v28  ;;  %5887 = vmatprep.subr.bf16.mxu0 %v9891_v29  ;;  %v13096_v25 = vpop.f32.mrf.mxu1  ;;  %v2613_v28 = vld [vmem:[#allocation14 + $0x48] sm:$0xff] }
 0x3ac   :  { %15283 = vst [vmem:[#allocation45_spill] sm:$0xff] %v13096_v25  ;;  %v2617_v29 = vld [vmem:[#allocation14 + $0x68] sm:$0xff]  ;;  %v13106_v25 = vpop.f32.mrf.mxu0 }
 0x3ad   :  { %v13100_v35 = vpop.f32.mrf.mxu1  ;;  %15286 = vst [vmem:[#allocation39_spill] sm:$0xff] %v13106_v25  ;;  %v9739_v23 = vcombine.high %v2613_v28, %v2617_v29  ;;  %v2737_v49 = vld [vmem:[#allocation14 + $0x428] sm:$0xff]  ;;  %v9738_v6 = vcombine.low %v2613_v28, %v2617_v29 }
 0x3ae   :  { %5847 = vmatpush1.bf16.msra.mxu1 %v9762_v32  ;;  %5888 = vmatpush1.bf16.msra.mxu0 %v9890_v9  ;;  %v13110_v9 = vpop.f32.mrf.mxu0  ;;  %v9859_v56 = vcombine.high %v2733_v3, %v2737_v49  ;;  %v2853_v25 = vld [vmem:[#allocation14 + $0x7c8] sm:$0xff]  ;;  %v9858_v21 = vcombine.low %v2733_v3, %v2737_v49 }
 0x3af   :  { %5848 = vmatprep.subr.bf16.mxu1 %v9755_v0  ;;  %5889 = vmatprep.subr.bf16.mxu0 %v9883_v20  ;;  %v13104_v13 = vpop.f32.mrf.mxu1  ;;  %v2605_v0 = vld [vmem:[#allocation14 + $0x8] sm:$0xff]  ;;  %v9979_v29 = vcombine.high %v2853_v25, %v2857_v27  ;;  %v9978_v3 = vcombine.low %v2853_v25, %v2857_v27 }
 0x3b0   :  { %15285 = vst [vmem:[#allocation47_spill] sm:$0xff] %v13104_v13  ;;  %v2609_v20 = vld [vmem:[#allocation14 + $0x28] sm:$0xff]  ;;  %v13114_v13 = vpop.f32.mrf.mxu0 }
 0x3b1   :  { %v13108_v32 = vpop.f32.mrf.mxu1  ;;  %15288 = vst [vmem:[#allocation84_spill] sm:$0xff] %v13114_v13  ;;  %v9731_v10 = vcombine.high %v2605_v0, %v2609_v20  ;;  %v9730_v28 = vcombine.low %v2605_v0, %v2609_v20  ;;  %v2845_v13 = vld [vmem:[#allocation14 + $0x788] sm:$0xff] }
 0x3b2   :  { %5849 = vmatpush1.bf16.msra.mxu1 %v9754_v4  ;;  %5890 = vmatpush1.bf16.msra.mxu0 %v9882_v62  ;;  %v13118_v62 = vpop.f32.mrf.mxu0  ;;  %v2849_v5 = vld [vmem:[#allocation14 + $0x7a8] sm:$0xff] }
 0x3b3   :  { %5850 = vmatprep.subr.bf16.mxu1 %v9747_v39  ;;  %5891 = vmatprep.subr.bf16.mxu0 %v9875_v34  ;;  %v13112_v17 = vpop.f32.mrf.mxu1  ;;  %v2725_v39 = vld [vmem:[#allocation14 + $0x3c8] sm:$0xff]  ;;  %v9971_v20 = vcombine.high %v2845_v13, %v2849_v5  ;;  %v9970_v27 = vcombine.low %v2845_v13, %v2849_v5 }
 0x3b4   :  { %15287 = vst [vmem:[#allocation83_spill] sm:$0xff] %v13112_v17  ;;  %v2729_v34 = vld [vmem:[#allocation14 + $0x3e8] sm:$0xff]  ;;  %v13122_v17 = vpop.f32.mrf.mxu0 }
 0x3b5   :  { %v13116_v4 = vpop.f32.mrf.mxu1  ;;  %15290 = vst [vmem:[#allocation48_spill] sm:$0xff] %v13122_v17  ;;  %v9851_v11 = vcombine.high %v2725_v39, %v2729_v34  ;;  %v9850_v0 = vcombine.low %v2725_v39, %v2729_v34  ;;  %v2837_v17 = vld [vmem:[#allocation14 + $0x748] sm:$0xff] }
 0x3b6   :  { %5851 = vmatpush1.bf16.msra.mxu1 %v9746_v14  ;;  %5892 = vmatpush1.bf16.msra.mxu0 %v9874_v59  ;;  %v13126_v59 = vpop.f32.mrf.mxu0  ;;  %v2841_v18 = vld [vmem:[#allocation14 + $0x768] sm:$0xff] }
 0x3b7   :  { %5852 = vmatprep.subr.bf16.mxu1 %v9739_v23  ;;  %5893 = vmatprep.subr.bf16.mxu0 %v9867_v55  ;;  %v13120_v50 = vpop.f32.mrf.mxu1  ;;  %v2717_v23 = vld [vmem:[#allocation14 + $0x388] sm:$0xff]  ;;  %v9963_v34 = vcombine.high %v2837_v17, %v2841_v18  ;;  %v9962_v5 = vcombine.low %v2837_v17, %v2841_v18 }
 0x3b8   :  { %15289 = vst [vmem:[#allocation40_spill] sm:$0xff] %v13120_v50  ;;  %v2721_v55 = vld [vmem:[#allocation14 + $0x3a8] sm:$0xff]  ;;  %v13130_v50 = vpop.f32.mrf.mxu0 }
 0x3b9   :  { %v13124_v14 = vpop.f32.mrf.mxu1  ;;  %15292 = vst [vmem:[#allocation50_spill] sm:$0xff] %v13130_v50  ;;  %v9843_v49 = vcombine.high %v2717_v23, %v2721_v55  ;;  %v9842_v39 = vcombine.low %v2717_v23, %v2721_v55  ;;  %v2829_v50 = vld [vmem:[#allocation14 + $0x708] sm:$0xff] }
 0x3ba   :  { %5853 = vmatpush1.bf16.msra.mxu1 %v9738_v6  ;;  %5894 = vmatpush1.bf16.msra.mxu0 %v9866_v36  ;;  %v13134_v36 = vpop.f32.mrf.mxu0  ;;  %v9955_v55 = vcombine.high %v2829_v50, %v2833_v33  ;;  %v9954_v17 = vcombine.low %v2829_v50, %v2833_v33 }
 0x3bb   :  { %5854 = vmatprep.subr.bf16.mxu1 %v9731_v10  ;;  %5895 = vmatprep.subr.bf16.mxu0 %v9859_v56  ;;  %v13128_v31 = vpop.f32.mrf.mxu1  ;;  %v2709_v10 = vld [vmem:[#allocation14 + $0x348] sm:$0xff] }
 0x3bc   :  { %15291 = vst [vmem:[#allocation49_spill] sm:$0xff] %v13128_v31  ;;  %v2713_v56 = vld [vmem:[#allocation14 + $0x368] sm:$0xff]  ;;  %v13138_v31 = vpop.f32.mrf.mxu0 }
 0x3bd   :  { %v13132_v6 = vpop.f32.mrf.mxu1  ;;  %15294 = vst [vmem:[#allocation33_spill] sm:$0xff] %v13138_v31  ;;  %v9835_v25 = vcombine.high %v2709_v10, %v2713_v56  ;;  %v9834_v23 = vcombine.low %v2709_v10, %v2713_v56  ;;  %v2821_v31 = vld [vmem:[#allocation14 + $0x6c8] sm:$0xff] }
 0x3be   :  { %5855 = vmatpush1.bf16.msra.mxu1 %v9730_v28  ;;  %5896 = vmatpush1.bf16.msra.mxu0 %v9858_v21  ;;  %v13142_v21 = vpop.f32.mrf.mxu0  ;;  %v9947_v56 = vcombine.high %v2821_v31, %v2825_v45  ;;  %v9946_v33 = vcombine.low %v2821_v31, %v2825_v45 }
 0x3bf   :  { %5856 = vmatprep.subr.bf16.mxu1 %v9851_v11  ;;  %5897 = vmatprep.subr.bf16.mxu0 %v9979_v29  ;;  %v13136_v16 = vpop.f32.mrf.mxu1  ;;  %15295 = vst [vmem:[#allocation57_spill] sm:$0xff] %v13142_v21  ;;  %v2701_v11 = vld [vmem:[#allocation14 + $0x308] sm:$0xff] }
 0x3c0   :  { %15293 = vst [vmem:[#allocation51_spill] sm:$0xff] %v13136_v16  ;;  %v2705_v29 = vld [vmem:[#allocation14 + $0x328] sm:$0xff]  ;;  %v13146_v16 = vpop.f32.mrf.mxu0 }
 0x3c1   :  { %v13140_v28 = vpop.f32.mrf.mxu1  ;;  %15297 = vst [vmem:[#allocation52_spill] sm:$0xff] %v13146_v16  ;;  %v9827_v13 = vcombine.high %v2701_v11, %v2705_v29  ;;  %v9826_v10 = vcombine.low %v2701_v11, %v2705_v29  ;;  %v2817_v16 = vld [vmem:[#allocation14 + $0x6a8] sm:$0xff] }
 0x3c2   :  { %5857 = vmatpush2.bf16.msra.mxu1 %v9850_v0  ;;  %5898 = vmatpush2.bf16.msra.mxu0 %v9978_v3  ;;  %v13150_v3 = vpop.f32.mrf.mxu0 }
 0x3c3   :  { %5858 = vmatprep.subr.bf16.mxu1 %v9843_v49  ;;  %5899 = vmatprep.subr.bf16.mxu0 %v9971_v20  ;;  %v13144_v42 = vpop.f32.mrf.mxu1  ;;  %15299 = vst [vmem:[#allocation54_spill] sm:$0xff] %v13150_v3  ;;  %v2693_v49 = vld [vmem:[#allocation14 + $0x2c8] sm:$0xff] }
 0x3c4   :  { %15296 = vst [vmem:[#allocation58_spill] sm:$0xff] %v13144_v42  ;;  %v2697_v20 = vld [vmem:[#allocation14 + $0x2e8] sm:$0xff]  ;;  %v13154_v42 = vpop.f32.mrf.mxu0 }
 0x3c5   :  { %v13148_v0 = vpop.f32.mrf.mxu1  ;;  %15301 = vst [vmem:[#allocation56_spill] sm:$0xff] %v13154_v42  ;;  %v9819_v18 = vcombine.high %v2693_v49, %v2697_v20  ;;  %v2813_v3 = vld [vmem:[#allocation14 + $0x688] sm:$0xff]  ;;  %v9818_v11 = vcombine.low %v2693_v49, %v2697_v20 }
 0x3c6   :  { %5859 = vmatpush2.bf16.msra.mxu1 %v9842_v39  ;;  %5900 = vmatpush2.bf16.msra.mxu0 %v9970_v27  ;;  %15298 = vst [vmem:[#allocation53_spill] sm:$0xff] %v13148_v0  ;;  %v13158_v27 = vpop.f32.mrf.mxu0  ;;  %v9939_v29 = vcombine.high %v2813_v3, %v2817_v16  ;;  %v2809_v42 = vld [vmem:[#allocation14 + $0x668] sm:$0xff]  ;;  %v9938_v45 = vcombine.low %v2813_v3, %v2817_v16 }
 0x3c7   :  { %5860 = vmatprep.subr.bf16.mxu1 %v9835_v25  ;;  %5901 = vmatprep.subr.bf16.mxu0 %v9963_v34  ;;  %v13152_v1 = vpop.f32.mrf.mxu1  ;;  %15303 = vst [vmem:[#allocation59_spill] sm:$0xff] %v13158_v27  ;;  %v2685_v25 = vld [vmem:[#allocation14 + $0x288] sm:$0xff] }
 0x3c8   :  { %15300 = vst [vmem:[#allocation55_spill] sm:$0xff] %v13152_v1  ;;  %v2689_v34 = vld [vmem:[#allocation14 + $0x2a8] sm:$0xff]  ;;  %v13162_v1 = vpop.f32.mrf.mxu0 }
 0x3c9   :  { %v13156_v39 = vpop.f32.mrf.mxu1  ;;  %15305 = vst [vmem:[#allocation61_spill] sm:$0xff] %v13162_v1  ;;  %v9811_v50 = vcombine.high %v2685_v25, %v2689_v34  ;;  %v2805_v27 = vld [vmem:[#allocation14 + $0x648] sm:$0xff]  ;;  %v9810_v49 = vcombine.low %v2685_v25, %v2689_v34 }
 0x3ca   :  { %5861 = vmatpush2.bf16.msra.mxu1 %v9834_v23  ;;  %5902 = vmatpush2.bf16.msra.mxu0 %v9962_v5  ;;  %15302 = vst [vmem:[#allocation34_spill] sm:$0xff] %v13156_v39  ;;  %v13166_v5 = vpop.f32.mrf.mxu0  ;;  %v9931_v20 = vcombine.high %v2805_v27, %v2809_v42  ;;  %v2801_v1 = vld [vmem:[#allocation14 + $0x628] sm:$0xff]  ;;  %v9930_v16 = vcombine.low %v2805_v27, %v2809_v42 }
 0x3cb   :  { %5862 = vmatprep.subr.bf16.mxu1 %v9827_v13  ;;  %5903 = vmatprep.subr.bf16.mxu0 %v9955_v55  ;;  %v13160_v0 = vpop.f32.mrf.mxu1  ;;  %15307 = vst [vmem:[#allocation63_spill] sm:$0xff] %v13166_v5  ;;  %v2677_v13 = vld [vmem:[#allocation14 + $0x248] sm:$0xff] }
 0x3cc   :  { %15304 = vst [vmem:[#allocation60_spill] sm:$0xff] %v13160_v0  ;;  %v2681_v55 = vld [vmem:[#allocation14 + $0x268] sm:$0xff]  ;;  %v13170_v0 = vpop.f32.mrf.mxu0 }
 0x3cd   :  { %v13164_v23 = vpop.f32.mrf.mxu1  ;;  %15309 = vst [vmem:[#allocation64_spill] sm:$0xff] %v13170_v0  ;;  %v9803_v31 = vcombine.high %v2677_v13, %v2681_v55  ;;  %v2797_v5 = vld [vmem:[#allocation14 + $0x608] sm:$0xff]  ;;  %v9802_v25 = vcombine.low %v2677_v13, %v2681_v55 }
 0x3ce   :  { %5863 = vmatpush2.bf16.msra.mxu1 %v9826_v10  ;;  %5904 = vmatpush2.bf16.msra.mxu0 %v9954_v17  ;;  %15306 = vst [vmem:[#allocation62_spill] sm:$0xff] %v13164_v23  ;;  %v13174_v17 = vpop.f32.mrf.mxu0  ;;  %v9923_v34 = vcombine.high %v2797_v5, %v2801_v1  ;;  %v3049_v0 = vld [vmem:[#allocation14 + $0xde8] sm:$0xff]  ;;  %v9922_v42 = vcombine.low %v2797_v5, %v2801_v1 }
 0x3cf   :  { %5864 = vmatprep.subr.bf16.mxu1 %v9819_v18  ;;  %5905 = vmatprep.subr.bf16.mxu0 %v9947_v56  ;;  %v13168_v39 = vpop.f32.mrf.mxu1  ;;  %15311 = vst [vmem:[#allocation85_spill] sm:$0xff] %v13174_v17  ;;  %v2669_v18 = vld [vmem:[#allocation14 + $0x208] sm:$0xff] }
 0x3d0   :  { %15308 = vst [vmem:[#allocation35_spill] sm:$0xff] %v13168_v39  ;;  %v2673_v56 = vld [vmem:[#allocation14 + $0x228] sm:$0xff]  ;;  %v13178_v39 = vpop.f32.mrf.mxu0 }
 0x3d1   :  { %v13172_v10 = vpop.f32.mrf.mxu1  ;;  %15313 = vst [vmem:[#allocation87_spill] sm:$0xff] %v13178_v39  ;;  %v9795_v3 = vcombine.high %v2669_v18, %v2673_v56  ;;  %v3045_v17 = vld [vmem:[#allocation14 + $0xdc8] sm:$0xff]  ;;  %v9794_v13 = vcombine.low %v2669_v18, %v2673_v56 }
 0x3d2   :  { %5865 = vmatpush2.bf16.msra.mxu1 %v9818_v11  ;;  %5906 = vmatpush2.bf16.msra.mxu0 %v9946_v33  ;;  %15310 = vst [vmem:[#allocation65_spill] sm:$0xff] %v13172_v10  ;;  %v13182_v33 = vpop.f32.mrf.mxu0  ;;  %v10171_v55 = vcombine.high %v3045_v17, %v3049_v0  ;;  %v2913_v39 = vld [vmem:[#allocation14 + $0x9a8] sm:$0xff]  ;;  %v10170_v1 = vcombine.low %v3045_v17, %v3049_v0 }
 0x3d3   :  { %5866 = vmatprep.subr.bf16.mxu1 %v9811_v50  ;;  %5907 = vmatprep.subr.bf16.mxu0 %v9939_v29  ;;  %v13176_v23 = vpop.f32.mrf.mxu1  ;;  %15315 = vst [vmem:[#allocation89_spill] sm:$0xff] %v13182_v33  ;;  %v2917_v50 = vld [vmem:[#allocation14 + $0x9c8] sm:$0xff] }
 0x3d4   :  { %15312 = vst [vmem:[#allocation86_spill] sm:$0xff] %v13176_v23  ;;  %v2921_v29 = vld [vmem:[#allocation14 + $0x9e8] sm:$0xff]  ;;  %v13186_v23 = vpop.f32.mrf.mxu0 }
 0x3d5   :  { %v13180_v11 = vpop.f32.mrf.mxu1  ;;  %15317 = vst [vmem:[#allocation91_spill] sm:$0xff] %v13186_v23  ;;  %v10043_v27 = vcombine.high %v2917_v50, %v2921_v29  ;;  %v3041_v23 = vld [vmem:[#allocation14 + $0xda8] sm:$0xff]  ;;  %v10042_v18 = vcombine.low %v2917_v50, %v2921_v29 }
 0x3d6   :  { %5867 = vmatpush2.bf16.msra.mxu1 %v9810_v49  ;;  %5908 = vmatpush2.bf16.msra.mxu0 %v9938_v45  ;;  %15314 = vst [vmem:[#allocation88_spill] sm:$0xff] %v13180_v11  ;;  %v13190_v45 = vpop.f32.mrf.mxu0  ;;  %v3037_v11 = vld [vmem:[#allocation14 + $0xd88] sm:$0xff] }
 0x3d7   :  { %5868 = vmatprep.subr.bf16.mxu1 %v9803_v31  ;;  %5909 = vmatprep.subr.bf16.mxu0 %v9931_v20  ;;  %v13184_v10 = vpop.f32.mrf.mxu1  ;;  %15319 = vst [vmem:[#allocation93_spill] sm:$0xff] %v13190_v45  ;;  %v2909_v31 = vld [vmem:[#allocation14 + $0x988] sm:$0xff]  ;;  %v10162_v17 = vcombine.low %v3037_v11, %v3041_v23 }
 0x3d8   :  { %15316 = vst [vmem:[#allocation90_spill] sm:$0xff] %v13184_v10  ;;  %v13194_v33 = vpop.f32.mrf.mxu0  ;;  %v3029_v50 = vld [vmem:[#allocation14 + $0xd48] sm:$0xff]  ;;  %v10034_v0 = vcombine.low %v2909_v31, %v2913_v39 }
 0x3d9   :  { %v13188_v49 = vpop.f32.mrf.mxu1  ;;  %15321 = vst [vmem:[#allocation95_spill] sm:$0xff] %v13194_v33  ;;  %v3033_v29 = vld [vmem:[#allocation14 + $0xd68] sm:$0xff] }
 0x3da   :  { %5869 = vmatpush2.bf16.msra.mxu1 %v9802_v25  ;;  %5910 = vmatpush2.bf16.msra.mxu0 %v9930_v16  ;;  %15318 = vst [vmem:[#allocation92_spill] sm:$0xff] %v13188_v49  ;;  %v13198_v56 = vpop.f32.mrf.mxu0  ;;  %v10035_v25 = vcombine.high %v2909_v31, %v2913_v39  ;;  %v10163_v16 = vcombine.high %v3037_v11, %v3041_v23  ;;  %v2893_v45 = vld [vmem:[#allocation14 + $0x908] sm:$0xff] }
 0x3db   :  { %5870 = vmatprep.subr.bf16.mxu1 %v9795_v3  ;;  %5911 = vmatprep.subr.bf16.mxu0 %v9923_v34  ;;  %v13192_v20 = vpop.f32.mrf.mxu1  ;;  %15323 = vst [vmem:[#allocation97_spill] sm:$0xff] %v13198_v56  ;;  %v2901_v3 = vld [vmem:[#allocation14 + $0x948] sm:$0xff]  ;;  %v10155_v56 = vcombine.high %v3029_v50, %v3033_v29  ;;  %v10154_v23 = vcombine.low %v3029_v50, %v3033_v29 }
 0x3dc   :  { %15320 = vst [vmem:[#allocation94_spill] sm:$0xff] %v13192_v20  ;;  %v2905_v34 = vld [vmem:[#allocation14 + $0x968] sm:$0xff] }
 0x3dd   :  { %v13196_v5 = vpop.f32.mrf.mxu1  ;;  %v3021_v20 = vld [vmem:[#allocation14 + $0xd08] sm:$0xff]  ;;  %v10026_v31 = vcombine.low %v2901_v3, %v2905_v34 }
 0x3de   :  { %5871 = vmatpush2.bf16.msra.mxu1 %v9794_v13  ;;  %5912 = vmatpush2.bf16.msra.mxu0 %v9922_v42  ;;  %15322 = vst [vmem:[#allocation96_spill] sm:$0xff] %v13196_v5  ;;  %v13204_v13 = vpop.f32.mrf.mxu0  ;;  %v10027_v42 = vcombine.high %v2901_v3, %v2905_v34  ;;  %v3025_v39 = vld [vmem:[#allocation14 + $0xd28] sm:$0xff] }
 0x3df   :  { %5922 = vmatprep.subr.bf16.mxu1 %v10043_v27  ;;  %5963 = vmatprep.subr.bf16.mxu0 %v10171_v55  ;;  %v13202_v33 = vpop.f32.mrf.mxu1  ;;  %15325 = vst [vmem:[#allocation99_spill] sm:$0xff] %v13204_v13  ;;  %v2897_v13 = vld [vmem:[#allocation14 + $0x928] sm:$0xff] }
 0x3e0   :  { %15324 = vst [vmem:[#allocation98_spill] sm:$0xff] %v13202_v33  ;;  %v13210_v55 = vpop.f32.mrf.mxu0  ;;  %v10019_v11 = vcombine.high %v2893_v45, %v2897_v13  ;;  %v3013_v5 = vld [vmem:[#allocation14 + $0xcc8] sm:$0xff] }
 0x3e1   :  { %5873 = vmatmul.mubr.bf16.vlgmr.msra.gmra.mxu1 %v12731_v43  ;;  %5914 = vmatmul.mubr.bf16.vlgmr.msra.gmra.mxu0 %v12744_v38  ;;  %v13208_v27 = vpop.f32.mrf.mxu1  ;;  %15327 = vst [vmem:[#allocation101_spill] sm:$0xff] %v13210_v55 }
 0x3e2   :  { %5923 = vmatpush1.bf16.msra.mxu1 %v10042_v18  ;;  %5954 = vmatprep.mubr.bf16.mxu1 %v13039_v53  ;;  %15326 = vst [vmem:[#allocation100_spill] sm:$0xff] %v13208_v27  ;;  %v13214_v18 = vpop.f32.mrf.mxu0  ;;  %v2889_v27 = vld [vmem:[#allocation14 + $0x8e8] sm:$0xff] }
 0x3e3   :  { %5964 = vmatpush1.bf16.msra.mxu0 %v10170_v1  ;;  %5995 = vmatprep.mubr.bf16.mxu0 %v13041_v8  ;;  %v13212_v33 = vpop.f32.mrf.mxu1  ;;  %15329 = vst [vmem:[#allocation103_spill] sm:$0xff] %v13214_v18  ;;  %v10018_v18 = vcombine.low %v2893_v45, %v2897_v13 }
 0x3e4   :  { %5924 = vmatprep.subr.bf16.mxu1 %v10035_v25  ;;  %5965 = vmatprep.subr.bf16.mxu0 %v10163_v16  ;;  %15328 = vst [vmem:[#allocation102_spill] sm:$0xff] %v13212_v33  ;;  %v13218_v55 = vpop.f32.mrf.mxu0  ;;  %v10147_v25 = vcombine.high %v3021_v20, %v3025_v39  ;;  %v2885_v16 = vld [vmem:[#allocation14 + $0x8c8] sm:$0xff] }
 0x3e5   :  { %v13216_v1 = vpop.f32.mrf.mxu1  ;;  %15331 = vst [vmem:[#allocation105_spill] sm:$0xff] %v13218_v55  ;;  %v3017_v33 = vld [vmem:[#allocation14 + $0xce8] sm:$0xff]  ;;  %v10011_v50 = vcombine.high %v2885_v16, %v2889_v27 }
 0x3e6   :  { %5925 = vmatpush1.bf16.msra.mxu1 %v10034_v0  ;;  %15330 = vst [vmem:[#allocation104_spill] sm:$0xff] %v13216_v1  ;;  %v10146_v0 = vcombine.low %v3021_v20, %v3025_v39  ;;  %v13222_v34 = vpop.f32.mrf.mxu0  ;;  %v10139_v29 = vcombine.high %v3013_v5, %v3017_v33  ;;  %v3009_v55 = vld [vmem:[#allocation14 + $0xca8] sm:$0xff]  ;;  %v10010_v1 = vcombine.low %v2885_v16, %v2889_v27 }
 0x3e7   :  { %5966 = vmatpush1.bf16.msra.mxu0 %v10162_v17  ;;  %5926 = vmatprep.subr.bf16.mxu1 %v10027_v42  ;;  %v13220_v3 = vpop.f32.mrf.mxu1  ;;  %15333 = vst [vmem:[#allocation107_spill] sm:$0xff] %v13222_v34  ;;  %v2877_v17 = vld [vmem:[#allocation14 + $0x888] sm:$0xff] }
 0x3e8   :  { %5967 = vmatprep.subr.bf16.mxu0 %v10155_v56  ;;  %15332 = vst [vmem:[#allocation106_spill] sm:$0xff] %v13220_v3  ;;  %v2881_v42 = vld [vmem:[#allocation14 + $0x8a8] sm:$0xff]  ;;  %v13226_v13 = vpop.f32.mrf.mxu0 }
 0x3e9   :  { %v3005_v56 = vld [vmem:[#allocation14 + $0xc88] sm:$0xff]  ;;  %v13224_v45 = vpop.f32.mrf.mxu1  ;;  %15335 = vst [vmem:[#allocation109_spill] sm:$0xff] %v13226_v13  ;;  %v10003_v20 = vcombine.high %v2877_v17, %v2881_v42  ;;  %v10002_v3 = vcombine.low %v2877_v17, %v2881_v42 }
 0x3ea   :  { %5927 = vmatpush1.bf16.msra.mxu1 %v10026_v31  ;;  %v10138_v31 = vcombine.low %v3013_v5, %v3017_v33  ;;  %15334 = vst [vmem:[#allocation108_spill] sm:$0xff] %v13224_v45  ;;  %v10131_v39 = vcombine.high %v3005_v56, %v3009_v55  ;;  %v3001_v34 = vld [vmem:[#allocation14 + $0xc68] sm:$0xff]  ;;  %v13230_v27 = vpop.f32.mrf.mxu0  ;;  %v10130_v33 = vcombine.low %v3005_v56, %v3009_v55 }
 0x3eb   :  { %5968 = vmatpush1.bf16.msra.mxu0 %v10154_v23  ;;  %5928 = vmatprep.subr.bf16.mxu1 %v10019_v11  ;;  %v2869_v23 = vld [vmem:[#allocation14 + $0x848] sm:$0xff]  ;;  %v13228_v49 = vpop.f32.mrf.mxu1  ;;  %15337 = vst [vmem:[#allocation111_spill] sm:$0xff] %v13230_v27 }
 0x3ec   :  { %5969 = vmatprep.subr.bf16.mxu0 %v10147_v25  ;;  %v2873_v11 = vld [vmem:[#allocation14 + $0x868] sm:$0xff]  ;;  %15336 = vst [vmem:[#allocation110_spill] sm:$0xff] %v13228_v49 }
 0x3ed   :  { %v2997_v25 = vld [vmem:[#allocation14 + $0xc48] sm:$0xff]  ;;  %v9995_v5 = vcombine.high %v2869_v23, %v2873_v11  ;;  %v9994_v13 = vcombine.low %v2869_v23, %v2873_v11  ;;  %v13232_v45 = vpop.f32.mrf.mxu1 }
 0x3ee   :  { %5929 = vmatpush1.bf16.msra.mxu1 %v10018_v18  ;;  %v10123_v18 = vcombine.high %v2997_v25, %v3001_v34  ;;  %v2861_v16 = vld [vmem:[#allocation14 + $0x808] sm:$0xff]  ;;  %15338 = vst [vmem:[#allocation112_spill] sm:$0xff] %v13232_v45  ;;  %v10122_v17 = vcombine.low %v2997_v25, %v3001_v34 }
 0x3ef   :  { %5970 = vmatpush1.bf16.msra.mxu0 %v10146_v0  ;;  %5930 = vmatprep.subr.bf16.mxu1 %v10011_v50  ;;  %v2865_v0 = vld [vmem:[#allocation14 + $0x828] sm:$0xff]  ;;  %v13236_v49 = vpop.f32.mrf.mxu1 }
 0x3f0   :  { %5971 = vmatprep.subr.bf16.mxu0 %v10139_v29  ;;  %v2989_v50 = vld [vmem:[#allocation14 + $0xc08] sm:$0xff]  ;;  %v9987_v42 = vcombine.high %v2861_v16, %v2865_v0  ;;  %v9986_v27 = vcombine.low %v2861_v16, %v2865_v0  ;;  %15340 = vst [vmem:[#allocation114_spill] sm:$0xff] %v13236_v49 }
 0x3f1   :  { %v2993_v29 = vld [vmem:[#allocation14 + $0xc28] sm:$0xff]  ;;  %v13240_v45 = vpop.f32.mrf.mxu1 }
 0x3f2   :  { %5931 = vmatpush1.bf16.msra.mxu1 %v10010_v1  ;;  %v13234_v1 = vpop.f32.mrf.mxu0  ;;  %v2981_v55 = vld [vmem:[#allocation14 + $0xbc8] sm:$0xff]  ;;  %v10114_v23 = vcombine.low %v2989_v50, %v2993_v29  ;;  %15342 = vst [vmem:[#allocation116_spill] sm:$0xff] %v13240_v45 }
 0x3f3   :  { %5972 = vmatpush1.bf16.msra.mxu0 %v10138_v31  ;;  %5932 = vmatprep.subr.bf16.mxu1 %v10003_v20  ;;  %15339 = vst [vmem:[#allocation113_spill] sm:$0xff] %v13234_v1  ;;  %v10115_v31 = vcombine.high %v2989_v50, %v2993_v29  ;;  %v2985_v56 = vld [vmem:[#allocation14 + $0xbe8] sm:$0xff]  ;;  %v13244_v49 = vpop.f32.mrf.mxu1 }
 0x3f4   :  { %5973 = vmatprep.subr.bf16.mxu0 %v10131_v39  ;;  %v3109_v20 = vld [vmem:[#allocation14 + $0xfc8] sm:$0xff]  ;;  %v10107_v11 = vcombine.high %v2981_v55, %v2985_v56  ;;  %v10106_v1 = vcombine.low %v2981_v55, %v2985_v56  ;;  %15344 = vst [vmem:[#allocation118_spill] sm:$0xff] %v13244_v49 }
 0x3f5   :  { %v3113_v39 = vld [vmem:[#allocation14 + $0xfe8] sm:$0xff]  ;;  %v13248_v45 = vpop.f32.mrf.mxu1 }
 0x3f6   :  { %5933 = vmatpush1.bf16.msra.mxu1 %v10002_v3  ;;  %v13238_v3 = vpop.f32.mrf.mxu0  ;;  %v2973_v34 = vld [vmem:[#allocation14 + $0xb88] sm:$0xff]  ;;  %v10234_v16 = vcombine.low %v3109_v20, %v3113_v39  ;;  %15346 = vst [vmem:[#allocation120_spill] sm:$0xff] %v13248_v45 }
 0x3f7   :  { %5974 = vmatpush1.bf16.msra.mxu0 %v10130_v33  ;;  %5934 = vmatprep.subr.bf16.mxu1 %v9995_v5  ;;  %15341 = vst [vmem:[#allocation115_spill] sm:$0xff] %v13238_v3  ;;  %v10235_v33 = vcombine.high %v3109_v20, %v3113_v39  ;;  %v2977_v25 = vld [vmem:[#allocation14 + $0xba8] sm:$0xff]  ;;  %v13252_v49 = vpop.f32.mrf.mxu1 }
 0x3f8   :  { %5975 = vmatprep.subr.bf16.mxu0 %v10123_v18  ;;  %v3101_v5 = vld [vmem:[#allocation14 + $0xf88] sm:$0xff]  ;;  %v10099_v0 = vcombine.high %v2973_v34, %v2977_v25  ;;  %v10098_v3 = vcombine.low %v2973_v34, %v2977_v25  ;;  %15348 = vst [vmem:[#allocation122_spill] sm:$0xff] %v13252_v49 }
 0x3f9   :  { %v3105_v18 = vld [vmem:[#allocation14 + $0xfa8] sm:$0xff]  ;;  %v13256_v45 = vpop.f32.mrf.mxu1 }
 0x3fa   :  { %5935 = vmatpush1.bf16.msra.mxu1 %v9994_v13  ;;  %v13242_v13 = vpop.f32.mrf.mxu0  ;;  %v2965_v50 = vld [vmem:[#allocation14 + $0xb48] sm:$0xff]  ;;  %v10226_v55 = vcombine.low %v3101_v5, %v3105_v18  ;;  %15350 = vst [vmem:[#allocation124_spill] sm:$0xff] %v13256_v45 }
 0x3fb   :  { %5976 = vmatpush1.bf16.msra.mxu0 %v10122_v17  ;;  %5936 = vmatprep.subr.bf16.mxu1 %v9987_v42  ;;  %15343 = vst [vmem:[#allocation117_spill] sm:$0xff] %v13242_v13  ;;  %v10227_v17 = vcombine.high %v3101_v5, %v3105_v18  ;;  %v2969_v29 = vld [vmem:[#allocation14 + $0xb68] sm:$0xff]  ;;  %v13260_v49 = vpop.f32.mrf.mxu1 }
 0x3fc   :  { %5977 = vmatprep.subr.bf16.mxu0 %v10115_v31  ;;  %v3093_v42 = vld [vmem:[#allocation14 + $0xf48] sm:$0xff]  ;;  %v10091_v56 = vcombine.high %v2965_v50, %v2969_v29  ;;  %v10090_v13 = vcombine.low %v2965_v50, %v2969_v29  ;;  %15352 = vst [vmem:[#allocation126_spill] sm:$0xff] %v13260_v49 }
 0x3fd   :  { %v3097_v31 = vld [vmem:[#allocation14 + $0xf68] sm:$0xff]  ;;  %v13264_v45 = vpop.f32.mrf.mxu1 }
 0x3fe   :  { %5937 = vmatpush1.bf16.msra.mxu1 %v9986_v27  ;;  %v13246_v27 = vpop.f32.mrf.mxu0  ;;  %v2957_v20 = vld [vmem:[#allocation14 + $0xb08] sm:$0xff]  ;;  %v10218_v34 = vcombine.low %v3093_v42, %v3097_v31  ;;  %15354 = vst [vmem:[#allocation128_spill] sm:$0xff] %v13264_v45 }
 0x3ff   :  { %5978 = vmatpush1.bf16.msra.mxu0 %v10114_v23  ;;  %5938 = vmatprep.subr.bf16.mxu1 %v10107_v11  ;;  %15345 = vst [vmem:[#allocation119_spill] sm:$0xff] %v13246_v27  ;;  %v10219_v23 = vcombine.high %v3093_v42, %v3097_v31  ;;  %v2961_v39 = vld [vmem:[#allocation14 + $0xb28] sm:$0xff]  ;;  %v13268_v49 = vpop.f32.mrf.mxu1 }
 0x400   :  { %5979 = vmatprep.subr.bf16.mxu0 %v10235_v33  ;;  %v3085_v11 = vld [vmem:[#allocation14 + $0xf08] sm:$0xff]  ;;  %v10083_v25 = vcombine.high %v2957_v20, %v2961_v39  ;;  %v10082_v27 = vcombine.low %v2957_v20, %v2961_v39  ;;  %15356 = vst [vmem:[#allocation130_spill] sm:$0xff] %v13268_v49  ;;  %v2638_v49 = vld [vmem:[#allocation14 + $0x110] sm:$0xff] }
 0x401   :  { %v3089_v33 = vld [vmem:[#allocation14 + $0xf28] sm:$0xff]  ;;  %v13272_v45 = vpop.f32.mrf.mxu1 }
 0x402   :  { %5939 = vmatpush2.bf16.msra.mxu1 %v10106_v1  ;;  %v13250_v1 = vpop.f32.mrf.mxu0  ;;  %v2949_v5 = vld [vmem:[#allocation14 + $0xac8] sm:$0xff]  ;;  %v10210_v50 = vcombine.low %v3085_v11, %v3089_v33  ;;  %15358 = vst [vmem:[#allocation132_spill] sm:$0xff] %v13272_v45  ;;  %v2642_v45 = vld [vmem:[#allocation14 + $0x130] sm:$0xff] }
 0x403   :  { %5980 = vmatpush2.bf16.msra.mxu0 %v10234_v16  ;;  %5940 = vmatprep.subr.bf16.mxu1 %v10099_v0  ;;  %15347 = vst [vmem:[#allocation121_spill] sm:$0xff] %v13250_v1  ;;  %v10211_v16 = vcombine.high %v3085_v11, %v3089_v33  ;;  %v2953_v18 = vld [vmem:[#allocation14 + $0xae8] sm:$0xff] }
 0x404   :  { %5981 = vmatprep.subr.bf16.mxu0 %v10227_v17  ;;  %v3077_v0 = vld [vmem:[#allocation14 + $0xec8] sm:$0xff]  ;;  %v10075_v29 = vcombine.high %v2949_v5, %v2953_v18  ;;  %v10074_v1 = vcombine.low %v2949_v5, %v2953_v18 }
 0x405   :  { %v3081_v17 = vld [vmem:[#allocation14 + $0xee8] sm:$0xff] }
 0x406   :  { %5941 = vmatpush2.bf16.msra.mxu1 %v10098_v3  ;;  %v13254_v3 = vpop.f32.mrf.mxu0  ;;  %v2941_v42 = vld [vmem:[#allocation14 + $0xa88] sm:$0xff]  ;;  %v10202_v20 = vcombine.low %v3077_v0, %v3081_v17 }
 0x407   :  { %5982 = vmatpush2.bf16.msra.mxu0 %v10226_v55  ;;  %5942 = vmatprep.subr.bf16.mxu1 %v10091_v56  ;;  %15349 = vst [vmem:[#allocation123_spill] sm:$0xff] %v13254_v3  ;;  %v10203_v55 = vcombine.high %v3077_v0, %v3081_v17  ;;  %v2945_v31 = vld [vmem:[#allocation14 + $0xaa8] sm:$0xff] }
 0x408   :  { %5983 = vmatprep.subr.bf16.mxu0 %v10219_v23  ;;  %v3069_v56 = vld [vmem:[#allocation14 + $0xe88] sm:$0xff]  ;;  %v10067_v39 = vcombine.high %v2941_v42, %v2945_v31  ;;  %v10066_v3 = vcombine.low %v2941_v42, %v2945_v31 }
 0x409   :  { %v3073_v23 = vld [vmem:[#allocation14 + $0xea8] sm:$0xff] }
 0x40a   :  { %5943 = vmatpush2.bf16.msra.mxu1 %v10090_v13  ;;  %v13258_v13 = vpop.f32.mrf.mxu0  ;;  %v2933_v11 = vld [vmem:[#allocation14 + $0xa48] sm:$0xff]  ;;  %v10194_v5 = vcombine.low %v3069_v56, %v3073_v23 }
 0x40b   :  { %5984 = vmatpush2.bf16.msra.mxu0 %v10218_v34  ;;  %5944 = vmatprep.subr.bf16.mxu1 %v10083_v25  ;;  %15351 = vst [vmem:[#allocation125_spill] sm:$0xff] %v13258_v13  ;;  %v10195_v34 = vcombine.high %v3069_v56, %v3073_v23  ;;  %v2937_v33 = vld [vmem:[#allocation14 + $0xa68] sm:$0xff]  ;;  %v2662_v56 = vld [vmem:[#allocation14 + $0x1d0] sm:$0xff] }
 0x40c   :  { %5985 = vmatprep.subr.bf16.mxu0 %v10211_v16  ;;  %v3061_v25 = vld [vmem:[#allocation14 + $0xe48] sm:$0xff]  ;;  %v10059_v18 = vcombine.high %v2933_v11, %v2937_v33  ;;  %v10058_v13 = vcombine.low %v2933_v11, %v2937_v33  ;;  %v2666_v23 = vld [vmem:[#allocation14 + $0x1f0] sm:$0xff] }
 0x40d   :  { %v3065_v16 = vld [vmem:[#allocation14 + $0xe68] sm:$0xff]  ;;  %v9789_v33 = vcombine.high %v2662_v56, %v2666_v23 }
 0x40e   :  { %5945 = vmatpush2.bf16.msra.mxu1 %v10082_v27  ;;  %v13262_v27 = vpop.f32.mrf.mxu0  ;;  %v2925_v0 = vld [vmem:[#allocation14 + $0xa08] sm:$0xff]  ;;  %v10186_v42 = vcombine.low %v3061_v25, %v3065_v16 }
 0x40f   :  { %5986 = vmatpush2.bf16.msra.mxu0 %v10210_v50  ;;  %5946 = vmatprep.subr.bf16.mxu1 %v10075_v29  ;;  %15353 = vst [vmem:[#allocation127_spill] sm:$0xff] %v13262_v27  ;;  %v10187_v50 = vcombine.high %v3061_v25, %v3065_v16  ;;  %v2929_v17 = vld [vmem:[#allocation14 + $0xa28] sm:$0xff]  ;;  %v2654_v25 = vld [vmem:[#allocation14 + $0x190] sm:$0xff] }
 0x410   :  { %5987 = vmatprep.subr.bf16.mxu0 %v10203_v55  ;;  %v3053_v29 = vld [vmem:[#allocation14 + $0xe08] sm:$0xff]  ;;  %v10051_v31 = vcombine.high %v2925_v0, %v2929_v17  ;;  %v10050_v27 = vcombine.low %v2925_v0, %v2929_v17  ;;  %v2658_v16 = vld [vmem:[#allocation14 + $0x1b0] sm:$0xff] }
 0x411   :  { %v3057_v55 = vld [vmem:[#allocation14 + $0xe28] sm:$0xff]  ;;  %v9781_v17 = vcombine.high %v2654_v25, %v2658_v16 }
 0x412   :  { %5947 = vmatpush2.bf16.msra.mxu1 %v10074_v1  ;;  %v13266_v1 = vpop.f32.mrf.mxu0  ;;  %v10178_v11 = vcombine.low %v3053_v29, %v3057_v55 }
 0x413   :  { %5988 = vmatpush2.bf16.msra.mxu0 %v10202_v20  ;;  %5948 = vmatprep.subr.bf16.mxu1 %v10067_v39  ;;  %15355 = vst [vmem:[#allocation129_spill] sm:$0xff] %v13266_v1  ;;  %v10179_v20 = vcombine.high %v3053_v29, %v3057_v55  ;;  %v2790_v39 = vld [vmem:[#allocation14 + $0x5d0] sm:$0xff] }
 0x414   :  { %5989 = vmatprep.subr.bf16.mxu0 %v10195_v34  ;;  %v2794_v34 = vld [vmem:[#allocation14 + $0x5f0] sm:$0xff] }
 0x415   :  { %v2786_v1 = vld [vmem:[#allocation14 + $0x5b0] sm:$0xff]  ;;  %v9916_v0 = vcombine.low %v2790_v39, %v2794_v34  ;;  %v5710_v55 = vpop.f32.mrf.mxu1 }
 0x416   :  { %5949 = vmatpush2.bf16.msra.mxu1 %v10066_v3  ;;  %v13270_v3 = vpop.f32.mrf.mxu0  ;;  %v2650_v29 = vld [vmem:[#allocation14 + $0x170] sm:$0xff] }
 0x417   :  { %5990 = vmatpush2.bf16.msra.mxu0 %v10194_v5  ;;  %5950 = vmatprep.subr.bf16.mxu1 %v10059_v18  ;;  %15357 = vst [vmem:[#allocation131_spill] sm:$0xff] %v13270_v3  ;;  %v9917_v5 = vcombine.high %v2790_v39, %v2794_v34  ;;  %v9788_v18 = vcombine.low %v2662_v56, %v2666_v23  ;;  %v2778_v56 = vld [vmem:[#allocation14 + $0x570] sm:$0xff]  ;;  %v5712_v39 = vpop.f32.mrf.mxu1 }
 0x418   :  { %5991 = vmatprep.subr.bf16.mxu0 %v10187_v50  ;;  %v2782_v50 = vld [vmem:[#allocation14 + $0x590] sm:$0xff] }
 0x41a   :  { %5951 = vmatpush2.bf16.msra.mxu1 %v10058_v13  ;;  %v13274_v13 = vpop.f32.mrf.mxu0 }
 0x41b   :  { %5992 = vmatpush2.bf16.msra.mxu0 %v10186_v42  ;;  %5952 = vmatprep.subr.bf16.mxu1 %v10051_v31  ;;  %15359 = vst [vmem:[#allocation133_spill] sm:$0xff] %v13274_v13  ;;  %v2646_v42 = vld [vmem:[#allocation14 + $0x150] sm:$0xff]  ;;  %v9780_v13 = vcombine.low %v2654_v25, %v2658_v16 }
 0x41c   :  { %5993 = vmatprep.subr.bf16.mxu0 %v10179_v20  ;;  %v5751_v31 = vpop.f32.mrf.mxu0  ;;  %v9909_v20 = vcombine.high %v2782_v50, %v2786_v1  ;;  %v2770_v25 = vld [vmem:[#allocation14 + $0x530] sm:$0xff]  ;;  %v9772_v16 = vcombine.low %v2646_v42, %v2650_v29 }
 0x41d   :  { %v13278_v23 = vadd.f32 %v5751_v31, %v5710_v55  ;;  %v5714_v55 = vpop.f32.mrf.mxu1 }
 0x41e   :  { %5953 = vmatpush2.bf16.msra.mxu1 %v10050_v27  ;;  %v2774_v27 = vld [vmem:[#allocation14 + $0x550] sm:$0xff]  ;;  %v5753_v34 = vpop.f32.mrf.mxu0 }
 0x41f   :  { %5994 = vmatpush2.bf16.msra.mxu0 %v10178_v11  ;;  %6004 = vmatprep.subr.bf16.mxu1 %v9789_v33  ;;  %v9908_v11 = vcombine.low %v2782_v50, %v2786_v1  ;;  %v9773_v33 = vcombine.high %v2646_v42, %v2650_v29  ;;  %v9901_v3 = vcombine.high %v2774_v27, %v2778_v56  ;;  %v2622_v42 = vld [vmem:[#allocation14 + $0x90] sm:$0xff] }
 0x420   :  { %6045 = vmatprep.subr.bf16.mxu0 %v9917_v5  ;;  %v13282_v5 = vadd.f32 %v5753_v34, %v5712_v39  ;;  %v5755_v31 = vpop.f32.mrf.mxu0  ;;  %v9900_v1 = vcombine.low %v2774_v27, %v2778_v56  ;;  %v9765_v50 = vcombine.high %v2638_v49, %v2642_v45  ;;  %v2630_v34 = vld [vmem:[#allocation14 + $0xd0] sm:$0xff] }
 0x421   :  { %5955 = vmatmul.mubr.bf16.vlgmr.msra.gmra.mxu1 %v13060_v46  ;;  %v2626_v29 = vld [vmem:[#allocation14 + $0xb0] sm:$0xff] }
 0x422   :  { %5996 = vmatmul.mubr.bf16.vlgmr.msra.gmra.mxu0 %v13062_v15  ;;  %6005 = vmatpush1.bf16.msra.mxu1 %v9788_v18  ;;  %v2766_v18 = vld [vmem:[#allocation14 + $0x510] sm:$0xff]  ;;  %v5756_v10 = vpop.f32.mrf.mxu0  ;;  %v9749_v56 = vcombine.high %v2622_v42, %v2626_v29 }
 0x423   :  { %6036 = vmatprep.mubr.bf16.mxu1 %v12740_v61  ;;  %6046 = vmatpush1.bf16.msra.mxu0 %v9916_v0  ;;  %v5715_v0 = vpop.f32.mrf.mxu1  ;;  %v9893_v39 = vcombine.high %v2766_v18, %v2770_v25  ;;  %v9892_v55 = vcombine.low %v2766_v18, %v2770_v25  ;;  %v2750_v10 = vld [vmem:[#allocation14 + $0x490] sm:$0xff]  ;;  %v9748_v18 = vcombine.low %v2622_v42, %v2626_v29 }
 0x424   :  { %6077 = vmatprep.mubr.bf16.mxu0 %v12742_v51  ;;  %6006 = vmatprep.subr.bf16.mxu1 %v9781_v17  ;;  %v2634_v17 = vld [vmem:[#allocation14 + $0xf0] sm:$0xff] }
 0x425   :  { %6047 = vmatprep.subr.bf16.mxu0 %v9909_v20  ;;  %v9764_v20 = vcombine.low %v2638_v49, %v2642_v45  ;;  %v9757_v31 = vcombine.high %v2630_v34, %v2634_v17  ;;  %v9756_v27 = vcombine.low %v2630_v34, %v2634_v17  ;;  %v2618_v49 = vld [vmem:[#allocation14 + $0x70] sm:$0xff] }
 0x426   :  { %6007 = vmatpush1.bf16.msra.mxu1 %v9780_v13  ;;  %v9885_v13 = vcombine.high %v2758_v22, %v2762_v2  ;;  %v2742_v45 = vld [vmem:[#allocation14 + $0x450] sm:$0xff] }
 0x427   :  { %6048 = vmatpush1.bf16.msra.mxu0 %v9908_v11  ;;  %6008 = vmatprep.subr.bf16.mxu1 %v9773_v33  ;;  %v2754_v11 = vld [vmem:[#allocation14 + $0x4b0] sm:$0xff] }
 0x428   :  { %6049 = vmatprep.subr.bf16.mxu0 %v9901_v3  ;;  %v9884_v3 = vcombine.low %v2758_v22, %v2762_v2  ;;  %v9877_v33 = vcombine.high %v2750_v10, %v2754_v11  ;;  %v2746_v0 = vld [vmem:[#allocation14 + $0x470] sm:$0xff]  ;;  %v9876_v25 = vcombine.low %v2750_v10, %v2754_v11 }
 0x429   :  { %v2610_v34 = vld [vmem:[#allocation14 + $0x30] sm:$0xff]  ;;  %v9868_v2 = vcombine.low %v2742_v45, %v2746_v0 }
 0x42a   :  { %6009 = vmatpush1.bf16.msra.mxu1 %v9772_v16  ;;  %v2614_v16 = vld [vmem:[#allocation14 + $0x50] sm:$0xff] }
 0x42b   :  { %6050 = vmatpush1.bf16.msra.mxu0 %v9900_v1  ;;  %6010 = vmatprep.subr.bf16.mxu1 %v9765_v50  ;;  %v9741_v1 = vcombine.high %v2614_v16, %v2618_v49  ;;  %v9869_v50 = vcombine.high %v2742_v45, %v2746_v0  ;;  %v2734_v17 = vld [vmem:[#allocation14 + $0x410] sm:$0xff]  ;;  %v9740_v22 = vcombine.low %v2614_v16, %v2618_v49 }
 0x42c   :  { %6051 = vmatprep.subr.bf16.mxu0 %v9893_v39  ;;  %v2606_v39 = vld [vmem:[#allocation14 + $0x10] sm:$0xff] }
 0x42d   :  { %v2730_v42 = vld [vmem:[#allocation14 + $0x3f0] sm:$0xff]  ;;  %v9732_v10 = vcombine.low %v2606_v39, %v2610_v34 }
 0x42e   :  { %6011 = vmatpush1.bf16.msra.mxu1 %v9764_v20  ;;  %v2738_v20 = vld [vmem:[#allocation14 + $0x430] sm:$0xff] }
 0x42f   :  { %6052 = vmatpush1.bf16.msra.mxu0 %v9892_v55  ;;  %6012 = vmatprep.subr.bf16.mxu1 %v9757_v31  ;;  %v9733_v55 = vcombine.high %v2606_v39, %v2610_v34  ;;  %v9861_v31 = vcombine.high %v2734_v17, %v2738_v20  ;;  %v2854_v29 = vld [vmem:[#allocation14 + $0x7d0] sm:$0xff]  ;;  %v9860_v11 = vcombine.low %v2734_v17, %v2738_v20 }
 0x430   :  { %6053 = vmatprep.subr.bf16.mxu0 %v9885_v13  ;;  %v2726_v13 = vld [vmem:[#allocation14 + $0x3d0] sm:$0xff] }
 0x431   :  { %v2722_v16 = vld [vmem:[#allocation14 + $0x3b0] sm:$0xff]  ;;  %v9852_v45 = vcombine.low %v2726_v13, %v2730_v42 }
 0x432   :  { %6013 = vmatpush1.bf16.msra.mxu1 %v9756_v27  ;;  %v2858_v27 = vld [vmem:[#allocation14 + $0x7f0] sm:$0xff] }
 0x433   :  { %6054 = vmatpush1.bf16.msra.mxu0 %v9884_v3  ;;  %6014 = vmatprep.subr.bf16.mxu1 %v9749_v56  ;;  %v9853_v3 = vcombine.high %v2726_v13, %v2730_v42  ;;  %v9981_v56 = vcombine.high %v2854_v29, %v2858_v27  ;;  %v2846_v49 = vld [vmem:[#allocation14 + $0x790] sm:$0xff]  ;;  %v9980_v0 = vcombine.low %v2854_v29, %v2858_v27 }
 0x434   :  { %6055 = vmatprep.subr.bf16.mxu0 %v9877_v33  ;;  %v2718_v33 = vld [vmem:[#allocation14 + $0x390] sm:$0xff] }
 0x435   :  { %v2714_v39 = vld [vmem:[#allocation14 + $0x370] sm:$0xff]  ;;  %v9844_v17 = vcombine.low %v2718_v33, %v2722_v16 }
 0x436   :  { %6015 = vmatpush1.bf16.msra.mxu1 %v9748_v18  ;;  %v2850_v18 = vld [vmem:[#allocation14 + $0x7b0] sm:$0xff] }
 0x437   :  { %6056 = vmatpush1.bf16.msra.mxu0 %v9876_v25  ;;  %6016 = vmatprep.subr.bf16.mxu1 %v9741_v1  ;;  %v9845_v25 = vcombine.high %v2718_v33, %v2722_v16  ;;  %v9973_v1 = vcombine.high %v2846_v49, %v2850_v18  ;;  %v2838_v34 = vld [vmem:[#allocation14 + $0x750] sm:$0xff]  ;;  %v9972_v20 = vcombine.low %v2846_v49, %v2850_v18 }
 0x438   :  { %6057 = vmatprep.subr.bf16.mxu0 %v9869_v50  ;;  %v2710_v50 = vld [vmem:[#allocation14 + $0x350] sm:$0xff] }
 0x439   :  { %v2706_v13 = vld [vmem:[#allocation14 + $0x330] sm:$0xff]  ;;  %v9836_v29 = vcombine.low %v2710_v50, %v2714_v39 }
 0x43a   :  { %6017 = vmatpush1.bf16.msra.mxu1 %v9740_v22  ;;  %v2842_v22 = vld [vmem:[#allocation14 + $0x770] sm:$0xff] }
 0x43b   :  { %6058 = vmatpush1.bf16.msra.mxu0 %v9868_v2  ;;  %6018 = vmatprep.subr.bf16.mxu1 %v9733_v55  ;;  %v9837_v2 = vcombine.high %v2710_v50, %v2714_v39  ;;  %v9965_v55 = vcombine.high %v2838_v34, %v2842_v22  ;;  %v2830_v42 = vld [vmem:[#allocation14 + $0x710] sm:$0xff]  ;;  %v9964_v27 = vcombine.low %v2838_v34, %v2842_v22 }
 0x43c   :  { %6059 = vmatprep.subr.bf16.mxu0 %v9861_v31  ;;  %v2702_v31 = vld [vmem:[#allocation14 + $0x310] sm:$0xff] }
 0x43d   :  { %v2698_v33 = vld [vmem:[#allocation14 + $0x2f0] sm:$0xff]  ;;  %v9828_v49 = vcombine.low %v2702_v31, %v2706_v13 }
 0x43e   :  { %6019 = vmatpush1.bf16.msra.mxu1 %v9732_v10  ;;  %v2834_v10 = vld [vmem:[#allocation14 + $0x730] sm:$0xff] }
 0x43f   :  { %6060 = vmatpush1.bf16.msra.mxu0 %v9860_v11  ;;  %6020 = vmatprep.subr.bf16.mxu1 %v9853_v3  ;;  %v9829_v11 = vcombine.high %v2702_v31, %v2706_v13  ;;  %v9957_v3 = vcombine.high %v2830_v42, %v2834_v10  ;;  %v2822_v16 = vld [vmem:[#allocation14 + $0x6d0] sm:$0xff]  ;;  %v9956_v18 = vcombine.low %v2830_v42, %v2834_v10 }
 0x440   :  { %6061 = vmatprep.subr.bf16.mxu0 %v9981_v56  ;;  %v2694_v56 = vld [vmem:[#allocation14 + $0x2d0] sm:$0xff] }
 0x441   :  { %v2690_v50 = vld [vmem:[#allocation14 + $0x2b0] sm:$0xff]  ;;  %v9820_v34 = vcombine.low %v2694_v56, %v2698_v33 }
 0x442   :  { %6021 = vmatpush2.bf16.msra.mxu1 %v9852_v45  ;;  %v2826_v45 = vld [vmem:[#allocation14 + $0x6f0] sm:$0xff] }
 0x443   :  { %6062 = vmatpush2.bf16.msra.mxu0 %v9980_v0  ;;  %6022 = vmatprep.subr.bf16.mxu1 %v9845_v25  ;;  %v9821_v0 = vcombine.high %v2694_v56, %v2698_v33  ;;  %v9949_v25 = vcombine.high %v2822_v16, %v2826_v45  ;;  %v2814_v39 = vld [vmem:[#allocation14 + $0x690] sm:$0xff]  ;;  %v9948_v22 = vcombine.low %v2822_v16, %v2826_v45 }
 0x444   :  { %6063 = vmatprep.subr.bf16.mxu0 %v9973_v1  ;;  %v2686_v1 = vld [vmem:[#allocation14 + $0x290] sm:$0xff] }
 0x445   :  { %v2682_v31 = vld [vmem:[#allocation14 + $0x270] sm:$0xff]  ;;  %v9812_v42 = vcombine.low %v2686_v1, %v2690_v50 }
 0x446   :  { %6023 = vmatpush2.bf16.msra.mxu1 %v9844_v17  ;;  %v2818_v17 = vld [vmem:[#allocation14 + $0x6b0] sm:$0xff] }
 0x447   :  { %6064 = vmatpush2.bf16.msra.mxu0 %v9972_v20  ;;  %6024 = vmatprep.subr.bf16.mxu1 %v9837_v2  ;;  %v9813_v20 = vcombine.high %v2686_v1, %v2690_v50  ;;  %v9941_v2 = vcombine.high %v2814_v39, %v2818_v17  ;;  %v2806_v13 = vld [vmem:[#allocation14 + $0x650] sm:$0xff]  ;;  %v9940_v10 = vcombine.low %v2814_v39, %v2818_v17 }
 0x448   :  { %6065 = vmatprep.subr.bf16.mxu0 %v9965_v55  ;;  %v2678_v55 = vld [vmem:[#allocation14 + $0x250] sm:$0xff] }
 0x449   :  { %v2674_v56 = vld [vmem:[#allocation14 + $0x230] sm:$0xff]  ;;  %v9804_v16 = vcombine.low %v2678_v55, %v2682_v31 }
 0x44a   :  { %6025 = vmatpush2.bf16.msra.mxu1 %v9836_v29  ;;  %v2810_v29 = vld [vmem:[#allocation14 + $0x670] sm:$0xff] }
 0x44b   :  { %6066 = vmatpush2.bf16.msra.mxu0 %v9964_v27  ;;  %6026 = vmatprep.subr.bf16.mxu1 %v9829_v11  ;;  %v9805_v27 = vcombine.high %v2678_v55, %v2682_v31  ;;  %v9933_v11 = vcombine.high %v2806_v13, %v2810_v29  ;;  %v2798_v33 = vld [vmem:[#allocation14 + $0x610] sm:$0xff]  ;;  %v9932_v45 = vcombine.low %v2806_v13, %v2810_v29 }
 0x44c   :  { %6067 = vmatprep.subr.bf16.mxu0 %v9957_v3  ;;  %v2670_v3 = vld [vmem:[#allocation14 + $0x210] sm:$0xff] }
 0x44d   :  { %v2922_v1 = vld [vmem:[#allocation14 + $0x9f0] sm:$0xff]  ;;  %v9796_v39 = vcombine.low %v2670_v3, %v2674_v56 }
 0x44e   :  { %6027 = vmatpush2.bf16.msra.mxu1 %v9828_v49  ;;  %v2802_v49 = vld [vmem:[#allocation14 + $0x630] sm:$0xff] }
 0x44f   :  { %6068 = vmatpush2.bf16.msra.mxu0 %v9956_v18  ;;  %6028 = vmatprep.subr.bf16.mxu1 %v9821_v0  ;;  %v9797_v18 = vcombine.high %v2670_v3, %v2674_v56  ;;  %v9925_v0 = vcombine.high %v2798_v33, %v2802_v49  ;;  %v3046_v50 = vld [vmem:[#allocation14 + $0xdd0] sm:$0xff]  ;;  %v9924_v17 = vcombine.low %v2798_v33, %v2802_v49 }
 0x450   :  { %6069 = vmatprep.subr.bf16.mxu0 %v9949_v25  ;;  %v2918_v25 = vld [vmem:[#allocation14 + $0x9d0] sm:$0xff] }
 0x451   :  { %v2914_v55 = vld [vmem:[#allocation14 + $0x9b0] sm:$0xff]  ;;  %v10044_v31 = vcombine.low %v2918_v25, %v2922_v1 }
 0x452   :  { %6029 = vmatpush2.bf16.msra.mxu1 %v9820_v34  ;;  %v3050_v34 = vld [vmem:[#allocation14 + $0xdf0] sm:$0xff] }
 0x453   :  { %6070 = vmatpush2.bf16.msra.mxu0 %v9948_v22  ;;  %6030 = vmatprep.subr.bf16.mxu1 %v9813_v20  ;;  %v10045_v22 = vcombine.high %v2918_v25, %v2922_v1  ;;  %v10173_v20 = vcombine.high %v3046_v50, %v3050_v34  ;;  %v3038_v13 = vld [vmem:[#allocation14 + $0xd90] sm:$0xff] }
 0x454   :  { %6071 = vmatprep.subr.bf16.mxu0 %v9941_v2  ;;  %v2910_v2 = vld [vmem:[#allocation14 + $0x990] sm:$0xff] }
 0x455   :  { %v3042_v29 = vld [vmem:[#allocation14 + $0xdb0] sm:$0xff] }
 0x456   :  { %6031 = vmatpush2.bf16.msra.mxu1 %v9812_v42  ;;  %v10172_v42 = vcombine.low %v3046_v50, %v3050_v34  ;;  %v10165_v33 = vcombine.high %v3038_v13, %v3042_v29  ;;  %v3030_v49 = vld [vmem:[#allocation14 + $0xd50] sm:$0xff]  ;;  %v10164_v1 = vcombine.low %v3038_v13, %v3042_v29 }
 0x457   :  { %6072 = vmatpush2.bf16.msra.mxu0 %v9940_v10  ;;  %6032 = vmatprep.subr.bf16.mxu1 %v9805_v27  ;;  %v10037_v10 = vcombine.high %v2910_v2, %v2914_v55  ;;  %v2902_v27 = vld [vmem:[#allocation14 + $0x950] sm:$0xff] }
 0x458   :  { %6073 = vmatprep.subr.bf16.mxu0 %v9933_v11  ;;  %v2906_v11 = vld [vmem:[#allocation14 + $0x970] sm:$0xff] }
 0x459   :  { %v10029_v50 = vcombine.high %v2902_v27, %v2906_v11  ;;  %v10028_v13 = vcombine.low %v2902_v27, %v2906_v11 }
 0x45a   :  { %6033 = vmatpush2.bf16.msra.mxu1 %v9804_v16  ;;  %v3034_v16 = vld [vmem:[#allocation14 + $0xd70] sm:$0xff] }
 0x45b   :  { %6074 = vmatpush2.bf16.msra.mxu0 %v9932_v45  ;;  %6034 = vmatprep.subr.bf16.mxu1 %v9797_v18  ;;  %v10036_v18 = vcombine.low %v2910_v2, %v2914_v55  ;;  %v3022_v55 = vld [vmem:[#allocation14 + $0xd10] sm:$0xff] }
 0x45c   :  { %6075 = vmatprep.subr.bf16.mxu0 %v9925_v0 }
 0x45e   :  { %6035 = vmatpush2.bf16.msra.mxu1 %v9796_v39 }
 0x45f   :  { %6076 = vmatpush2.bf16.msra.mxu0 %v9924_v17  ;;  %6086 = vmatprep.subr.bf16.mxu1 %v10045_v22  ;;  %v10157_v17 = vcombine.high %v3030_v49, %v3034_v16  ;;  %v2894_v22 = vld [vmem:[#allocation14 + $0x910] sm:$0xff] }
 0x460   :  { %6127 = vmatprep.subr.bf16.mxu0 %v10173_v20  ;;  %v2898_v20 = vld [vmem:[#allocation14 + $0x930] sm:$0xff] }
 0x461   :  { %6037 = vmatmul.mubr.bf16.vlgmr.msra.gmra.mxu1 %v12731_v43  ;;  %v5792_v3 = vpop.f32.mrf.mxu1  ;;  %v5833_v56 = vpop.f32.mrf.mxu0 }
 0x462   :  { %6078 = vmatmul.mubr.bf16.vlgmr.msra.gmra.mxu0 %v12744_v38  ;;  %v5793_v45 = vadd.f32 %v5792_v3, %v13278_v23  ;;  %6087 = vmatpush1.bf16.msra.mxu1 %v10044_v31  ;;  %v3026_v31 = vld [vmem:[#allocation14 + $0xd30] sm:$0xff] }
 0x463   :  { %6118 = vmatprep.mubr.bf16.mxu1 %v13039_v53  ;;  %6128 = vmatpush1.bf16.msra.mxu0 %v10172_v42  ;;  %v5794_v0 = vpop.f32.mrf.mxu1  ;;  %v5835_v25 = vpop.f32.mrf.mxu0  ;;  %v10148_v27 = vcombine.low %v3022_v55, %v3026_v31 }
 0x464   :  { %v13288_v34 = vadd.f32 %v5833_v56, %v5793_v45  ;;  %6159 = vmatprep.mubr.bf16.mxu0 %v13041_v8  ;;  %v5795_v39 = vadd.f32 %v5794_v0, %v13282_v5  ;;  %6088 = vmatprep.subr.bf16.mxu1 %v10037_v10  ;;  %v10156_v56 = vcombine.low %v3030_v49, %v3034_v16  ;;  %v2886_v10 = vld [vmem:[#allocation14 + $0x8d0] sm:$0xff] }
 0x465   :  { %6129 = vmatprep.subr.bf16.mxu0 %v10165_v33  ;;  %v5796_v23 = vpop.f32.mrf.mxu1  ;;  %v5837_v2 = vpop.f32.mrf.mxu0  ;;  %v10021_v45 = vcombine.high %v2894_v22, %v2898_v20  ;;  %v10149_v5 = vcombine.high %v3022_v55, %v3026_v31  ;;  %v2890_v0 = vld [vmem:[#allocation14 + $0x8f0] sm:$0xff] }
 0x466   :  { %15360 = vst [vmem:[#allocation134_spill] sm:$0xff] %v13288_v34  ;;  %v13292_v42 = vadd.f32 %v5835_v25, %v5795_v39  ;;  %6089 = vmatpush1.bf16.msra.mxu1 %v10036_v18  ;;  %v3014_v34 = vld [vmem:[#allocation14 + $0xcd0] sm:$0xff]  ;;  %v15361_v23 = vld [vmem:[#allocation30_spill] sm:$0xff]  ;;  %v10020_v25 = vcombine.low %v2894_v22, %v2898_v20  ;;  %v10013_v11 = vcombine.high %v2886_v10, %v2890_v0 }
 0x467   :  { %6130 = vmatpush1.bf16.msra.mxu0 %v10164_v1  ;;  %v5797_v29 = vpop.f32.mrf.mxu1  ;;  %v5838_v3 = vpop.f32.mrf.mxu0  ;;  %6090 = vmatprep.subr.bf16.mxu1 %v10029_v50  ;;  %v3018_v33 = vld [vmem:[#allocation14 + $0xcf0] sm:$0xff]  ;;  %v13298_v18 = vld [vmem:[#allocation16] sm:$0xff] }
 0x468   :  { %6131 = vmatprep.subr.bf16.mxu0 %v10157_v17  ;;  %v13296_v2 = vrot.slane %v13292_v42, %v15361_v23  ;;  %v10141_v49 = vcombine.high %v3014_v34, %v3018_v33  ;;  %v2878_v16 = vld [vmem:[#allocation14 + $0x890] sm:$0xff]  ;;  %v15362_v17 = vld [vmem:[#allocation29_spill] sm:$0xff]  ;;  %v10012_v3 = vcombine.low %v2886_v10, %v2890_v0  ;;  %v10140_v20 = vcombine.low %v3014_v34, %v3018_v33 }
 0x469   :  { %v2882_v1 = vld [vmem:[#allocation14 + $0x8b0] sm:$0xff]  ;;  %v13302_v29 = vrot.slane %v13298_v18, %v15362_v17 }
 0x46a   :  { %6091 = vmatpush1.bf16.msra.mxu1 %v10028_v13  ;;  %v3006_v50 = vld [vmem:[#allocation14 + $0xc90] sm:$0xff]  ;;  %v6381_v22 = vadd.f32 %v13296_v2, %v13009_v54  ;;  %v10005_v55 = vcombine.high %v2878_v16, %v2882_v1  ;;  %v6389_v31 = vadd.f32 %v13296_v2, %v13022_v24  ;;  %v10004_v0 = vcombine.low %v2878_v16, %v2882_v1 }
 0x46b   :  { %6132 = vmatpush1.bf16.msra.mxu0 %v10156_v56  ;;  %6092 = vmatprep.subr.bf16.mxu1 %v10021_v45  ;;  %v3010_v39 = vld [vmem:[#allocation14 + $0xcb0] sm:$0xff]  ;;  %v6397_v54 = vadd.f32 %v13296_v2, %v13035_v58  ;;  %v6405_v34 = vadd.f32 %v13296_v2, %v13050_v40 }
 0x46c   :  { %6133 = vmatprep.subr.bf16.mxu0 %v10149_v5  ;;  %v10133_v13 = vcombine.high %v3006_v50, %v3010_v39  ;;  %v2870_v56 = vld [vmem:[#allocation14 + $0x850] sm:$0xff]  ;;  %v6487_v21 = vadd.f32 %v13302_v29, %v6381_v22  ;;  %v6495_v10 = vadd.f32 %v13302_v29, %v6389_v31  ;;  %v10132_v24 = vcombine.low %v3006_v50, %v3010_v39 }
 0x46d   :  { %v2874_v45 = vld [vmem:[#allocation14 + $0x870] sm:$0xff]  ;;  %v6503_v31 = vadd.f32 %v13302_v29, %v6397_v54  ;;  %v6511_v58 = vadd.f32 %v13302_v29, %v6405_v34  ;;  %v13322_v50 = vrot.slane %v13292_v42, %v15362_v17 }
 0x46e   :  { %6093 = vmatpush1.bf16.msra.mxu1 %v10020_v25  ;;  %v2998_v5 = vld [vmem:[#allocation14 + $0xc50] sm:$0xff]  ;;  %v9997_v33 = vcombine.high %v2870_v56, %v2874_v45  ;;  %v6551_v25 = vmax.f32 %v6487_v21, 0.0  ;;  %v9996_v40 = vcombine.low %v2870_v56, %v2874_v45  ;;  %v6413_v21 = vadd.f32 %v13296_v2, %v13064_v48 }
 0x46f   :  { %6134 = vmatpush1.bf16.msra.mxu0 %v10148_v27  ;;  %6094 = vmatprep.subr.bf16.mxu1 %v10013_v11  ;;  %v6559_v27 = vmax.f32 %v6495_v10, 0.0  ;;  %v10125_v11 = vcombine.high %v2998_v5, %v3002_v63  ;;  %v2866_v22 = vld [vmem:[#allocation14 + $0x830] sm:$0xff]  ;;  %v6421_v10 = vadd.f32 %v13296_v2, %v13076_v52  ;;  %v6631_v52 = vadd.f32 %v13322_v50, %v13084_v57 }
 0x470   :  { %6135 = vmatprep.subr.bf16.mxu0 %v10141_v49  ;;  %v2862_v49 = vld [vmem:[#allocation14 + $0x810] sm:$0xff]  ;;  %v6519_v48 = vadd.f32 %v13302_v29, %v6413_v21 }
 0x471   :  { %v2994_v16 = vld [vmem:[#allocation14 + $0xc30] sm:$0xff]  ;;  %v13315_v1 = vpack.c.bf16 %v6559_v27, %v6551_v25  ;;  %v9989_v39 = vcombine.high %v2862_v49, %v2866_v22  ;;  %v9988_v42 = vcombine.low %v2862_v49, %v2866_v22  ;;  %v6639_v27 = vadd.f32 %v13322_v50, %v13092_v60 }
 0x472   :  { %6095 = vmatpush1.bf16.msra.mxu1 %v10012_v3  ;;  %v2990_v3 = vld [vmem:[#allocation14 + $0xc10] sm:$0xff]  ;;  %v6583_v25 = vmax.f32 %v6519_v48, 0.0  ;;  %v6695_v22 = vadd.f32 %v6631_v52, %v13302_v29  ;;  %v6671_v52 = vadd.f32 %v13322_v50, %v13124_v14  ;;  %v6679_v14 = vadd.f32 %v13322_v50, %v13132_v6 }
 0x473   :  { %6136 = vmatpush1.bf16.msra.mxu0 %v10140_v20  ;;  %6096 = vmatprep.subr.bf16.mxu1 %v10005_v55  ;;  %v10124_v20 = vcombine.low %v2998_v5, %v3002_v63  ;;  %v6567_v55 = vmax.f32 %v6503_v31, 0.0  ;;  %v10117_v54 = vcombine.high %v2990_v3, %v2994_v16  ;;  %v2986_v56 = vld [vmem:[#allocation14 + $0xbf0] sm:$0xff]  ;;  %v10116_v34 = vcombine.low %v2990_v3, %v2994_v16 }
 0x474   :  { %6137 = vmatprep.subr.bf16.mxu0 %v10133_v13  ;;  %v6575_v13 = vmax.f32 %v6511_v58, 0.0  ;;  %v3110_v63 = vld [vmem:[#allocation14 + $0xfd0] sm:$0xff]  ;;  %v6703_v21 = vadd.f32 %v6639_v27, %v13302_v29  ;;  %v6759_v60 = vmax.f32 %v6695_v22, 0.0 }
 0x475   :  { %v3114_v45 = vld [vmem:[#allocation14 + $0xff0] sm:$0xff] }
 0x476   :  { %6097 = vmatpush1.bf16.msra.mxu1 %v10004_v0  ;;  %v2982_v0 = vld [vmem:[#allocation14 + $0xbd0] sm:$0xff]  ;;  %v13326_v5 = vpack.c.bf16 %v6575_v13, %v6567_v55  ;;  %v10236_v16 = vcombine.low %v3110_v63, %v3114_v45  ;;  %v6655_v13 = vadd.f32 %v13322_v50, %v13108_v32 }
 0x477   :  { %6138 = vmatpush1.bf16.msra.mxu0 %v10132_v24  ;;  %6098 = vmatprep.subr.bf16.mxu1 %v9997_v33  ;;  %v6527_v24 = vadd.f32 %v13302_v29, %v6421_v10  ;;  %v10109_v33 = vcombine.high %v2982_v0, %v2986_v56  ;;  %v2974_v31 = vld [vmem:[#allocation14 + $0xb90] sm:$0xff]  ;;  %v10108_v3 = vcombine.low %v2982_v0, %v2986_v56  ;;  %v6767_v0 = vmax.f32 %v6703_v21, 0.0 }
 0x478   :  { %6139 = vmatprep.subr.bf16.mxu0 %v10125_v11  ;;  %15363 = vst [vmem:[#allocation135_spill] sm:$0xff] %v13326_v5  ;;  %v10237_v11 = vcombine.high %v3110_v63, %v3114_v45  ;;  %v2978_v58 = vld [vmem:[#allocation14 + $0xbb0] sm:$0xff] }
 0x479   :  { %v6591_v55 = vmax.f32 %v6527_v24, 0.0  ;;  %v3106_v49 = vld [vmem:[#allocation14 + $0xfb0] sm:$0xff]  ;;  %v10101_v57 = vcombine.high %v2974_v31, %v2978_v58  ;;  %v13343_v24 = vpack.c.bf16 %v6767_v0, %v6759_v60 }
 0x47a   :  { %6099 = vmatpush1.bf16.msra.mxu1 %v9996_v40  ;;  %v3102_v40 = vld [vmem:[#allocation14 + $0xf90] sm:$0xff] }
 0x47b   :  { %6140 = vmatpush1.bf16.msra.mxu0 %v10124_v20  ;;  %6100 = vmatprep.subr.bf16.mxu1 %v9989_v39  ;;  %v13335_v20 = vpack.c.bf16 %v6591_v55, %v6583_v25  ;;  %v6647_v39 = vadd.f32 %v13322_v50, %v13100_v35  ;;  %v10229_v10 = vcombine.high %v3102_v40, %v3106_v49  ;;  %v2970_v48 = vld [vmem:[#allocation14 + $0xb70] sm:$0xff] }
 0x47c   :  { %6141 = vmatprep.subr.bf16.mxu0 %v10117_v54  ;;  %v2966_v54 = vld [vmem:[#allocation14 + $0xb50] sm:$0xff]  ;;  %15364 = vst [vmem:[#allocation136_spill] sm:$0xff] %v13343_v24  ;;  %v6663_v25 = vadd.f32 %v13322_v50, %v13116_v4 }
 0x47d   :  { %v3094_v56 = vld [vmem:[#allocation14 + $0xf50] sm:$0xff]  ;;  %v6711_v45 = vadd.f32 %v6647_v39, %v13302_v29  ;;  %v10093_v35 = vcombine.high %v2966_v54, %v2970_v48 }
 0x47e   :  { %6101 = vmatpush1.bf16.msra.mxu1 %v9988_v42  ;;  %v3098_v63 = vld [vmem:[#allocation14 + $0xf70] sm:$0xff]  ;;  %v10100_v42 = vcombine.low %v2974_v31, %v2978_v58 }
 0x47f   :  { %6142 = vmatpush1.bf16.msra.mxu0 %v10116_v34  ;;  %6102 = vmatprep.subr.bf16.mxu1 %v10109_v33  ;;  %v10228_v34 = vcombine.low %v3102_v40, %v3106_v49  ;;  %v6719_v33 = vadd.f32 %v6655_v13, %v13302_v29  ;;  %v6775_v32 = vmax.f32 %v6711_v45, 0.0  ;;  %v10221_v27 = vcombine.high %v3094_v56, %v3098_v63  ;;  %v2962_v55 = vld [vmem:[#allocation14 + $0xb30] sm:$0xff] }
 0x480   :  { %6143 = vmatprep.subr.bf16.mxu0 %v10237_v11  ;;  %v2958_v11 = vld [vmem:[#allocation14 + $0xb10] sm:$0xff]  ;;  %v10092_v49 = vcombine.low %v2966_v54, %v2970_v48  ;;  %v10220_v4 = vcombine.low %v3094_v56, %v3098_v63  ;;  %v6743_v56 = vadd.f32 %v6679_v14, %v13302_v29 }
 0x481   :  { %v6783_v31 = vmax.f32 %v6719_v33, 0.0  ;;  %v3086_v58 = vld [vmem:[#allocation14 + $0xf10] sm:$0xff]  ;;  %v10085_v21 = vcombine.high %v2958_v11, %v2962_v55  ;;  %v10084_v0 = vcombine.low %v2958_v11, %v2962_v55 }
 0x482   :  { %6103 = vmatpush2.bf16.msra.mxu1 %v10108_v3  ;;  %v3090_v40 = vld [vmem:[#allocation14 + $0xf30] sm:$0xff]  ;;  %v6727_v3 = vadd.f32 %v6663_v25, %v13302_v29 }
 0x483   :  { %6144 = vmatpush2.bf16.msra.mxu0 %v10236_v16  ;;  %6104 = vmatprep.subr.bf16.mxu1 %v10101_v57  ;;  %v13350_v22 = vpack.c.bf16 %v6783_v31, %v6775_v32  ;;  %v6735_v16 = vadd.f32 %v6671_v52, %v13302_v29  ;;  %v10213_v57 = vcombine.high %v3086_v58, %v3090_v40  ;;  %v2950_v60 = vld [vmem:[#allocation14 + $0xad0] sm:$0xff] }
 0x484   :  { %6145 = vmatprep.subr.bf16.mxu0 %v10229_v10  ;;  %v2954_v39 = vld [vmem:[#allocation14 + $0xaf0] sm:$0xff]  ;;  %v6791_v13 = vmax.f32 %v6727_v3, 0.0  ;;  %v10212_v6 = vcombine.low %v3086_v58, %v3090_v40 }
 0x485   :  { %v6799_v10 = vmax.f32 %v6735_v16, 0.0  ;;  %v3078_v54 = vld [vmem:[#allocation14 + $0xed0] sm:$0xff]  ;;  %v10077_v63 = vcombine.high %v2950_v60, %v2954_v39  ;;  %v10076_v11 = vcombine.low %v2950_v60, %v2954_v39 }
 0x486   :  { %6105 = vmatpush2.bf16.msra.mxu1 %v10100_v42  ;;  %v3082_v48 = vld [vmem:[#allocation14 + $0xef0] sm:$0xff]  ;;  %v6687_v42 = vadd.f32 %v13322_v50, %v13140_v28 }
 0x487   :  { %6146 = vmatpush2.bf16.msra.mxu0 %v10228_v34  ;;  %6106 = vmatprep.subr.bf16.mxu1 %v10093_v35  ;;  %v13356_v45 = vpack.c.bf16 %v6799_v10, %v6791_v13  ;;  %v10205_v34 = vcombine.high %v3078_v54, %v3082_v48  ;;  %v2942_v33 = vld [vmem:[#allocation14 + $0xa90] sm:$0xff]  ;;  %v10204_v28 = vcombine.low %v3078_v54, %v3082_v48 }
 0x488   :  { %6147 = vmatprep.subr.bf16.mxu0 %v10221_v27  ;;  %v2946_v35 = vld [vmem:[#allocation14 + $0xab0] sm:$0xff]  ;;  %v6751_v32 = vadd.f32 %v6687_v42, %v13302_v29  ;;  %v6807_v27 = vmax.f32 %v6743_v56, 0.0  ;;  %v2663_v56 = vld [vmem:[#allocation14 + $0x1d8] sm:$0xff] }
 0x489   :  { %v3070_v25 = vld [vmem:[#allocation14 + $0xe90] sm:$0xff]  ;;  %v10069_v50 = vcombine.high %v2942_v33, %v2946_v35 }
 0x48a   :  { %6107 = vmatpush2.bf16.msra.mxu1 %v10092_v49  ;;  %v3074_v52 = vld [vmem:[#allocation14 + $0xeb0] sm:$0xff]  ;;  %v6815_v55 = vmax.f32 %v6751_v32, 0.0 }
 0x48b   :  { %6148 = vmatpush2.bf16.msra.mxu0 %v10220_v4  ;;  %6108 = vmatprep.subr.bf16.mxu1 %v10085_v21  ;;  %v10197_v31 = vcombine.high %v3070_v25, %v3074_v52  ;;  %v2934_v58 = vld [vmem:[#allocation14 + $0xa50] sm:$0xff]  ;;  %v10068_v4 = vcombine.low %v2942_v33, %v2946_v35  ;;  %v10196_v21 = vcombine.low %v3070_v25, %v3074_v52  ;;  %v2655_v52 = vld [vmem:[#allocation14 + $0x198] sm:$0xff] }
 0x48c   :  { %6149 = vmatprep.subr.bf16.mxu0 %v10213_v57  ;;  %v2938_v40 = vld [vmem:[#allocation14 + $0xa70] sm:$0xff]  ;;  %v13362_v49 = vpack.c.bf16 %v6815_v55, %v6807_v27  ;;  %v2659_v27 = vld [vmem:[#allocation14 + $0x1b8] sm:$0xff] }
 0x48d   :  { %v3062_v3 = vld [vmem:[#allocation14 + $0xe50] sm:$0xff]  ;;  %v10061_v14 = vcombine.high %v2934_v58, %v2938_v40  ;;  %v10060_v54 = vcombine.low %v2934_v58, %v2938_v40  ;;  %v2783_v55 = vld [vmem:[#allocation14 + $0x598] sm:$0xff] }
 0x48e   :  { %6109 = vmatpush2.bf16.msra.mxu1 %v10084_v0  ;;  %v3066_v16 = vld [vmem:[#allocation14 + $0xe70] sm:$0xff]  ;;  %v2647_v58 = vld [vmem:[#allocation14 + $0x158] sm:$0xff] }
 0x48f   :  { %6150 = vmatpush2.bf16.msra.mxu0 %v10212_v6  ;;  %6110 = vmatprep.subr.bf16.mxu1 %v10077_v63  ;;  %v10189_v57 = vcombine.high %v3062_v3, %v3066_v16  ;;  %v2926_v60 = vld [vmem:[#allocation14 + $0xa10] sm:$0xff]  ;;  %v10188_v48 = vcombine.low %v3062_v3, %v3066_v16  ;;  %v2667_v6 = vld [vmem:[#allocation14 + $0x1f8] sm:$0xff] }
 0x490   :  { %6151 = vmatprep.subr.bf16.mxu0 %v10205_v34  ;;  %v2930_v39 = vld [vmem:[#allocation14 + $0xa30] sm:$0xff]  ;;  %v2791_v63 = vld [vmem:[#allocation14 + $0x5d8] sm:$0xff]  ;;  %v9791_v32 = vcombine.high %v2663_v56, %v2667_v6 }
 0x491   :  { %v3054_v13 = vld [vmem:[#allocation14 + $0xe10] sm:$0xff]  ;;  %v10053_v0 = vcombine.high %v2926_v60, %v2930_v39  ;;  %v2795_v34 = vld [vmem:[#allocation14 + $0x5f8] sm:$0xff]  ;;  %v10052_v33 = vcombine.low %v2926_v60, %v2930_v39  ;;  %v9782_v60 = vcombine.low %v2655_v52, %v2659_v27 }
 0x492   :  { %6111 = vmatpush2.bf16.msra.mxu1 %v10076_v11  ;;  %v3058_v10 = vld [vmem:[#allocation14 + $0xe30] sm:$0xff]  ;;  %v9919_v25 = vcombine.high %v2791_v63, %v2795_v34  ;;  %v9790_v11 = vcombine.low %v2663_v56, %v2667_v6  ;;  %v2651_v40 = vld [vmem:[#allocation14 + $0x178] sm:$0xff] }
 0x493   :  { %6152 = vmatpush2.bf16.msra.mxu0 %v10204_v28  ;;  %6112 = vmatprep.subr.bf16.mxu1 %v10069_v50  ;;  %v10181_v42 = vcombine.high %v3054_v13, %v3058_v10  ;;  %v10180_v35 = vcombine.low %v3054_v13, %v3058_v10  ;;  %v2787_v28 = vld [vmem:[#allocation14 + $0x5b8] sm:$0xff]  ;;  %v9918_v50 = vcombine.low %v2791_v63, %v2795_v34 }
 0x494   :  { %6153 = vmatprep.subr.bf16.mxu0 %v10197_v31  ;;  %v9783_v31 = vcombine.high %v2655_v52, %v2659_v27  ;;  %v9910_v10 = vcombine.low %v2783_v55, %v2787_v28  ;;  %v2643_v56 = vld [vmem:[#allocation14 + $0x138] sm:$0xff] }
 0x495   :  { %v2767_v34 = vld [vmem:[#allocation14 + $0x518] sm:$0xff] }
 0x496   :  { %6113 = vmatpush2.bf16.msra.mxu1 %v10068_v4  ;;  %v9911_v4 = vcombine.high %v2783_v55, %v2787_v28  ;;  %v2631_v27 = vld [vmem:[#allocation14 + $0xd8] sm:$0xff] }
 0x497   :  { %6154 = vmatpush2.bf16.msra.mxu0 %v10196_v21  ;;  %6114 = vmatprep.subr.bf16.mxu1 %v10061_v14  ;;  %v2775_v21 = vld [vmem:[#allocation14 + $0x558] sm:$0xff] }
 0x498   :  { %6155 = vmatprep.subr.bf16.mxu0 %v10189_v57  ;;  %v2779_v14 = vld [vmem:[#allocation14 + $0x578] sm:$0xff] }
 0x499   :  { %v2759_v55 = vld [vmem:[#allocation14 + $0x4d8] sm:$0xff] }
 0x49a   :  { %6115 = vmatpush2.bf16.msra.mxu1 %v10060_v54  ;;  %v9775_v54 = vcombine.high %v2647_v58, %v2651_v40  ;;  %v2763_v28 = vld [vmem:[#allocation14 + $0x4f8] sm:$0xff] }
 0x49b   :  { %6156 = vmatpush2.bf16.msra.mxu0 %v10188_v48  ;;  %6116 = vmatprep.subr.bf16.mxu1 %v10053_v0  ;;  %v9903_v0 = vcombine.high %v2775_v21, %v2779_v14 }
 0x49c   :  { %6157 = vmatprep.subr.bf16.mxu0 %v10181_v42  ;;  %v2639_v42 = vld [vmem:[#allocation14 + $0x118] sm:$0xff] }
 0x49d   :  { %v9767_v52 = vcombine.high %v2639_v42, %v2643_v56 }
 0x49e   :  { %6117 = vmatpush2.bf16.msra.mxu1 %v10052_v33  ;;  %v2771_v33 = vld [vmem:[#allocation14 + $0x538] sm:$0xff] }
 0x49f   :  { %6158 = vmatpush2.bf16.msra.mxu0 %v10180_v35  ;;  %6168 = vmatprep.subr.bf16.mxu1 %v9791_v32 }
 0x4a0   :  { %6209 = vmatprep.subr.bf16.mxu0 %v9919_v25  ;;  %v9902_v25 = vcombine.low %v2775_v21, %v2779_v14  ;;  %v9886_v14 = vcombine.low %v2759_v55, %v2763_v28 }
 0x4a1   :  { %v5874_v3 = vpop.f32.mrf.mxu1  ;;  %v5915_v16 = vpop.f32.mrf.mxu0  ;;  %6119 = vmatmul.mubr.bf16.vlgmr.msra.gmra.mxu1 %v13060_v46 }
 0x4a2   :  { %v13365_v57 = vadd.f32 %v5915_v16, %v5874_v3  ;;  %6160 = vmatmul.mubr.bf16.vlgmr.msra.gmra.mxu0 %v13062_v15  ;;  %6169 = vmatpush1.bf16.msra.mxu1 %v9790_v11  ;;  %v2635_v11 = vld [vmem:[#allocation14 + $0xf8] sm:$0xff] }
 0x4a3   :  { %6200 = vmatprep.mubr.bf16.mxu1 %v12740_v61  ;;  %6210 = vmatpush1.bf16.msra.mxu0 %v9918_v50  ;;  %v5876_v39 = vpop.f32.mrf.mxu1  ;;  %v5917_v13 = vpop.f32.mrf.mxu0  ;;  %v9774_v61 = vcombine.low %v2647_v58, %v2651_v40  ;;  %v9766_v50 = vcombine.low %v2639_v42, %v2643_v56  ;;  %v9759_v3 = vcombine.high %v2631_v27, %v2635_v11  ;;  %v2623_v40 = vld [vmem:[#allocation14 + $0x98] sm:$0xff] }
 0x4a4   :  { %6241 = vmatprep.mubr.bf16.mxu0 %v12742_v51  ;;  %v13370_v48 = vadd.f32 %v5917_v13, %v5876_v39  ;;  %6170 = vmatprep.subr.bf16.mxu1 %v9783_v31  ;;  %v9895_v51 = vcombine.high %v2767_v34, %v2771_v33  ;;  %v9894_v31 = vcombine.low %v2767_v34, %v2771_v33  ;;  %v2627_v16 = vld [vmem:[#allocation14 + $0xb8] sm:$0xff] }
 0x4a5   :  { %v5878_v6 = vpop.f32.mrf.mxu1  ;;  %v5919_v63 = vpop.f32.mrf.mxu0  ;;  %6211 = vmatprep.subr.bf16.mxu0 %v9911_v4  ;;  %v9887_v58 = vcombine.high %v2759_v55, %v2763_v28  ;;  %v2751_v4 = vld [vmem:[#allocation14 + $0x498] sm:$0xff]  ;;  %v9758_v21 = vcombine.low %v2631_v27, %v2635_v11  ;;  %v9751_v39 = vcombine.high %v2623_v40, %v2627_v16  ;;  %v9750_v56 = vcombine.low %v2623_v40, %v2627_v16 }
 0x4a6   :  { %6171 = vmatpush1.bf16.msra.mxu1 %v9782_v60  ;;  %v2755_v60 = vld [vmem:[#allocation14 + $0x4b8] sm:$0xff] }
 0x4a7   :  { %6212 = vmatpush1.bf16.msra.mxu0 %v9910_v10  ;;  %v5879_v35 = vpop.f32.mrf.mxu1  ;;  %v5920_v32 = vpop.f32.mrf.mxu0  ;;  %6172 = vmatprep.subr.bf16.mxu1 %v9775_v54  ;;  %v9879_v13 = vcombine.high %v2751_v4, %v2755_v60  ;;  %v2615_v10 = vld [vmem:[#allocation14 + $0x58] sm:$0xff]  ;;  %v9878_v6 = vcombine.low %v2751_v4, %v2755_v60 }
 0x4a8   :  { %6213 = vmatprep.subr.bf16.mxu0 %v9903_v0  ;;  %v2619_v54 = vld [vmem:[#allocation14 + $0x78] sm:$0xff] }
 0x4a9   :  { %v2743_v0 = vld [vmem:[#allocation14 + $0x458] sm:$0xff]  ;;  %v9743_v63 = vcombine.high %v2615_v10, %v2619_v54 }
 0x4aa   :  { %6173 = vmatpush1.bf16.msra.mxu1 %v9774_v61  ;;  %v2747_v42 = vld [vmem:[#allocation14 + $0x478] sm:$0xff] }
 0x4ab   :  { %6214 = vmatpush1.bf16.msra.mxu0 %v9902_v25  ;;  %6174 = vmatprep.subr.bf16.mxu1 %v9767_v52  ;;  %v9871_v34 = vcombine.high %v2743_v0, %v2747_v42  ;;  %v2607_v33 = vld [vmem:[#allocation14 + $0x18] sm:$0xff]  ;;  %v9742_v25 = vcombine.low %v2615_v10, %v2619_v54  ;;  %v9870_v52 = vcombine.low %v2743_v0, %v2747_v42 }
 0x4ac   :  { %6215 = vmatprep.subr.bf16.mxu0 %v9895_v51  ;;  %v2611_v61 = vld [vmem:[#allocation14 + $0x38] sm:$0xff] }
 0x4ad   :  { %v2735_v35 = vld [vmem:[#allocation14 + $0x418] sm:$0xff]  ;;  %v9735_v51 = vcombine.high %v2607_v33, %v2611_v61 }
 0x4ae   :  { %6175 = vmatpush1.bf16.msra.mxu1 %v9766_v50  ;;  %v2739_v32 = vld [vmem:[#allocation14 + $0x438] sm:$0xff] }
 0x4af   :  { %6216 = vmatpush1.bf16.msra.mxu0 %v9894_v31  ;;  %6176 = vmatprep.subr.bf16.mxu1 %v9759_v3  ;;  %v9863_v27 = vcombine.high %v2735_v35, %v2739_v32  ;;  %v2727_v11 = vld [vmem:[#allocation14 + $0x3d8] sm:$0xff]  ;;  %v9734_v31 = vcombine.low %v2607_v33, %v2611_v61  ;;  %v9862_v3 = vcombine.low %v2735_v35, %v2739_v32 }
 0x4b0   :  { %6217 = vmatprep.subr.bf16.mxu0 %v9887_v58  ;;  %v2731_v55 = vld [vmem:[#allocation14 + $0x3f8] sm:$0xff] }
 0x4b1   :  { %v2855_v28 = vld [vmem:[#allocation14 + $0x7d8] sm:$0xff]  ;;  %v9855_v58 = vcombine.high %v2727_v11, %v2731_v55 }
 0x4b2   :  { %6177 = vmatpush1.bf16.msra.mxu1 %v9758_v21  ;;  %v2859_v50 = vld [vmem:[#allocation14 + $0x7f8] sm:$0xff] }
 0x4b3   :  { %6218 = vmatpush1.bf16.msra.mxu0 %v9886_v14  ;;  %6178 = vmatprep.subr.bf16.mxu1 %v9751_v39  ;;  %v9983_v40 = vcombine.high %v2855_v28, %v2859_v50  ;;  %v2719_v16 = vld [vmem:[#allocation14 + $0x398] sm:$0xff]  ;;  %v9854_v14 = vcombine.low %v2727_v11, %v2731_v55  ;;  %v9982_v39 = vcombine.low %v2855_v28, %v2859_v50 }
 0x4b4   :  { %6219 = vmatprep.subr.bf16.mxu0 %v9879_v13  ;;  %v2723_v4 = vld [vmem:[#allocation14 + $0x3b8] sm:$0xff] }
 0x4b5   :  { %v2847_v60 = vld [vmem:[#allocation14 + $0x798] sm:$0xff]  ;;  %v9847_v13 = vcombine.high %v2719_v16, %v2723_v4 }
 0x4b6   :  { %6179 = vmatpush1.bf16.msra.mxu1 %v9750_v56  ;;  %v2851_v21 = vld [vmem:[#allocation14 + $0x7b8] sm:$0xff] }
 0x4b7   :  { %6220 = vmatpush1.bf16.msra.mxu0 %v9878_v6  ;;  %6180 = vmatprep.subr.bf16.mxu1 %v9743_v63  ;;  %v9975_v10 = vcombine.high %v2847_v60, %v2851_v21  ;;  %v2711_v54 = vld [vmem:[#allocation14 + $0x358] sm:$0xff]  ;;  %v9846_v6 = vcombine.low %v2719_v16, %v2723_v4  ;;  %v9974_v63 = vcombine.low %v2847_v60, %v2851_v21 }
 0x4b8   :  { %6221 = vmatprep.subr.bf16.mxu0 %v9871_v34  ;;  %v2715_v0 = vld [vmem:[#allocation14 + $0x378] sm:$0xff] }
 0x4b9   :  { %v2839_v42 = vld [vmem:[#allocation14 + $0x758] sm:$0xff]  ;;  %v9839_v34 = vcombine.high %v2711_v54, %v2715_v0 }
 0x4ba   :  { %6181 = vmatpush1.bf16.msra.mxu1 %v9742_v25  ;;  %v2843_v56 = vld [vmem:[#allocation14 + $0x778] sm:$0xff] }
 0x4bb   :  { %6222 = vmatpush1.bf16.msra.mxu0 %v9870_v52  ;;  %6182 = vmatprep.subr.bf16.mxu1 %v9735_v51  ;;  %v9967_v33 = vcombine.high %v2839_v42, %v2843_v56  ;;  %v2703_v61 = vld [vmem:[#allocation14 + $0x318] sm:$0xff]  ;;  %v9838_v52 = vcombine.low %v2711_v54, %v2715_v0  ;;  %v9966_v51 = vcombine.low %v2839_v42, %v2843_v56 }
 0x4bc   :  { %6223 = vmatprep.subr.bf16.mxu0 %v9863_v27  ;;  %v2707_v35 = vld [vmem:[#allocation14 + $0x338] sm:$0xff] }
 0x4bd   :  { %v2831_v32 = vld [vmem:[#allocation14 + $0x718] sm:$0xff]  ;;  %v9831_v27 = vcombine.high %v2703_v61, %v2707_v35 }
 0x4be   :  { %6183 = vmatpush1.bf16.msra.mxu1 %v9734_v31  ;;  %v2835_v25 = vld [vmem:[#allocation14 + $0x738] sm:$0xff] }
 0x4bf   :  { %6224 = vmatpush1.bf16.msra.mxu0 %v9862_v3  ;;  %6184 = vmatprep.subr.bf16.mxu1 %v9855_v58  ;;  %v9959_v11 = vcombine.high %v2831_v32, %v2835_v25  ;;  %v2695_v55 = vld [vmem:[#allocation14 + $0x2d8] sm:$0xff]  ;;  %v9830_v3 = vcombine.low %v2703_v61, %v2707_v35  ;;  %v9958_v58 = vcombine.low %v2831_v32, %v2835_v25 }
 0x4c0   :  { %6225 = vmatprep.subr.bf16.mxu0 %v9983_v40  ;;  %v2699_v28 = vld [vmem:[#allocation14 + $0x2f8] sm:$0xff] }
 0x4c1   :  { %v2823_v50 = vld [vmem:[#allocation14 + $0x6d8] sm:$0xff]  ;;  %v9823_v40 = vcombine.high %v2695_v55, %v2699_v28 }
 0x4c2   :  { %6185 = vmatpush2.bf16.msra.mxu1 %v9854_v14  ;;  %v2827_v31 = vld [vmem:[#allocation14 + $0x6f8] sm:$0xff] }
 0x4c3   :  { %6226 = vmatpush2.bf16.msra.mxu0 %v9982_v39  ;;  %6186 = vmatprep.subr.bf16.mxu1 %v9847_v13  ;;  %v9951_v16 = vcombine.high %v2823_v50, %v2827_v31  ;;  %v2687_v4 = vld [vmem:[#allocation14 + $0x298] sm:$0xff]  ;;  %v9822_v39 = vcombine.low %v2695_v55, %v2699_v28  ;;  %v9950_v13 = vcombine.low %v2823_v50, %v2827_v31 }
 0x4c4   :  { %6227 = vmatprep.subr.bf16.mxu0 %v9975_v10  ;;  %v2691_v60 = vld [vmem:[#allocation14 + $0x2b8] sm:$0xff] }
 0x4c5   :  { %v2815_v21 = vld [vmem:[#allocation14 + $0x698] sm:$0xff]  ;;  %v9815_v10 = vcombine.high %v2687_v4, %v2691_v60 }
 0x4c6   :  { %6187 = vmatpush2.bf16.msra.mxu1 %v9846_v6  ;;  %v2819_v14 = vld [vmem:[#allocation14 + $0x6b8] sm:$0xff] }
 0x4c7   :  { %6228 = vmatpush2.bf16.msra.mxu0 %v9974_v63  ;;  %6188 = vmatprep.subr.bf16.mxu1 %v9839_v34  ;;  %v9943_v54 = vcombine.high %v2815_v21, %v2819_v14  ;;  %v2679_v0 = vld [vmem:[#allocation14 + $0x258] sm:$0xff]  ;;  %v9814_v63 = vcombine.low %v2687_v4, %v2691_v60  ;;  %v9942_v34 = vcombine.low %v2815_v21, %v2819_v14 }
 0x4c8   :  { %6229 = vmatprep.subr.bf16.mxu0 %v9967_v33  ;;  %v2683_v42 = vld [vmem:[#allocation14 + $0x278] sm:$0xff] }
 0x4c9   :  { %v2807_v56 = vld [vmem:[#allocation14 + $0x658] sm:$0xff]  ;;  %v9807_v33 = vcombine.high %v2679_v0, %v2683_v42 }
 0x4ca   :  { %6189 = vmatpush2.bf16.msra.mxu1 %v9838_v52  ;;  %v2811_v6 = vld [vmem:[#allocation14 + $0x678] sm:$0xff] }
 0x4cb   :  { %6230 = vmatpush2.bf16.msra.mxu0 %v9966_v51  ;;  %6190 = vmatprep.subr.bf16.mxu1 %v9831_v27  ;;  %v9935_v61 = vcombine.high %v2807_v56, %v2811_v6  ;;  %v2671_v35 = vld [vmem:[#allocation14 + $0x218] sm:$0xff]  ;;  %v9806_v51 = vcombine.low %v2679_v0, %v2683_v42  ;;  %v9934_v27 = vcombine.low %v2807_v56, %v2811_v6 }
 0x4cc   :  { %6231 = vmatprep.subr.bf16.mxu0 %v9959_v11  ;;  %v2675_v32 = vld [vmem:[#allocation14 + $0x238] sm:$0xff] }
 0x4cd   :  { %v2799_v25 = vld [vmem:[#allocation14 + $0x618] sm:$0xff]  ;;  %v9799_v11 = vcombine.high %v2671_v35, %v2675_v32 }
 0x4ce   :  { %6191 = vmatpush2.bf16.msra.mxu1 %v9830_v3  ;;  %v2803_v52 = vld [vmem:[#allocation14 + $0x638] sm:$0xff] }
 0x4cf   :  { %6232 = vmatpush2.bf16.msra.mxu0 %v9958_v58  ;;  %6192 = vmatprep.subr.bf16.mxu1 %v9823_v40  ;;  %v9927_v55 = vcombine.high %v2799_v25, %v2803_v52  ;;  %v2919_v28 = vld [vmem:[#allocation14 + $0x9d8] sm:$0xff]  ;;  %v9798_v58 = vcombine.low %v2671_v35, %v2675_v32  ;;  %v9926_v40 = vcombine.low %v2799_v25, %v2803_v52 }
 0x4d0   :  { %6233 = vmatprep.subr.bf16.mxu0 %v9951_v16  ;;  %v2923_v50 = vld [vmem:[#allocation14 + $0x9f8] sm:$0xff] }
 0x4d1   :  { %v3047_v31 = vld [vmem:[#allocation14 + $0xdd8] sm:$0xff]  ;;  %v10047_v16 = vcombine.high %v2919_v28, %v2923_v50  ;;  %v10046_v14 = vcombine.low %v2919_v28, %v2923_v50 }
 0x4d2   :  { %6193 = vmatpush2.bf16.msra.mxu1 %v9822_v39  ;;  %v3051_v3 = vld [vmem:[#allocation14 + $0xdf8] sm:$0xff] }
 0x4d3   :  { %6234 = vmatpush2.bf16.msra.mxu0 %v9950_v13  ;;  %6194 = vmatprep.subr.bf16.mxu1 %v9815_v10  ;;  %v10175_v4 = vcombine.high %v3047_v31, %v3051_v3  ;;  %v2911_v60 = vld [vmem:[#allocation14 + $0x998] sm:$0xff]  ;;  %v10174_v10 = vcombine.low %v3047_v31, %v3051_v3 }
 0x4d4   :  { %6235 = vmatprep.subr.bf16.mxu0 %v9943_v54  ;;  %v2915_v21 = vld [vmem:[#allocation14 + $0x9b8] sm:$0xff] }
 0x4d5   :  { %v3039_v39 = vld [vmem:[#allocation14 + $0xd98] sm:$0xff]  ;;  %v10039_v54 = vcombine.high %v2911_v60, %v2915_v21  ;;  %v10038_v35 = vcombine.low %v2911_v60, %v2915_v21 }
 0x4d6   :  { %6195 = vmatpush2.bf16.msra.mxu1 %v9814_v63  ;;  %v3043_v13 = vld [vmem:[#allocation14 + $0xdb8] sm:$0xff] }
 0x4d7   :  { %6236 = vmatpush2.bf16.msra.mxu0 %v9942_v34  ;;  %6196 = vmatprep.subr.bf16.mxu1 %v9807_v33  ;;  %v2903_v0 = vld [vmem:[#allocation14 + $0x958] sm:$0xff]  ;;  %v10167_v6 = vcombine.high %v3039_v39, %v3043_v13  ;;  %v10166_v25 = vcombine.low %v3039_v39, %v3043_v13  ;;  %v15365_v13 = vld [vmem:[#allocation38_spill] sm:$0xff] }
 0x4d8   :  { %6237 = vmatprep.subr.bf16.mxu0 %v9935_v61  ;;  %v2907_v42 = vld [vmem:[#allocation14 + $0x978] sm:$0xff] }
 0x4d9   :  { %v3031_v63 = vld [vmem:[#allocation14 + $0xd58] sm:$0xff]  ;;  %v10031_v52 = vcombine.high %v2903_v0, %v2907_v42  ;;  %v10030_v3 = vcombine.low %v2903_v0, %v2907_v42 }
 0x4da   :  { %6197 = vmatpush2.bf16.msra.mxu1 %v9806_v51  ;;  %v3035_v34 = vld [vmem:[#allocation14 + $0xd78] sm:$0xff] }
 0x4db   :  { %6238 = vmatpush2.bf16.msra.mxu0 %v9934_v27  ;;  %6198 = vmatprep.subr.bf16.mxu1 %v9799_v11  ;;  %v2895_v11 = vld [vmem:[#allocation14 + $0x918] sm:$0xff] }
 0x4dc   :  { %6239 = vmatprep.subr.bf16.mxu0 %v9927_v55  ;;  %v2899_v55 = vld [vmem:[#allocation14 + $0x938] sm:$0xff] }
 0x4dd   :  { %v3023_v28 = vld [vmem:[#allocation14 + $0xd18] sm:$0xff] }
 0x4de   :  { %6199 = vmatpush2.bf16.msra.mxu1 %v9798_v58  ;;  %v3027_v50 = vld [vmem:[#allocation14 + $0xd38] sm:$0xff] }
 0x4df   :  { %6240 = vmatpush2.bf16.msra.mxu0 %v9926_v40  ;;  %6250 = vmatprep.subr.bf16.mxu1 %v10047_v16  ;;  %v10158_v40 = vcombine.low %v3031_v63, %v3035_v34  ;;  %v2887_v60 = vld [vmem:[#allocation14 + $0x8d8] sm:$0xff]  ;;  %v10150_v0 = vcombine.low %v3023_v28, %v3027_v50 }
 0x4e0   :  { %6291 = vmatprep.subr.bf16.mxu0 %v10175_v4  ;;  %v10151_v4 = vcombine.high %v3023_v28, %v3027_v50  ;;  %v2891_v21 = vld [vmem:[#allocation14 + $0x8f8] sm:$0xff] }
 0x4e1   :  { %v5956_v56 = vpop.f32.mrf.mxu1  ;;  %6201 = vmatmul.mubr.bf16.vlgmr.msra.gmra.mxu1 %v12731_v43  ;;  %v3019_v39 = vld [vmem:[#allocation14 + $0xcf8] sm:$0xff]  ;;  %v10015_v42 = vcombine.high %v2887_v60, %v2891_v21 }
 0x4e2   :  { %v5957_v33 = vadd.f32 %v5956_v56, %v13365_v57  ;;  %v5997_v61 = vpop.f32.mrf.mxu0  ;;  %6242 = vmatmul.mubr.bf16.vlgmr.msra.gmra.mxu0 %v12744_v38  ;;  %6251 = vmatpush1.bf16.msra.mxu1 %v10046_v14  ;;  %v10159_v57 = vcombine.high %v3031_v63, %v3035_v34  ;;  %v3015_v14 = vld [vmem:[#allocation14 + $0xcd8] sm:$0xff] }
 0x4e3   :  { %6282 = vmatprep.mubr.bf16.mxu1 %v13039_v53  ;;  %6292 = vmatpush1.bf16.msra.mxu0 %v10174_v10  ;;  %v5958_v32 = vpop.f32.mrf.mxu1  ;;  %v13385_v10 = vrot.slane %v13298_v18, %v15365_v13  ;;  %v10143_v63 = vcombine.high %v3015_v14, %v3019_v39  ;;  %v2879_v34 = vld [vmem:[#allocation14 + $0x898] sm:$0xff] }
 0x4e4   :  { %v13376_v51 = vadd.f32 %v5997_v61, %v5957_v33  ;;  %6323 = vmatprep.mubr.bf16.mxu0 %v13041_v8  ;;  %v5959_v43 = vadd.f32 %v5958_v32, %v13370_v48  ;;  %v5999_v27 = vpop.f32.mrf.mxu0  ;;  %6252 = vmatprep.subr.bf16.mxu1 %v10039_v54  ;;  %v10023_v8 = vcombine.high %v2895_v11, %v2899_v55  ;;  %v2883_v33 = vld [vmem:[#allocation14 + $0x8b8] sm:$0xff] }
 0x4e5   :  { %v5960_v38 = vpop.f32.mrf.mxu1  ;;  %6293 = vmatprep.subr.bf16.mxu0 %v10167_v6  ;;  %v10022_v54 = vcombine.low %v2895_v11, %v2899_v55  ;;  %v3007_v61 = vld [vmem:[#allocation14 + $0xc98] sm:$0xff] }
 0x4e6   :  { %v6000_v53 = vadd.f32 %v5999_v27, %v5959_v43  ;;  %v6001_v31 = vpop.f32.mrf.mxu0  ;;  %6253 = vmatpush1.bf16.msra.mxu1 %v10038_v35  ;;  %v3011_v35 = vld [vmem:[#allocation14 + $0xcb8] sm:$0xff] }
 0x4e7   :  { %6294 = vmatpush1.bf16.msra.mxu0 %v10166_v25  ;;  %v5961_v58 = vpop.f32.mrf.mxu1  ;;  %6254 = vmatprep.subr.bf16.mxu1 %v10031_v52  ;;  %v10014_v25 = vcombine.low %v2887_v60, %v2891_v21  ;;  %v10142_v52 = vcombine.low %v3015_v14, %v3019_v39  ;;  %v10135_v55 = vcombine.high %v3007_v61, %v3011_v35  ;;  %v2871_v38 = vld [vmem:[#allocation14 + $0x858] sm:$0xff] }
 0x4e8   :  { %v13381_v48 = vrot.slane %v6000_v53, %v15361_v23  ;;  %v6002_v16 = vpop.f32.mrf.mxu0  ;;  %6295 = vmatprep.subr.bf16.mxu0 %v10159_v57  ;;  %v13398_v11 = vrot.slane %v6000_v53, %v15362_v17  ;;  %v2875_v28 = vld [vmem:[#allocation14 + $0x878] sm:$0xff] }
 0x4e9   :  { %v2999_v31 = vld [vmem:[#allocation14 + $0xc58] sm:$0xff]  ;;  %v10134_v16 = vcombine.low %v3007_v61, %v3011_v35 }
 0x4ea   :  { %6255 = vmatpush1.bf16.msra.mxu1 %v10030_v3  ;;  %v6383_v56 = vadd.f32 %v13381_v48, %v13011_v7  ;;  %v6391_v6 = vadd.f32 %v13381_v48, %v13024_v30  ;;  %v6399_v43 = vadd.f32 %v13381_v48, %v13037_v44  ;;  %v10007_v7 = vcombine.high %v2879_v34, %v2883_v33  ;;  %v3003_v3 = vld [vmem:[#allocation14 + $0xc78] sm:$0xff] }
 0x4eb   :  { %6296 = vmatpush1.bf16.msra.mxu0 %v10158_v40  ;;  %6256 = vmatprep.subr.bf16.mxu1 %v10023_v8  ;;  %v6407_v57 = vadd.f32 %v13381_v48, %v13052_v19  ;;  %v6415_v40 = vadd.f32 %v13381_v48, %v13066_v37  ;;  %v10006_v19 = vcombine.low %v2879_v34, %v2883_v33  ;;  %v2863_v39 = vld [vmem:[#allocation14 + $0x818] sm:$0xff] }
 0x4ec   :  { %6297 = vmatprep.subr.bf16.mxu0 %v10151_v4  ;;  %v6489_v18 = vadd.f32 %v13385_v10, %v6383_v56  ;;  %v6497_v32 = vadd.f32 %v13385_v10, %v6391_v6  ;;  %v6505_v50 = vadd.f32 %v13385_v10, %v6399_v43  ;;  %v6423_v53 = vadd.f32 %v13381_v48, %v13078_v47  ;;  %v2991_v47 = vld [vmem:[#allocation14 + $0xc18] sm:$0xff] }
 0x4ed   :  { %v6513_v58 = vadd.f32 %v13385_v10, %v6407_v57  ;;  %v9999_v4 = vcombine.high %v2871_v38, %v2875_v28  ;;  %v6521_v21 = vadd.f32 %v13385_v10, %v6415_v40  ;;  %v10127_v14 = vcombine.high %v2999_v31, %v3003_v3  ;;  %v2995_v56 = vld [vmem:[#allocation14 + $0xc38] sm:$0xff] }
 0x4ee   :  { %6257 = vmatpush1.bf16.msra.mxu1 %v10022_v54  ;;  %v6553_v30 = vmax.f32 %v6489_v18, 0.0  ;;  %v6561_v27 = vmax.f32 %v6497_v32, 0.0  ;;  %v6569_v8 = vmax.f32 %v6505_v50, 0.0  ;;  %v2867_v54 = vld [vmem:[#allocation14 + $0x838] sm:$0xff]  ;;  %v6633_v37 = vadd.f32 %v13398_v11, %v13086_v26 }
 0x4ef   :  { %6298 = vmatpush1.bf16.msra.mxu0 %v10150_v0  ;;  %6258 = vmatprep.subr.bf16.mxu1 %v10015_v42  ;;  %v6577_v60 = vmax.f32 %v6513_v58, 0.0  ;;  %v6529_v0 = vadd.f32 %v13385_v10, %v6423_v53  ;;  %v6641_v42 = vadd.f32 %v13398_v11, %v13094_v12  ;;  %v9998_v34 = vcombine.low %v2871_v38, %v2875_v28  ;;  %v3115_v57 = vld [vmem:[#allocation14 + $0xff8] sm:$0xff] }
 0x4f0   :  { %6299 = vmatprep.subr.bf16.mxu0 %v10143_v63  ;;  %v13401_v44 = vpack.c.bf16 %v6561_v27, %v6553_v30  ;;  %v6585_v63 = vmax.f32 %v6521_v21, 0.0  ;;  %v6697_v61 = vadd.f32 %v6633_v37, %v13385_v10  ;;  %v10126_v18 = vcombine.low %v2999_v31, %v3003_v3  ;;  %v3111_v27 = vld [vmem:[#allocation14 + $0xfd8] sm:$0xff] }
 0x4f1   :  { %v13414_v6 = vpack.c.bf16 %v6577_v60, %v6569_v8  ;;  %v6593_v33 = vmax.f32 %v6529_v0, 0.0  ;;  %v6705_v35 = vadd.f32 %v6641_v42, %v13385_v10  ;;  %v9991_v32 = vcombine.high %v2863_v39, %v2867_v54  ;;  %v2975_v8 = vld [vmem:[#allocation14 + $0xb98] sm:$0xff] }
 0x4f2   :  { %15366 = vst [vmem:[#allocation137_spill] sm:$0xff] %v13401_v44  ;;  %6259 = vmatpush1.bf16.msra.mxu1 %v10014_v25  ;;  %v6649_v26 = vadd.f32 %v13398_v11, %v13102_v41  ;;  %v10119_v12 = vcombine.high %v2991_v47, %v2995_v56  ;;  %v2983_v25 = vld [vmem:[#allocation14 + $0xbd8] sm:$0xff]  ;;  %v9990_v28 = vcombine.low %v2863_v39, %v2867_v54 }
 0x4f3   :  { %6300 = vmatpush1.bf16.msra.mxu0 %v10142_v52  ;;  %6260 = vmatprep.subr.bf16.mxu1 %v10007_v7  ;;  %15367 = vst [vmem:[#allocation138_spill] sm:$0xff] %v13414_v6  ;;  %v2987_v52 = vld [vmem:[#allocation14 + $0xbf8] sm:$0xff]  ;;  %v13420_v43 = vpack.c.bf16 %v6593_v33, %v6585_v63  ;;  %v6761_v7 = vmax.f32 %v6697_v61, 0.0  ;;  %v6769_v30 = vmax.f32 %v6705_v35, 0.0  ;;  %v10118_v50 = vcombine.low %v2991_v47, %v2995_v56 }
 0x4f4   :  { %6301 = vmatprep.subr.bf16.mxu0 %v10135_v55  ;;  %v6657_v55 = vadd.f32 %v13398_v11, %v13110_v9  ;;  %v6713_v38 = vadd.f32 %v6649_v26, %v13385_v10  ;;  %v10111_v41 = vcombine.high %v2983_v25, %v2987_v52  ;;  %v6665_v40 = vadd.f32 %v13398_v11, %v13118_v62  ;;  %v2979_v9 = vld [vmem:[#allocation14 + $0xbb8] sm:$0xff] }
 0x4f5   :  { %15368 = vst [vmem:[#allocation139_spill] sm:$0xff] %v13420_v43  ;;  %v13425_v31 = vpack.c.bf16 %v6769_v30, %v6761_v7  ;;  %v6673_v53 = vadd.f32 %v13398_v11, %v13126_v59  ;;  %v10238_v39 = vcombine.low %v3111_v27, %v3115_v57  ;;  %v10103_v62 = vcombine.high %v2975_v8, %v2979_v9  ;;  %v2967_v47 = vld [vmem:[#allocation14 + $0xb58] sm:$0xff] }
 0x4f6   :  { %6261 = vmatpush1.bf16.msra.mxu1 %v10006_v19  ;;  %v6721_v3 = vadd.f32 %v6657_v55, %v13385_v10  ;;  %v6777_v58 = vmax.f32 %v6713_v38, 0.0  ;;  %v10239_v19 = vcombine.high %v3111_v27, %v3115_v57  ;;  %v6729_v21 = vadd.f32 %v6665_v40, %v13385_v10  ;;  %v2971_v56 = vld [vmem:[#allocation14 + $0xb78] sm:$0xff] }
 0x4f7   :  { %6302 = vmatpush1.bf16.msra.mxu0 %v10134_v16  ;;  %6262 = vmatprep.subr.bf16.mxu1 %v9999_v4  ;;  %15369 = vst [vmem:[#allocation140_spill] sm:$0xff] %v13425_v31  ;;  %v3103_v16 = vld [vmem:[#allocation14 + $0xf98] sm:$0xff]  ;;  %v6737_v54 = vadd.f32 %v6673_v53, %v13385_v10  ;;  %v6681_v42 = vadd.f32 %v13398_v11, %v13134_v36 }
 0x4f8   :  { %6303 = vmatprep.subr.bf16.mxu0 %v10127_v14  ;;  %v3107_v4 = vld [vmem:[#allocation14 + $0xfb8] sm:$0xff]  ;;  %v6785_v60 = vmax.f32 %v6721_v3, 0.0  ;;  %v10110_v14 = vcombine.low %v2983_v25, %v2987_v52  ;;  %v6793_v37 = vmax.f32 %v6729_v21, 0.0  ;;  %v10095_v25 = vcombine.high %v2967_v47, %v2971_v56 }
 0x4f9   :  { %v10231_v59 = vcombine.high %v3103_v16, %v3107_v4  ;;  %v6801_v63 = vmax.f32 %v6737_v54, 0.0  ;;  %v3095_v61 = vld [vmem:[#allocation14 + $0xf58] sm:$0xff]  ;;  %v10230_v36 = vcombine.low %v3103_v16, %v3107_v4  ;;  %v10094_v38 = vcombine.low %v2967_v47, %v2971_v56 }
 0x4fa   :  { %6263 = vmatpush1.bf16.msra.mxu1 %v9998_v34  ;;  %v13434_v0 = vpack.c.bf16 %v6785_v60, %v6777_v58  ;;  %v15370_v34 = vld [vmem:[#allocation57_spill] sm:$0xff] }
 0x4fb   :  { %6304 = vmatpush1.bf16.msra.mxu0 %v10126_v18  ;;  %6264 = vmatprep.subr.bf16.mxu1 %v9991_v32  ;;  %v6689_v33 = vadd.f32 %v13398_v11, %v15370_v34  ;;  %v3099_v35 = vld [vmem:[#allocation14 + $0xf78] sm:$0xff]  ;;  %v6745_v18 = vadd.f32 %v6681_v42, %v13385_v10  ;;  %v10102_v32 = vcombine.low %v2975_v8, %v2979_v9 }
 0x4fc   :  { %6305 = vmatprep.subr.bf16.mxu0 %v10119_v12  ;;  %v13441_v26 = vpack.c.bf16 %v6801_v63, %v6793_v37  ;;  %v10223_v7 = vcombine.high %v3095_v61, %v3099_v35  ;;  %v2959_v30 = vld [vmem:[#allocation14 + $0xb18] sm:$0xff] }
 0x4fd   :  { %v6753_v12 = vadd.f32 %v6689_v33, %v13385_v10  ;;  %v6809_v52 = vmax.f32 %v6745_v18, 0.0  ;;  %v2963_v27 = vld [vmem:[#allocation14 + $0xb38] sm:$0xff] }
 0x4fe   :  { %6265 = vmatpush1.bf16.msra.mxu1 %v9990_v28  ;;  %v3087_v57 = vld [vmem:[#allocation14 + $0xf18] sm:$0xff]  ;;  %v10086_v9 = vcombine.low %v2959_v30, %v2963_v27 }
 0x4ff   :  { %6306 = vmatpush1.bf16.msra.mxu0 %v10118_v50  ;;  %6266 = vmatprep.subr.bf16.mxu1 %v10111_v41  ;;  %v6817_v11 = vmax.f32 %v6753_v12, 0.0  ;;  %v3091_v55 = vld [vmem:[#allocation14 + $0xf38] sm:$0xff]  ;;  %v10222_v50 = vcombine.low %v3095_v61, %v3099_v35  ;;  %v10087_v41 = vcombine.high %v2959_v30, %v2963_v27 }
 0x500   :  { %6307 = vmatprep.subr.bf16.mxu0 %v10239_v19  ;;  %v10215_v3 = vcombine.high %v3087_v57, %v3091_v55  ;;  %v2951_v58 = vld [vmem:[#allocation14 + $0xad8] sm:$0xff]  ;;  %v10214_v53 = vcombine.low %v3087_v57, %v3091_v55  ;;  %v15375_v55 = vld [vmem:[#allocation75_spill] sm:$0xff] }
 0x501   :  { %v13444_v28 = vpack.c.bf16 %v6817_v11, %v6809_v52  ;;  %v2955_v40 = vld [vmem:[#allocation14 + $0xaf8] sm:$0xff] }
 0x502   :  { %6267 = vmatpush2.bf16.msra.mxu1 %v10110_v14  ;;  %v3079_v19 = vld [vmem:[#allocation14 + $0xed8] sm:$0xff]  ;;  %v10079_v16 = vcombine.high %v2951_v58, %v2955_v40  ;;  %v10078_v54 = vcombine.low %v2951_v58, %v2955_v40 }
 0x503   :  { %6308 = vmatpush2.bf16.msra.mxu0 %v10238_v39  ;;  %6268 = vmatprep.subr.bf16.mxu1 %v10103_v62  ;;  %15371 = vst [vmem:[#allocation57_spill] sm:$0xff] %v13444_v28  ;;  %v3083_v8 = vld [vmem:[#allocation14 + $0xef8] sm:$0xff] }
 0x504   :  { %6309 = vmatprep.subr.bf16.mxu0 %v10231_v59  ;;  %v10207_v4 = vcombine.high %v3079_v19, %v3083_v8  ;;  %v2943_v60 = vld [vmem:[#allocation14 + $0xa98] sm:$0xff]  ;;  %v10206_v62 = vcombine.low %v3079_v19, %v3083_v8 }
 0x505   :  { %v2947_v21 = vld [vmem:[#allocation14 + $0xab8] sm:$0xff] }
 0x506   :  { %6269 = vmatpush2.bf16.msra.mxu1 %v10102_v32  ;;  %v3071_v14 = vld [vmem:[#allocation14 + $0xe98] sm:$0xff]  ;;  %v10071_v37 = vcombine.high %v2943_v60, %v2947_v21  ;;  %v10070_v34 = vcombine.low %v2943_v60, %v2947_v21 }
 0x507   :  { %6310 = vmatpush2.bf16.msra.mxu0 %v10230_v36  ;;  %6270 = vmatprep.subr.bf16.mxu1 %v10095_v25  ;;  %v3075_v39 = vld [vmem:[#allocation14 + $0xeb8] sm:$0xff]  ;;  %v15372_v25 = vld [vmem:[#allocation71_spill] sm:$0xff] }
 0x508   :  { %6311 = vmatprep.subr.bf16.mxu0 %v10223_v7  ;;  %v10199_v42 = vcombine.high %v3071_v14, %v3075_v39  ;;  %v2935_v59 = vld [vmem:[#allocation14 + $0xa58] sm:$0xff]  ;;  %v10198_v33 = vcombine.low %v3071_v14, %v3075_v39  ;;  %v6365_v52 = vadd.f32 %v13296_v2, %v15372_v25  ;;  %v15373_v7 = vld [vmem:[#allocation74_spill] sm:$0xff] }
 0x509   :  { %v2939_v47 = vld [vmem:[#allocation14 + $0xa78] sm:$0xff]  ;;  %v6373_v30 = vadd.f32 %v13296_v2, %v15373_v7 }
 0x50a   :  { %6271 = vmatpush2.bf16.msra.mxu1 %v10094_v38  ;;  %v3063_v56 = vld [vmem:[#allocation14 + $0xe58] sm:$0xff]  ;;  %v10063_v61 = vcombine.high %v2935_v59, %v2939_v47  ;;  %v10062_v27 = vcombine.low %v2935_v59, %v2939_v47  ;;  %v6375_v38 = vadd.f32 %v13381_v48, %v15375_v55  ;;  %v6471_v58 = vadd.f32 %v13302_v29, %v6365_v52 }
 0x50b   :  { %6312 = vmatpush2.bf16.msra.mxu0 %v10222_v50  ;;  %6272 = vmatprep.subr.bf16.mxu1 %v10087_v41  ;;  %v3067_v63 = vld [vmem:[#allocation14 + $0xe78] sm:$0xff]  ;;  %v6479_v40 = vadd.f32 %v13302_v29, %v6373_v30 }
 0x50c   :  { %6313 = vmatprep.subr.bf16.mxu0 %v10215_v3  ;;  %v10191_v35 = vcombine.high %v3063_v56, %v3067_v63  ;;  %v2927_v18 = vld [vmem:[#allocation14 + $0xa18] sm:$0xff]  ;;  %v10190_v50 = vcombine.low %v3063_v56, %v3067_v63  ;;  %v6481_v8 = vadd.f32 %v13385_v10, %v6375_v38 }
 0x50d   :  { %v2931_v32 = vld [vmem:[#allocation14 + $0xa38] sm:$0xff] }
 0x50e   :  { %6273 = vmatpush2.bf16.msra.mxu1 %v10086_v9  ;;  %v3055_v12 = vld [vmem:[#allocation14 + $0xe18] sm:$0xff]  ;;  %v10055_v41 = vcombine.high %v2927_v18, %v2931_v32  ;;  %v10054_v2 = vcombine.low %v2927_v18, %v2931_v32  ;;  %v6545_v14 = vmax.f32 %v6481_v8, 0.0 }
 0x50f   :  { %6314 = vmatpush2.bf16.msra.mxu0 %v10214_v53  ;;  %6274 = vmatprep.subr.bf16.mxu1 %v10079_v16  ;;  %v3059_v36 = vld [vmem:[#allocation14 + $0xe38] sm:$0xff]  ;;  %v6535_v16 = vmax.f32 %v6471_v58, 0.0 }
 0x510   :  { %6315 = vmatprep.subr.bf16.mxu0 %v10207_v4  ;;  %v15374_v11 = vld [vmem:[#allocation72_spill] sm:$0xff]  ;;  %v10183_v3 = vcombine.high %v3055_v12, %v3059_v36  ;;  %v10182_v9 = vcombine.low %v3055_v12, %v3059_v36  ;;  %v10620_v53 = vld [vmem:[#allocation17 + $0x2e4] ss:$16 sps:$4 sm:$0xff]   ;;  %v6543_v4 = vmax.f32 %v6479_v40, 0.0 }
 0x511   :  { %v6367_v57 = vadd.f32 %v13381_v48, %v15374_v11  ;;  %v10617_v48 = vld [vmem:[#allocation17 + $0xe4] ss:$16 sps:$4 sm:$0xff]   ;;  %v10615_v60 = vld [vmem:[#allocation17 + $0xe0] ss:$16 sps:$4 sm:$0xff]  }
 0x512   :  { %6275 = vmatpush2.bf16.msra.mxu1 %v10078_v54  ;;  %v10618_v29 = vld [vmem:[#allocation17 + $0x2e0] ss:$16 sps:$4 sm:$0xff]   ;;  %v10623_v39 = vld [vmem:[#allocation17 + $0xc4] ss:$16 sps:$4 sm:$0xff]  }
 0x513   :  { %6316 = vmatpush2.bf16.msra.mxu0 %v10206_v62  ;;  %6276 = vmatprep.subr.bf16.mxu1 %v10071_v37  ;;  %v6473_v19 = vadd.f32 %v13385_v10, %v6367_v57  ;;  %v13459_v10 = vpack.c.bf16 %v6543_v4, %v6535_v16  ;;  %v10626_v62 = vld [vmem:[#allocation17 + $0x2c4] ss:$16 sps:$4 sm:$0xff]   ;;  %v10621_v59 = vld [vmem:[#allocation17 + $0xc0] ss:$16 sps:$4 sm:$0xff]  }
 0x514   :  { %6317 = vmatprep.subr.bf16.mxu0 %v10199_v42  ;;  %v10624_v63 = vld [vmem:[#allocation17 + $0x2c0] ss:$16 sps:$4 sm:$0xff]   ;;  %v10635_v36 = vld [vmem:[#allocation17 + $0x84] ss:$16 sps:$4 sm:$0xff]  }
 0x515   :  { %v6537_v21 = vmax.f32 %v6473_v19, 0.0  ;;  %v10627_v18 = vld [vmem:[#allocation17 + $0xa0] ss:$16 sps:$4 sm:$0xff]   ;;  %v10638_v52 = vld [vmem:[#allocation17 + $0x284] ss:$16 sps:$4 sm:$0xff]  }
 0x516   :  { %6277 = vmatpush2.bf16.msra.mxu1 %v10070_v34  ;;  %v10629_v34 = vld [vmem:[#allocation17 + $0xa4] ss:$16 sps:$4 sm:$0xff]   ;;  %v10630_v12 = vld [vmem:[#allocation17 + $0x2a0] ss:$16 sps:$4 sm:$0xff]  }
 0x517   :  { %6318 = vmatpush2.bf16.msra.mxu0 %v10198_v33  ;;  %6278 = vmatprep.subr.bf16.mxu1 %v10063_v61  ;;  %v13462_v42 = vpack.c.bf16 %v6545_v14, %v6537_v21  ;;  %v10632_v33 = vld [vmem:[#allocation17 + $0x2a4] ss:$16 sps:$4 sm:$0xff]   ;;  %v10633_v7 = vld [vmem:[#allocation17 + $0x80] ss:$16 sps:$4 sm:$0xff]  }
 0x518   :  { %6319 = vmatprep.subr.bf16.mxu0 %v10191_v35  ;;  %v10636_v30 = vld [vmem:[#allocation17 + $0x280] ss:$16 sps:$4 sm:$0xff]   ;;  %v10644_v11 = vld [vmem:[#allocation17 + $0x264] ss:$16 sps:$4 sm:$0xff]  }
 0x519   :  { %15376 = vst [vmem:[#allocation71_spill] sm:$0xff] %v13462_v42  ;;  %v10639_v57 = vld [vmem:[#allocation17 + $0x60] ss:$16 sps:$4 sm:$0xff]   ;;  %v10647_v38 = vld [vmem:[#allocation17 + $0x44] ss:$16 sps:$4 sm:$0xff]  }
 0x51a   :  { %6279 = vmatpush2.bf16.msra.mxu1 %v10062_v27  ;;  %v10641_v27 = vld [vmem:[#allocation17 + $0x64] ss:$16 sps:$4 sm:$0xff]   ;;  %v10642_v55 = vld [vmem:[#allocation17 + $0x260] ss:$16 sps:$4 sm:$0xff]  }
 0x51b   :  { %6320 = vmatpush2.bf16.msra.mxu0 %v10190_v50  ;;  %6280 = vmatprep.subr.bf16.mxu1 %v10055_v41  ;;  %v10650_v50 = vld [vmem:[#allocation17 + $0x244] ss:$16 sps:$4 sm:$0xff]   ;;  %v10645_v41 = vld [vmem:[#allocation17 + $0x40] ss:$16 sps:$4 sm:$0xff]  }
 0x51c   :  { %6321 = vmatprep.subr.bf16.mxu0 %v10183_v3  ;;  %v10648_v3 = vld [vmem:[#allocation17 + $0x240] ss:$16 sps:$4 sm:$0xff]   ;;  %v10653_v58 = vld [vmem:[#allocation17 + $0x24] ss:$16 sps:$4 sm:$0xff]  }
 0x51d   :  { %v10656_v40 = vld [vmem:[#allocation17 + $0x224] ss:$16 sps:$4 sm:$0xff]   ;;  %v10654_v19 = vld [vmem:[#allocation17 + $0x220] ss:$16 sps:$4 sm:$0xff]  }
 0x51e   :  { %6281 = vmatpush2.bf16.msra.mxu1 %v10054_v2  ;;  %v10651_v2 = vld [vmem:[#allocation17 + $0x20] ss:$16 sps:$4 sm:$0xff]   ;;  %v10659_v8 = vld [vmem:[#allocation17 + $0x4] ss:$16 sps:$4 sm:$0xff]  }
 0x51f   :  { %6322 = vmatpush2.bf16.msra.mxu0 %v10182_v9  ;;  %8444 = vmatprep.subr.bf16.mxu1 %v10617_v48  ;;  %v10662_v9 = vld [vmem:[#allocation17 + $0x204] ss:$16 sps:$4 sm:$0xff]   ;;  %v10657_v48 = vld [vmem:[#allocation17] ss:$16 sps:$4 sm:$0xff]  }
 0x520   :  { %8557 = vmatprep.subr.bf16.mxu0 %v10620_v53  ;;  %v10660_v53 = vld [vmem:[#allocation17 + $0x200] ss:$16 sps:$4 sm:$0xff]   ;;  %v10665_v16 = vld [vmem:[#allocation17 + $0x1e4] ss:$16 sps:$4 sm:$0xff]  }
 0x521   :  { %v6038_v54 = vpop.f32.mrf.mxu1  ;;  %6283 = vmatmul.mubr.bf16.vlgmr.msra.gmra.mxu1 %v13060_v46  ;;  %v10668_v4 = vld [vmem:[#allocation17 + $0x3e4] ss:$16 sps:$4 sm:$0xff]   ;;  %v10666_v21 = vld [vmem:[#allocation17 + $0x3e0] ss:$16 sps:$4 sm:$0xff]  }
 0x522   :  { %v6079_v37 = vpop.f32.mrf.mxu0  ;;  %6324 = vmatmul.mubr.bf16.vlgmr.msra.gmra.mxu0 %v13062_v15  ;;  %8445 = vmatpush1.bf16.msra.mxu1 %v10615_v60  ;;  %v10663_v60 = vld [vmem:[#allocation17 + $0x1e0] ss:$16 sps:$4 sm:$0xff]   ;;  %v10671_v14 = vld [vmem:[#allocation17 + $0x1c4] ss:$16 sps:$4 sm:$0xff]  }
 0x523   :  { %v13464_v47 = vadd.f32 %v6079_v37, %v6038_v54  ;;  %8476 = vmatprep.mubr.bf16.mxu1 %v13459_v10  ;;  %8558 = vmatpush1.bf16.msra.mxu0 %v10618_v29  ;;  %v6040_v56 = vpop.f32.mrf.mxu1  ;;  %v10674_v29 = vld [vmem:[#allocation17 + $0x3c4] ss:$16 sps:$4 sm:$0xff]   ;;  %v10672_v54 = vld [vmem:[#allocation17 + $0x3c0] ss:$16 sps:$4 sm:$0xff]  }
 0x524   :  { %8589 = vmatprep.mubr.bf16.mxu0 %v13462_v42  ;;  %v6081_v46 = vpop.f32.mrf.mxu0  ;;  %8446 = vmatprep.subr.bf16.mxu1 %v10623_v39  ;;  %v10669_v39 = vld [vmem:[#allocation17 + $0x1c0] ss:$16 sps:$4 sm:$0xff]   ;;  %v10680_v37 = vld [vmem:[#allocation17 + $0x3a4] ss:$16 sps:$4 sm:$0xff]  }
 0x525   :  { %v13468_v61 = vadd.f32 %v6081_v46, %v6040_v56  ;;  %v6042_v15 = vpop.f32.mrf.mxu1  ;;  %8559 = vmatprep.subr.bf16.mxu0 %v10626_v62  ;;  %v10677_v62 = vld [vmem:[#allocation17 + $0x1a4] ss:$16 sps:$4 sm:$0xff]  }
 0x526   :  { %v6083_v35 = vpop.f32.mrf.mxu0  ;;  %8447 = vmatpush1.bf16.msra.mxu1 %v10621_v59  ;;  %v15377_v59 = vld [vmem:[#allocation134_spill] sm:$0xff]  ;;  %v10683_v46 = vld [vmem:[#allocation17 + $0x184] ss:$16 sps:$4 sm:$0xff]   ;;  %v15378_v15 = vld [vmem:[#allocation36_spill] sm:$0xff] }
 0x527   :  { %8560 = vmatpush1.bf16.msra.mxu0 %v10624_v63  ;;  %v6043_v32 = vpop.f32.mrf.mxu1  ;;  %8448 = vmatprep.subr.bf16.mxu1 %v10629_v34  ;;  %v6335_v56 = vrot.slane %v15377_v59, %v15361_v23  ;;  %v10675_v63 = vld [vmem:[#allocation17 + $0x1a0] ss:$16 sps:$4 sm:$0xff]  }
 0x528   :  { %v6084_v25 = vpop.f32.mrf.mxu0  ;;  %8561 = vmatprep.subr.bf16.mxu0 %v10632_v33  ;;  %v10678_v34 = vld [vmem:[#allocation17 + $0x3a0] ss:$16 sps:$4 sm:$0xff]   ;;  %v10686_v33 = vld [vmem:[#allocation17 + $0x384] ss:$16 sps:$4 sm:$0xff]  }
 0x529   :  { %v6364_v35 = vadd.f32 %v6335_v56, %v15378_v15 }
 0x52a   :  { %8449 = vmatpush1.bf16.msra.mxu1 %v10627_v18  ;;  %v10999_v18 = vld [vmem:[#allocation16] sm:$0xff] }
 0x52b   :  { %8562 = vmatpush1.bf16.msra.mxu0 %v10630_v12  ;;  %8450 = vmatprep.subr.bf16.mxu1 %v10635_v36  ;;  %v13474_v32 = vrot.slane %v10999_v18, %v15361_v23  ;;  %v10681_v12 = vld [vmem:[#allocation17 + $0x180] ss:$16 sps:$4 sm:$0xff]   ;;  %v15379_v36 = vld [vmem:[#allocation73_spill] sm:$0xff] }
 0x52c   :  { %8563 = vmatprep.subr.bf16.mxu0 %v10638_v52  ;;  %v6372_v25 = vadd.f32 %v6335_v56, %v15379_v36  ;;  %v10684_v52 = vld [vmem:[#allocation17 + $0x380] ss:$16 sps:$4 sm:$0xff]  }
 0x52d   :  { %v15389_v36 = vld [vmem:[#allocation32_spill] sm:$0xff] }
 0x52e   :  { %8451 = vmatpush1.bf16.msra.mxu1 %v10633_v7  ;;  %v10689_v7 = vld [vmem:[#allocation17 + $0x164] ss:$16 sps:$4 sm:$0xff]  }
 0x52f   :  { %8564 = vmatpush1.bf16.msra.mxu0 %v10636_v30  ;;  %8452 = vmatprep.subr.bf16.mxu1 %v10641_v27  ;;  %v10692_v30 = vld [vmem:[#allocation17 + $0x364] ss:$16 sps:$4 sm:$0xff]   ;;  %v6470_v27 = vadd.f32 %v13474_v32, %v6364_v35 }
 0x530   :  { %8565 = vmatprep.subr.bf16.mxu0 %v10644_v11  ;;  %v10687_v11 = vld [vmem:[#allocation17 + $0x160] ss:$16 sps:$4 sm:$0xff]   ;;  %v15388_v35 = vld [vmem:[#allocation37_spill] sm:$0xff] }
 0x532   :  { %8453 = vmatpush1.bf16.msra.mxu1 %v10639_v57  ;;  %v6478_v57 = vadd.f32 %v13474_v32, %v6372_v25 }
 0x533   :  { %8566 = vmatpush1.bf16.msra.mxu0 %v10642_v55  ;;  %8454 = vmatprep.subr.bf16.mxu1 %v10647_v38  ;;  %v15380_v55 = vld [vmem:[#allocation76_spill] sm:$0xff] }
 0x534   :  { %8567 = vmatprep.subr.bf16.mxu0 %v10650_v50  ;;  %v6380_v38 = vadd.f32 %v6335_v56, %v15380_v55  ;;  %v10690_v50 = vld [vmem:[#allocation17 + $0x360] ss:$16 sps:$4 sm:$0xff]  }
 0x536   :  { %8455 = vmatpush1.bf16.msra.mxu1 %v10645_v41  ;;  %v10695_v41 = vld [vmem:[#allocation17 + $0x144] ss:$16 sps:$4 sm:$0xff]  }
 0x537   :  { %8568 = vmatpush1.bf16.msra.mxu0 %v10648_v3  ;;  %8456 = vmatprep.subr.bf16.mxu1 %v10653_v58  ;;  %v15381_v3 = vld [vmem:[#allocation78_spill] sm:$0xff] }
 0x538   :  { %8569 = vmatprep.subr.bf16.mxu0 %v10656_v40  ;;  %v6388_v58 = vadd.f32 %v6335_v56, %v15381_v3  ;;  %v13483_v40 = vrot.slane %v15377_v59, %v15362_v17 }
 0x53a   :  { %8457 = vmatpush1.bf16.msra.mxu1 %v10651_v2  ;;  %v6343_v2 = vrot.slane %v13376_v51, %v15361_v23  ;;  %v6630_v25 = vadd.f32 %v13483_v40, %v15389_v36  ;;  %v15398_v36 = vld [vmem:[#allocation67_spill] sm:$0xff] }
 0x53b   :  { %8570 = vmatpush1.bf16.msra.mxu0 %v10654_v19  ;;  %8458 = vmatprep.subr.bf16.mxu1 %v10659_v8  ;;  %v10698_v19 = vld [vmem:[#allocation17 + $0x344] ss:$16 sps:$4 sm:$0xff]   ;;  %v6534_v8 = vmax.f32 %v6470_v27, 0.0 }
 0x53c   :  { %8571 = vmatprep.subr.bf16.mxu0 %v10662_v9  ;;  %v15382_v9 = vld [vmem:[#allocation31_spill] sm:$0xff] }
 0x53e   :  { %8459 = vmatpush1.bf16.msra.mxu1 %v10657_v48  ;;  %v13488_v48 = vrot.slane %v10999_v18, %v15382_v9 }
 0x53f   :  { %8572 = vmatpush1.bf16.msra.mxu0 %v10660_v53  ;;  %8460 = vmatprep.subr.bf16.mxu1 %v10665_v16  ;;  %v10693_v53 = vld [vmem:[#allocation17 + $0x140] ss:$16 sps:$4 sm:$0xff]   ;;  %v6542_v16 = vmax.f32 %v6478_v57, 0.0 }
 0x540   :  { %8573 = vmatprep.subr.bf16.mxu0 %v10668_v4  ;;  %v13491_v4 = vadd.f32 %v13474_v32, %v6380_v38 }
 0x541   :  { %v13512_v38 = vpack.c.bf16 %v6542_v16, %v6534_v8  ;;  %v10710_v16 = vld [vmem:[#allocation17 + $0x304] ss:$16 sps:$4 sm:$0xff]  }
 0x542   :  { %8461 = vmatpush2.bf16.msra.mxu1 %v10663_v60  ;;  %v15383_v60 = vld [vmem:[#allocation41_spill] sm:$0xff] }
 0x543   :  { %8574 = vmatpush2.bf16.msra.mxu0 %v10666_v21  ;;  %8462 = vmatprep.subr.bf16.mxu1 %v10671_v14  ;;  %v6396_v21 = vadd.f32 %v6335_v56, %v15383_v60  ;;  %v15384_v14 = vld [vmem:[#allocation43_spill] sm:$0xff] }
 0x544   :  { %8575 = vmatprep.subr.bf16.mxu0 %v10674_v29  ;;  %v6404_v29 = vadd.f32 %v6335_v56, %v15384_v14  ;;  %v10707_v60 = vld [vmem:[#allocation17 + $0x104] ss:$16 sps:$4 sm:$0xff]   ;;  %v6694_v14 = vadd.f32 %v6630_v25, %v13474_v32  ;;  %v10708_v25 = vld [vmem:[#allocation17 + $0x300] ss:$16 sps:$4 sm:$0xff]  }
 0x546   :  { %8463 = vmatpush2.bf16.msra.mxu1 %v10669_v39  ;;  %v10696_v39 = vld [vmem:[#allocation17 + $0x340] ss:$16 sps:$4 sm:$0xff]   ;;  %v6510_v3 = vadd.f32 %v13474_v32, %v6404_v29  ;;  %v15394_v29 = vld [vmem:[#allocation77_spill] sm:$0xff] }
 0x547   :  { %8576 = vmatpush2.bf16.msra.mxu0 %v10672_v54  ;;  %8464 = vmatprep.subr.bf16.mxu1 %v10677_v62  ;;  %v10701_v54 = vld [vmem:[#allocation17 + $0x124] ss:$16 sps:$4 sm:$0xff]   ;;  %v6494_v62 = vadd.f32 %v13474_v32, %v6388_v58  ;;  %v13519_v58 = vrot.slane %v13376_v51, %v15362_v17 }
 0x548   :  { %8577 = vmatprep.subr.bf16.mxu0 %v10680_v37  ;;  %v15385_v37 = vld [vmem:[#allocation66_spill] sm:$0xff] }
 0x549   :  { %v6412_v59 = vadd.f32 %v6335_v56, %v15385_v37 }
 0x54a   :  { %8465 = vmatpush2.bf16.msra.mxu1 %v10675_v63  ;;  %v15386_v63 = vld [vmem:[#allocation68_spill] sm:$0xff] }
 0x54b   :  { %8578 = vmatpush2.bf16.msra.mxu0 %v10678_v34  ;;  %8466 = vmatprep.subr.bf16.mxu1 %v10683_v46  ;;  %v6420_v34 = vadd.f32 %v6335_v56, %v15386_v63  ;;  %v10704_v46 = vld [vmem:[#allocation17 + $0x324] ss:$16 sps:$4 sm:$0xff]   ;;  %v10699_v56 = vld [vmem:[#allocation17 + $0x120] ss:$16 sps:$4 sm:$0xff]  }
 0x54c   :  { %8579 = vmatprep.subr.bf16.mxu0 %v10686_v33  ;;  %v15387_v33 = vld [vmem:[#allocation70_spill] sm:$0xff] }
 0x54d   :  { %v6366_v15 = vadd.f32 %v6343_v2, %v15387_v33  ;;  %v6526_v8 = vadd.f32 %v13474_v32, %v6420_v34  ;;  %v15396_v63 = vld [vmem:[#allocation42_spill] sm:$0xff]  ;;  %v15397_v33 = vld [vmem:[#allocation44_spill] sm:$0xff] }
 0x54e   :  { %8467 = vmatpush2.bf16.msra.mxu1 %v10681_v12  ;;  %v6374_v12 = vadd.f32 %v6343_v2, %v15388_v35  ;;  %v10705_v34 = vld [vmem:[#allocation17 + $0x100] ss:$16 sps:$4 sm:$0xff]   ;;  %v6574_v35 = vmax.f32 %v6510_v3, 0.0  ;;  %v6758_v3 = vmax.f32 %v6694_v14, 0.0 }
 0x54f   :  { %8580 = vmatpush2.bf16.msra.mxu0 %v10684_v52  ;;  %8468 = vmatprep.subr.bf16.mxu1 %v10689_v7  ;;  %v15390_v52 = vld [vmem:[#allocation81_spill] sm:$0xff] }
 0x550   :  { %8581 = vmatprep.subr.bf16.mxu0 %v10692_v30  ;;  %v6638_v7 = vadd.f32 %v13483_v40, %v15390_v52  ;;  %v15391_v30 = vld [vmem:[#allocation28_spill] sm:$0xff]  ;;  %v15399_v52 = vld [vmem:[#allocation69_spill] sm:$0xff] }
 0x551   :  { %v15392_v27 = vsub.s32 5, %v15391_v30  ;;  %v15393_v57 = vsub.s32 4, %v15391_v30 }
 0x552   :  { %8469 = vmatpush2.bf16.msra.mxu1 %v10687_v11  ;;  %v6702_v51 = vadd.f32 %v6638_v7, %v13474_v32  ;;  %v10713_v7 = vld [vmem:[#allocation17 + $0x4e4] ss:$16 sps:$4 sm:$0xff]  }
 0x553   :  { %8582 = vmatpush2.bf16.msra.mxu0 %v10690_v50  ;;  %8470 = vmatprep.subr.bf16.mxu1 %v10695_v41  ;;  %v13506_v11 = vrot.slane %v10999_v18, %v15392_v27  ;;  %v13510_v55 = vrot.slane %v10999_v18, %v15393_v57  ;;  %v6550_v50 = vmax.f32 %v13491_v4, 0.0  ;;  %v6502_v41 = vadd.f32 %v13474_v32, %v6396_v21 }
 0x554   :  { %8583 = vmatprep.subr.bf16.mxu0 %v10698_v19  ;;  %v10702_v19 = vld [vmem:[#allocation17 + $0x320] ss:$16 sps:$4 sm:$0xff]   ;;  %v6558_v18 = vmax.f32 %v6494_v62, 0.0  ;;  %v6472_v4 = vadd.f32 %v13488_v48, %v6366_v15  ;;  %v6480_v21 = vadd.f32 %v13488_v48, %v6374_v12  ;;  %v6398_v62 = vadd.f32 %v6343_v2, %v15396_v63 }
 0x555   :  { %v6414_v15 = vadd.f32 %v6343_v2, %v15398_v36  ;;  %v6422_v12 = vadd.f32 %v6343_v2, %v15399_v52  ;;  %v6590_v57 = vmax.f32 %v6526_v8, 0.0  ;;  %v15401_v63 = vld [vmem:[#allocation82_spill] sm:$0xff]  ;;  %v6766_v13 = vmax.f32 %v6702_v51, 0.0  ;;  %v10776_v36 = vld [vmem:[#allocation17 + $0x6e4] ss:$16 sps:$4 sm:$0xff]  }
 0x556   :  { %8471 = vmatpush2.bf16.msra.mxu1 %v10693_v53  ;;  %v6518_v53 = vadd.f32 %v13474_v32, %v6412_v59  ;;  %v6406_v59 = vadd.f32 %v6343_v2, %v15397_v33  ;;  %v6640_v33 = vadd.f32 %v13519_v58, %v15401_v63  ;;  %v13541_v8 = vpack.c.bf16 %v6558_v18, %v6550_v50  ;;  %v10716_v50 = vld [vmem:[#allocation17 + $0x4c4] ss:$16 sps:$4 sm:$0xff]  }
 0x557   :  { %8584 = vmatpush2.bf16.msra.mxu0 %v10696_v39  ;;  %8472 = vmatprep.subr.bf16.mxu1 %v10701_v54  ;;  %v6382_v39 = vadd.f32 %v6343_v2, %v15394_v29  ;;  %v15395_v54 = vld [vmem:[#allocation79_spill] sm:$0xff]  ;;  %v15400_v29 = vld [vmem:[#allocation80_spill] sm:$0xff] }
 0x558   :  { %8585 = vmatprep.subr.bf16.mxu0 %v10704_v46  ;;  %v6390_v37 = vadd.f32 %v6343_v2, %v15395_v54  ;;  %v6566_v46 = vmax.f32 %v6502_v41, 0.0  ;;  %v6582_v27 = vmax.f32 %v6518_v53, 0.0  ;;  %v6632_v54 = vadd.f32 %v13519_v58, %v15400_v29  ;;  %15402 = vst [vmem:[#allocation74_spill] sm:$0xff] %v13541_v8 }
 0x559   :  { %v6544_v41 = vmax.f32 %v6480_v21, 0.0  ;;  %v6488_v2 = vadd.f32 %v13488_v48, %v6382_v39  ;;  %v6512_v53 = vadd.f32 %v13488_v48, %v6406_v59  ;;  %v10711_v21 = vld [vmem:[#allocation17 + $0x4e0] ss:$16 sps:$4 sm:$0xff]   ;;  %v6704_v51 = vadd.f32 %v6640_v33, %v13488_v48  ;;  %v15403_v39 = vld [vmem:[#allocation45_spill] sm:$0xff] }
 0x55a   :  { %8473 = vmatpush2.bf16.msra.mxu1 %v10699_v56  ;;  %v6536_v56 = vmax.f32 %v6472_v4, 0.0  ;;  %v13543_v52 = vpack.c.bf16 %v6574_v35, %v6566_v46  ;;  %v6528_v4 = vadd.f32 %v13488_v48, %v6422_v12  ;;  %v6696_v14 = vadd.f32 %v6632_v54, %v13488_v48  ;;  %v10774_v35 = vld [vmem:[#allocation17 + $0x6e0] ss:$16 sps:$4 sm:$0xff]   ;;  %v10782_v54 = vld [vmem:[#allocation17 + $0x6c4] ss:$16 sps:$4 sm:$0xff]  }
 0x55b   :  { %8586 = vmatpush2.bf16.msra.mxu0 %v10702_v19  ;;  %8474 = vmatprep.subr.bf16.mxu1 %v10707_v60  ;;  %v6496_v19 = vadd.f32 %v13488_v48, %v6390_v37  ;;  %v6504_v60 = vadd.f32 %v13488_v48, %v6398_v62  ;;  %v6646_v37 = vadd.f32 %v13483_v40, %v15403_v39  ;;  %v6552_v12 = vmax.f32 %v6488_v2, 0.0  ;;  %v10719_v39 = vld [vmem:[#allocation17 + $0x4a4] ss:$16 sps:$4 sm:$0xff]  }
 0x55c   :  { %8587 = vmatprep.subr.bf16.mxu0 %v10710_v16  ;;  %v6520_v16 = vadd.f32 %v13488_v48, %v6414_v15  ;;  %v13551_v62 = vpack.c.bf16 %v6544_v41, %v6536_v56  ;;  %v13553_v18 = vpack.c.bf16 %v6590_v57, %v6582_v27  ;;  %v13555_v59 = vpack.c.bf16 %v6766_v13, %v6758_v3  ;;  %v15406_v57 = vld [vmem:[#allocation46_spill] sm:$0xff] }
 0x55d   :  { %v6576_v29 = vmax.f32 %v6512_v53, 0.0  ;;  %v6592_v27 = vmax.f32 %v6528_v4, 0.0  ;;  %v6648_v56 = vadd.f32 %v13519_v58, %v15406_v57  ;;  %v10714_v3 = vld [vmem:[#allocation17 + $0x4c0] ss:$16 sps:$4 sm:$0xff]   ;;  %v6768_v2 = vmax.f32 %v6704_v51, 0.0  ;;  %v15410_v51 = vld [vmem:[#allocation83_spill] sm:$0xff] }
 0x55e   :  { %8475 = vmatpush2.bf16.msra.mxu1 %v10705_v34  ;;  %15404 = vst [vmem:[#allocation72_spill] sm:$0xff] %v13551_v62  ;;  %v15405_v34 = vld [vmem:[#allocation47_spill] sm:$0xff]  ;;  %v6584_v13 = vmax.f32 %v6520_v16, 0.0  ;;  %v15411_v57 = vld [vmem:[#allocation40_spill] sm:$0xff] }
 0x55f   :  { %8588 = vmatpush2.bf16.msra.mxu0 %v10708_v25  ;;  %8670 = vmatprep.subr.bf16.mxu1 %v10713_v7  ;;  %v6654_v46 = vadd.f32 %v13483_v40, %v15405_v34  ;;  %v6560_v25 = vmax.f32 %v6496_v19, 0.0  ;;  %v6568_v7 = vmax.f32 %v6504_v60, 0.0  ;;  %v13567_v19 = vadd.f32 %v6646_v37, %v13474_v32 }
 0x560   :  { %8783 = vmatprep.subr.bf16.mxu0 %v10776_v36  ;;  %v6760_v36 = vmax.f32 %v6696_v14, 0.0  ;;  %v13581_v37 = vadd.f32 %v13483_v40, %v15410_v51  ;;  %v15417_v51 = vld [vmem:[#allocation35_spill] sm:$0xff] }
 0x561   :  { %v6120_v15 = vpop.f32.mrf.mxu1  ;;  %8477 = vmatmul.mubr.bf16.vlgmr.msra.gmra.mxu1 %v13512_v38  ;;  %v13573_v34 = vadd.f32 %v6654_v46, %v13474_v32  ;;  %v13577_v14 = vpack.c.bf16 %v6576_v29, %v6568_v7  ;;  %v10717_v29 = vld [vmem:[#allocation17 + $0x4a0] ss:$16 sps:$4 sm:$0xff]  }
 0x562   :  { %v6121_v63 = vadd.f32 %v6120_v15, %v13464_v47  ;;  %v6161_v33 = vpop.f32.mrf.mxu0  ;;  %8590 = vmatmul.mubr.bf16.vlgmr.msra.gmra.mxu0 %v13551_v62  ;;  %8486 = vmatprep.mubr.bf16.mxu1 %v13315_v1  ;;  %v15407_v47 = vld [vmem:[#allocation39_spill] sm:$0xff]  ;;  %v13575_v15 = vpack.c.bf16 %v6560_v25, %v6552_v12  ;;  %v13593_v12 = vadd.f32 %v6648_v56, %v13488_v48  ;;  %v15423_v62 = vld [vmem:[#allocation65_spill] sm:$0xff] }
 0x563   :  { %8599 = vmatprep.mubr.bf16.mxu0 %v13401_v44  ;;  %8671 = vmatpush1.bf16.msra.mxu1 %v10711_v21  ;;  %v6122_v41 = vpop.f32.mrf.mxu1  ;;  %v6656_v60 = vadd.f32 %v13519_v58, %v15407_v47  ;;  %15409 = vst [vmem:[#allocation134_spill] sm:$0xff] %v13577_v14  ;;  %v15422_v44 = vld [vmem:[#allocation62_spill] sm:$0xff] }
 0x564   :  { %v6162_v53 = vadd.f32 %v6161_v33, %v6121_v63  ;;  %v6123_v16 = vadd.f32 %v6122_v41, %v13468_v61  ;;  %v6163_v4 = vpop.f32.mrf.mxu0  ;;  %8672 = vmatprep.subr.bf16.mxu1 %v10716_v50  ;;  %8784 = vmatpush1.bf16.msra.mxu0 %v10774_v35  ;;  %15408 = vst [vmem:[#allocation75_spill] sm:$0xff] %v13575_v15  ;;  %v15413_v41 = vld [vmem:[#allocation84_spill] sm:$0xff] }
 0x565   :  { %v6124_v21 = vpop.f32.mrf.mxu1  ;;  %v13585_v63 = vadd.f32 %v13483_v40, %v15411_v57  ;;  %8785 = vmatprep.subr.bf16.mxu0 %v10782_v54  ;;  %v13590_v35 = vpack.c.bf16 %v6592_v27, %v6584_v13  ;;  %v13598_v33 = vpack.c.bf16 %v6768_v2, %v6760_v36  ;;  %v13601_v54 = vadd.f32 %v6656_v60, %v13488_v48  ;;  %v15415_v2 = vld [vmem:[#allocation55_spill] sm:$0xff] }
 0x566   :  { %v13588_v61 = vrot.slane %v6162_v53, %v15361_v23  ;;  %v6164_v50 = vadd.f32 %v6163_v4, %v6123_v16  ;;  %v6165_v46 = vpop.f32.mrf.mxu0  ;;  %v13596_v25 = vrot.slane %v6162_v53, %v15362_v17  ;;  %v13605_v47 = vadd.f32 %v13519_v58, %v15413_v41  ;;  %v15414_v53 = vld [vmem:[#allocation58_spill] sm:$0xff]  ;;  %v15416_v4 = vld [vmem:[#allocation60_spill] sm:$0xff]  ;;  %v10788_v41 = vld [vmem:[#allocation17 + $0x6a4] ss:$16 sps:$4 sm:$0xff]  }
 0x567   :  { %15412 = vst [vmem:[#allocation36_spill] sm:$0xff] %v13590_v35  ;;  %8673 = vmatpush1.bf16.msra.mxu1 %v10714_v3  ;;  %v6125_v7 = vpop.f32.mrf.mxu1  ;;  %v10722_v3 = vld [vmem:[#allocation17 + $0x484] ss:$16 sps:$4 sm:$0xff]   ;;  %v10780_v16 = vld [vmem:[#allocation17 + $0x6c0] ss:$16 sps:$4 sm:$0xff]  }
 0x568   :  { %v13608_v13 = vrot.slane %v6164_v50, %v15361_v23  ;;  %v13611_v27 = vrot.slane %v6164_v50, %v15362_v17  ;;  %v6166_v56 = vpop.f32.mrf.mxu0  ;;  %8674 = vmatprep.subr.bf16.mxu1 %v10719_v39  ;;  %v6368_v36 = vadd.f32 %v13588_v61, %v15414_v53  ;;  %v6376_v60 = vadd.f32 %v13588_v61, %v15415_v2  ;;  %v15418_v50 = vld [vmem:[#allocation86_spill] sm:$0xff] }
 0x569   :  { %8487 = vmatmul.mubr.bf16.gmra.mxu1 %v13541_v8  ;;  %v6384_v21 = vadd.f32 %v13588_v61, %v15416_v4  ;;  %v6392_v57 = vadd.f32 %v13588_v61, %v15417_v51  ;;  %v6400_v46 = vadd.f32 %v13588_v61, %v15418_v50  ;;  %v15419_v39 = vld [vmem:[#allocation90_spill] sm:$0xff]  ;;  %v15420_v56 = vld [vmem:[#allocation53_spill] sm:$0xff]  ;;  %8786 = vmatpush1.bf16.msra.mxu0 %v10780_v16  ;;  %v15424_v8 = vld [vmem:[#allocation88_spill] sm:$0xff] }
 0x56a   :  { %v6408_v7 = vadd.f32 %v13588_v61, %v15419_v39  ;;  %8600 = vmatmul.mubr.bf16.gmra.mxu0 %v13575_v15  ;;  %8496 = vmatprep.mubr.bf16.mxu1 %v13326_v5  ;;  %v6369_v53 = vadd.f32 %v13608_v13, %v15420_v56  ;;  %v15421_v2 = vld [vmem:[#allocation34_spill] sm:$0xff]  ;;  %v6474_v9 = vadd.f32 %v13510_v55, %v6368_v36  ;;  %v10725_v56 = vld [vmem:[#allocation17 + $0x464] ss:$16 sps:$4 sm:$0xff]  }
 0x56b   :  { %v6377_v4 = vadd.f32 %v13608_v13, %v15421_v2  ;;  %8609 = vmatprep.mubr.bf16.mxu0 %v13414_v6  ;;  %8675 = vmatpush1.bf16.msra.mxu1 %v10717_v29  ;;  %v10720_v51 = vld [vmem:[#allocation17 + $0x480] ss:$16 sps:$4 sm:$0xff]   ;;  %v6482_v39 = vadd.f32 %v13510_v55, %v6376_v60  ;;  %v6385_v15 = vadd.f32 %v13608_v13, %v15422_v44 }
 0x56c   :  { %v6393_v42 = vadd.f32 %v13608_v13, %v15423_v62  ;;  %8676 = vmatprep.subr.bf16.mxu1 %v10722_v3  ;;  %v6475_v2 = vadd.f32 %v13506_v11, %v6369_v53  ;;  %v6538_v17 = vmax.f32 %v6474_v9, 0.0  ;;  %v6490_v29 = vadd.f32 %v13510_v55, %v6384_v21  ;;  %8787 = vmatprep.subr.bf16.mxu0 %v10788_v41 }
 0x56d   :  { %v6483_v36 = vadd.f32 %v13506_v11, %v6377_v4  ;;  %v6546_v6 = vmax.f32 %v6482_v39, 0.0  ;;  %v6491_v50 = vadd.f32 %v13506_v11, %v6385_v15  ;;  %v6498_v44 = vadd.f32 %v13510_v55, %v6392_v57  ;;  %v10723_v4 = vld [vmem:[#allocation17 + $0x460] ss:$16 sps:$4 sm:$0xff]   ;;  %v10728_v15 = vld [vmem:[#allocation17 + $0x444] ss:$16 sps:$4 sm:$0xff]  }
 0x56e   :  { %v6499_v60 = vadd.f32 %v13506_v11, %v6393_v42  ;;  %v6539_v5 = vmax.f32 %v6475_v2, 0.0  ;;  %v6554_v3 = vmax.f32 %v6490_v29, 0.0  ;;  %v6401_v53 = vadd.f32 %v13608_v13, %v15424_v8  ;;  %v15425_v42 = vld [vmem:[#allocation92_spill] sm:$0xff] }
 0x56f   :  { %v6547_v62 = vmax.f32 %v6483_v36, 0.0  ;;  %8677 = vmatpush1.bf16.msra.mxu1 %v10720_v51  ;;  %v13648_v9 = vpack.c.bf16 %v6546_v6, %v6538_v17  ;;  %v6555_v21 = vmax.f32 %v6491_v50, 0.0  ;;  %v6562_v39 = vmax.f32 %v6498_v44, 0.0  ;;  %v10786_v36 = vld [vmem:[#allocation17 + $0x6a0] ss:$16 sps:$4 sm:$0xff]  }
 0x570   :  { %v6563_v16 = vmax.f32 %v6499_v60, 0.0  ;;  %8678 = vmatprep.subr.bf16.mxu1 %v10725_v56  ;;  %v6409_v57 = vadd.f32 %v13608_v13, %v15425_v42  ;;  %v6507_v41 = vadd.f32 %v13506_v11, %v6401_v53  ;;  %v6506_v2 = vadd.f32 %v13510_v55, %v6400_v46  ;;  %v15426_v51 = vld [vmem:[#allocation96_spill] sm:$0xff]  ;;  %v10794_v50 = vld [vmem:[#allocation17 + $0x684] ss:$16 sps:$4 sm:$0xff]   ;;  %v15428_v53 = vld [vmem:[#allocation94_spill] sm:$0xff]  ;;  %8788 = vmatpush1.bf16.msra.mxu0 %v10786_v36 }
 0x571   :  { %v13650_v23 = vpack.c.bf16 %v6547_v62, %v6539_v5  ;;  %8497 = vmatmul.mubr.bf16.gmra.mxu1 %v13543_v52  ;;  %v13659_v17 = vpack.c.bf16 %v6562_v39, %v6554_v3  ;;  %v6514_v6 = vadd.f32 %v13510_v55, %v6408_v7  ;;  %v6417_v5 = vadd.f32 %v13608_v13, %v15426_v51  ;;  %v15427_v60 = vld [vmem:[#allocation100_spill] sm:$0xff]  ;;  %v10731_v42 = vld [vmem:[#allocation17 + $0x424] ss:$16 sps:$4 sm:$0xff]  }
 0x572   :  { %v13657_v8 = vpack.c.bf16 %v6563_v16, %v6555_v21  ;;  %8610 = vmatmul.mubr.bf16.gmra.mxu0 %v13577_v14  ;;  %8506 = vmatprep.mubr.bf16.mxu1 %v13335_v20  ;;  %v6515_v56 = vadd.f32 %v13506_v11, %v6409_v57  ;;  %v6571_v46 = vmax.f32 %v6507_v41, 0.0  ;;  %v6570_v29 = vmax.f32 %v6506_v2, 0.0  ;;  %v10726_v62 = vld [vmem:[#allocation17 + $0x440] ss:$16 sps:$4 sm:$0xff]  }
 0x573   :  { %v6425_v44 = vadd.f32 %v13608_v13, %v15427_v60  ;;  %8619 = vmatprep.mubr.bf16.mxu0 %v13420_v43  ;;  %8679 = vmatpush1.bf16.msra.mxu1 %v10723_v4  ;;  %v6578_v7 = vmax.f32 %v6514_v6, 0.0  ;;  %v6523_v3 = vadd.f32 %v13506_v11, %v6417_v5  ;;  %v6416_v21 = vadd.f32 %v13588_v61, %v15428_v53  ;;  %v15429_v16 = vld [vmem:[#allocation98_spill] sm:$0xff]  ;;  %v15430_v2 = vld [vmem:[#allocation104_spill] sm:$0xff] }
 0x574   :  { %v6424_v39 = vadd.f32 %v13588_v61, %v15429_v16  ;;  %8680 = vmatprep.subr.bf16.mxu1 %v10728_v15  ;;  %v6579_v57 = vmax.f32 %v6515_v56, 0.0  ;;  %v6635_v13 = vadd.f32 %v13611_v27, %v15430_v2  ;;  %v15431_v51 = vld [vmem:[#allocation108_spill] sm:$0xff]  ;;  %8789 = vmatprep.subr.bf16.mxu0 %v10794_v50  ;;  %v15432_v43 = vld [vmem:[#allocation102_spill] sm:$0xff] }
 0x575   :  { %v6531_v41 = vadd.f32 %v13506_v11, %v6425_v44  ;;  %v6643_v4 = vadd.f32 %v13611_v27, %v15431_v51  ;;  %v10792_v6 = vld [vmem:[#allocation17 + $0x680] ss:$16 sps:$4 sm:$0xff]   ;;  %v13680_v5 = vpack.c.bf16 %v6578_v7, %v6570_v29  ;;  %v6587_v60 = vmax.f32 %v6523_v3, 0.0 }
 0x576   :  { %v6522_v53 = vadd.f32 %v13510_v55, %v6416_v21  ;;  %v6530_v61 = vadd.f32 %v13510_v55, %v6424_v39  ;;  %v13684_v15 = vpack.c.bf16 %v6579_v57, %v6571_v46  ;;  %v6699_v44 = vadd.f32 %v6635_v13, %v13506_v11  ;;  %v10729_v2 = vld [vmem:[#allocation17 + $0x420] ss:$16 sps:$4 sm:$0xff]   ;;  %v10734_v21 = vld [vmem:[#allocation17 + $0x404] ss:$16 sps:$4 sm:$0xff]   ;;  %8790 = vmatpush1.bf16.msra.mxu0 %v10792_v6 }
 0x577   :  { %v6595_v56 = vmax.f32 %v6531_v41, 0.0  ;;  %v6707_v16 = vadd.f32 %v6643_v4, %v13506_v11  ;;  %8681 = vmatpush1.bf16.msra.mxu1 %v10726_v62  ;;  %v6634_v29 = vadd.f32 %v13596_v25, %v15432_v43  ;;  %v15433_v7 = vld [vmem:[#allocation106_spill] sm:$0xff]  ;;  %v15434_v57 = vld [vmem:[#allocation112_spill] sm:$0xff]  ;;  %v10800_v62 = vld [vmem:[#allocation17 + $0x664] ss:$16 sps:$4 sm:$0xff]  }
 0x578   :  { %v6586_v51 = vmax.f32 %v6522_v53, 0.0  ;;  %v6594_v36 = vmax.f32 %v6530_v61, 0.0  ;;  %v6642_v3 = vadd.f32 %v13596_v25, %v15433_v7  ;;  %8682 = vmatprep.subr.bf16.mxu1 %v10731_v42  ;;  %v6763_v46 = vmax.f32 %v6699_v44, 0.0  ;;  %v15435_v53 = vld [vmem:[#allocation116_spill] sm:$0xff]  ;;  %v10806_v44 = vld [vmem:[#allocation17 + $0x644] ss:$16 sps:$4 sm:$0xff]   ;;  %8791 = vmatprep.subr.bf16.mxu0 %v10800_v62 }
 0x579   :  { %v13692_v50 = vpack.c.bf16 %v6595_v56, %v6587_v60  ;;  %v6771_v39 = vmax.f32 %v6707_v16, 0.0  ;;  %v6651_v41 = vadd.f32 %v13611_v27, %v15434_v57  ;;  %8507 = vmatmul.mubr.bf16.gmra.mxu1 %v13553_v18  ;;  %v6698_v43 = vadd.f32 %v6634_v29, %v13510_v55  ;;  %v10798_v60 = vld [vmem:[#allocation17 + $0x660] ss:$16 sps:$4 sm:$0xff]  }
 0x57a   :  { %v13697_v13 = vpack.c.bf16 %v6594_v36, %v6586_v51  ;;  %v6706_v4 = vadd.f32 %v6642_v3, %v13510_v55  ;;  %v6659_v42 = vadd.f32 %v13611_v27, %v15435_v53  ;;  %8620 = vmatmul.mubr.bf16.gmra.mxu0 %v13590_v35  ;;  %8516 = vmatprep.mubr.bf16.mxu1 %v13343_v24  ;;  %v15436_v16 = vld [vmem:[#allocation110_spill] sm:$0xff]  ;;  %v15438_v6 = vld [vmem:[#allocation120_spill] sm:$0xff] }
 0x57b   :  { %v13706_v61 = vpack.c.bf16 %v6771_v39, %v6763_v46  ;;  %v6715_v56 = vadd.f32 %v6651_v41, %v13506_v11  ;;  %v6650_v51 = vadd.f32 %v13596_v25, %v15436_v16  ;;  %8629 = vmatprep.mubr.bf16.mxu0 %v13425_v31  ;;  %8683 = vmatpush1.bf16.msra.mxu1 %v10729_v2  ;;  %v10732_v36 = vld [vmem:[#allocation17 + $0x400] ss:$16 sps:$4 sm:$0xff]   ;;  %v6762_v29 = vmax.f32 %v6698_v43, 0.0  ;;  %v10737_v46 = vld [vmem:[#allocation17 + $0x5e4] ss:$16 sps:$4 sm:$0xff]  }
 0x57c   :  { %v6770_v7 = vmax.f32 %v6706_v4, 0.0  ;;  %v6723_v3 = vadd.f32 %v6659_v42, %v13506_v11  ;;  %v15437_v57 = vld [vmem:[#allocation114_spill] sm:$0xff]  ;;  %8684 = vmatprep.subr.bf16.mxu1 %v10734_v21  ;;  %v6667_v16 = vadd.f32 %v13611_v27, %v15438_v6  ;;  %v15439_v35 = vld [vmem:[#allocation124_spill] sm:$0xff]  ;;  %8792 = vmatpush1.bf16.msra.mxu0 %v10798_v60 }
 0x57d   :  { %v6658_v53 = vadd.f32 %v13596_v25, %v15437_v57  ;;  %v6779_v39 = vmax.f32 %v6715_v56, 0.0  ;;  %v6714_v41 = vadd.f32 %v6650_v51, %v13510_v55  ;;  %v6675_v2 = vadd.f32 %v13611_v27, %v15439_v35  ;;  %v10804_v4 = vld [vmem:[#allocation17 + $0x640] ss:$16 sps:$4 sm:$0xff]   ;;  %8793 = vmatprep.subr.bf16.mxu0 %v10806_v44  ;;  %v10740_v44 = vld [vmem:[#allocation17 + $0x5c4] ss:$16 sps:$4 sm:$0xff]  }
 0x57e   :  { %v13720_v31 = vpack.c.bf16 %v6770_v7, %v6762_v29  ;;  %v6787_v43 = vmax.f32 %v6723_v3, 0.0  ;;  %v15440_v57 = vld [vmem:[#allocation118_spill] sm:$0xff]  ;;  %v6731_v56 = vadd.f32 %v6667_v16, %v13506_v11  ;;  %v15442_v3 = vld [vmem:[#allocation128_spill] sm:$0xff]  ;;  %v10812_v16 = vld [vmem:[#allocation17 + $0x624] ss:$16 sps:$4 sm:$0xff]  }
 0x57f   :  { %v6722_v42 = vadd.f32 %v6658_v53, %v13510_v55  ;;  %v6666_v21 = vadd.f32 %v13596_v25, %v15440_v57  ;;  %v6778_v62 = vmax.f32 %v6714_v41, 0.0  ;;  %v6739_v51 = vadd.f32 %v6675_v2, %v13506_v11  ;;  %v15441_v6 = vld [vmem:[#allocation122_spill] sm:$0xff]  ;;  %8685 = vmatpush1.bf16.msra.mxu1 %v10732_v36  ;;  %v15443_v24 = vld [vmem:[#allocation132_spill] sm:$0xff] }
 0x580   :  { %v6674_v14 = vadd.f32 %v13596_v25, %v15441_v6  ;;  %v10735_v35 = vld [vmem:[#allocation17 + $0x5e0] ss:$16 sps:$4 sm:$0xff]   ;;  %v13729_v29 = vpack.c.bf16 %v6787_v43, %v6779_v39  ;;  %v6683_v53 = vadd.f32 %v13611_v27, %v15442_v3  ;;  %8686 = vmatprep.subr.bf16.mxu1 %v10737_v46  ;;  %v6795_v41 = vmax.f32 %v6731_v56, 0.0  ;;  %8794 = vmatpush1.bf16.msra.mxu0 %v10804_v4  ;;  %v10818_v56 = vld [vmem:[#allocation17 + $0x604] ss:$16 sps:$4 sm:$0xff]  }
 0x581   :  { %v6786_v60 = vmax.f32 %v6722_v42, 0.0  ;;  %v6730_v7 = vadd.f32 %v6666_v21, %v13510_v55  ;;  %v6803_v57 = vmax.f32 %v6739_v51, 0.0  ;;  %v6691_v6 = vadd.f32 %v13611_v27, %v15443_v24  ;;  %8517 = vmatmul.mubr.bf16.gmra.mxu1 %v13555_v59  ;;  %v10810_v39 = vld [vmem:[#allocation17 + $0x620] ss:$16 sps:$4 sm:$0xff]   ;;  %8795 = vmatprep.subr.bf16.mxu0 %v10812_v16 }
 0x582   :  { %v6738_v2 = vadd.f32 %v6674_v14, %v13510_v55  ;;  %v6747_v42 = vadd.f32 %v6683_v53, %v13506_v11  ;;  %v15444_v21 = vld [vmem:[#allocation126_spill] sm:$0xff]  ;;  %8630 = vmatmul.mubr.bf16.gmra.mxu0 %v13598_v33  ;;  %8526 = vmatprep.mubr.bf16.mxu1 %v13350_v22 }
 0x583   :  { %v13738_v36 = vpack.c.bf16 %v6786_v60, %v6778_v62  ;;  %v6794_v43 = vmax.f32 %v6730_v7, 0.0  ;;  %v6682_v46 = vadd.f32 %v13596_v25, %v15444_v21  ;;  %v13745_v14 = vpack.c.bf16 %v6803_v57, %v6795_v41  ;;  %v15445_v4 = vld [vmem:[#allocation130_spill] sm:$0xff]  ;;  %8639 = vmatprep.mubr.bf16.mxu0 %v13434_v0  ;;  %8687 = vmatpush2.bf16.msra.mxu1 %v10735_v35  ;;  %v15446_v7 = vld [vmem:[#allocation48_spill] sm:$0xff] }
 0x584   :  { %v6802_v24 = vmax.f32 %v6738_v2, 0.0  ;;  %v6755_v27 = vadd.f32 %v6691_v6, %v13506_v11  ;;  %v6690_v62 = vadd.f32 %v13596_v25, %v15445_v4  ;;  %v10738_v51 = vld [vmem:[#allocation17 + $0x5c0] ss:$16 sps:$4 sm:$0xff]   ;;  %v6776_v60 = vmax.f32 %v13593_v12, 0.0  ;;  %8688 = vmatprep.subr.bf16.mxu1 %v10740_v44  ;;  %v10743_v2 = vld [vmem:[#allocation17 + $0x5a4] ss:$16 sps:$4 sm:$0xff]   ;;  %8796 = vmatpush1.bf16.msra.mxu0 %v10810_v39 }
 0x585   :  { %v6672_v3 = vadd.f32 %v13519_v58, %v15446_v7  ;;  %v6811_v53 = vmax.f32 %v6747_v42, 0.0  ;;  %v6746_v41 = vadd.f32 %v6682_v46, %v13510_v55  ;;  %v6784_v57 = vmax.f32 %v13601_v54, 0.0  ;;  %v10816_v35 = vld [vmem:[#allocation17 + $0x600] ss:$16 sps:$4 sm:$0xff]   ;;  %8797 = vmatprep.subr.bf16.mxu0 %v10818_v56  ;;  %v10746_v46 = vld [vmem:[#allocation17 + $0x584] ss:$16 sps:$4 sm:$0xff]  }
 0x586   :  { %v13756_v11 = vpack.c.bf16 %v6802_v24, %v6794_v43  ;;  %v6819_v25 = vmax.f32 %v6755_v27, 0.0  ;;  %v6754_v6 = vadd.f32 %v6690_v62, %v13510_v55  ;;  %v15447_v42 = vmax.f32 %v13567_v19, 0.0  ;;  %v10741_v16 = vld [vmem:[#allocation17 + $0x5a0] ss:$16 sps:$4 sm:$0xff]   ;;  %v10824_v24 = vld [vmem:[#allocation17 + $0x7e4] ss:$16 sps:$4 sm:$0xff]  }
 0x587   :  { %v6810_v21 = vmax.f32 %v6746_v41, 0.0  ;;  %8689 = vmatpush2.bf16.msra.mxu1 %v10738_v51  ;;  %v15448_v44 = vmax.f32 %v13573_v34, 0.0  ;;  %v6726_v43 = vadd.f32 %v13581_v37, %v13474_v32  ;;  %v6734_v55 = vadd.f32 %v13585_v63, %v13474_v32  ;;  %v10822_v27 = vld [vmem:[#allocation17 + $0x7e0] ss:$16 sps:$4 sm:$0xff]   ;;  %v10830_v37 = vld [vmem:[#allocation17 + $0x7c4] ss:$16 sps:$4 sm:$0xff]  }
 0x588   :  { %v13759_v12 = vpack.c.bf16 %v6819_v25, %v6811_v53  ;;  %v6818_v4 = vmax.f32 %v6754_v6, 0.0  ;;  %v13771_v39 = vpack.c.bf16 %v6784_v57, %v6776_v60  ;;  %8690 = vmatprep.subr.bf16.mxu1 %v10743_v2  ;;  %v6728_v56 = vadd.f32 %v13605_v47, %v13488_v48  ;;  %8798 = vmatpush1.bf16.msra.mxu0 %v10816_v35  ;;  %v10744_v63 = vld [vmem:[#allocation17 + $0x580] ss:$16 sps:$4 sm:$0xff]   ;;  %v15449_v51 = vld [vmem:[#allocation49_spill] sm:$0xff]  ;;  %v15450_v7 = vld [vmem:[#allocation51_spill] sm:$0xff] }
 0x589   :  { %v13765_v54 = vpack.c.bf16 %v15448_v44, %v15447_v42  ;;  %v6736_v19 = vadd.f32 %v6672_v3, %v13488_v48  ;;  %v6790_v62 = vmax.f32 %v6726_v43, 0.0  ;;  %v6798_v47 = vmax.f32 %v6734_v55, 0.0  ;;  %v10749_v57 = vld [vmem:[#allocation17 + $0x564] ss:$16 sps:$4 sm:$0xff]   ;;  %v15451_v2 = vld [vmem:[#allocation50_spill] sm:$0xff]  ;;  %8799 = vmatprep.subr.bf16.mxu0 %v10824_v24 }
 0x58a   :  { %v13776_v34 = vpack.c.bf16 %v6818_v4, %v6810_v21  ;;  %8640 = vmatmul.mubr.bf16.gmra.mxu0 %v13771_v39  ;;  %v6678_v60 = vadd.f32 %v13483_v40, %v15449_v51  ;;  %v6686_v3 = vadd.f32 %v13483_v40, %v15450_v7  ;;  %v6792_v53 = vmax.f32 %v6728_v56, 0.0  ;;  %v15452_v6 = vld [vmem:[#allocation33_spill] sm:$0xff]  ;;  %v10828_v21 = vld [vmem:[#allocation17 + $0x7c0] ss:$16 sps:$4 sm:$0xff]  }
 0x58b   :  { %8527 = vmatmul.mubr.bf16.gmra.mxu1 %v13765_v54  ;;  %8649 = vmatprep.mubr.bf16.mxu0 %v13441_v26  ;;  %v6800_v41 = vmax.f32 %v6736_v19, 0.0  ;;  %v6680_v25 = vadd.f32 %v13519_v58, %v15451_v2  ;;  %v6688_v35 = vadd.f32 %v13519_v58, %v15452_v6  ;;  %v13790_v4 = vpack.c.bf16 %v6798_v47, %v6790_v62  ;;  %v10747_v42 = vld [vmem:[#allocation17 + $0x560] ss:$16 sps:$4 sm:$0xff]   ;;  %v10752_v43 = vld [vmem:[#allocation17 + $0x544] ss:$16 sps:$4 sm:$0xff]  }
 0x58c   :  { %8536 = vmatprep.mubr.bf16.mxu1 %v13356_v45  ;;  %8691 = vmatpush2.bf16.msra.mxu1 %v10741_v16  ;;  %v6742_v40 = vadd.f32 %v6678_v60, %v13474_v32  ;;  %v6750_v44 = vadd.f32 %v6686_v3, %v13474_v32  ;;  %v10834_v56 = vld [vmem:[#allocation17 + $0x7a0] ss:$16 sps:$4 sm:$0xff]   ;;  %v10842_v19 = vld [vmem:[#allocation17 + $0x784] ss:$16 sps:$4 sm:$0xff]   ;;  %v10761_v2 = vld [vmem:[#allocation17 + $0xec] ss:$16 sps:$4 sm:$0xff]  }
 0x58d   :  { %8692 = vmatprep.subr.bf16.mxu1 %v10746_v46  ;;  %8800 = vmatpush2.bf16.msra.mxu0 %v10822_v27  ;;  %v13794_v16 = vpack.c.bf16 %v6800_v41, %v6792_v53  ;;  %v6744_v55 = vadd.f32 %v6680_v25, %v13488_v48  ;;  %v6752_v58 = vadd.f32 %v6688_v35, %v13488_v48  ;;  %v10836_v46 = vld [vmem:[#allocation17 + $0x7a4] ss:$16 sps:$4 sm:$0xff]   ;;  %v10750_v32 = vld [vmem:[#allocation17 + $0x540] ss:$16 sps:$4 sm:$0xff]   ;;  %v10759_v35 = vld [vmem:[#allocation17 + $0xe8] ss:$16 sps:$4 sm:$0xff]  }
 0x58e   :  { %8801 = vmatprep.subr.bf16.mxu0 %v10830_v37  ;;  %v6806_v24 = vmax.f32 %v6742_v40, 0.0  ;;  %v6814_v27 = vmax.f32 %v6750_v44, 0.0  ;;  %v10755_v48 = vld [vmem:[#allocation17 + $0x524] ss:$16 sps:$4 sm:$0xff]   ;;  %v10840_v62 = vld [vmem:[#allocation17 + $0x780] ss:$16 sps:$4 sm:$0xff]  }
 0x58f   :  { %v6808_v37 = vmax.f32 %v6744_v55, 0.0  ;;  %v10753_v51 = vld [vmem:[#allocation17 + $0x520] ss:$16 sps:$4 sm:$0xff]   ;;  %v10848_v60 = vld [vmem:[#allocation17 + $0x764] ss:$16 sps:$4 sm:$0xff]  }
 0x590   :  { %8693 = vmatpush2.bf16.msra.mxu1 %v10744_v63  ;;  %v6816_v63 = vmax.f32 %v6752_v58, 0.0  ;;  %v13802_v47 = vpack.c.bf16 %v6814_v27, %v6806_v24  ;;  %v10758_v3 = vld [vmem:[#allocation17 + $0x504] ss:$16 sps:$4 sm:$0xff]   ;;  %v10846_v53 = vld [vmem:[#allocation17 + $0x760] ss:$16 sps:$4 sm:$0xff]  }
 0x591   :  { %8694 = vmatprep.subr.bf16.mxu1 %v10749_v57  ;;  %8802 = vmatpush2.bf16.msra.mxu0 %v10828_v21  ;;  %v10854_v41 = vld [vmem:[#allocation17 + $0x744] ss:$16 sps:$4 sm:$0xff]   ;;  %v10756_v57 = vld [vmem:[#allocation17 + $0x500] ss:$16 sps:$4 sm:$0xff]   ;;  %v10764_v21 = vld [vmem:[#allocation17 + $0xcc] ss:$16 sps:$4 sm:$0xff]  }
 0x592   :  { %8650 = vmatmul.mubr.bf16.gmra.mxu0 %v13794_v16  ;;  %8803 = vmatprep.subr.bf16.mxu0 %v10836_v46  ;;  %v13804_v7 = vpack.c.bf16 %v6816_v63, %v6808_v37  ;;  %v10852_v25 = vld [vmem:[#allocation17 + $0x740] ss:$16 sps:$4 sm:$0xff]   ;;  %v10860_v6 = vld [vmem:[#allocation17 + $0x724] ss:$16 sps:$4 sm:$0xff]   ;;  %v10762_v46 = vld [vmem:[#allocation17 + $0xc8] ss:$16 sps:$4 sm:$0xff]  }
 0x593   :  { %8537 = vmatmul.mubr.bf16.gmra.mxu1 %v13790_v4  ;;  %8659 = vmatprep.mubr.bf16.mxu0 %v13444_v28  ;;  %v10858_v40 = vld [vmem:[#allocation17 + $0x720] ss:$16 sps:$4 sm:$0xff]   ;;  %v10872_v37 = vld [vmem:[#allocation17 + $0x2ec] ss:$16 sps:$4 sm:$0xff]  }
 0x594   :  { %8546 = vmatprep.mubr.bf16.mxu1 %v13362_v49  ;;  %8695 = vmatpush2.bf16.msra.mxu1 %v10747_v42  ;;  %15453 = vst [vmem:[#allocation73_spill] sm:$0xff] %v13804_v7  ;;  %v10864_v24 = vld [vmem:[#allocation17 + $0x700] ss:$16 sps:$4 sm:$0xff]  }
 0x595   :  { %8696 = vmatprep.subr.bf16.mxu1 %v10752_v43  ;;  %8804 = vmatpush2.bf16.msra.mxu0 %v10834_v56  ;;  %v10866_v43 = vld [vmem:[#allocation17 + $0x704] ss:$16 sps:$4 sm:$0xff]  }
 0x596   :  { %8805 = vmatprep.subr.bf16.mxu0 %v10842_v19  ;;  %v10767_v19 = vld [vmem:[#allocation17 + $0xac] ss:$16 sps:$4 sm:$0xff]  }
 0x598   :  { %8697 = vmatpush2.bf16.msra.mxu1 %v10750_v32 }
 0x599   :  { %8698 = vmatprep.subr.bf16.mxu1 %v10755_v48  ;;  %8806 = vmatpush2.bf16.msra.mxu0 %v10840_v62  ;;  %v10765_v48 = vld [vmem:[#allocation17 + $0xa8] ss:$16 sps:$4 sm:$0xff]  }
 0x59a   :  { %8660 = vmatmul.mubr.bf16.gmra.mxu0 %v13804_v7  ;;  %8807 = vmatprep.subr.bf16.mxu0 %v10848_v60  ;;  %v10768_v60 = vld [vmem:[#allocation17 + $0x88] ss:$16 sps:$4 sm:$0xff]  }
 0x59b   :  { %8547 = vmatmul.mubr.bf16.gmra.mxu1 %v13802_v47 }
 0x59c   :  { %8702 = vmatprep.mubr.bf16.mxu1 %v13650_v23  ;;  %8699 = vmatpush2.bf16.msra.mxu1 %v10753_v51  ;;  %v10770_v51 = vld [vmem:[#allocation17 + $0x8c] ss:$16 sps:$4 sm:$0xff]  }
 0x59d   :  { %8700 = vmatprep.subr.bf16.mxu1 %v10758_v3  ;;  %8808 = vmatpush2.bf16.msra.mxu0 %v10846_v53  ;;  %v10773_v3 = vld [vmem:[#allocation17 + $0x6c] ss:$16 sps:$4 sm:$0xff]   ;;  %v10771_v53 = vld [vmem:[#allocation17 + $0x68] ss:$16 sps:$4 sm:$0xff]  }
 0x59e   :  { %8809 = vmatprep.subr.bf16.mxu0 %v10854_v41  ;;  %v10779_v41 = vld [vmem:[#allocation17 + $0x4c] ss:$16 sps:$4 sm:$0xff]  }
 0x5a0   :  { %8701 = vmatpush2.bf16.msra.mxu1 %v10756_v57  ;;  %v10777_v57 = vld [vmem:[#allocation17 + $0x48] ss:$16 sps:$4 sm:$0xff]  }
 0x5a1   :  { %8896 = vmatprep.subr.bf16.mxu1 %v10761_v2  ;;  %v6202_v42 = vpop.f32.mrf.mxu1  ;;  %8810 = vmatpush2.bf16.msra.mxu0 %v10852_v25  ;;  %v10785_v2 = vld [vmem:[#allocation17 + $0x2c] ss:$16 sps:$4 sm:$0xff]   ;;  %v10783_v25 = vld [vmem:[#allocation17 + $0x28] ss:$16 sps:$4 sm:$0xff]  }
 0x5a2   :  { %v6243_v44 = vpop.f32.mrf.mxu0  ;;  %8811 = vmatprep.subr.bf16.mxu0 %v10860_v6  ;;  %v10791_v6 = vld [vmem:[#allocation17 + $0xc] ss:$16 sps:$4 sm:$0xff]  }
 0x5a3   :  { %8703 = vmatmul.mubr.bf16.vlgmr.msra.gmra.mxu1 %v13648_v9  ;;  %v13810_v55 = vadd.f32 %v6243_v44, %v6202_v42  ;;  %v13813_v58 = vpop.f32.mrf.mxu1  ;;  %v10795_v42 = vld [vmem:[#allocation17 + $0x1e8] ss:$16 sps:$4 sm:$0xff]  }
 0x5a4   :  { %8712 = vmatprep.mubr.bf16.mxu1 %v13657_v8  ;;  %8897 = vmatpush1.bf16.msra.mxu1 %v10759_v35  ;;  %v13815_v56 = vpop.f32.mrf.mxu0  ;;  %v10789_v35 = vld [vmem:[#allocation17 + $0x8] ss:$16 sps:$4 sm:$0xff]  }
 0x5a5   :  { %8898 = vmatprep.subr.bf16.mxu1 %v10764_v21  ;;  %v6206_v32 = vpop.f32.mrf.mxu1  ;;  %8812 = vmatpush2.bf16.msra.mxu0 %v10858_v40  ;;  %v10797_v21 = vld [vmem:[#allocation17 + $0x1ec] ss:$16 sps:$4 sm:$0xff]   ;;  %v10801_v44 = vld [vmem:[#allocation17 + $0x1c8] ss:$16 sps:$4 sm:$0xff]  }
 0x5a6   :  { %v6247_v27 = vpop.f32.mrf.mxu0  ;;  %8813 = vmatprep.subr.bf16.mxu0 %v10866_v43  ;;  %v10803_v40 = vld [vmem:[#allocation17 + $0x1cc] ss:$16 sps:$4 sm:$0xff]   ;;  %v10813_v32 = vld [vmem:[#allocation17 + $0x188] ss:$16 sps:$4 sm:$0xff]  }
 0x5a7   :  { %v6207_v63 = vpop.f32.mrf.mxu1  ;;  %v10809_v43 = vld [vmem:[#allocation17 + $0x1ac] ss:$16 sps:$4 sm:$0xff]   ;;  %v10819_v27 = vld [vmem:[#allocation17 + $0x168] ss:$16 sps:$4 sm:$0xff]  }
 0x5a8   :  { %8899 = vmatpush1.bf16.msra.mxu1 %v10762_v46  ;;  %v6248_v62 = vpop.f32.mrf.mxu0  ;;  %v10807_v46 = vld [vmem:[#allocation17 + $0x1a8] ss:$16 sps:$4 sm:$0xff]  }
 0x5a9   :  { %8900 = vmatprep.subr.bf16.mxu1 %v10767_v19  ;;  %8814 = vmatpush2.bf16.msra.mxu0 %v10864_v24  ;;  %v10815_v19 = vld [vmem:[#allocation17 + $0x18c] ss:$16 sps:$4 sm:$0xff]   ;;  %v10825_v63 = vld [vmem:[#allocation17 + $0x148] ss:$16 sps:$4 sm:$0xff]  }
 0x5aa   :  { %9009 = vmatprep.subr.bf16.mxu0 %v10872_v37  ;;  %v10821_v24 = vld [vmem:[#allocation17 + $0x16c] ss:$16 sps:$4 sm:$0xff]   ;;  %v10831_v62 = vld [vmem:[#allocation17 + $0x128] ss:$16 sps:$4 sm:$0xff]  }
 0x5ab   :  { %8713 = vmatmul.mubr.bf16.gmra.mxu1 %v13659_v17  ;;  %v10827_v37 = vld [vmem:[#allocation17 + $0x14c] ss:$16 sps:$4 sm:$0xff]  }
 0x5ac   :  { %8722 = vmatprep.mubr.bf16.mxu1 %v13684_v15  ;;  %8901 = vmatpush1.bf16.msra.mxu1 %v10765_v48  ;;  %v10833_v48 = vld [vmem:[#allocation17 + $0x12c] ss:$16 sps:$4 sm:$0xff]  }
 0x5ad   :  { %8902 = vmatprep.subr.bf16.mxu1 %v10770_v51  ;;  %v10839_v51 = vld [vmem:[#allocation17 + $0x10c] ss:$16 sps:$4 sm:$0xff]  }
 0x5b0   :  { %8903 = vmatpush1.bf16.msra.mxu1 %v10768_v60  ;;  %v10837_v60 = vld [vmem:[#allocation17 + $0x108] ss:$16 sps:$4 sm:$0xff]  }
 0x5b1   :  { %8904 = vmatprep.subr.bf16.mxu1 %v10773_v3  ;;  %v10845_v3 = vld [vmem:[#allocation17 + $0x4ec] ss:$16 sps:$4 sm:$0xff]  }
 0x5b3   :  { %8723 = vmatmul.mubr.bf16.gmra.mxu1 %v13680_v5 }
 0x5b4   :  { %8732 = vmatprep.mubr.bf16.mxu1 %v13692_v50  ;;  %8905 = vmatpush1.bf16.msra.mxu1 %v10771_v53  ;;  %v10843_v53 = vld [vmem:[#allocation17 + $0x4e8] ss:$16 sps:$4 sm:$0xff]  }
 0x5b5   :  { %8906 = vmatprep.subr.bf16.mxu1 %v10779_v41  ;;  %v10851_v41 = vld [vmem:[#allocation17 + $0x4cc] ss:$16 sps:$4 sm:$0xff]  }
 0x5b8   :  { %8907 = vmatpush1.bf16.msra.mxu1 %v10777_v57 }
 0x5b9   :  { %8908 = vmatprep.subr.bf16.mxu1 %v10785_v2  ;;  %v6246_v2 = vadd.f32 %v13815_v56, %v13813_v58 }
 0x5bb   :  { %8733 = vmatmul.mubr.bf16.gmra.mxu1 %v13697_v13 }
 0x5bc   :  { %8742 = vmatprep.mubr.bf16.mxu1 %v13706_v61  ;;  %8909 = vmatpush1.bf16.msra.mxu1 %v10783_v25 }
 0x5bd   :  { %8910 = vmatprep.subr.bf16.mxu1 %v10791_v6 }
 0x5c0   :  { %8911 = vmatpush1.bf16.msra.mxu1 %v10789_v35  ;;  %v10849_v35 = vld [vmem:[#allocation17 + $0x4c8] ss:$16 sps:$4 sm:$0xff]  }
 0x5c1   :  { %8912 = vmatprep.subr.bf16.mxu1 %v10797_v21 }
 0x5c3   :  { %8743 = vmatmul.mubr.bf16.gmra.mxu1 %v13720_v31 }
 0x5c4   :  { %8752 = vmatprep.mubr.bf16.mxu1 %v13729_v29  ;;  %8913 = vmatpush2.bf16.msra.mxu1 %v10795_v42 }
 0x5c5   :  { %8914 = vmatprep.subr.bf16.mxu1 %v10803_v40 }
 0x5c8   :  { %8915 = vmatpush2.bf16.msra.mxu1 %v10801_v44  ;;  %v10857_v44 = vld [vmem:[#allocation17 + $0x4ac] ss:$16 sps:$4 sm:$0xff]  }
 0x5c9   :  { %8916 = vmatprep.subr.bf16.mxu1 %v10809_v43 }
 0x5cb   :  { %8753 = vmatmul.mubr.bf16.gmra.mxu1 %v13738_v36 }
 0x5cc   :  { %8762 = vmatprep.mubr.bf16.mxu1 %v13745_v14  ;;  %8917 = vmatpush2.bf16.msra.mxu1 %v10807_v46  ;;  %v11000_v46 = vld [vmem:[#allocation16] sm:$0xff] }
 0x5cd   :  { %8918 = vmatprep.subr.bf16.mxu1 %v10815_v19  ;;  %v15454_v19 = vsub.s32 6, %v15391_v30 }
 0x5cf   :  { %v13838_v58 = vrot.slane %v11000_v46, %v15454_v19 }
 0x5d0   :  { %8919 = vmatpush2.bf16.msra.mxu1 %v10813_v32 }
 0x5d1   :  { %8920 = vmatprep.subr.bf16.mxu1 %v10821_v24  ;;  %v10855_v24 = vld [vmem:[#allocation17 + $0x4a8] ss:$16 sps:$4 sm:$0xff]  }
 0x5d3   :  { %8763 = vmatmul.mubr.bf16.gmra.mxu1 %v13756_v11 }
 0x5d4   :  { %8772 = vmatprep.mubr.bf16.mxu1 %v13759_v12  ;;  %8921 = vmatpush2.bf16.msra.mxu1 %v10819_v27  ;;  %v15456_v27 = vsub.s32 7, %v15391_v30 }
 0x5d5   :  { %8922 = vmatprep.subr.bf16.mxu1 %v10827_v37 }
 0x5d6   :  { %v13847_v37 = vrot.slane %v11000_v46, %v15456_v27  ;;  %v15465_v46 = vld [vmem:[#allocation59_spill] sm:$0xff] }
 0x5d7   :  { %v15466_v27 = vld [vmem:[#allocation135_spill] sm:$0xff] }
 0x5d8   :  { %8923 = vmatpush2.bf16.msra.mxu1 %v10825_v63 }
 0x5d9   :  { %8924 = vmatprep.subr.bf16.mxu1 %v10833_v48 }
 0x5db   :  { %8773 = vmatmul.mubr.bf16.gmra.mxu1 %v13776_v34 }
 0x5dc   :  { %8925 = vmatpush2.bf16.msra.mxu1 %v10831_v62  ;;  %8928 = vmatprep.mubr.bf16.mxu1 %v13459_v10  ;;  %v10863_v62 = vld [vmem:[#allocation17 + $0x48c] ss:$16 sps:$4 sm:$0xff]  }
 0x5dd   :  { %8926 = vmatprep.subr.bf16.mxu1 %v10839_v51  ;;  %v15457_v51 = vld [vmem:[#allocation52_spill] sm:$0xff] }
 0x5e0   :  { %8927 = vmatpush2.bf16.msra.mxu1 %v10837_v60 }
 0x5e1   :  { %9122 = vmatprep.subr.bf16.mxu1 %v10845_v3  ;;  %v6284_v57 = vpop.f32.mrf.mxu1  ;;  %v15458_v3 = vld [vmem:[#allocation56_spill] sm:$0xff] }
 0x5e2   :  { %v6285_v25 = vadd.f32 %v6284_v57, %v13810_v55  ;;  %v6325_v6 = vpop.f32.mrf.mxu0  ;;  %v15455_v55 = vld [vmem:[#allocation30_spill] sm:$0xff] }
 0x5e3   :  { %8929 = vmatmul.mubr.bf16.vlgmr.msra.gmra.mxu1 %v13512_v38  ;;  %v6286_v10 = vpop.f32.mrf.mxu1 }
 0x5e4   :  { %8938 = vmatprep.mubr.bf16.mxu1 %v13315_v1  ;;  %9123 = vmatpush1.bf16.msra.mxu1 %v10843_v53  ;;  %v6326_v21 = vadd.f32 %v6325_v6, %v6285_v25  ;;  %v6287_v42 = vadd.f32 %v6286_v10, %v6246_v2  ;;  %v6327_v40 = vpop.f32.mrf.mxu0  ;;  %v15460_v2 = vld [vmem:[#allocation64_spill] sm:$0xff]  ;;  %v15461_v6 = vld [vmem:[#allocation87_spill] sm:$0xff] }
 0x5e5   :  { %9124 = vmatprep.subr.bf16.mxu1 %v10851_v41  ;;  %v6288_v43 = vpop.f32.mrf.mxu1  ;;  %v15459_v41 = vld [vmem:[#allocation61_spill] sm:$0xff] }
 0x5e6   :  { %v13841_v56 = vrot.slane %v6326_v21, %v15455_v55  ;;  %v13843_v38 = vadd.f32 %v6327_v40, %v6287_v42  ;;  %v6329_v1 = vpop.f32.mrf.mxu0  ;;  %v15463_v40 = vld [vmem:[#allocation74_spill] sm:$0xff] }
 0x5e7   :  { %v6289_v32 = vpop.f32.mrf.mxu1 }
 0x5e8   :  { %9125 = vmatpush1.bf16.msra.mxu1 %v10849_v35  ;;  %v13851_v63 = vrot.slane %v13843_v38, %v15455_v55  ;;  %v6330_v48 = vpop.f32.mrf.mxu0  ;;  %v6370_v60 = vadd.f32 %v13841_v56, %v15457_v51  ;;  %v6378_v53 = vadd.f32 %v13841_v56, %v15458_v3  ;;  %v6386_v57 = vadd.f32 %v13841_v56, %v15459_v41  ;;  %v15462_v35 = vld [vmem:[#allocation91_spill] sm:$0xff]  ;;  %v15468_v41 = vld [vmem:[#allocation85_spill] sm:$0xff] }
 0x5e9   :  { %9126 = vmatprep.subr.bf16.mxu1 %v10857_v44  ;;  %v6394_v25 = vadd.f32 %v13841_v56, %v15460_v2  ;;  %v6402_v10 = vadd.f32 %v13841_v56, %v15461_v6  ;;  %v6410_v42 = vadd.f32 %v13841_v56, %v15462_v35  ;;  %v15464_v44 = vld [vmem:[#allocation54_spill] sm:$0xff]  ;;  %v10861_v48 = vld [vmem:[#allocation17 + $0x488] ss:$16 sps:$4 sm:$0xff]  }
 0x5ea   :  { %v6371_v43 = vadd.f32 %v13851_v63, %v15464_v44  ;;  %v6379_v19 = vadd.f32 %v13851_v63, %v15465_v46  ;;  %v6476_v1 = vadd.f32 %v13838_v58, %v6370_v60  ;;  %v6484_v32 = vadd.f32 %v13838_v58, %v6378_v53  ;;  %v15467_v51 = vld [vmem:[#allocation63_spill] sm:$0xff]  ;;  %v10869_v35 = vld [vmem:[#allocation17 + $0x46c] ss:$16 sps:$4 sm:$0xff]  }
 0x5eb   :  { %8939 = vmatmul.mubr.bf16.gmra.mxu1 %v15463_v40  ;;  %v6387_v3 = vadd.f32 %v13851_v63, %v15467_v51  ;;  %v6395_v2 = vadd.f32 %v13851_v63, %v15468_v41  ;;  %v6492_v6 = vadd.f32 %v13838_v58, %v6386_v57  ;;  %v15469_v57 = vld [vmem:[#allocation89_spill] sm:$0xff] }
 0x5ec   :  { %8948 = vmatprep.mubr.bf16.mxu1 %v15466_v27  ;;  %9127 = vmatpush1.bf16.msra.mxu1 %v10855_v24  ;;  %v6477_v40 = vadd.f32 %v13847_v37, %v6371_v43  ;;  %v6485_v60 = vadd.f32 %v13847_v37, %v6379_v19  ;;  %v6540_v44 = vmax.f32 %v6476_v1, 0.0  ;;  %v6548_v53 = vmax.f32 %v6484_v32, 0.0  ;;  %v10867_v43 = vld [vmem:[#allocation17 + $0x468] ss:$16 sps:$4 sm:$0xff]  }
 0x5ed   :  { %9128 = vmatprep.subr.bf16.mxu1 %v10863_v62  ;;  %v6493_v46 = vadd.f32 %v13847_v37, %v6387_v3  ;;  %v6501_v24 = vadd.f32 %v13847_v37, %v6395_v2  ;;  %v6500_v27 = vadd.f32 %v13838_v58, %v6394_v25  ;;  %v6556_v51 = vmax.f32 %v6492_v6, 0.0  ;;  %v15470_v32 = vld [vmem:[#allocation93_spill] sm:$0xff]  ;;  %v10875_v25 = vld [vmem:[#allocation17 + $0x44c] ss:$16 sps:$4 sm:$0xff]  }
 0x5ee   :  { %v6541_v30 = vmax.f32 %v6477_v40, 0.0  ;;  %v6549_v7 = vmax.f32 %v6485_v60, 0.0  ;;  %v13883_v41 = vpack.c.bf16 %v6548_v53, %v6540_v44  ;;  %v6403_v62 = vadd.f32 %v13851_v63, %v15469_v57  ;;  %v15471_v60 = vld [vmem:[#allocation29_spill] sm:$0xff] }
 0x5ef   :  { %v6557_v28 = vmax.f32 %v6493_v46, 0.0  ;;  %v6565_v19 = vmax.f32 %v6501_v24, 0.0  ;;  %v6564_v1 = vmax.f32 %v6500_v27, 0.0  ;;  %v6411_v3 = vadd.f32 %v13851_v63, %v15470_v32  ;;  %v10870_v53 = vld [vmem:[#allocation17 + $0x2e8] ss:$16 sps:$4 sm:$0xff]  }
 0x5f0   :  { %9129 = vmatpush1.bf16.msra.mxu1 %v10861_v48  ;;  %v13889_v2 = vpack.c.bf16 %v6549_v7, %v6541_v30  ;;  %v6508_v6 = vadd.f32 %v13838_v58, %v6402_v10  ;;  %v6516_v40 = vadd.f32 %v13838_v58, %v6410_v42  ;;  %v13894_v44 = vrot.slane %v6326_v21, %v15471_v60  ;;  %v10873_v10 = vld [vmem:[#allocation17 + $0x448] ss:$16 sps:$4 sm:$0xff]  }
 0x5f1   :  { %9130 = vmatprep.subr.bf16.mxu1 %v10869_v35  ;;  %v13896_v48 = vpack.c.bf16 %v6564_v1, %v6556_v51  ;;  %v13900_v46 = vpack.c.bf16 %v6565_v19, %v6557_v28  ;;  %v10878_v35 = vld [vmem:[#allocation17 + $0x2cc] ss:$16 sps:$4 sm:$0xff]   ;;  %v6509_v30 = vadd.f32 %v13847_v37, %v6403_v62  ;;  %v6517_v21 = vadd.f32 %v13847_v37, %v6411_v3  ;;  %v15472_v42 = vld [vmem:[#allocation95_spill] sm:$0xff]  ;;  %v15474_v62 = vld [vmem:[#allocation97_spill] sm:$0xff] }
 0x5f2   :  { %8815 = vmatprep.mubr.bf16.mxu0 %v13889_v2  ;;  %v6572_v7 = vmax.f32 %v6508_v6, 0.0  ;;  %v6580_v24 = vmax.f32 %v6516_v40, 0.0  ;;  %v6418_v27 = vadd.f32 %v13841_v56, %v15472_v42  ;;  %v15473_v51 = vld [vmem:[#allocation99_spill] sm:$0xff]  ;;  %v10881_v28 = vld [vmem:[#allocation17 + $0x42c] ss:$16 sps:$4 sm:$0xff]   ;;  %v6419_v19 = vadd.f32 %v13851_v63, %v15474_v62 }
 0x5f3   :  { %8949 = vmatmul.mubr.bf16.gmra.mxu1 %v13543_v52  ;;  %v6426_v52 = vadd.f32 %v13841_v56, %v15473_v51  ;;  %8816 = vmatmul.mubr.bf16.vlgmr.msra.gmra.mxu0 %v13883_v41  ;;  %v10884_v3 = vld [vmem:[#allocation17 + $0x2ac] ss:$16 sps:$4 sm:$0xff]   ;;  %v15476_v6 = vld [vmem:[#allocation103_spill] sm:$0xff] }
 0x5f4   :  { %8958 = vmatprep.mubr.bf16.mxu1 %v13335_v20  ;;  %9131 = vmatpush1.bf16.msra.mxu1 %v10867_v43  ;;  %v13910_v57 = vpack.c.bf16 %v6580_v24, %v6572_v7  ;;  %v10876_v20 = vld [vmem:[#allocation17 + $0x2c8] ss:$16 sps:$4 sm:$0xff]   ;;  %v6524_v32 = vadd.f32 %v13838_v58, %v6418_v27  ;;  %v6636_v40 = vadd.f32 %v13894_v44, %v15476_v6  ;;  %v6581_v24 = vmax.f32 %v6517_v21, 0.0  ;;  %v10887_v27 = vld [vmem:[#allocation17 + $0x40c] ss:$16 sps:$4 sm:$0xff]  }
 0x5f5   :  { %9132 = vmatprep.subr.bf16.mxu1 %v10875_v25  ;;  %9010 = vmatpush1.bf16.msra.mxu0 %v10870_v53  ;;  %v15475_v43 = vld [vmem:[#allocation101_spill] sm:$0xff]  ;;  %v6532_v56 = vadd.f32 %v13838_v58, %v6426_v52  ;;  %v6573_v25 = vmax.f32 %v6509_v30, 0.0  ;;  %v15477_v51 = vld [vmem:[#allocation107_spill] sm:$0xff]  ;;  %v6525_v52 = vadd.f32 %v13847_v37, %v6419_v19 }
 0x5f6   :  { %8825 = vmatprep.mubr.bf16.mxu0 %v13900_v46  ;;  %v6427_v1 = vadd.f32 %v13851_v63, %v15475_v43  ;;  %9011 = vmatprep.subr.bf16.mxu0 %v10878_v35  ;;  %v10879_v7 = vld [vmem:[#allocation17 + $0x428] ss:$16 sps:$4 sm:$0xff]   ;;  %v6588_v53 = vmax.f32 %v6524_v32, 0.0  ;;  %v6644_v62 = vadd.f32 %v13894_v44, %v15477_v51  ;;  %v13925_v63 = vrot.slane %v13843_v38, %v15471_v60  ;;  %v10890_v32 = vld [vmem:[#allocation17 + $0x28c] ss:$16 sps:$4 sm:$0xff]  }
 0x5f7   :  { %v6596_v42 = vmax.f32 %v6532_v56, 0.0  ;;  %v6700_v35 = vadd.f32 %v6636_v40, %v13838_v58  ;;  %v10882_v30 = vld [vmem:[#allocation17 + $0x2a8] ss:$16 sps:$4 sm:$0xff]   ;;  %v15481_v40 = vld [vmem:[#allocation136_spill] sm:$0xff]  ;;  %v13939_v19 = vpack.c.bf16 %v6581_v24, %v6573_v25 }
 0x5f8   :  { %9133 = vmatpush1.bf16.msra.mxu1 %v10873_v10  ;;  %v6533_v10 = vadd.f32 %v13847_v37, %v6427_v1  ;;  %v6708_v43 = vadd.f32 %v6644_v62, %v13838_v58  ;;  %v15479_v56 = vld [vmem:[#allocation111_spill] sm:$0xff]  ;;  %v6589_v62 = vmax.f32 %v6525_v52, 0.0  ;;  %v10896_v24 = vld [vmem:[#allocation17 + $0x26c] ss:$16 sps:$4 sm:$0xff]  }
 0x5f9   :  { %9134 = vmatprep.subr.bf16.mxu1 %v10881_v28  ;;  %9012 = vmatpush1.bf16.msra.mxu0 %v10876_v20  ;;  %v13930_v21 = vpack.c.bf16 %v6596_v42, %v6588_v53  ;;  %v6764_v38 = vmax.f32 %v6700_v35, 0.0  ;;  %v6652_v28 = vadd.f32 %v13894_v44, %v15479_v56  ;;  %v15480_v6 = vld [vmem:[#allocation115_spill] sm:$0xff]  ;;  %15482 = vst [vmem:[#allocation78_spill] sm:$0xff] %v13939_v19  ;;  %v15483_v56 = vld [vmem:[#allocation105_spill] sm:$0xff] }
 0x5fa   :  { %9013 = vmatprep.subr.bf16.mxu0 %v10884_v3  ;;  %v6660_v20 = vadd.f32 %v13894_v44, %v15480_v6  ;;  %v10885_v1 = vld [vmem:[#allocation17 + $0x408] ss:$16 sps:$4 sm:$0xff]   ;;  %v6772_v53 = vmax.f32 %v6708_v43, 0.0  ;;  %v6597_v35 = vmax.f32 %v6533_v10, 0.0  ;;  %v6637_v25 = vadd.f32 %v13925_v63, %v15483_v56  ;;  %v10899_v10 = vld [vmem:[#allocation17 + $0x5cc] ss:$16 sps:$4 sm:$0xff]  }
 0x5fb   :  { %15478 = vst [vmem:[#allocation76_spill] sm:$0xff] %v13930_v21  ;;  %8959 = vmatmul.mubr.bf16.gmra.mxu1 %v13553_v18  ;;  %8826 = vmatmul.mubr.bf16.gmra.mxu0 %v13896_v48  ;;  %v10893_v18 = vld [vmem:[#allocation17 + $0x5ec] ss:$16 sps:$4 sm:$0xff]   ;;  %v6716_v3 = vadd.f32 %v6652_v28, %v13838_v58  ;;  %v10888_v51 = vld [vmem:[#allocation17 + $0x288] ss:$16 sps:$4 sm:$0xff]  }
 0x5fc   :  { %8968 = vmatprep.mubr.bf16.mxu1 %v15481_v40  ;;  %9135 = vmatpush1.bf16.msra.mxu1 %v10879_v7  ;;  %v6724_v42 = vadd.f32 %v6660_v20, %v13838_v58  ;;  %v13947_v7 = vpack.c.bf16 %v6772_v53, %v6764_v38  ;;  %v15485_v6 = vld [vmem:[#allocation119_spill] sm:$0xff] }
 0x5fd   :  { %9136 = vmatprep.subr.bf16.mxu1 %v10887_v27  ;;  %9014 = vmatpush1.bf16.msra.mxu0 %v10882_v30  ;;  %v6780_v43 = vmax.f32 %v6716_v3, 0.0  ;;  %v6668_v28 = vadd.f32 %v13894_v44, %v15485_v6  ;;  %v15486_v40 = vld [vmem:[#allocation123_spill] sm:$0xff] }
 0x5fe   :  { %8835 = vmatprep.mubr.bf16.mxu0 %v13939_v19  ;;  %15484 = vst [vmem:[#allocation41_spill] sm:$0xff] %v13947_v7  ;;  %9015 = vmatprep.subr.bf16.mxu0 %v10890_v32  ;;  %v6788_v27 = vmax.f32 %v6724_v42, 0.0  ;;  %v6676_v30 = vadd.f32 %v13894_v44, %v15486_v40  ;;  %v10891_v20 = vld [vmem:[#allocation17 + $0x5e8] ss:$16 sps:$4 sm:$0xff]  }
 0x5ff   :  { %v15487_v19 = vld [vmem:[#allocation109_spill] sm:$0xff]  ;;  %v6732_v32 = vadd.f32 %v6668_v28, %v13838_v58  ;;  %v15489_v3 = vld [vmem:[#allocation127_spill] sm:$0xff] }
 0x600   :  { %9137 = vmatpush1.bf16.msra.mxu1 %v10885_v1  ;;  %v6645_v52 = vadd.f32 %v13925_v63, %v15487_v19  ;;  %v13955_v56 = vpack.c.bf16 %v6788_v27, %v6780_v43  ;;  %v6740_v38 = vadd.f32 %v6676_v30, %v13838_v58  ;;  %v10894_v53 = vld [vmem:[#allocation17 + $0x268] ss:$16 sps:$4 sm:$0xff]   ;;  %v6684_v42 = vadd.f32 %v13894_v44, %v15489_v3 }
 0x601   :  { %9138 = vmatprep.subr.bf16.mxu1 %v10893_v18  ;;  %9016 = vmatpush1.bf16.msra.mxu0 %v10888_v51  ;;  %v15490_v6 = vld [vmem:[#allocation131_spill] sm:$0xff]  ;;  %v13964_v19 = vpack.c.bf16 %v6597_v35, %v6589_v62  ;;  %v10902_v18 = vld [vmem:[#allocation17 + $0x24c] ss:$16 sps:$4 sm:$0xff]   ;;  %v6701_v43 = vadd.f32 %v6637_v25, %v13847_v37  ;;  %v6796_v27 = vmax.f32 %v6732_v32, 0.0  ;;  %v15493_v3 = vld [vmem:[#allocation117_spill] sm:$0xff] }
 0x602   :  { %15488 = vst [vmem:[#allocation43_spill] sm:$0xff] %v13955_v56  ;;  %v6692_v1 = vadd.f32 %v13894_v44, %v15490_v6  ;;  %9017 = vmatprep.subr.bf16.mxu0 %v10896_v24  ;;  %v6804_v28 = vmax.f32 %v6740_v38, 0.0  ;;  %v10897_v51 = vld [vmem:[#allocation17 + $0x5c8] ss:$16 sps:$4 sm:$0xff]   ;;  %v6709_v40 = vadd.f32 %v6645_v52, %v13847_v37  ;;  %v6748_v30 = vadd.f32 %v6684_v42, %v13838_v58  ;;  %v10908_v24 = vld [vmem:[#allocation17 + $0x22c] ss:$16 sps:$4 sm:$0xff]  }
 0x603   :  { %8969 = vmatmul.mubr.bf16.gmra.mxu1 %v13555_v59  ;;  %8836 = vmatmul.mubr.bf16.gmra.mxu0 %v13910_v57  ;;  %v10905_v59 = vld [vmem:[#allocation17 + $0x5ac] ss:$16 sps:$4 sm:$0xff]   ;;  %v10900_v35 = vld [vmem:[#allocation17 + $0x248] ss:$16 sps:$4 sm:$0xff]  }
 0x604   :  { %8978 = vmatprep.mubr.bf16.mxu1 %v13350_v22  ;;  %9139 = vmatpush2.bf16.msra.mxu1 %v10891_v20  ;;  %v6756_v44 = vadd.f32 %v6692_v1, %v13838_v58  ;;  %v13972_v62 = vpack.c.bf16 %v6804_v28, %v6796_v27  ;;  %v6812_v25 = vmax.f32 %v6748_v30, 0.0  ;;  %v15492_v20 = vld [vmem:[#allocation113_spill] sm:$0xff]  ;;  %v6765_v58 = vmax.f32 %v6701_v43, 0.0  ;;  %v10914_v1 = vld [vmem:[#allocation17 + $0x20c] ss:$16 sps:$4 sm:$0xff]  }
 0x605   :  { %9140 = vmatprep.subr.bf16.mxu1 %v10899_v10  ;;  %9018 = vmatpush1.bf16.msra.mxu0 %v10894_v53  ;;  %v6653_v52 = vadd.f32 %v13925_v63, %v15492_v20  ;;  %v10903_v32 = vld [vmem:[#allocation17 + $0x5a8] ss:$16 sps:$4 sm:$0xff]   ;;  %v6773_v38 = vmax.f32 %v6709_v40, 0.0  ;;  %v6661_v10 = vadd.f32 %v13925_v63, %v15493_v3  ;;  %v10911_v53 = vld [vmem:[#allocation17 + $0x58c] ss:$16 sps:$4 sm:$0xff]  }
 0x606   :  { %15491 = vst [vmem:[#allocation66_spill] sm:$0xff] %v13972_v62  ;;  %8845 = vmatprep.mubr.bf16.mxu0 %v13964_v19  ;;  %v6820_v22 = vmax.f32 %v6756_v44, 0.0  ;;  %9019 = vmatprep.subr.bf16.mxu0 %v10902_v18  ;;  %v10906_v6 = vld [vmem:[#allocation17 + $0x228] ss:$16 sps:$4 sm:$0xff]   ;;  %v10920_v40 = vld [vmem:[#allocation17 + $0x3ec] ss:$16 sps:$4 sm:$0xff]  }
 0x607   :  { %v13983_v18 = vpack.c.bf16 %v6773_v38, %v6765_v58  ;;  %v10909_v43 = vld [vmem:[#allocation17 + $0x588] ss:$16 sps:$4 sm:$0xff]   ;;  %v6717_v27 = vadd.f32 %v6653_v52, %v13847_v37  ;;  %v6725_v28 = vadd.f32 %v6661_v10, %v13847_v37  ;;  %v10926_v52 = vld [vmem:[#allocation17 + $0x3cc] ss:$16 sps:$4 sm:$0xff]  }
 0x608   :  { %9141 = vmatpush2.bf16.msra.mxu1 %v10897_v51  ;;  %v13979_v42 = vpack.c.bf16 %v6820_v22, %v6812_v25  ;;  %v10917_v51 = vld [vmem:[#allocation17 + $0x56c] ss:$16 sps:$4 sm:$0xff]   ;;  %v15496_v25 = vld [vmem:[#allocation125_spill] sm:$0xff] }
 0x609   :  { %9142 = vmatprep.subr.bf16.mxu1 %v10905_v59  ;;  %9020 = vmatpush1.bf16.msra.mxu0 %v10900_v35  ;;  %15494 = vst [vmem:[#allocation68_spill] sm:$0xff] %v13983_v18  ;;  %v6781_v30 = vmax.f32 %v6717_v27, 0.0  ;;  %v6789_v44 = vmax.f32 %v6725_v28, 0.0  ;;  %v15495_v59 = vld [vmem:[#allocation121_spill] sm:$0xff]  ;;  %v6677_v22 = vadd.f32 %v13925_v63, %v15496_v25  ;;  %v10929_v10 = vld [vmem:[#allocation17 + $0x52c] ss:$16 sps:$4 sm:$0xff]  }
 0x60a   :  { %9021 = vmatprep.subr.bf16.mxu0 %v10908_v24  ;;  %v6669_v35 = vadd.f32 %v13925_v63, %v15495_v59  ;;  %v10923_v24 = vld [vmem:[#allocation17 + $0x54c] ss:$16 sps:$4 sm:$0xff]   ;;  %v10918_v20 = vld [vmem:[#allocation17 + $0x3e8] ss:$16 sps:$4 sm:$0xff]   ;;  %v7142_v59 = vld [vmem:[#allocation19] sm:$0xf] }
 0x60b   :  { %8979 = vmatmul.mubr.bf16.gmra.mxu1 %v13765_v54  ;;  %8846 = vmatmul.mubr.bf16.gmra.mxu0 %v13930_v21  ;;  %v10912_v54 = vld [vmem:[#allocation17 + $0x208] ss:$16 sps:$4 sm:$0xff]   ;;  %v6741_v3 = vadd.f32 %v6677_v22, %v13847_v37  ;;  %v10944_v22 = vld [vmem:[#allocation17 + $0x36c] ss:$16 sps:$4 sm:$0xff]  }
 0x60c   :  { %8988 = vmatprep.mubr.bf16.mxu1 %v13356_v45  ;;  %9143 = vmatpush2.bf16.msra.mxu1 %v10903_v32  ;;  %v10915_v45 = vld [vmem:[#allocation17 + $0x568] ss:$16 sps:$4 sm:$0xff]   ;;  %v13995_v32 = vpack.c.bf16 %v6789_v44, %v6781_v30  ;;  %v6733_v38 = vadd.f32 %v6669_v35, %v13847_v37 }
 0x60d   :  { %9144 = vmatprep.subr.bf16.mxu1 %v10911_v53  ;;  %9022 = vmatpush1.bf16.msra.mxu0 %v10906_v6  ;;  %v10921_v58 = vld [vmem:[#allocation17 + $0x548] ss:$16 sps:$4 sm:$0xff]   ;;  %v10932_v53 = vld [vmem:[#allocation17 + $0x3ac] ss:$16 sps:$4 sm:$0xff]  }
 0x60e   :  { %8855 = vmatprep.mubr.bf16.mxu0 %v13983_v18  ;;  %9023 = vmatprep.subr.bf16.mxu0 %v10914_v1  ;;  %15497 = vst [vmem:[#allocation70_spill] sm:$0xff] %v13995_v32  ;;  %v6797_v6 = vmax.f32 %v6733_v38, 0.0  ;;  %v6805_v1 = vmax.f32 %v6741_v3, 0.0  ;;  %v15499_v28 = vld [vmem:[#allocation133_spill] sm:$0xff] }
 0x60f   :  { %v10933_v44 = vld [vmem:[#allocation17 + $0x508] ss:$16 sps:$4 sm:$0xff]  }
 0x610   :  { %9145 = vmatpush2.bf16.msra.mxu1 %v10909_v43  ;;  %v15498_v43 = vld [vmem:[#allocation129_spill] sm:$0xff]  ;;  %v14007_v30 = vpack.c.bf16 %v6805_v1, %v6797_v6 }
 0x611   :  { %9146 = vmatprep.subr.bf16.mxu1 %v10917_v51  ;;  %9024 = vmatpush1.bf16.msra.mxu0 %v10912_v54  ;;  %v6685_v27 = vadd.f32 %v13925_v63, %v15498_v43  ;;  %v6693_v51 = vadd.f32 %v13925_v63, %v15499_v28  ;;  %v10935_v54 = vld [vmem:[#allocation17 + $0x50c] ss:$16 sps:$4 sm:$0xff]   ;;  %v10942_v3 = vld [vmem:[#allocation17 + $0x368] ss:$16 sps:$4 sm:$0xff]  }
 0x612   :  { %9025 = vmatprep.subr.bf16.mxu0 %v10920_v40  ;;  %v10930_v40 = vld [vmem:[#allocation17 + $0x3a8] ss:$16 sps:$4 sm:$0xff]   ;;  %15500 = vst [vmem:[#allocation37_spill] sm:$0xff] %v14007_v30  ;;  %v14012_v63 = vld [vmem:[#allocation17 + $0x6ec] ss:$16 sps:$4 sm:$0xff]  }
 0x613   :  { %8989 = vmatmul.mubr.bf16.gmra.mxu1 %v13790_v4  ;;  %8856 = vmatmul.mubr.bf16.gmra.mxu0 %v13947_v7  ;;  %v10924_v4 = vld [vmem:[#allocation17 + $0x3c8] ss:$16 sps:$4 sm:$0xff]   ;;  %v6749_v35 = vadd.f32 %v6685_v27, %v13847_v37  ;;  %v6757_v25 = vadd.f32 %v6693_v51, %v13847_v37  ;;  %v14022_v37 = vrot.slane %v7142_v59, %v15471_v60 }
 0x614   :  { %8998 = vmatprep.mubr.bf16.mxu1 %v13362_v49  ;;  %9147 = vmatpush2.bf16.msra.mxu1 %v10915_v45  ;;  %v10927_v49 = vld [vmem:[#allocation17 + $0x528] ss:$16 sps:$4 sm:$0xff]   ;;  %v10938_v45 = vld [vmem:[#allocation17 + $0x38c] ss:$16 sps:$4 sm:$0xff]  }
 0x615   :  { %9148 = vmatprep.subr.bf16.mxu1 %v10923_v24  ;;  %9026 = vmatpush2.bf16.msra.mxu0 %v10918_v20  ;;  %v14018_v24 = vld [vmem:[#allocation17 + $0x6e8] ss:$16 sps:$4 sm:$0xff]   ;;  %v6813_v20 = vmax.f32 %v6749_v35, 0.0 }
 0x616   :  { %8865 = vmatprep.mubr.bf16.mxu0 %v13995_v32  ;;  %9027 = vmatprep.subr.bf16.mxu0 %v10926_v52  ;;  %v6821_v52 = vmax.f32 %v6757_v25, 0.0  ;;  %v14032_v60 = vld [vmem:[#allocation17 + $0x6c8] ss:$16 sps:$4 sm:$0xff]   ;;  %v14055_v25 = vld [vmem:[#allocation17 + $0x68c] ss:$16 sps:$4 sm:$0xff]  }
 0x617   :  { %v10948_v27 = vld [vmem:[#allocation17 + $0x348] ss:$16 sps:$4 sm:$0xff]  }
 0x618   :  { %9149 = vmatpush2.bf16.msra.mxu1 %v10921_v58  ;;  %v14024_v58 = vld [vmem:[#allocation17 + $0x6cc] ss:$16 sps:$4 sm:$0xff]  }
 0x619   :  { %9150 = vmatprep.subr.bf16.mxu1 %v10929_v10  ;;  %9028 = vmatpush2.bf16.msra.mxu0 %v10924_v4  ;;  %v10950_v4 = vld [vmem:[#allocation17 + $0x34c] ss:$16 sps:$4 sm:$0xff]  }
 0x61a   :  { %9029 = vmatprep.subr.bf16.mxu0 %v10932_v53 }
 0x61b   :  { %8999 = vmatmul.mubr.bf16.gmra.mxu1 %v13802_v47  ;;  %8866 = vmatmul.mubr.bf16.gmra.mxu0 %v13955_v56  ;;  %v10936_v47 = vld [vmem:[#allocation17 + $0x388] ss:$16 sps:$4 sm:$0xff]  }
 0x61c   :  { %9151 = vmatpush2.bf16.msra.mxu1 %v10927_v49  ;;  %9154 = vmatprep.mubr.bf16.mxu1 %v13650_v23  ;;  %v14016_v23 = vrot.slane %v7142_v59, %v15455_v55  ;;  %v14030_v49 = vpack.c.bf16 %v6821_v52, %v6813_v20 }
 0x61d   :  { %9152 = vmatprep.subr.bf16.mxu1 %v10935_v54  ;;  %9030 = vmatpush2.bf16.msra.mxu0 %v10930_v40  ;;  %v10956_v40 = vld [vmem:[#allocation17 + $0x32c] ss:$16 sps:$4 sm:$0xff]  }
 0x61e   :  { %8875 = vmatprep.mubr.bf16.mxu0 %v14007_v30  ;;  %9031 = vmatprep.subr.bf16.mxu0 %v10938_v45  ;;  %v15504_v30 = vld [vmem:[#allocation75_spill] sm:$0xff] }
 0x620   :  { %9153 = vmatpush2.bf16.msra.mxu1 %v10933_v44  ;;  %v14048_v44 = vld [vmem:[#allocation17 + $0x6a8] ss:$16 sps:$4 sm:$0xff]  }
 0x621   :  { %10532 = vmatprep.subr.bf16.mxu1 %v14012_v63  ;;  %9032 = vmatpush2.bf16.msra.mxu0 %v10936_v47  ;;  %v8478_v38 = vpop.f32.mrf.mxu1 }
 0x622   :  { %v8479_v10 = vadd.f32 %v8478_v38, %v14016_v23  ;;  %v8591_v55 = vpop.f32.mrf.mxu0  ;;  %9033 = vmatprep.subr.bf16.mxu0 %v10944_v22  ;;  %v10954_v22 = vld [vmem:[#allocation17 + $0x328] ss:$16 sps:$4 sm:$0xff]   ;;  %v10962_v38 = vld [vmem:[#allocation17 + $0x30c] ss:$16 sps:$4 sm:$0xff]  }
 0x623   :  { %9155 = vmatmul.mubr.bf16.vlgmr.msra.gmra.mxu1 %v13648_v9  ;;  %v8480_v53 = vpop.f32.mrf.mxu1  ;;  %8876 = vmatmul.mubr.bf16.gmra.mxu0 %v13972_v62  ;;  %v14039_v9 = vld [vmem:[#allocation17 + $0x6ac] ss:$16 sps:$4 sm:$0xff]  }
 0x624   :  { %9164 = vmatprep.mubr.bf16.mxu1 %v13657_v8  ;;  %10548 = vmatpush1.bf16.msra.mxu1 %v14018_v24  ;;  %v14034_v6 = vadd.f32 %v8591_v55, %v8479_v10  ;;  %v8481_v1 = vadd.f32 %v8480_v53, %v14022_v37  ;;  %v8593_v43 = vpop.f32.mrf.mxu0  ;;  %v14061_v10 = vld [vmem:[#allocation17 + $0x688] ss:$16 sps:$4 sm:$0xff]  }
 0x625   :  { %10533 = vmatprep.subr.bf16.mxu1 %v14024_v58  ;;  %9034 = vmatpush2.bf16.msra.mxu0 %v10942_v3  ;;  %v8482_v8 = vpop.f32.mrf.mxu1 }
 0x626   :  { %8885 = vmatprep.mubr.bf16.mxu0 %v14030_v49  ;;  %v14042_v28 = vadd.f32 %v8593_v43, %v8481_v1  ;;  %v8483_v51 = vadd.f32 %v8482_v8, %v14016_v23  ;;  %v8595_v54 = vpop.f32.mrf.mxu0  ;;  %9035 = vmatprep.subr.bf16.mxu0 %v10950_v4  ;;  %v14068_v1 = vld [vmem:[#allocation17 + $0x66c] ss:$16 sps:$4 sm:$0xff]   ;;  %v10960_v43 = vld [vmem:[#allocation17 + $0x308] ss:$16 sps:$4 sm:$0xff]  }
 0x627   :  { %v14046_v45 = vpop.f32.mrf.mxu1 }
 0x628   :  { %10549 = vmatpush1.bf16.msra.mxu1 %v14032_v60  ;;  %v14050_v59 = vadd.f32 %v8595_v54, %v8483_v51  ;;  %v14052_v35 = vpop.f32.mrf.mxu0 }
 0x629   :  { %10534 = vmatprep.subr.bf16.mxu1 %v14039_v9  ;;  %9036 = vmatpush2.bf16.msra.mxu0 %v10948_v27  ;;  %v8488_v47 = vpop.f32.mrf.mxu1 }
 0x62a   :  { %v8489_v20 = vadd.f32 %v8488_v47, %v14016_v23  ;;  %v8601_v52 = vpop.f32.mrf.mxu0  ;;  %9037 = vmatprep.subr.bf16.mxu0 %v10956_v40  ;;  %v14077_v40 = vld [vmem:[#allocation17 + $0x668] ss:$16 sps:$4 sm:$0xff]  }
 0x62b   :  { %9165 = vmatmul.mubr.bf16.gmra.mxu1 %v13659_v17  ;;  %v8490_v3 = vpop.f32.mrf.mxu1  ;;  %8886 = vmatmul.mubr.bf16.gmra.mxu0 %v13979_v42  ;;  %v15501_v17 = vld [vmem:[#allocation71_spill] sm:$0xff] }
 0x62c   :  { %9174 = vmatprep.mubr.bf16.mxu1 %v13684_v15  ;;  %10550 = vmatpush1.bf16.msra.mxu1 %v14048_v44  ;;  %v14063_v55 = vadd.f32 %v8601_v52, %v8489_v20  ;;  %v8491_v4 = vadd.f32 %v8490_v3, %v14022_v37  ;;  %v8603_v53 = vpop.f32.mrf.mxu0 }
 0x62d   :  { %10535 = vmatprep.subr.bf16.mxu1 %v14055_v25  ;;  %9038 = vmatpush2.bf16.msra.mxu0 %v10954_v22  ;;  %v8492_v15 = vpop.f32.mrf.mxu1  ;;  %v14084_v22 = vld [vmem:[#allocation17 + $0x64c] ss:$16 sps:$4 sm:$0xff]  }
 0x62e   :  { %9041 = vmatprep.mubr.bf16.mxu0 %v15501_v17  ;;  %v14071_v8 = vadd.f32 %v8603_v53, %v8491_v4  ;;  %v8493_v27 = vadd.f32 %v8492_v15, %v14016_v23  ;;  %v8605_v51 = vpop.f32.mrf.mxu0  ;;  %9039 = vmatprep.subr.bf16.mxu0 %v10962_v38  ;;  %v14091_v53 = vld [vmem:[#allocation17 + $0x648] ss:$16 sps:$4 sm:$0xff]  }
 0x62f   :  { %v14075_v54 = vpop.f32.mrf.mxu1 }
 0x630   :  { %10551 = vmatpush1.bf16.msra.mxu1 %v14061_v10  ;;  %v14079_v47 = vadd.f32 %v8605_v51, %v8493_v27  ;;  %v14081_v20 = vpop.f32.mrf.mxu0  ;;  %v15502_v27 = vld [vmem:[#allocation72_spill] sm:$0xff] }
 0x631   :  { %10536 = vmatprep.subr.bf16.mxu1 %v14068_v1  ;;  %9040 = vmatpush2.bf16.msra.mxu0 %v10960_v43  ;;  %v8498_v52 = vpop.f32.mrf.mxu1  ;;  %v14098_v51 = vld [vmem:[#allocation17 + $0x62c] ss:$16 sps:$4 sm:$0xff]  }
 0x632   :  { %v8499_v3 = vadd.f32 %v8498_v52, %v14016_v23  ;;  %v8611_v4 = vpop.f32.mrf.mxu0  ;;  %9235 = vmatprep.subr.bf16.mxu0 %v14012_v63 }
 0x633   :  { %9175 = vmatmul.mubr.bf16.gmra.mxu1 %v13680_v5  ;;  %v8500_v38 = vpop.f32.mrf.mxu1  ;;  %v15503_v5 = vld [vmem:[#allocation137_spill] sm:$0xff] }
 0x634   :  { %9184 = vmatprep.mubr.bf16.mxu1 %v13692_v50  ;;  %10552 = vmatpush1.bf16.msra.mxu1 %v14077_v40  ;;  %v14093_v17 = vadd.f32 %v8611_v4, %v8499_v3  ;;  %v8501_v15 = vadd.f32 %v8500_v38, %v14022_v37  ;;  %v8613_v43 = vpop.f32.mrf.mxu0  ;;  %v14109_v38 = vld [vmem:[#allocation17 + $0x628] ss:$16 sps:$4 sm:$0xff]  }
 0x635   :  { %9042 = vmatmul.mubr.bf16.vlgmr.msra.gmra.mxu0 %v15502_v27  ;;  %10537 = vmatprep.subr.bf16.mxu1 %v14084_v22  ;;  %v8502_v50 = vpop.f32.mrf.mxu1 }
 0x636   :  { %9236 = vmatpush1.bf16.msra.mxu0 %v14018_v24  ;;  %9051 = vmatprep.mubr.bf16.mxu0 %v15503_v5  ;;  %v14102_v63 = vadd.f32 %v8613_v43, %v8501_v15  ;;  %v8503_v52 = vadd.f32 %v8502_v50, %v14016_v23  ;;  %v8615_v3 = vpop.f32.mrf.mxu0  ;;  %v14116_v24 = vld [vmem:[#allocation17 + $0x60c] ss:$16 sps:$4 sm:$0xff]   ;;  %v14124_v50 = vld [vmem:[#allocation17 + $0x608] ss:$16 sps:$4 sm:$0xff]  }
 0x637   :  { %9237 = vmatprep.subr.bf16.mxu0 %v14024_v58  ;;  %v14107_v4 = vpop.f32.mrf.mxu1 }
 0x638   :  { %10553 = vmatpush1.bf16.msra.mxu1 %v14091_v53  ;;  %v14111_v27 = vadd.f32 %v8615_v3, %v8503_v52  ;;  %v14113_v62 = vpop.f32.mrf.mxu0 }
 0x639   :  { %10538 = vmatprep.subr.bf16.mxu1 %v14098_v51  ;;  %v8508_v15 = vpop.f32.mrf.mxu1 }
 0x63a   :  { %9238 = vmatpush1.bf16.msra.mxu0 %v14032_v60  ;;  %v8509_v43 = vadd.f32 %v8508_v15, %v14016_v23  ;;  %v8621_v58 = vpop.f32.mrf.mxu0  ;;  %v14131_v15 = vld [vmem:[#allocation17 + $0x7ec] ss:$16 sps:$4 sm:$0xff]  }
 0x63b   :  { %9185 = vmatmul.mubr.bf16.gmra.mxu1 %v13697_v13  ;;  %9239 = vmatprep.subr.bf16.mxu0 %v14039_v9  ;;  %v8510_v5 = vpop.f32.mrf.mxu1  ;;  %v15505_v13 = vld [vmem:[#allocation138_spill] sm:$0xff] }
 0x63c   :  { %9194 = vmatprep.mubr.bf16.mxu1 %v13706_v61  ;;  %10554 = vmatpush1.bf16.msra.mxu1 %v14109_v38  ;;  %v14126_v52 = vadd.f32 %v8621_v58, %v8509_v43  ;;  %v8511_v3 = vadd.f32 %v8510_v5, %v14022_v37  ;;  %v8623_v60 = vpop.f32.mrf.mxu0 }
 0x63d   :  { %9052 = vmatmul.mubr.bf16.gmra.mxu0 %v15504_v30  ;;  %10539 = vmatprep.subr.bf16.mxu1 %v14116_v24  ;;  %v8512_v61 = vpop.f32.mrf.mxu1  ;;  %v14140_v30 = vld [vmem:[#allocation17 + $0x7e8] ss:$16 sps:$4 sm:$0xff]  }
 0x63e   :  { %9240 = vmatpush1.bf16.msra.mxu0 %v14048_v44  ;;  %9061 = vmatprep.mubr.bf16.mxu0 %v15505_v13  ;;  %v14135_v9 = vadd.f32 %v8623_v60, %v8511_v3  ;;  %v8513_v56 = vadd.f32 %v8512_v61, %v14016_v23  ;;  %v8625_v43 = vpop.f32.mrf.mxu0  ;;  %v14146_v13 = vld [vmem:[#allocation17 + $0x7cc] ss:$16 sps:$4 sm:$0xff]  }
 0x63f   :  { %9241 = vmatprep.subr.bf16.mxu0 %v14055_v25  ;;  %v8514_v58 = vpop.f32.mrf.mxu1 }
 0x640   :  { %10555 = vmatpush1.bf16.msra.mxu1 %v14124_v50  ;;  %v14142_v5 = vadd.f32 %v8625_v43, %v8513_v56  ;;  %v8515_v32 = vadd.f32 %v8514_v58, %v14022_v37  ;;  %v8627_v44 = vpop.f32.mrf.mxu0  ;;  %v14156_v43 = vld [vmem:[#allocation17 + $0x7c8] ss:$16 sps:$4 sm:$0xff]  }
 0x641   :  { %10540 = vmatprep.subr.bf16.mxu1 %v14131_v15  ;;  %v8518_v3 = vpop.f32.mrf.mxu1 }
 0x642   :  { %9242 = vmatpush1.bf16.msra.mxu0 %v14061_v10  ;;  %v14149_v60 = vadd.f32 %v8627_v44, %v8515_v32  ;;  %v8519_v25 = vadd.f32 %v8518_v3, %v14016_v23  ;;  %v8631_v61 = vpop.f32.mrf.mxu0  ;;  %v15506_v44 = vld [vmem:[#allocation134_spill] sm:$0xff] }
 0x643   :  { %9195 = vmatmul.mubr.bf16.gmra.mxu1 %v13720_v31  ;;  %9243 = vmatprep.subr.bf16.mxu0 %v14068_v1  ;;  %v8520_v56 = vpop.f32.mrf.mxu1  ;;  %v14163_v3 = vld [vmem:[#allocation17 + $0x7ac] ss:$16 sps:$4 sm:$0xff]   ;;  %v15507_v31 = vld [vmem:[#allocation139_spill] sm:$0xff] }
 0x644   :  { %9204 = vmatprep.mubr.bf16.mxu1 %v13729_v29  ;;  %10556 = vmatpush2.bf16.msra.mxu1 %v14140_v30  ;;  %v14158_v58 = vadd.f32 %v8631_v61, %v8519_v25  ;;  %v8521_v10 = vadd.f32 %v8520_v56, %v14022_v37  ;;  %v8633_v32 = vpop.f32.mrf.mxu0  ;;  %v14172_v56 = vld [vmem:[#allocation17 + $0x7a8] ss:$16 sps:$4 sm:$0xff]  }
 0x645   :  { %9062 = vmatmul.mubr.bf16.gmra.mxu0 %v15506_v44  ;;  %10541 = vmatprep.subr.bf16.mxu1 %v14146_v13  ;;  %v8522_v29 = vpop.f32.mrf.mxu1 }
 0x646   :  { %9244 = vmatpush1.bf16.msra.mxu0 %v14077_v40  ;;  %9071 = vmatprep.mubr.bf16.mxu0 %v15507_v31  ;;  %v14167_v1 = vadd.f32 %v8633_v32, %v8521_v10  ;;  %v8523_v7 = vadd.f32 %v8522_v29, %v14016_v23  ;;  %v8635_v25 = vpop.f32.mrf.mxu0  ;;  %v14178_v31 = vld [vmem:[#allocation17 + $0x78c] ss:$16 sps:$4 sm:$0xff]  }
 0x647   :  { %9245 = vmatprep.subr.bf16.mxu0 %v14084_v22  ;;  %v8524_v61 = vpop.f32.mrf.mxu1 }
 0x648   :  { %10557 = vmatpush2.bf16.msra.mxu1 %v14156_v43  ;;  %v14174_v44 = vadd.f32 %v8635_v25, %v8523_v7  ;;  %v8525_v18 = vadd.f32 %v8524_v61, %v14022_v37  ;;  %v8637_v40 = vpop.f32.mrf.mxu0  ;;  %v14188_v25 = vld [vmem:[#allocation17 + $0x788] ss:$16 sps:$4 sm:$0xff]  }
 0x649   :  { %10542 = vmatprep.subr.bf16.mxu1 %v14163_v3 }
 0x64a   :  { %9246 = vmatpush1.bf16.msra.mxu0 %v14091_v53  ;;  %v14181_v32 = vadd.f32 %v8637_v40, %v8525_v18  ;;  %v8641_v29 = vpop.f32.mrf.mxu0  ;;  %v15509_v40 = vld [vmem:[#allocation36_spill] sm:$0xff] }
 0x64b   :  { %v8528_v10 = vpop.f32.mrf.mxu1  ;;  %9205 = vmatmul.mubr.bf16.gmra.mxu1 %v13738_v36  ;;  %9247 = vmatprep.subr.bf16.mxu0 %v14098_v51  ;;  %v15510_v36 = vld [vmem:[#allocation140_spill] sm:$0xff] }
 0x64c   :  { %v8529_v22 = vadd.f32 %v8528_v10, %v14016_v23  ;;  %9214 = vmatprep.mubr.bf16.mxu1 %v13745_v14  ;;  %10558 = vmatpush2.bf16.msra.mxu1 %v14172_v56  ;;  %v8643_v18 = vpop.f32.mrf.mxu0  ;;  %v14195_v10 = vld [vmem:[#allocation17 + $0x76c] ss:$16 sps:$4 sm:$0xff]  }
 0x64d   :  { %v8530_v7 = vpop.f32.mrf.mxu1  ;;  %9072 = vmatmul.mubr.bf16.gmra.mxu0 %v15509_v40  ;;  %10543 = vmatprep.subr.bf16.mxu1 %v14178_v31 }
 0x64e   :  { %v14190_v61 = vadd.f32 %v8641_v29, %v8529_v22  ;;  %v8531_v53 = vadd.f32 %v8530_v7, %v14022_v37  ;;  %9248 = vmatpush1.bf16.msra.mxu0 %v14109_v38  ;;  %9081 = vmatprep.mubr.bf16.mxu0 %v15510_v36  ;;  %v8645_v22 = vpop.f32.mrf.mxu0  ;;  %v14204_v7 = vld [vmem:[#allocation17 + $0x768] ss:$16 sps:$4 sm:$0xff]   ;;  %v14210_v36 = vld [vmem:[#allocation17 + $0x74c] ss:$16 sps:$4 sm:$0xff]  }
 0x64f   :  { %v8532_v14 = vpop.f32.mrf.mxu1  ;;  %9249 = vmatprep.subr.bf16.mxu0 %v14116_v24 }
 0x650   :  { %15508 = vst [vmem:[#allocation32_spill] sm:$0xff] %v14190_v61  ;;  %v14199_v51 = vadd.f32 %v8643_v18, %v8531_v53  ;;  %v8533_v21 = vadd.f32 %v8532_v14, %v14016_v23  ;;  %10559 = vmatpush2.bf16.msra.mxu1 %v14188_v25  ;;  %v8647_v38 = vpop.f32.mrf.mxu0 }
 0x651   :  { %v8534_v29 = vpop.f32.mrf.mxu1  ;;  %10544 = vmatprep.subr.bf16.mxu1 %v14195_v10 }
 0x652   :  { %v14206_v40 = vadd.f32 %v8645_v22, %v8533_v21  ;;  %v8535_v61 = vadd.f32 %v8534_v29, %v14022_v37  ;;  %9250 = vmatpush1.bf16.msra.mxu0 %v14124_v50  ;;  %v8651_v14 = vpop.f32.mrf.mxu0  ;;  %v14220_v22 = vld [vmem:[#allocation17 + $0x748] ss:$16 sps:$4 sm:$0xff]  }
 0x653   :  { %v8538_v53 = vpop.f32.mrf.mxu1  ;;  %9215 = vmatmul.mubr.bf16.gmra.mxu1 %v13756_v11  ;;  %9251 = vmatprep.subr.bf16.mxu0 %v14131_v15 }
 0x654   :  { %v14213_v18 = vadd.f32 %v8647_v38, %v8535_v61  ;;  %v8539_v24 = vadd.f32 %v8538_v53, %v14016_v23  ;;  %9224 = vmatprep.mubr.bf16.mxu1 %v13759_v12  ;;  %10560 = vmatpush2.bf16.msra.mxu1 %v14204_v7  ;;  %v8653_v61 = vpop.f32.mrf.mxu0  ;;  %v10995_v38 = vld [vmem:[#allocation17 + $0x72c] ss:$16 sps:$4 sm:$0xff]  }
 0x655   :  { %v8540_v21 = vpop.f32.mrf.mxu1  ;;  %9082 = vmatmul.mubr.bf16.gmra.mxu0 %v13598_v33  ;;  %10545 = vmatprep.subr.bf16.mxu1 %v14210_v36 }
 0x656   :  { %v14222_v29 = vadd.f32 %v8651_v14, %v8539_v24  ;;  %v8541_v50 = vadd.f32 %v8540_v21, %v14022_v37  ;;  %9252 = vmatpush2.bf16.msra.mxu0 %v14140_v30  ;;  %9091 = vmatprep.mubr.bf16.mxu0 %v13434_v0  ;;  %v8655_v53 = vpop.f32.mrf.mxu0  ;;  %v10993_v14 = vld [vmem:[#allocation17 + $0x728] ss:$16 sps:$4 sm:$0xff]   ;;  %v10998_v30 = vld [vmem:[#allocation17 + $0x70c] ss:$16 sps:$4 sm:$0xff]  }
 0x657   :  { %v8542_v11 = vpop.f32.mrf.mxu1  ;;  %9253 = vmatprep.subr.bf16.mxu0 %v14146_v13 }
 0x658   :  { %15511 = vst [vmem:[#allocation81_spill] sm:$0xff] %v14222_v29  ;;  %v14229_v12 = vadd.f32 %v8653_v61, %v8541_v50  ;;  %v8543_v15 = vadd.f32 %v8542_v11, %v14016_v23  ;;  %10561 = vmatpush2.bf16.msra.mxu1 %v14220_v22  ;;  %v8657_v29 = vpop.f32.mrf.mxu0 }
 0x659   :  { %v8544_v24 = vpop.f32.mrf.mxu1  ;;  %10546 = vmatprep.subr.bf16.mxu1 %v10995_v38 }
 0x65a   :  { %v14234_v33 = vadd.f32 %v8655_v53, %v8543_v15  ;;  %v8545_v21 = vadd.f32 %v8544_v24, %v14022_v37  ;;  %9254 = vmatpush2.bf16.msra.mxu0 %v14156_v43  ;;  %v8661_v11 = vpop.f32.mrf.mxu0  ;;  %v10996_v15 = vld [vmem:[#allocation17 + $0x708] ss:$16 sps:$4 sm:$0xff]  }
 0x65b   :  { %v8548_v0 = vpop.f32.mrf.mxu1  ;;  %9225 = vmatmul.mubr.bf16.gmra.mxu1 %v13776_v34  ;;  %9255 = vmatprep.subr.bf16.mxu0 %v14163_v3 }
 0x65c   :  { %v14238_v50 = vadd.f32 %v8657_v29, %v8545_v21  ;;  %v8549_v61 = vadd.f32 %v8548_v0, %v14016_v23  ;;  %10562 = vmatpush2.bf16.msra.mxu1 %v10993_v14  ;;  %9337 = vmatprep.mubr.bf16.mxu1 %v14030_v49  ;;  %v8663_v43 = vpop.f32.mrf.mxu0 }
 0x65d   :  { %v8550_v13 = vpop.f32.mrf.mxu1  ;;  %9092 = vmatmul.mubr.bf16.gmra.mxu0 %v13771_v39  ;;  %10547 = vmatprep.subr.bf16.mxu1 %v10998_v30 }
 0x65e   :  { %v14244_v53 = vadd.f32 %v8661_v11, %v8549_v61  ;;  %v8551_v24 = vadd.f32 %v8550_v13, %v14022_v37  ;;  %9256 = vmatpush2.bf16.msra.mxu0 %v14172_v56  ;;  %9101 = vmatprep.mubr.bf16.mxu0 %v13441_v26  ;;  %v8665_v49 = vpop.f32.mrf.mxu0  ;;  %v8485_v26 = vadd.f32 %v14046_v45, %v14022_v37 }
 0x65f   :  { %v8552_v34 = vpop.f32.mrf.mxu1  ;;  %9257 = vmatprep.subr.bf16.mxu0 %v14178_v31 }
 0x660   :  { %v14250_v29 = vadd.f32 %v8663_v43, %v8551_v24  ;;  %v8553_v3 = vadd.f32 %v8552_v34, %v14016_v23  ;;  %10563 = vmatpush2.bf16.msra.mxu1 %v10996_v15  ;;  %v8505_v24 = vadd.f32 %v14107_v4, %v14022_v37 }
 0x661   :  { %v14254_v21 = vpop.f32.mrf.mxu1 }
 0x662   :  { %v14256_v0 = vadd.f32 %v8665_v49, %v8553_v3  ;;  %9258 = vmatpush2.bf16.msra.mxu0 %v14188_v25  ;;  %v15512_v25 = vld [vmem:[#allocation57_spill] sm:$0xff] }
 0x663   :  { %v8704_v39 = vpop.f32.mrf.mxu1  ;;  %9338 = vmatmul.mubr.bf16.vlgmr.msra.gmra.mxu1 %v13979_v42  ;;  %9259 = vmatprep.subr.bf16.mxu0 %v14195_v10  ;;  %v8598_v42 = vadd.f32 %v14052_v35, %v8485_v26 }
 0x664   :  { %v14264_v23 = vadd.f32 %v8704_v39, %v14034_v6 }
 0x665   :  { %v8706_v56 = vpop.f32.mrf.mxu1  ;;  %9102 = vmatmul.mubr.bf16.gmra.mxu0 %v13794_v16 }
 0x666   :  { %v14268_v31 = vadd.f32 %v8706_v56, %v14042_v28  ;;  %9260 = vmatpush2.bf16.msra.mxu0 %v14204_v7  ;;  %9111 = vmatprep.mubr.bf16.mxu0 %v15512_v25  ;;  %v8495_v28 = vadd.f32 %v14075_v54, %v14022_v37  ;;  %v15515_v25 = vld [vmem:[#allocation32_spill] sm:$0xff] }
 0x667   :  { %v8708_v61 = vpop.f32.mrf.mxu1  ;;  %9261 = vmatprep.subr.bf16.mxu0 %v14210_v36  ;;  %v15513_v36 = vld [vmem:[#allocation73_spill] sm:$0xff] }
 0x668   :  { %v14275_v45 = vadd.f32 %v8708_v61, %v14050_v59 }
 0x669   :  { %v8710_v6 = vpop.f32.mrf.mxu1 }
 0x66a   :  { %v14277_v10 = vadd.f32 %v8710_v6, %v8598_v42  ;;  %9262 = vmatpush2.bf16.msra.mxu0 %v14220_v22  ;;  %v8608_v22 = vadd.f32 %v14081_v20, %v8495_v28  ;;  %v8618_v20 = vadd.f32 %v14113_v62, %v8505_v24  ;;  %v15516_v42 = vld [vmem:[#allocation76_spill] sm:$0xff]  ;;  %v15518_v28 = vld [vmem:[#allocation81_spill] sm:$0xff] }
 0x66b   :  { %v8714_v16 = vpop.f32.mrf.mxu1  ;;  %9263 = vmatprep.subr.bf16.mxu0 %v10995_v38 }
 0x66c   :  { %v14283_v7 = vadd.f32 %v8714_v16, %v14063_v55 }
 0x66d   :  { %v8716_v11 = vpop.f32.mrf.mxu1  ;;  %9112 = vmatmul.mubr.bf16.gmra.mxu0 %v15513_v36 }
 0x66e   :  { %v14287_v35 = vadd.f32 %v8716_v11, %v14071_v8  ;;  %9264 = vmatpush2.bf16.msra.mxu0 %v10993_v14  ;;  %9267 = vmatprep.mubr.bf16.mxu0 %v13889_v2 }
 0x66f   :  { %v8718_v59 = vpop.f32.mrf.mxu1  ;;  %9265 = vmatprep.subr.bf16.mxu0 %v10998_v30 }
 0x670   :  { %v14292_v38 = vadd.f32 %v8718_v59, %v14079_v47  ;;  %v15519_v59 = vld [vmem:[#allocation41_spill] sm:$0xff] }
 0x671   :  { %v8720_v54 = vpop.f32.mrf.mxu1 }
 0x672   :  { %v14294_v13 = vadd.f32 %v8720_v54, %v8608_v22  ;;  %9266 = vmatpush2.bf16.msra.mxu0 %v10996_v15  ;;  %v15520_v22 = vld [vmem:[#allocation70_spill] sm:$0xff] }
 0x673   :  { %v8724_v55 = vpop.f32.mrf.mxu1 }
 0x674   :  { %v14299_v8 = vadd.f32 %v8724_v55, %v14093_v17 }
 0x675   :  { %v8726_v14 = vpop.f32.mrf.mxu1  ;;  %9268 = vmatmul.mubr.bf16.vlgmr.msra.gmra.mxu0 %v13883_v41 }
 0x676   :  { %v14303_v2 = vadd.f32 %v8726_v14, %v14102_v63  ;;  %9277 = vmatprep.mubr.bf16.mxu0 %v13900_v46  ;;  %v15514_v46 = vld [vmem:[#allocation78_spill] sm:$0xff]  ;;  %v8555_v14 = vadd.f32 %v14254_v21, %v14022_v37 }
 0x677   :  { %v8728_v47 = vpop.f32.mrf.mxu1  ;;  %v15523_v21 = vld [vmem:[#allocation66_spill] sm:$0xff] }
 0x678   :  { %v14308_v30 = vadd.f32 %v8728_v47, %v14111_v27 }
 0x679   :  { %v8730_v15 = vpop.f32.mrf.mxu1 }
 0x67a   :  { %v14310_v43 = vadd.f32 %v8730_v15, %v8618_v20 }
 0x67b   :  { %v8734_v4 = vpop.f32.mrf.mxu1 }
 0x67c   :  { %v14313_v17 = vadd.f32 %v8734_v4, %v14126_v52  ;;  %v15522_v4 = vld [vmem:[#allocation37_spill] sm:$0xff] }
 0x67d   :  { %v8736_v34 = vpop.f32.mrf.mxu1  ;;  %9278 = vmatmul.mubr.bf16.gmra.mxu0 %v13896_v48 }
 0x67e   :  { %v14317_v41 = vadd.f32 %v8736_v34, %v14135_v9  ;;  %9287 = vmatprep.mubr.bf16.mxu0 %v15514_v46 }
 0x67f   :  { %v8738_v63 = vpop.f32.mrf.mxu1 }
 0x680   :  { %v14321_v62 = vadd.f32 %v8738_v63, %v14142_v5 }
 0x681   :  { %v8740_v27 = vpop.f32.mrf.mxu1 }
 0x682   :  { %v14324_v3 = vadd.f32 %v8740_v27, %v14149_v60 }
 0x683   :  { %v8744_v49 = vpop.f32.mrf.mxu1 }
 0x684   :  { %v14327_v52 = vadd.f32 %v8744_v49, %v14158_v58 }
 0x685   :  { %v8746_v39 = vpop.f32.mrf.mxu1  ;;  %9288 = vmatmul.mubr.bf16.gmra.mxu0 %v13910_v57 }
 0x686   :  { %v14331_v48 = vadd.f32 %v8746_v39, %v14167_v1  ;;  %9297 = vmatprep.mubr.bf16.mxu0 %v13964_v19  ;;  %v15517_v1 = vld [vmem:[#allocation68_spill] sm:$0xff] }
 0x687   :  { %v8748_v9 = vpop.f32.mrf.mxu1 }
 0x688   :  { %v14335_v5 = vadd.f32 %v8748_v9, %v14174_v44 }
 0x689   :  { %v8750_v26 = vpop.f32.mrf.mxu1 }
 0x68a   :  { %v14338_v60 = vadd.f32 %v8750_v26, %v14181_v32 }
 0x68b   :  { %v8754_v56 = vpop.f32.mrf.mxu1 }
 0x68c   :  { %v14341_v58 = vadd.f32 %v8754_v56, %v15515_v25 }
 0x68d   :  { %v8756_v61 = vpop.f32.mrf.mxu1  ;;  %9298 = vmatmul.mubr.bf16.gmra.mxu0 %v15516_v42 }
 0x68e   :  { %v14345_v57 = vadd.f32 %v8756_v61, %v14199_v51  ;;  %9307 = vmatprep.mubr.bf16.mxu0 %v15517_v1 }
 0x68f   :  { %v8758_v19 = vpop.f32.mrf.mxu1 }
 0x690   :  { %v14349_v44 = vadd.f32 %v8758_v19, %v14206_v40 }
 0x691   :  { %v8760_v6 = vpop.f32.mrf.mxu1 }
 0x692   :  { %v14352_v32 = vadd.f32 %v8760_v6, %v14213_v18 }
 0x693   :  { %v8764_v16 = vpop.f32.mrf.mxu1 }
 0x694   :  { %v14355_v11 = vadd.f32 %v8764_v16, %v15518_v28 }
 0x695   :  { %v8766_v36 = vpop.f32.mrf.mxu1  ;;  %9308 = vmatmul.mubr.bf16.gmra.mxu0 %v15519_v59 }
 0x696   :  { %v14359_v51 = vadd.f32 %v8766_v36, %v14229_v12  ;;  %9317 = vmatprep.mubr.bf16.mxu0 %v15520_v22  ;;  %v15521_v12 = vld [vmem:[#allocation43_spill] sm:$0xff] }
 0x697   :  { %v8768_v54 = vpop.f32.mrf.mxu1 }
 0x698   :  { %v14363_v40 = vadd.f32 %v8768_v54, %v14234_v33  ;;  %v8667_v33 = vpop.f32.mrf.mxu0 }
 0x699   :  { %v8770_v55 = vpop.f32.mrf.mxu1  ;;  %v8668_v46 = vadd.f32 %v8667_v33, %v8555_v14 }
 0x69a   :  { %v14366_v18 = vadd.f32 %v8770_v55, %v14238_v50 }
 0x69b   :  { %v8774_v24 = vpop.f32.mrf.mxu1 }
 0x69c   :  { %v14371_v47 = vadd.f32 %v8774_v24, %v14244_v53 }
 0x69d   :  { %v8776_v20 = vpop.f32.mrf.mxu1  ;;  %9318 = vmatmul.mubr.bf16.gmra.mxu0 %v15521_v12 }
 0x69e   :  { %v14375_v15 = vadd.f32 %v8776_v20, %v14250_v29  ;;  %9327 = vmatprep.mubr.bf16.mxu0 %v15522_v4 }
 0x69f   :  { %v8778_v34 = vpop.f32.mrf.mxu1 }
 0x6a0   :  { %v14379_v50 = vadd.f32 %v8778_v34, %v14256_v0 }
 0x6a1   :  { %v8780_v63 = vpop.f32.mrf.mxu1 }
 0x6a2   :  { %v14381_v27 = vadd.f32 %v8780_v63, %v8668_v46 }
 0x6a3   :  { %v14383_v37 = vpop.f32.mrf.mxu1 }
 0x6a5   :  { %v14385_v53 = vpop.f32.mrf.mxu1  ;;  %9328 = vmatmul.mubr.bf16.gmra.mxu0 %v15523_v21 }
 0x6a7   :  { %v14388_v49 = vpop.f32.mrf.mxu1 }
 0x6a9   :  { %v14390_v29 = vpop.f32.mrf.mxu1 }
 0x6ab   :  { %v14392_v39 = vpop.f32.mrf.mxu1 }
 0x6ad   :  { %v14394_v9 = vpop.f32.mrf.mxu1 }
 0x6af   :  { %v14396_v26 = vpop.f32.mrf.mxu1 }
 0x6b1   :  { %v14398_v0 = vpop.f32.mrf.mxu1 }
 0x6b3   :  { %v14400_v56 = vpop.f32.mrf.mxu1  ;;  %v8817_v25 = vpop.f32.mrf.mxu0 }
 0x6b4   :  { %v8818_v42 = vadd.f32 %v8817_v25, %v14264_v23 }
 0x6b5   :  { %v14402_v61 = vpop.f32.mrf.mxu1  ;;  %v8819_v1 = vpop.f32.mrf.mxu0 }
 0x6b6   :  { %v8820_v6 = vadd.f32 %v8819_v1, %v14268_v31  ;;  %v9348_v54 = vmax.f32 %v8818_v42, 0.0 }
 0x6b7   :  { %v14405_v19 = vpop.f32.mrf.mxu1  ;;  %v8821_v16 = vpop.f32.mrf.mxu0 }
 0x6b8   :  { %v8822_v36 = vadd.f32 %v8821_v16, %v14275_v45  ;;  %v9349_v23 = vmax.f32 %v8820_v6, 0.0 }
 0x6b9   :  { %v14408_v28 = vpop.f32.mrf.mxu1  ;;  %v8823_v59 = vpop.f32.mrf.mxu0 }
 0x6ba   :  { %v9352_v55 = vmax.f32 %v8822_v36, 0.0  ;;  %v8824_v24 = vadd.f32 %v8823_v59, %v14277_v10 }
 0x6bb   :  { %v14411_v22 = vpop.f32.mrf.mxu1  ;;  %v8827_v14 = vpop.f32.mrf.mxu0 }
 0x6bc   :  { %v9412_v12 = vmax.f32 %v9348_v54, %v9352_v55  ;;  %v9353_v4 = vmax.f32 %v8824_v24, 0.0  ;;  %v8828_v31 = vadd.f32 %v8827_v14, %v14283_v7 }
 0x6bd   :  { %v14414_v20 = vpop.f32.mrf.mxu1  ;;  %v8829_v33 = vpop.f32.mrf.mxu0 }
 0x6be   :  { %v9425_v46 = vmax.f32 %v9349_v23, %v9353_v4  ;;  %v9356_v45 = vmax.f32 %v8828_v31, 0.0  ;;  %v8830_v63 = vadd.f32 %v8829_v33, %v14287_v35 }
 0x6bf   :  { %v14417_v34 = vpop.f32.mrf.mxu1  ;;  %v8831_v21 = vpop.f32.mrf.mxu0 }
 0x6c0   :  { %v9413_v42 = vmax.f32 %v9412_v12, %v9356_v45  ;;  %v9357_v10 = vmax.f32 %v8830_v63, 0.0  ;;  %v8832_v1 = vadd.f32 %v8831_v21, %v14292_v38 }
 0x6c1   :  { %v14420_v25 = vpop.f32.mrf.mxu1  ;;  %v8833_v16 = vpop.f32.mrf.mxu0 }
 0x6c2   :  { %v9426_v36 = vmax.f32 %v9425_v46, %v9357_v10  ;;  %v9360_v59 = vmax.f32 %v8832_v1, 0.0  ;;  %v8834_v7 = vadd.f32 %v8833_v16, %v14294_v13 }
 0x6c3   :  { %v14423_v6 = vpop.f32.mrf.mxu1  ;;  %v8837_v54 = vpop.f32.mrf.mxu0 }
 0x6c4   :  { %v9414_v24 = vmax.f32 %v9413_v42, %v9360_v59  ;;  %v9361_v14 = vmax.f32 %v8834_v7, 0.0  ;;  %v8838_v35 = vadd.f32 %v8837_v54, %v14299_v8 }
 0x6c5   :  { %v14426_v55 = vpop.f32.mrf.mxu1  ;;  %v8839_v23 = vpop.f32.mrf.mxu0 }
 0x6c6   :  { %v9427_v12 = vmax.f32 %v9426_v36, %v9361_v14  ;;  %v9364_v31 = vmax.f32 %v8838_v35, 0.0  ;;  %v8840_v38 = vadd.f32 %v8839_v23, %v14303_v2 }
 0x6c7   :  { %v14429_v4 = vpop.f32.mrf.mxu1  ;;  %v8841_v33 = vpop.f32.mrf.mxu0 }
 0x6c8   :  { %v9415_v46 = vmax.f32 %v9414_v24, %v9364_v31  ;;  %v9365_v63 = vmax.f32 %v8840_v38, 0.0  ;;  %v8842_v13 = vadd.f32 %v8841_v33, %v14308_v30 }
 0x6c9   :  { %v14432_v45 = vpop.f32.mrf.mxu1  ;;  %v8843_v21 = vpop.f32.mrf.mxu0 }
 0x6ca   :  { %v9428_v42 = vmax.f32 %v9427_v12, %v9365_v63  ;;  %v9368_v1 = vmax.f32 %v8842_v13, 0.0  ;;  %v8844_v8 = vadd.f32 %v8843_v21, %v14310_v43 }
 0x6cb   :  { %v14435_v10 = vpop.f32.mrf.mxu1  ;;  %v8847_v16 = vpop.f32.mrf.mxu0 }
 0x6cc   :  { %v9416_v36 = vmax.f32 %v9415_v46, %v9368_v1  ;;  %v9369_v7 = vmax.f32 %v8844_v8, 0.0  ;;  %v8848_v2 = vadd.f32 %v8847_v16, %v14313_v17 }
 0x6cd   :  { %v14438_v59 = vpop.f32.mrf.mxu1  ;;  %v8849_v54 = vpop.f32.mrf.mxu0 }
 0x6ce   :  { %v9429_v24 = vmax.f32 %v9428_v42, %v9369_v7  ;;  %v9372_v35 = vmax.f32 %v8848_v2, 0.0  ;;  %v8850_v30 = vadd.f32 %v8849_v54, %v14317_v41 }
 0x6cf   :  { %v14441_v14 = vpop.f32.mrf.mxu1  ;;  %v8851_v23 = vpop.f32.mrf.mxu0 }
 0x6d0   :  { %v9417_v12 = vmax.f32 %v9416_v36, %v9372_v35  ;;  %v9373_v38 = vmax.f32 %v8850_v30, 0.0  ;;  %v8852_v43 = vadd.f32 %v8851_v23, %v14321_v62 }
 0x6d1   :  { %v14444_v31 = vpop.f32.mrf.mxu1  ;;  %v8853_v33 = vpop.f32.mrf.mxu0 }
 0x6d2   :  { %v9430_v46 = vmax.f32 %v9429_v24, %v9373_v38  ;;  %v9376_v13 = vmax.f32 %v8852_v43, 0.0  ;;  %v8854_v17 = vadd.f32 %v8853_v33, %v14324_v3 }
 0x6d3   :  { %v14447_v63 = vpop.f32.mrf.mxu1  ;;  %v8857_v21 = vpop.f32.mrf.mxu0 }
 0x6d4   :  { %v14452_v42 = vmax.f32 %v9417_v12, %v9376_v13  ;;  %v9377_v41 = vmax.f32 %v8854_v17, 0.0  ;;  %v8858_v8 = vadd.f32 %v8857_v21, %v14327_v52 }
 0x6d5   :  { %v14450_v1 = vpop.f32.mrf.mxu1  ;;  %v8859_v16 = vpop.f32.mrf.mxu0 }
 0x6d6   :  { %v14457_v7 = vmax.f32 %v9430_v46, %v9377_v41  ;;  %v8860_v62 = vadd.f32 %v8859_v16, %v14331_v48  ;;  %v9380_v30 = vmax.f32 %v8858_v8, 0.0 }
 0x6d7   :  { %v14455_v36 = vpop.f32.mrf.mxu1  ;;  %v8861_v2 = vpop.f32.mrf.mxu0 }
 0x6d8   :  { %v8862_v3 = vadd.f32 %v8861_v2, %v14335_v5  ;;  %v9381_v43 = vmax.f32 %v8860_v62, 0.0 }
 0x6d9   :  { %v14460_v54 = vpop.f32.mrf.mxu1  ;;  %v8863_v24 = vpop.f32.mrf.mxu0 }
 0x6da   :  { %v9384_v23 = vmax.f32 %v8862_v3, 0.0  ;;  %v8864_v12 = vadd.f32 %v8863_v24, %v14338_v60 }
 0x6db   :  { %v14463_v35 = vpop.f32.mrf.mxu1  ;;  %v8867_v52 = vpop.f32.mrf.mxu0 }
 0x6dc   :  { %v9464_v33 = vmax.f32 %v9380_v30, %v9384_v23  ;;  %v9385_v46 = vmax.f32 %v8864_v12, 0.0  ;;  %v8868_v48 = vadd.f32 %v8867_v52, %v14341_v58 }
 0x6dd   :  { %v14466_v38 = vpop.f32.mrf.mxu1  ;;  %v8869_v13 = vpop.f32.mrf.mxu0 }
 0x6de   :  { %15524 = vst [vmem:[#allocation77_spill] sm:$0xff] %v14466_v38  ;;  %v9477_v21 = vmax.f32 %v9381_v43, %v9385_v46  ;;  %v8870_v5 = vadd.f32 %v8869_v13, %v14345_v57  ;;  %v9388_v41 = vmax.f32 %v8868_v48, 0.0 }
 0x6df   :  { %v14469_v17 = vpop.f32.mrf.mxu1  ;;  %v8871_v16 = vpop.f32.mrf.mxu0 }
 0x6e0   :  { %15525 = vst [vmem:[#allocation79_spill] sm:$0xff] %v14469_v17  ;;  %v9389_v2 = vmax.f32 %v8870_v5, 0.0  ;;  %v8872_v60 = vadd.f32 %v8871_v16, %v14349_v44  ;;  %v9465_v3 = vmax.f32 %v9464_v33, %v9388_v41 }
 0x6e1   :  { %v14472_v8 = vpop.f32.mrf.mxu1  ;;  %v8873_v24 = vpop.f32.mrf.mxu0 }
 0x6e2   :  { %15526 = vst [vmem:[#allocation42_spill] sm:$0xff] %v14472_v8  ;;  %v9478_v30 = vmax.f32 %v9477_v21, %v9389_v2  ;;  %v9392_v23 = vmax.f32 %v8872_v60, 0.0  ;;  %v8874_v58 = vadd.f32 %v8873_v24, %v14352_v32 }
 0x6e3   :  { %v14475_v62 = vpop.f32.mrf.mxu1  ;;  %v8877_v12 = vpop.f32.mrf.mxu0 }
 0x6e4   :  { %v9466_v43 = vmax.f32 %v9465_v3, %v9392_v23  ;;  %v9393_v57 = vmax.f32 %v8874_v58, 0.0  ;;  %v8878_v46 = vadd.f32 %v8877_v12, %v14355_v11 }
 0x6e5   :  { %v14478_v52 = vpop.f32.mrf.mxu1  ;;  %v8879_v48 = vpop.f32.mrf.mxu0 }
 0x6e6   :  { %v9479_v13 = vmax.f32 %v9478_v30, %v9393_v57  ;;  %v9396_v5 = vmax.f32 %v8878_v46, 0.0  ;;  %v8880_v44 = vadd.f32 %v8879_v48, %v14359_v51  ;;  %v9419_v30 = vrot.slane %v14452_v42, 4  ;;  %v11001_v57 = vld [vmem:[#allocation19] sm:$0xf]  ;;  %v15527_v46 = vld [vmem:[#allocation31_spill] sm:$0xff] }
 0x6e7   :  { %v14482_v33 = vpop.f32.mrf.mxu1  ;;  %v8881_v41 = vpop.f32.mrf.mxu0 }
 0x6e8   :  { %v9467_v16 = vmax.f32 %v9466_v43, %v9396_v5  ;;  %v9397_v21 = vmax.f32 %v8880_v44, 0.0  ;;  %v8882_v2 = vadd.f32 %v8881_v41, %v14363_v40  ;;  %v14491_v43 = vrot.slane %v11001_v57, %v15527_v46  ;;  %v15528_v44 = vld [vmem:[#allocation38_spill] sm:$0xff] }
 0x6e9   :  { %v8883_v32 = vpop.f32.mrf.mxu0  ;;  %v14486_v23 = vpop.f32.mrf.mxu1  ;;  %v9432_v40 = vrot.slane %v14457_v7, 4  ;;  %v14496_v41 = vrot.slane %v11001_v57, %v15528_v44 }
 0x6ea   :  { %v9480_v60 = vmax.f32 %v9479_v13, %v9397_v21  ;;  %v9400_v24 = vmax.f32 %v8882_v2, 0.0  ;;  %v8884_v3 = vadd.f32 %v8883_v32, %v14366_v18  ;;  %v9420_v2 = vmax.f32 %v14452_v42, %v9419_v30 }
 0x6eb   :  { %v8887_v11 = vpop.f32.mrf.mxu0  ;;  %v14498_v21 = vpop.f32.mrf.mxu1  ;;  %v8933_v57 = vadd.f32 %v14385_v53, %v14496_v41 }
 0x6ec   :  { %v9468_v58 = vmax.f32 %v9467_v16, %v9400_v24  ;;  %v9401_v12 = vmax.f32 %v8884_v3, 0.0  ;;  %v8888_v51 = vadd.f32 %v8887_v11, %v14371_v47  ;;  %v8931_v3 = vadd.f32 %v14383_v37, %v14491_v43 }
 0x6ed   :  { %v8889_v48 = vpop.f32.mrf.mxu0  ;;  %v14508_v46 = vpop.f32.mrf.mxu1  ;;  %v9421_v30 = vrot.slane %v9420_v2, 2  ;;  %v8935_v37 = vadd.f32 %v14388_v49, %v14491_v43  ;;  %v8941_v49 = vadd.f32 %v14392_v39, %v14491_v43  ;;  %v8945_v39 = vadd.f32 %v14396_v26, %v14491_v43 }
 0x6ee   :  { %v9481_v13 = vmax.f32 %v9480_v60, %v9401_v12  ;;  %v9404_v5 = vmax.f32 %v8888_v51, 0.0  ;;  %v8890_v18 = vadd.f32 %v8889_v48, %v14375_v15  ;;  %v9433_v60 = vmax.f32 %v14457_v7, %v9432_v40 }
 0x6ef   :  { %v8891_v16 = vpop.f32.mrf.mxu0  ;;  %v14518_v53 = vpop.f32.mrf.mxu1  ;;  %v8951_v26 = vadd.f32 %v14400_v56, %v14491_v43 }
 0x6f0   :  { %v9469_v47 = vmax.f32 %v9468_v58, %v9404_v5  ;;  %v9405_v32 = vmax.f32 %v8890_v18, 0.0  ;;  %v8892_v24 = vadd.f32 %v8891_v16, %v14379_v50  ;;  %v9434_v7 = vrot.slane %v9433_v60, 2 }
 0x6f1   :  { %v8893_v11 = vpop.f32.mrf.mxu0  ;;  %v9422_v16 = vmax.f32 %v9420_v2, %v9421_v30 }
 0x6f2   :  { %v9482_v12 = vmax.f32 %v9481_v13, %v9405_v32  ;;  %v9408_v15 = vmax.f32 %v8892_v24, 0.0  ;;  %v8894_v51 = vadd.f32 %v8893_v11, %v14381_v27  ;;  %v8937_v27 = vadd.f32 %v14390_v29, %v14496_v41 }
 0x6f3   :  { %v9435_v11 = vmax.f32 %v9433_v60, %v9434_v7  ;;  %v8943_v29 = vadd.f32 %v14394_v9, %v14496_v41  ;;  %v9423_v2 = vrot.slane %v9422_v16, 1  ;;  %v8947_v9 = vadd.f32 %v14398_v0, %v14496_v41 }
 0x6f4   :  { %v9470_v58 = vmax.f32 %v9469_v47, %v9408_v15  ;;  %v9409_v48 = vmax.f32 %v8894_v51, 0.0 }
 0x6f5   :  { %v9043_v42 = vpop.f32.mrf.mxu0  ;;  %v9436_v60 = vrot.slane %v9435_v11, 1 }
 0x6f6   :  { %v14510_v50 = vadd.f32 %v9043_v42, %v8931_v3  ;;  %v9471_v40 = vrot.slane %v9470_v58, 4  ;;  %v9483_v13 = vmax.f32 %v9482_v12, %v9409_v48 }
 0x6f7   :  { %v9045_v5 = vpop.f32.mrf.mxu0 }
 0x6f8   :  { %v14514_v18 = vadd.f32 %v9045_v5, %v8933_v57  ;;  %v9472_v47 = vmax.f32 %v9470_v58, %v9471_v40  ;;  %v9484_v32 = vrot.slane %v9483_v13, 4  ;;  %v14528_v57 = vpop.f32.mrf.mxu1 }
 0x6f9   :  { %v9047_v44 = vpop.f32.mrf.mxu0 }
 0x6fa   :  { %v14520_v24 = vadd.f32 %v9047_v44, %v8935_v37  ;;  %v9473_v15 = vrot.slane %v9472_v47, 2  ;;  %v9485_v12 = vmax.f32 %v9483_v13, %v9484_v32  ;;  %v14538_v13 = vpop.f32.mrf.mxu1  ;;  %v9424_v44 = vmax.f32 %v9422_v16, %v9423_v2 }
 0x6fb   :  { %v9049_v3 = vpop.f32.mrf.mxu0  ;;  %v8953_v16 = vadd.f32 %v14402_v61, %v14496_v41  ;;  %v8957_v61 = vadd.f32 %v14408_v28, %v14496_v41  ;;  %v8965_v28 = vadd.f32 %v14417_v34, %v14491_v43  ;;  %v8973_v34 = vadd.f32 %v14426_v55, %v14496_v41 }
 0x6fc   :  { %v14524_v51 = vadd.f32 %v9049_v3, %v8937_v27  ;;  %v9474_v30 = vmax.f32 %v9472_v47, %v9473_v15  ;;  %v9486_v58 = vrot.slane %v9485_v12, 2  ;;  %v9437_v15 = vmax.f32 %v9435_v11, %v9436_v60  ;;  %v14549_v0 = vpop.f32.mrf.mxu1 }
 0x6fd   :  { %v9053_v42 = vpop.f32.mrf.mxu0  ;;  %v8981_v55 = vadd.f32 %v14435_v10, %v14491_v43  ;;  %v8987_v10 = vadd.f32 %v14444_v31, %v14496_v41 }
 0x6fe   :  { %v14530_v48 = vadd.f32 %v9053_v42, %v8941_v49  ;;  %v9475_v5 = vrot.slane %v9474_v30, 1  ;;  %v9487_v7 = vmax.f32 %v9485_v12, %v9486_v58  ;;  %v14564_v60 = vpop.f32.mrf.mxu1 }
 0x6ff   :  { %v9055_v37 = vpop.f32.mrf.mxu0 }
 0x700   :  { %v14534_v40 = vadd.f32 %v9055_v37, %v8943_v29  ;;  %v9476_v47 = vmax.f32 %v9474_v30, %v9475_v5  ;;  %v9488_v32 = vrot.slane %v9487_v7, 1 }
 0x701   :  { %v9057_v27 = vpop.f32.mrf.mxu0 }
 0x702   :  { %v14540_v49 = vadd.f32 %v9057_v27, %v8945_v39  ;;  %v14545_v12 = vsel %vm1943_vm1, %v9424_v44, %v9476_v47  ;;  %v9489_v29 = vmax.f32 %v9487_v7, %v9488_v32  ;;  %v8955_v39 = vadd.f32 %v14405_v19, %v14491_v43  ;;  %v14574_v47 = vpop.f32.mrf.mxu1 }
 0x703   :  { %v9059_v3 = vpop.f32.mrf.mxu0  ;;  %15529 = vst [vmem:[#allocation44_spill] sm:$0xff] %v14545_v12  ;;  %v8961_v27 = vadd.f32 %v14411_v22, %v14491_v43  ;;  %v8963_v19 = vadd.f32 %v14414_v20, %v14496_v41  ;;  %v8967_v22 = vadd.f32 %v14420_v25, %v14496_v41  ;;  %v8971_v20 = vadd.f32 %v14423_v6, %v14491_v43 }
 0x704   :  { %v14547_v42 = vadd.f32 %v9059_v3, %v8947_v9  ;;  %v14554_v2 = vsel %vm1943_vm1, %v9437_v15, %v9489_v29  ;;  %v14584_v29 = vpop.f32.mrf.mxu1  ;;  %v8975_v25 = vadd.f32 %v14429_v4, %v14491_v43  ;;  %v8977_v6 = vadd.f32 %v14432_v45, %v14496_v41 }
 0x705   :  { %v9063_v58 = vpop.f32.mrf.mxu0  ;;  %15530 = vst [vmem:[#allocation67_spill] sm:$0xff] %v14554_v2  ;;  %v8983_v4 = vadd.f32 %v14438_v59, %v14496_v41  ;;  %v8985_v45 = vadd.f32 %v14441_v14, %v14491_v43  ;;  %v8991_v59 = vadd.f32 %v14447_v63, %v14491_v43 }
 0x706   :  { %v14556_v30 = vadd.f32 %v9063_v58, %v8951_v26 }
 0x707   :  { %v9065_v56 = vpop.f32.mrf.mxu0 }
 0x708   :  { %v14562_v37 = vadd.f32 %v9065_v56, %v8953_v16 }
 0x709   :  { %v9067_v5 = vpop.f32.mrf.mxu0 }
 0x70a   :  { %v14568_v7 = vadd.f32 %v9067_v5, %v8955_v39  ;;  %v14594_v5 = vpop.f32.mrf.mxu1 }
 0x70b   :  { %v9069_v9 = vpop.f32.mrf.mxu0 }
 0x70c   :  { %v14572_v44 = vadd.f32 %v9069_v9, %v8957_v61 }
 0x70d   :  { %v9073_v32 = vpop.f32.mrf.mxu0 }
 0x70e   :  { %v14578_v26 = vadd.f32 %v9073_v32, %v8961_v27 }
 0x70f   :  { %v9075_v3 = vpop.f32.mrf.mxu0 }
 0x710   :  { %v14582_v15 = vadd.f32 %v9075_v3, %v8963_v19  ;;  %v14604_v19 = vpop.f32.mrf.mxu1 }
 0x711   :  { %v9077_v58 = vpop.f32.mrf.mxu0 }
 0x712   :  { %v14588_v16 = vadd.f32 %v9077_v58, %v8965_v28 }
 0x713   :  { %v9079_v56 = vpop.f32.mrf.mxu0 }
 0x714   :  { %v14592_v39 = vadd.f32 %v9079_v56, %v8967_v22  ;;  %v14614_v56 = vpop.f32.mrf.mxu1 }
 0x715   :  { %v9083_v61 = vpop.f32.mrf.mxu0 }
 0x716   :  { %v14598_v9 = vadd.f32 %v9083_v61, %v8971_v20 }
 0x717   :  { %v9085_v27 = vpop.f32.mrf.mxu0 }
 0x718   :  { %v14602_v32 = vadd.f32 %v9085_v27, %v8973_v34 }
 0x719   :  { %v9087_v3 = vpop.f32.mrf.mxu0 }
 0x71a   :  { %v14608_v28 = vadd.f32 %v9087_v3, %v8975_v25  ;;  %v14624_v25 = vpop.f32.mrf.mxu1 }
 0x71b   :  { %v9089_v58 = vpop.f32.mrf.mxu0 }
 0x71c   :  { %v14612_v22 = vadd.f32 %v9089_v58, %v8977_v6 }
 0x71d   :  { %v9093_v20 = vpop.f32.mrf.mxu0 }
 0x71e   :  { %v14618_v61 = vadd.f32 %v9093_v20, %v8981_v55  ;;  %v14634_v20 = vpop.f32.mrf.mxu1 }
 0x71f   :  { %v9095_v34 = vpop.f32.mrf.mxu0 }
 0x720   :  { %v14622_v27 = vadd.f32 %v9095_v34, %v8983_v4  ;;  %v14640_v34 = vpop.f32.mrf.mxu1 }
 0x721   :  { %v9097_v3 = vpop.f32.mrf.mxu0 }
 0x722   :  { %v14628_v6 = vadd.f32 %v9097_v3, %v8985_v45  ;;  %v14646_v45 = vpop.f32.mrf.mxu1 }
 0x723   :  { %v9099_v58 = vpop.f32.mrf.mxu0 }
 0x724   :  { %15531 = vst [vmem:[#allocation69_spill] sm:$0xff] %v14628_v6  ;;  %v14632_v55 = vadd.f32 %v9099_v58, %v8987_v10  ;;  %v14652_v10 = vpop.f32.mrf.mxu1 }
 0x725   :  { %v9103_v11 = vpop.f32.mrf.mxu0 }
 0x726   :  { %15532 = vst [vmem:[#allocation80_spill] sm:$0xff] %v14632_v55  ;;  %v14636_v14 = vadd.f32 %v9103_v11, %v8991_v59  ;;  %v14658_v59 = vpop.f32.mrf.mxu1  ;;  %v9159_v55 = vadd.f32 %v14478_v52, %v14514_v18 }
 0x727   :  { %v14638_v4 = vpop.f32.mrf.mxu0 }
 0x728   :  { %15533 = vst [vmem:[#allocation82_spill] sm:$0xff] %v14636_v14  ;;  %15534 = vst [vmem:[#allocation45_spill] sm:$0xff] %v14638_v4  ;;  %v14666_v4 = vpop.f32.mrf.mxu1 }
 0x729   :  { %v14642_v2 = vpop.f32.mrf.mxu0 }
 0x72a   :  { %15535 = vst [vmem:[#allocation47_spill] sm:$0xff] %v14642_v2  ;;  %v9157_v2 = vadd.f32 %v14475_v62, %v14510_v50  ;;  %v9167_v50 = vadd.f32 %v14498_v21, %v14530_v48 }
 0x72b   :  { %v14644_v31 = vpop.f32.mrf.mxu0 }
 0x72c   :  { %15536 = vst [vmem:[#allocation46_spill] sm:$0xff] %v14644_v31 }
 0x72d   :  { %v14648_v3 = vpop.f32.mrf.mxu0 }
 0x72e   :  { %15537 = vst [vmem:[#allocation39_spill] sm:$0xff] %v14648_v3 }
 0x72f   :  { %v14650_v63 = vpop.f32.mrf.mxu0 }
 0x730   :  { %15538 = vst [vmem:[#allocation83_spill] sm:$0xff] %v14650_v63  ;;  %v9161_v63 = vadd.f32 %v14482_v33, %v14520_v24  ;;  %v9169_v33 = vadd.f32 %v14508_v46, %v14534_v40  ;;  %v9173_v46 = vadd.f32 %v14528_v57, %v14547_v42  ;;  %v9181_v42 = vadd.f32 %v14564_v60, %v14568_v7 }
 0x731   :  { %v14654_v58 = vpop.f32.mrf.mxu0 }
 0x732   :  { %15539 = vst [vmem:[#allocation40_spill] sm:$0xff] %v14654_v58 }
 0x733   :  { %v14656_v11 = vpop.f32.mrf.mxu0 }
 0x734   :  { %15540 = vst [vmem:[#allocation84_spill] sm:$0xff] %v14656_v11  ;;  %v9163_v11 = vadd.f32 %v14486_v23, %v14524_v51 }
 0x735   :  { %v9269_v12 = vpop.f32.mrf.mxu0 }
 0x736   :  { %v9270_v31 = vadd.f32 %v9269_v12, %v9157_v2  ;;  %v14672_v12 = vpop.f32.mrf.mxu1 }
 0x737   :  { %v9271_v14 = vpop.f32.mrf.mxu0 }
 0x738   :  { %v9272_v58 = vadd.f32 %v9271_v14, %v9159_v55  ;;  %v9350_v6 = vmax.f32 %v9270_v31, 0.0 }
 0x739   :  { %v9273_v3 = vpop.f32.mrf.mxu0 }
 0x73a   :  { %v9274_v8 = vadd.f32 %v9273_v3, %v9161_v63  ;;  %v9351_v18 = vmax.f32 %v9272_v58, 0.0 }
 0x73b   :  { %v9275_v17 = vpop.f32.mrf.mxu0 }
 0x73c   :  { %v9354_v38 = vmax.f32 %v9274_v8, 0.0  ;;  %v9276_v62 = vadd.f32 %v9275_v17, %v9163_v11  ;;  %v9171_v17 = vadd.f32 %v14518_v53, %v14540_v49  ;;  %v14678_v8 = vpop.f32.mrf.mxu1  ;;  %v9177_v11 = vadd.f32 %v14538_v13, %v14556_v30 }
 0x73d   :  { %v9279_v52 = vpop.f32.mrf.mxu0 }
 0x73e   :  { %v9438_v24 = vmax.f32 %v9350_v6, %v9354_v38  ;;  %v9355_v2 = vmax.f32 %v9276_v62, 0.0  ;;  %v9280_v55 = vadd.f32 %v9279_v52, %v9167_v50  ;;  %v14684_v62 = vpop.f32.mrf.mxu1 }
 0x73f   :  { %v9281_v14 = vpop.f32.mrf.mxu0 }
 0x740   :  { %v9451_v3 = vmax.f32 %v9351_v18, %v9355_v2  ;;  %v9358_v23 = vmax.f32 %v9280_v55, 0.0  ;;  %v9282_v51 = vadd.f32 %v9281_v14, %v9169_v33  ;;  %v9179_v33 = vadd.f32 %v14549_v0, %v14562_v37  ;;  %v14690_v55 = vpop.f32.mrf.mxu1 }
 0x741   :  { %v9283_v21 = vpop.f32.mrf.mxu0  ;;  %v9187_v37 = vadd.f32 %v14584_v29, %v14578_v26 }
 0x742   :  { %v9439_v48 = vmax.f32 %v9438_v24, %v9358_v23  ;;  %v9359_v31 = vmax.f32 %v9282_v51, 0.0  ;;  %v9284_v63 = vadd.f32 %v9283_v21, %v9171_v17  ;;  %v9183_v23 = vadd.f32 %v14574_v47, %v14572_v44 }
 0x743   :  { %v9285_v40 = vpop.f32.mrf.mxu0  ;;  %v9191_v47 = vadd.f32 %v14604_v19, %v14588_v16  ;;  %v9197_v16 = vadd.f32 %v14624_v25, %v14598_v9 }
 0x744   :  { %v9452_v38 = vmax.f32 %v9451_v3, %v9359_v31  ;;  %v9362_v6 = vmax.f32 %v9284_v63, 0.0  ;;  %v9286_v58 = vadd.f32 %v9285_v40, %v9173_v46  ;;  %v9189_v46 = vadd.f32 %v14594_v5, %v14582_v15 }
 0x745   :  { %v9289_v50 = vpop.f32.mrf.mxu0 }
 0x746   :  { %v9440_v53 = vmax.f32 %v9439_v48, %v9362_v6  ;;  %v9363_v49 = vmax.f32 %v9286_v58, 0.0  ;;  %v9290_v52 = vadd.f32 %v9289_v50, %v9177_v11  ;;  %v14696_v48 = vpop.f32.mrf.mxu1 }
 0x747   :  { %v9291_v18 = vpop.f32.mrf.mxu0 }
 0x748   :  { %v9453_v24 = vmax.f32 %v9452_v38, %v9363_v49  ;;  %v9366_v2 = vmax.f32 %v9290_v52, 0.0  ;;  %v9292_v57 = vadd.f32 %v9291_v18, %v9179_v33  ;;  %v14702_v58 = vpop.f32.mrf.mxu1 }
 0x749   :  { %v9293_v14 = vpop.f32.mrf.mxu0 }
 0x74a   :  { %v9441_v13 = vmax.f32 %v9440_v53, %v9366_v2  ;;  %v9367_v30 = vmax.f32 %v9292_v57, 0.0  ;;  %v9294_v3 = vadd.f32 %v9293_v14, %v9181_v42  ;;  %v9193_v53 = vadd.f32 %v14614_v56, %v14592_v39  ;;  %v14706_v5 = vpop.f32.mrf.mxu1 }
 0x74b   :  { %v9295_v51 = vpop.f32.mrf.mxu0  ;;  %v9199_v39 = vadd.f32 %v14634_v20, %v14602_v32  ;;  %v9201_v56 = vadd.f32 %v14640_v34, %v14608_v28  ;;  %v9207_v32 = vadd.f32 %v14652_v10, %v14618_v61  ;;  %v15541_v61 = vld [vmem:[#allocation77_spill] sm:$0xff] }
 0x74c   :  { %v9454_v17 = vmax.f32 %v9453_v24, %v9367_v30  ;;  %v9370_v21 = vmax.f32 %v9294_v3, 0.0  ;;  %v9296_v0 = vadd.f32 %v9295_v51, %v9183_v23  ;;  %v9230_v14 = vpop.f32.mrf.mxu1  ;;  %v9203_v23 = vadd.f32 %v14646_v45, %v14612_v22 }
 0x74d   :  { %v9299_v31 = vpop.f32.mrf.mxu0  ;;  %v8995_v22 = vadd.f32 %v14455_v36, %v14491_v43  ;;  %v8997_v45 = vadd.f32 %v14460_v54, %v14496_v41  ;;  %v9003_v10 = vadd.f32 %v15541_v61, %v14496_v41  ;;  %v15544_v36 = vld [vmem:[#allocation42_spill] sm:$0xff] }
 0x74e   :  { %v9442_v60 = vmax.f32 %v9441_v13, %v9370_v21  ;;  %v9371_v7 = vmax.f32 %v9296_v0, 0.0  ;;  %v9300_v63 = vadd.f32 %v9299_v31, %v9187_v37  ;;  %v8993_v21 = vadd.f32 %v14450_v1, %v14496_v41  ;;  %v9232_v0 = vpop.f32.mrf.mxu1 }
 0x74f   :  { %v9301_v40 = vpop.f32.mrf.mxu0  ;;  %v9209_v31 = vadd.f32 %v14658_v59, %v14622_v27  ;;  %v9001_v1 = vadd.f32 %v14463_v35, %v14491_v43  ;;  %v15543_v27 = vld [vmem:[#allocation79_spill] sm:$0xff] }
 0x750   :  { %v9455_v38 = vmax.f32 %v9454_v17, %v9371_v7  ;;  %v9374_v6 = vmax.f32 %v9300_v63, 0.0  ;;  %v9302_v44 = vadd.f32 %v9301_v40, %v9189_v46  ;;  %v15542_v40 = vld [vmem:[#allocation69_spill] sm:$0xff]  ;;  %v9005_v59 = vadd.f32 %v15543_v27, %v14491_v43  ;;  %v9339_v54 = vpop.f32.mrf.mxu1 }
 0x751   :  { %v9303_v11 = vpop.f32.mrf.mxu0 }
 0x752   :  { %v9443_v26 = vmax.f32 %v9442_v60, %v9374_v6  ;;  %v9375_v29 = vmax.f32 %v9302_v44, 0.0  ;;  %v9304_v50 = vadd.f32 %v9303_v11, %v9191_v47  ;;  %v9007_v6 = vadd.f32 %v15544_v36, %v14496_v41  ;;  %v15545_v44 = vld [vmem:[#allocation39_spill] sm:$0xff] }
 0x753   :  { %v9305_v49 = vpop.f32.mrf.mxu0  ;;  %v9114_v47 = vadd.f32 %v15545_v44, %v9001_v1 }
 0x754   :  { %v9456_v52 = vmax.f32 %v9455_v38, %v9375_v29  ;;  %v9378_v33 = vmax.f32 %v9304_v50, 0.0  ;;  %v9306_v15 = vadd.f32 %v9305_v49, %v9193_v53  ;;  %v9211_v38 = vadd.f32 %v14666_v4, %v15542_v40  ;;  %v15547_v49 = vld [vmem:[#allocation80_spill] sm:$0xff] }
 0x755   :  { %v9309_v18 = vpop.f32.mrf.mxu0 }
 0x756   :  { %v14708_v24 = vmax.f32 %v9443_v26, %v9378_v33  ;;  %v9379_v2 = vmax.f32 %v9306_v15, 0.0  ;;  %v9310_v42 = vadd.f32 %v9309_v18, %v9197_v16  ;;  %v15546_v26 = vld [vmem:[#allocation45_spill] sm:$0xff]  ;;  %v15548_v33 = vld [vmem:[#allocation83_spill] sm:$0xff]  ;;  %v15549_v15 = vld [vmem:[#allocation40_spill] sm:$0xff] }
 0x757   :  { %v9311_v19 = vpop.f32.mrf.mxu0  ;;  %v9106_v29 = vadd.f32 %v15546_v26, %v8993_v21  ;;  %v9116_v4 = vadd.f32 %v15548_v33, %v9003_v10  ;;  %v9118_v18 = vadd.f32 %v15549_v15, %v9005_v59  ;;  %v15550_v16 = vld [vmem:[#allocation82_spill] sm:$0xff] }
 0x758   :  { %v14712_v57 = vmax.f32 %v9456_v52, %v9379_v2  ;;  %v9312_v30 = vadd.f32 %v9311_v19, %v9199_v39  ;;  %v9382_v17 = vmax.f32 %v9310_v42, 0.0  ;;  %v9213_v52 = vadd.f32 %v14672_v12, %v15547_v49  ;;  %v15551_v19 = vld [vmem:[#allocation47_spill] sm:$0xff]  ;;  %v15553_v12 = vld [vmem:[#allocation84_spill] sm:$0xff] }
 0x759   :  { %v9313_v13 = vpop.f32.mrf.mxu0  ;;  %v9217_v41 = vadd.f32 %v14678_v8, %v15550_v16  ;;  %v9108_v42 = vadd.f32 %v15551_v19, %v8995_v22  ;;  %v9229_v8 = vadd.f32 %v14706_v5, %v9116_v4  ;;  %v9445_v10 = vrot.slane %v14708_v24, 4 }
 0x75a   :  { %v9314_v3 = vadd.f32 %v9313_v13, %v9201_v56  ;;  %v9383_v28 = vmax.f32 %v9312_v30, 0.0  ;;  %v9341_v30 = vpop.f32.mrf.mxu1  ;;  %v11276_v19 = vmov 1966171168  }
 0x75b   :  { %v9315_v51 = vpop.f32.mrf.mxu0  ;;  %v9221_v1 = vadd.f32 %v14690_v55, %v9108_v42  ;;  %v9342_v40 = vadd.f32 %v9341_v30, %v9229_v8  ;;  %v9527_v42 = vunpack.c.l.s4 %v11276_v19 }
 0x75c   :  { %v9386_v9 = vmax.f32 %v9314_v3, 0.0  ;;  %v9316_v25 = vadd.f32 %v9315_v51, %v9203_v23  ;;  %v15552_v3 = vld [vmem:[#allocation46_spill] sm:$0xff]  ;;  %v9227_v51 = vadd.f32 %v14702_v58, %v9114_v47 }
 0x75d   :  { %v9319_v20 = vpop.f32.mrf.mxu0  ;;  %v9110_v23 = vadd.f32 %v15552_v3, %v8997_v45  ;;  %v9343_v45 = vpop.f32.mrf.mxu1  ;;  %v9407_v47 = vmax.f32 %v9342_v40, 0.0 }
 0x75e   :  { %v9490_v34 = vmax.f32 %v9382_v17, %v9386_v9  ;;  %v9387_v37 = vmax.f32 %v9316_v25, 0.0  ;;  %v9320_v60 = vadd.f32 %v9319_v20, %v9207_v32  ;;  %v9120_v17 = vadd.f32 %v15553_v12, %v9007_v6 }
 0x75f   :  { %v9321_v7 = vpop.f32.mrf.mxu0  ;;  %v9219_v20 = vadd.f32 %v14684_v62, %v9106_v29  ;;  %v9223_v61 = vadd.f32 %v14696_v48, %v9110_v23  ;;  %v9345_v55 = vpop.f32.mrf.mxu1  ;;  %v9528_v23 = vunpack.c.0.s8 %v9527_v42 }
 0x760   :  { %v9503_v63 = vmax.f32 %v9383_v28, %v9387_v37  ;;  %v9322_v46 = vadd.f32 %v9321_v7, %v9209_v31  ;;  %v9390_v35 = vmax.f32 %v9320_v60, 0.0  ;;  %v9231_v28 = vadd.f32 %v9230_v14, %v9118_v18 }
 0x761   :  { %v9323_v11 = vpop.f32.mrf.mxu0  ;;  %v9340_v60 = vadd.f32 %v9339_v54, %v9227_v51  ;;  %v9233_v58 = vadd.f32 %v9232_v0, %v9120_v17  ;;  %v9446_v0 = vmax.f32 %v14708_v24, %v9445_v10 }
 0x762   :  { %v9391_v50 = vmax.f32 %v9322_v46, 0.0  ;;  %v9324_v53 = vadd.f32 %v9323_v11, %v9211_v38  ;;  %v9491_v43 = vmax.f32 %v9490_v34, %v9390_v35  ;;  %v9344_v5 = vadd.f32 %v9343_v45, %v9231_v28 }
 0x763   :  { %v9325_v2 = vpop.f32.mrf.mxu0  ;;  %v9458_v38 = vrot.slane %v14712_v57, 4  ;;  %v9406_v6 = vmax.f32 %v9340_v60, 0.0  ;;  %v9346_v54 = vadd.f32 %v9345_v55, %v9233_v58  ;;  %v15558_v58 = vlaneseq }
 0x764   :  { %v9504_v39 = vmax.f32 %v9503_v63, %v9391_v50  ;;  %v9394_v56 = vmax.f32 %v9324_v53, 0.0  ;;  %v9326_v13 = vadd.f32 %v9325_v2, %v9213_v52  ;;  %v9410_v35 = vmax.f32 %v9344_v5, 0.0 }
 0x765   :  { %v9329_v9 = vpop.f32.mrf.mxu0  ;;  %v9459_v11 = vmax.f32 %v14712_v57, %v9458_v38  ;;  %v9411_v50 = vmax.f32 %v9346_v54, 0.0  ;;  %v9447_v53 = vrot.slane %v9446_v0, 2  ;;  %vm9560_vm2 = vcmp.lt.s32.totalorder %v15558_v58, 512 }
 0x766   :  { %v9492_v25 = vmax.f32 %v9491_v43, %v9394_v56  ;;  %v9395_v21 = vmax.f32 %v9326_v13, 0.0  ;;  %v9330_v32 = vadd.f32 %v9329_v9, %v9217_v41 }
 0x767   :  { %v9331_v34 = vpop.f32.mrf.mxu0  ;;  %v9460_v33 = vrot.slane %v9459_v11, 2  ;;  %v9448_v18 = vmax.f32 %v9446_v0, %v9447_v53 }
 0x768   :  { %v9505_v37 = vmax.f32 %v9504_v39, %v9395_v21  ;;  %v9398_v31 = vmax.f32 %v9330_v32, 0.0  ;;  %v9332_v22 = vadd.f32 %v9331_v34, %v9219_v20  ;;  %v15554_v32 = vld [vmem:[#allocation28_spill] sm:$0xff] }
 0x769   :  { %v9333_v7 = vpop.f32.mrf.mxu0  ;;  %v9461_v16 = vmax.f32 %v9459_v11, %v9460_v33  ;;  %v9449_v39 = vrot.slane %v9448_v18, 1  ;;  %v9531_v20 = vsub.s32 %v9528_v23, %v15554_v32  ;;  %v15555_v34 = vld [vmem:[#allocation44_spill] sm:$0xff] }
 0x76a   :  { %v9493_v63 = vmax.f32 %v9492_v25, %v9398_v31  ;;  %v9399_v46 = vmax.f32 %v9332_v22, 0.0  ;;  %v9334_v62 = vadd.f32 %v9333_v7, %v9221_v1 }
 0x76b   :  { %v9335_v14 = vpop.f32.mrf.mxu0  ;;  %v9462_v13 = vrot.slane %v9461_v16, 1  ;;  %v9450_v51 = vmax.f32 %v9448_v18, %v9449_v39 }
 0x76c   :  { %v9506_v27 = vmax.f32 %v9505_v37, %v9399_v46  ;;  %v9402_v59 = vmax.f32 %v9334_v62, 0.0  ;;  %v9336_v36 = vadd.f32 %v9335_v14, %v9223_v61  ;;  %v15556_v37 = vld [vmem:[#allocation67_spill] sm:$0xff] }
 0x76d   :  { %v9463_v9 = vmax.f32 %v9461_v16, %v9462_v13  ;;  %v15557_v31 = vcombine.low %v15555_v34, %v15556_v37 }
 0x76e   :  { %v9494_v44 = vmax.f32 %v9493_v63, %v9402_v59  ;;  %v9403_v48 = vmax.f32 %v9336_v36, 0.0 }
 0x76f   :  { %v9532_v22 = vrot.slane %v15557_v31, %v9531_v20 }
 0x770   :  { %v9495_v26 = vmax.f32 %v9494_v44, %v9406_v6  ;;  %v9507_v29 = vmax.f32 %v9506_v27, %v9403_v48 }
 0x772   :  { %v9496_v49 = vmax.f32 %v9495_v26, %v9410_v35  ;;  %v9508_v52 = vmax.f32 %v9507_v29, %v9407_v47 }
 0x774   :  { %v9497_v4 = vrot.slane %v9496_v49, 4  ;;  %v9509_v15 = vmax.f32 %v9508_v52, %v9411_v50 }
 0x776   :  { %v9498_v43 = vmax.f32 %v9496_v49, %v9497_v4  ;;  %v9510_v2 = vrot.slane %v9509_v15, 4 }
 0x778   :  { %v9499_v24 = vrot.slane %v9498_v43, 2  ;;  %v9511_v41 = vmax.f32 %v9509_v15, %v9510_v2 }
 0x77a   :  { %v9500_v56 = vmax.f32 %v9498_v43, %v9499_v24  ;;  %v9512_v57 = vrot.slane %v9511_v41, 2 }
 0x77c   :  { %v9501_v30 = vrot.slane %v9500_v56, 1  ;;  %v9513_v3 = vmax.f32 %v9511_v41, %v9512_v57 }
 0x77e   :  { %v9502_v12 = vmax.f32 %v9500_v56, %v9501_v30  ;;  %v9514_v17 = vrot.slane %v9513_v3, 1 }
 0x780   :  { %v9515_v25 = vmax.f32 %v9513_v3, %v9514_v17  ;;  %v9518_v21 = vsel %vm1943_vm1, %v9450_v51, %v9502_v12 }
 0x782   :  { %v9519_v8 = vsel %vm1943_vm1, %v9463_v9, %v9515_v25 }
 0x783   :  { %v9525_v28 = vcombine.low %v9518_v21, %v9519_v8 }
 0x785   :  { %v9539_v1 = vrot.slane %v9525_v28, %v9531_v20 }
 0x787   :  { %v9540_v45 = vcombine.low %v9532_v22, %v9539_v1  ;;  %v9541_v60 = vcombine.high %v9532_v22, %v9539_v1 }
 0x789   :  { %v9548_v7 = vrot.slane %v9540_v45, %v9531_v20  ;;  %v9555_v61 = vrot.slane %v9541_v60, %v9531_v20 }
 0x78b   :  { %9562 = vst.msk [vmem:[#allocation20] sm:$0xf] %vm9560_vm2, %v9548_v7  ;;  %9563 = vst.msk [vmem:[#allocation20 + $0x4] sm:$0xf] %vm9560_vm2, %v9555_v61 }
 0x78c   :  { %11233 = shalt.err (!%p11230_p3)
}
 0x78d   :  { %9575 = dma.vmem_to_hbm [thread:$0]  %s9570_s20, 128, %s14785_s12, [#allocation4], %s11267_s10, %s11267_s10, %s11268_s19  }
 0x78e   :  { %11254 = dma.done.wait [#allocation4], 128  }
 0x78f   :  { %11255 = vsyncadd [#allocation4], 4294967168 }
 0x790   :  { %9579 = vsyncpa [#allocation3], 1 }
 0x791   :  { %9580 = vsyncpa [#allocation6], 1 }
 0x792   :  { %9581 = vsyncpa [#allocation9], 1 }
 0x793   :  { %9582 = vsyncpa [#allocation12], 1 }
 0x794   :  { %9583 = vsyncpa [#allocation15], 1 }
 0x795   :  { %9584 = vsyncpa [#allocation18], 1 }
 0x796   :  { %9585 = vsyncpa [#allocation4], 1 }

</bundles_post_ra>
